<compile_context>
chip_gen: v6e
topology: v6e:2x2x1
jax: 0.10.0
libtpu: 0.0.40
codegen_flags: <defaults>
</compile_context>

<pallas_src>
import functools
import math

import jax
import jax.numpy as jnp
from jax import lax
from jax.experimental import pallas as pl
from jax.experimental.pallas import tpu as pltpu

# -------------------- config (small, synthetic) --------------------
N_VOCAB = 32
H = 32           # hidden / inter channels
N_HEADS = 2
D_HEAD = H // N_HEADS
FFN = 64
T_TEXT = 8
MAX_DUR = 4
TF = T_TEXT * MAX_DUR    # max number of mel frames = 32
UP = 4                   # total decoder upsampling (2 x 2)
DEC_C0, DEC_C1, DEC_C2 = 32, 16, 8


# -------------------- in-kernel helpers --------------------
def _act(y, kind):
    if kind == "relu":
        return jnp.maximum(y, 0.0)
    if kind == "leaky":
        return jnp.where(y > 0.0, y, 0.1 * y)
    if kind == "tanh":
        return jnp.tanh(y)
    return y


def _ln(x, g, b):
    mu = jnp.mean(x, axis=-1, keepdims=True)
    var = jnp.mean((x - mu) ** 2, axis=-1, keepdims=True)
    return (x - mu) * lax.rsqrt(var + 1e-5) * g + b


def _row(ref, r, w):
    """(1, w) bias/LN row from the packed bias table."""
    return ref[r:r + 1, 0:w]


def _taps(ref, row0, cin, cout):
    """Three (cin, cout) conv taps from a row-packed weight table."""
    return tuple(ref[row0 + k * cin: row0 + (k + 1) * cin, 0:cout]
                 for k in range(3))


def _conv3(x, taps, bias, act, seg):
    """K=3 'same' 1-D conv over (R, Cin); rows are `seg`-long batch segments.

    Shifted operands come from pltpu.roll (XLU) + per-segment boundary zero
    masks -> no VMEM pad-scratch store->load round-trip.
    """
    R = x.shape[0]
    assert seg & (seg - 1) == 0, "segment length must be a power of two"
    r = lax.broadcasted_iota(jnp.int32, (R, 1), 0)
    not_first = (r & (seg - 1)) != 0          # row is not a segment start
    not_last = ((r + 1) & (seg - 1)) != 0     # row is not a segment end
    x_prev = jnp.where(not_first, pltpu.roll(x, 1, axis=0), 0.0)
    x_next = jnp.where(not_last, pltpu.roll(x, R - 1, axis=0), 0.0)
    y = (jnp.dot(x_prev, taps[0], preferred_element_type=jnp.float32)
         + jnp.dot(x, taps[1], preferred_element_type=jnp.float32)
         + jnp.dot(x_next, taps[2], preferred_element_type=jnp.float32))
    return _act(y + bias, act)


def _upsample2(x):
    """2x nearest-neighbour upsample along rows via an iota-built 0/1 matmul.

    Block-diagonal per batch automatically (output row j <- input row j>>1).
    """
    R = x.shape[0]
    r_out = lax.broadcasted_iota(jnp.int32, (2 * R, R), 0)
    r_in = lax.broadcasted_iota(jnp.int32, (2 * R, R), 1)
    U = ((r_out >> 1) == r_in).astype(jnp.float32)
    return jnp.dot(U, x, preferred_element_type=jnp.float32)


# -------------------- the single fused kernel --------------------
def _vits_kernel(h2_ref, xm_ref, am_ref, nz_ref,
                 wenc_ref, wflow_ref, wdec_ref, bvec_ref,
                 wav_ref, *, B, noise_scale, length_scale):
    T, nH, Dh, Hh = T_TEXT, N_HEADS, D_HEAD, H // 2
    scale = 1.0 / math.sqrt(Dh)
    f32 = jnp.float32

    h2 = h2_ref[...]                                     # (B*T, H)
    xm = xm_ref[...]                                     # (B*T, 1)

    # ---- fused QKV projection (one matmul, heads lane-sliced) ----
    qkv = (jnp.dot(h2, wenc_ref[0:H, 0:3 * H], preferred_element_type=f32)
           + _row(bvec_ref, 0, 3 * H))                   # (B*T, 3H)

    o_rows = []
    for b in range(B):
        mask_b = am_ref[b]                               # (T, T)
        heads = []
        for hd in range(nH):
            q = qkv[b * T:(b + 1) * T, hd * Dh:(hd + 1) * Dh]
            k = qkv[b * T:(b + 1) * T, H + hd * Dh:H + (hd + 1) * Dh]
            v = qkv[b * T:(b + 1) * T, 2 * H + hd * Dh:2 * H + (hd + 1) * Dh]
            s = lax.dot_general(q, k, (((1,), (1,)), ((), ())),
                                preferred_element_type=f32) * scale
            s = jnp.where(mask_b > 0.0, s, -1e9)
            s = s - jnp.max(s, axis=-1, keepdims=True)
            e = jnp.exp(s)
            p = e * pl.reciprocal(jnp.sum(e, axis=-1, keepdims=True), approx=True)
            heads.append(jnp.dot(p, v, preferred_element_type=f32))
        o_rows.append(jnp.concatenate(heads, axis=-1))   # (T, H)
    attn_out = jnp.concatenate(o_rows, axis=0)           # (B*T, H)
    a = (jnp.dot(attn_out, wenc_ref[H:2 * H, 0:H], preferred_element_type=f32)
         + _row(bvec_ref, 1, H))

    # residual + LN, FFN + residual + LN
    h2 = _ln(h2 + a, _row(bvec_ref, 2, H), _row(bvec_ref, 3, H))
    f = jnp.maximum(
        jnp.dot(h2, wenc_ref[64:96, 0:FFN], preferred_element_type=f32)
        + _row(bvec_ref, 6, FFN), 0.0)
    f = (jnp.dot(f, wenc_ref[96:160, 0:H], preferred_element_type=f32)
         + _row(bvec_ref, 7, H))
    h2 = _ln(h2 + f, _row(bvec_ref, 4, H), _row(bvec_ref, 5, H))

    # stats projection -> (m_p | logs_p) packed on lanes
    stats = (jnp.dot(h2, wenc_ref[160:192, 0:2 * H], preferred_element_type=f32)
             + _row(bvec_ref, 8, 2 * H)) * xm            # (B*T, 2H)

    # ---- duration predictor (convs batched over B*T rows, seg=T) ----
    h_enc = h2 * xm
    d = _conv3(h_enc, _taps(wenc_ref, 192, H, H), _row(bvec_ref, 9, H), "relu", T)
    d = _conv3(d * xm, _taps(wenc_ref, 288, H, H), _row(bvec_ref, 10, H), "relu", T)
    logw = (jnp.dot(d, wenc_ref[384:416, 0:1], preferred_element_type=f32)
            + _row(bvec_ref, 11, 1)) * xm                # (B*T, 1)

    # ---- durations -> alignment path -> latent sampling (per batch) ----
    w_col = jnp.exp(logw) * xm * length_scale
    w_ceil = jnp.clip(jnp.ceil(w_col), 1.0, float(MAX_DUR)) * xm
    ri = lax.broadcasted_iota(jnp.int32, (T, T), 0)
    ci = lax.broadcasted_iota(jnp.int32, (T, T), 1)
    ltri = (ci <= ri).astype(f32)                        # inclusive-cumsum matrix
    frames_l = lax.broadcasted_iota(jnp.int32, (T, TF), 1).astype(f32)
    frames_c = lax.broadcasted_iota(jnp.int32, (TF, 1), 0).astype(f32)
    frames_r = lax.broadcasted_iota(jnp.int32, (1, TF), 1).astype(f32)

    z_rows, ym_rows = [], []
    for b in range(B):
        wb = w_ceil[b * T:(b + 1) * T, :]                # (T, 1)
        cum = jnp.dot(ltri, wb, preferred_element_type=f32)   # (T, 1)
        ylen = jnp.clip(cum[T - 1:T, 0:1], 1.0, float(TF))    # (1, 1)
        attnT = jnp.logical_and(frames_l < cum,
                                frames_l >= cum - wb).astype(f32)   # (T, TF)
        ym_row = (frames_r < ylen).astype(f32)                      # (1, TF)
        attn_b = jnp.transpose(attnT * ym_row)                      # (TF, T)
        mp_b = stats[b * T:(b + 1) * T, 0:H]
        lsp_b = stats[b * T:(b + 1) * T, H:2 * H]
        mean = jnp.dot(attn_b, mp_b, preferred_element_type=f32)    # (TF, H)
        logs = jnp.dot(attn_b, lsp_b, preferred_element_type=f32)
        ym_col = (frames_c < ylen).astype(f32)                      # (TF, 1)
        z_rows.append((mean + jnp.exp(logs) * nz_ref[b] * noise_scale) * ym_col)
        ym_rows.append(ym_col)
    z = jnp.concatenate(z_rows, axis=0)                  # (B*TF, H)
    ym = jnp.concatenate(ym_rows, axis=0)                # (B*TF, 1)

    # ---- reverse flow (2 mean-only coupling layers), batched over B*TF ----
    hi = lax.broadcasted_iota(jnp.int32, (Hh, Hh), 0)
    hj = lax.broadcasted_iota(jnp.int32, (Hh, Hh), 1)
    phalf = ((hi + hj) == (Hh - 1)).astype(f32)          # channel-reversal matrix
    z0 = z[:, 0:Hh]
    z1 = z[:, Hh:H]
    flow_layers = (((96, 144), (14, 15)),                # layer 1 (first in reverse)
                   ((0, 48), (12, 13)))                  # layer 0
    for (enc_r0, m_r0), (eb_row, mb_row) in flow_layers:
        z0, z1 = (jnp.dot(z1, phalf, preferred_element_type=f32),
                  jnp.dot(z0, phalf, preferred_element_type=f32))
        hmid = _conv3(z0 * ym, _taps(wflow_ref, enc_r0, Hh, Hh),
                      _row(bvec_ref, eb_row, Hh), "relu", TF)
        m = _conv3(hmid, _taps(wflow_ref, m_r0, Hh, Hh),
                   _row(bvec_ref, mb_row, Hh), "none", TF)
        z1 = (z1 - m) * ym
    z = jnp.concatenate([z0 * ym, z1 * ym], axis=-1)     # (B*TF, H)

    # ---- decoder (channels zero-padded to H lanes, batched over rows) ----
    # TODO(synk): real HiFi-GAN uses transposed convs + MRF resblocks; this is a
    # simplified nearest-upsample + conv stack (same math as the reference).
    x = _conv3(z, _taps(wdec_ref, 0, H, H), _row(bvec_ref, 16, H), "none", TF)
    x = _upsample2(x)                                               # (2*B*TF, H)
    x = _conv3(x, _taps(wdec_ref, 96, H, H), _row(bvec_ref, 17, H), "leaky", 2 * TF)
    x = x + _conv3(x, _taps(wdec_ref, 192, H, H), _row(bvec_ref, 18, H), "leaky", 2 * TF)
    x = _upsample2(x)                                               # (4*B*TF, H)
    x = _conv3(x, _taps(wdec_ref, 288, H, H), _row(bvec_ref, 19, H), "leaky", 4 * TF)
    x = x + _conv3(x, _taps(wdec_ref, 384, H, H), _row(bvec_ref, 20, H), "leaky", 4 * TF)
    x = _conv3(x, _taps(wdec_ref, 480, H, H), _row(bvec_ref, 21, H), "tanh", 4 * TF)

    # lane-dense wav store: channel 0 of each batch block as a (1, 4*TF) row
    xT = jnp.transpose(x)                                # (H, B*4*TF)
    for b in range(B):
        wav_ref[b] = xT[0:1, b * 4 * TF:(b + 1) * 4 * TF]


# -------------------- pallas_call plumbing --------------------
def _zeros_map(n):
    def idx(i):
        return (0,) * n
    return idx


def _full_spec(shape):
    return pl.BlockSpec(tuple(shape), _zeros_map(len(shape)))


# -------------------- parameters (deterministic init) --------------------
def init_params(key):
    ks = iter(jax.random.split(key, 64))

    def w(shape, scale=0.1):
        return jax.random.normal(next(ks), shape, jnp.float32) * scale

    def z(shape):
        return jnp.zeros(shape, jnp.float32)

    p = {"emb": w((N_VOCAB, H), 0.3)}
    for n in ("q", "k", "v", "o"):
        p[f"w{n}"] = w((H, H)); p[f"b{n}"] = z((1, H))
    p["ln1_g"] = jnp.ones((1, H)); p["ln1_b"] = z((1, H))
    p["ffn_w1"] = w((H, FFN)); p["ffn_b1"] = z((1, FFN))
    p["ffn_w2"] = w((FFN, H)); p["ffn_b2"] = z((1, H))
    p["ln2_g"] = jnp.ones((1, H)); p["ln2_b"] = z((1, H))
    p["proj_w"] = w((H, 2 * H)); p["proj_b"] = z((1, 2 * H))
    # duration predictor
    p["dp_w1"] = w((3, H, H)); p["dp_b1"] = z((1, H))
    p["dp_w2"] = w((3, H, H)); p["dp_b2"] = z((1, H))
    p["dp_proj_w"] = w((H, 1)); p["dp_proj_b"] = z((1, 1))
    # flow (2 residual-coupling layers, mean-only)
    Hh = H // 2
    for i in range(2):
        p[f"fl{i}_enc_w"] = w((3, Hh, Hh)); p[f"fl{i}_enc_b"] = z((1, Hh))
        p[f"fl{i}_m_w"] = w((3, Hh, Hh)); p[f"fl{i}_m_b"] = z((1, Hh))
    # decoder
    p["dec_pre_w"] = w((3, H, DEC_C0)); p["dec_pre_b"] = z((1, DEC_C0))
    p["dec_up1_w"] = w((3, DEC_C0, DEC_C1)); p["dec_up1_b"] = z((1, DEC_C1))
    p["dec_res1_w"] = w((3, DEC_C1, DEC_C1)); p["dec_res1_b"] = z((1, DEC_C1))
    p["dec_up2_w"] = w((3, DEC_C1, DEC_C2)); p["dec_up2_b"] = z((1, DEC_C2))
    p["dec_res2_w"] = w((3, DEC_C2, DEC_C2)); p["dec_res2_b"] = z((1, DEC_C2))
    p["dec_post_w"] = w((3, DEC_C2, 1)); p["dec_post_b"] = z((1, 1))
    return p


def pack_params(p):
    """Pack ~45 small weights/biases into 4 row-packed arrays (done once, host)."""
    wenc = jnp.zeros((416, 96), jnp.float32)
    wenc = wenc.at[0:32, 0:32].set(p["wq"])
    wenc = wenc.at[0:32, 32:64].set(p["wk"])
    wenc = wenc.at[0:32, 64:96].set(p["wv"])
    wenc = wenc.at[32:64, 0:32].set(p["wo"])
    wenc = wenc.at[64:96, 0:64].set(p["ffn_w1"])
    wenc = wenc.at[96:160, 0:32].set(p["ffn_w2"])
    wenc = wenc.at[160:192, 0:64].set(p["proj_w"])
    for k in range(3):
        wenc = wenc.at[192 + 32 * k:224 + 32 * k, 0:32].set(p["dp_w1"][k])
        wenc = wenc.at[288 + 32 * k:320 + 32 * k, 0:32].set(p["dp_w2"][k])
    wenc = wenc.at[384:416, 0:1].set(p["dp_proj_w"])

    wflow = jnp.zeros((192, 16), jnp.float32)
    for j, nm in enumerate(["fl0_enc_w", "fl0_m_w", "fl1_enc_w", "fl1_m_w"]):
        for k in range(3):
            wflow = wflow.at[48 * j + 16 * k:48 * j + 16 * (k + 1), :].set(p[nm][k])

    wdec = jnp.zeros((576, 32), jnp.float32)     # every conv zero-padded to (3,32,32)
    for j, nm in enumerate(["dec_pre_w", "dec_up1_w", "dec_res1_w",
                            "dec_up2_w", "dec_res2_w", "dec_post_w"]):
        wtap = p[nm]
        cin, cout = wtap.shape[1], wtap.shape[2]
        for k in range(3):
            wdec = wdec.at[96 * j + 32 * k:96 * j + 32 * k + cin, 0:cout].set(wtap[k])

    bvec = jnp.zeros((24, 128), jnp.float32)
    rows = [
        (0, jnp.concatenate([p["bq"], p["bk"], p["bv"]], axis=-1)),
        (1, p["bo"]), (2, p["ln1_g"]), (3, p["ln1_b"]),
        (4, p["ln2_g"]), (5, p["ln2_b"]),
        (6, p["ffn_b1"]), (7, p["ffn_b2"]), (8, p["proj_b"]),
        (9, p["dp_b1"]), (10, p["dp_b2"]), (11, p["dp_proj_b"]),
        (12, p["fl0_enc_b"]), (13, p["fl0_m_b"]),
        (14, p["fl1_enc_b"]), (15, p["fl1_m_b"]),
        (16, p["dec_pre_b"]), (17, p["dec_up1_b"]), (18, p["dec_res1_b"]),
        (19, p["dec_up2_b"]), (20, p["dec_res2_b"]), (21, p["dec_post_b"]),
    ]
    for r, v in rows:
        v = jnp.asarray(v, jnp.float32).reshape(1, -1)
        bvec = bvec.at[r:r + 1, 0:v.shape[1]].set(v)

    return {"emb": p["emb"], "wenc": wenc, "wflow": wflow,
            "wdec": wdec, "bvec": bvec}


# -------------------- full model --------------------
@functools.partial(jax.jit, static_argnames=("noise_scale", "length_scale",
                                             "noise_scale_w", "sid", "max_len"))
def onnx_model_infer(packed, x, x_lengths, noise_scale=1.0, length_scale=1.0,
                     noise_scale_w=1.0, sid=0, max_len=None, *, noise_key):
    # TODO(synk): the real SynthesizerTrn.infer uses a stochastic duration
    # predictor (noise_scale_w) and a speaker embedding (sid); this synthetic
    # single-speaker model uses a deterministic duration predictor instead.
    # TODO(synk): max_len < TF slicing of z is not fused; only the default
    # max_len=None (full TF frames) path is supported here.
    B, T = x.shape
    x_mask = (jnp.arange(T)[None, :] < x_lengths[:, None]).astype(jnp.float32)

    # embedding gather (JAX glue) + masks
    h2 = (packed["emb"][x] * math.sqrt(H) * x_mask[..., None]).reshape(B * T, H)
    xm = x_mask.reshape(B * T, 1)
    amask = x_mask[:, :, None] * x_mask[:, None, :]                  # (B, T, T)
    noise = jax.random.normal(noise_key, (B, TF, H), jnp.float32)

    inputs = (h2, xm, amask, noise,
              packed["wenc"], packed["wflow"], packed["wdec"], packed["bvec"])
    kernel = functools.partial(_vits_kernel, B=B,
                               noise_scale=float(noise_scale),
                               length_scale=float(length_scale))
    wav = pl.pallas_call(
        kernel,
        out_shape=jax.ShapeDtypeStruct((B, 1, UP * TF), jnp.float32),
        grid=(1,),
        in_specs=[_full_spec(a.shape) for a in inputs],
        out_specs=_full_spec((B, 1, UP * TF)),
        compiler_params=pltpu.CompilerParams(dimension_semantics=("arbitrary",)),
    )(*inputs)
    return wav                                                       # (B, 1, samples)


# -------------------- main --------------------
if __name__ == "__main__":
    key = jax.random.PRNGKey(0)
    k_tok, k_noise = jax.random.split(key, 2)
    params = init_params(jax.random.PRNGKey(42))
    packed = pack_params(params)

    B = 2
    x = jax.random.randint(k_tok, (B, T_TEXT), 0, N_VOCAB, dtype=jnp.int32)
    x_lengths = jnp.array([T_TEXT, T_TEXT - 2], dtype=jnp.int32)

    out = onnx_model_infer(packed, x, x_lengths,
                           noise_scale=1.0, length_scale=1.0,
                           noise_scale_w=1.0, sid=0, max_len=None,
                           noise_key=k_noise)
    out = jax.block_until_ready(out)
    assert out.shape == (B, 1, TF * UP), out.shape
    assert bool(jnp.all(jnp.isfinite(out)))
    print("KERNEL_OK")
</pallas_src>

<mosaic_0001>
module attributes {stable_mosaic.version = 11 : i64} {
  func.func @_vits_kernel(%arg0: i32, %arg1: memref<16x32xf32, #tpu.memory_space<vmem>>, %arg2: memref<16x1xf32, #tpu.memory_space<vmem>>, %arg3: memref<2x8x8xf32, #tpu.memory_space<vmem>>, %arg4: memref<2x32x32xf32, #tpu.memory_space<vmem>>, %arg5: memref<416x96xf32, #tpu.memory_space<vmem>>, %arg6: memref<192x16xf32, #tpu.memory_space<vmem>>, %arg7: memref<576x32xf32, #tpu.memory_space<vmem>>, %arg8: memref<24x128xf32, #tpu.memory_space<vmem>>, %arg9: memref<2x1x128xf32, #tpu.memory_space<vmem>>) attributes {dimension_semantics = [#tpu.dimension_semantics<arbitrary>], iteration_bounds = array<i64: 1>, scalar_prefetch = 0 : i64, scratch_operands = 0 : i64, tpu.core_type = #tpu.core_type<tc>, window_params = [{pipeline_mode = #tpu.pipeline_mode<synchronous>, transform_indices = @transform_0, window_bounds = array<i64: 16, 32>}, {pipeline_mode = #tpu.pipeline_mode<synchronous>, transform_indices = @transform_1, window_bounds = array<i64: 16, 1>}, {pipeline_mode = #tpu.pipeline_mode<synchronous>, transform_indices = @transform_2, window_bounds = array<i64: 2, 8, 8>}, {pipeline_mode = #tpu.pipeline_mode<synchronous>, transform_indices = @transform_3, window_bounds = array<i64: 2, 32, 32>}, {pipeline_mode = #tpu.pipeline_mode<synchronous>, transform_indices = @transform_4, window_bounds = array<i64: 416, 96>}, {pipeline_mode = #tpu.pipeline_mode<synchronous>, transform_indices = @transform_5, window_bounds = array<i64: 192, 16>}, {pipeline_mode = #tpu.pipeline_mode<synchronous>, transform_indices = @transform_6, window_bounds = array<i64: 576, 32>}, {pipeline_mode = #tpu.pipeline_mode<synchronous>, transform_indices = @transform_7, window_bounds = array<i64: 24, 128>}, {pipeline_mode = #tpu.pipeline_mode<synchronous>, transform_indices = @transform_8, window_bounds = array<i64: 2, 1, 128>}]} {
    %c0 = arith.constant 0 : index
    %c0_0 = arith.constant 0 : index
    %0 = vector.load %arg1[%c0, %c0_0] : memref<16x32xf32, #tpu.memory_space<vmem>>, vector<16x32xf32>
    %c0_1 = arith.constant 0 : index
    %c0_2 = arith.constant 0 : index
    %1 = vector.load %arg2[%c0_1, %c0_2] : memref<16x1xf32, #tpu.memory_space<vmem>>, vector<16x1xf32>
    %c0_3 = arith.constant 0 : index
    %c0_4 = arith.constant 0 : index
    %2 = vector.load %arg5[%c0_3, %c0_4] : memref<416x96xf32, #tpu.memory_space<vmem>>, vector<32x96xf32>
    %cst = arith.constant dense<0.000000e+00> : vector<16x96xf32>
    %3 = tpu.matmul %0, %2, %cst {dimension_numbers = #tpu.dot_dimension_numbers<[1], [0], [0], [1], [0, 0, 1, 1], [], []>} : vector<16x32xf32>, vector<32x96xf32>, vector<16x96xf32> -> vector<16x96xf32>
    %c0_5 = arith.constant 0 : index
    %c0_6 = arith.constant 0 : index
    %4 = vector.load %arg8[%c0_5, %c0_6] : memref<24x128xf32, #tpu.memory_space<vmem>>, vector<1x96xf32>
    %5 = vector.broadcast %4 : vector<1x96xf32> to vector<16x96xf32>
    %6 = arith.addf %3, %5 : vector<16x96xf32>
    %c0_7 = arith.constant 0 : index
    %c0_8 = arith.constant 0 : index
    %c0_9 = arith.constant 0 : index
    %7 = vector.load %arg3[%c0_7, %c0_8, %c0_9] : memref<2x8x8xf32, #tpu.memory_space<vmem>>, vector<1x8x8xf32>
    %8 = vector.shape_cast %7 : vector<1x8x8xf32> to vector<8x8xf32>
    %9 = vector.extract_strided_slice %6 {offsets = [0, 0], sizes = [8, 16], strides = [1, 1]} : vector<16x96xf32> to vector<8x16xf32>
    %10 = vector.extract_strided_slice %6 {offsets = [0, 32], sizes = [8, 16], strides = [1, 1]} : vector<16x96xf32> to vector<8x16xf32>
    %11 = vector.extract_strided_slice %6 {offsets = [0, 64], sizes = [8, 16], strides = [1, 1]} : vector<16x96xf32> to vector<8x16xf32>
    %cst_10 = arith.constant dense<0.000000e+00> : vector<8x8xf32>
    %12 = tpu.matmul %9, %10, %cst_10 {dimension_numbers = #tpu.dot_dimension_numbers<[1], [1], [0], [0], [0, 0, 1, 0], [], []>} : vector<8x16xf32>, vector<8x16xf32>, vector<8x8xf32> -> vector<8x8xf32>
    %cst_11 = arith.constant 2.500000e-01 : f32
    %13 = vector.broadcast %cst_11 : f32 to vector<8x8xf32>
    %14 = arith.mulf %12, %13 : vector<8x8xf32>
    %cst_12 = arith.constant 0.000000e+00 : f32
    %15 = vector.broadcast %cst_12 : f32 to vector<8x8xf32>
    %16 = arith.cmpf ogt, %8, %15 : vector<8x8xf32>
    %cst_13 = arith.constant -1.000000e+09 : f32
    %17 = vector.broadcast %cst_13 : f32 to vector<8x8xf32>
    %18 = arith.select %16, %14, %17 : vector<8x8xi1>, vector<8x8xf32>
    %cst_14 = arith.constant dense<0xFF800000> : vector<8xf32>
    %19 = vector.multi_reduction <maximumf>, %18, %cst_14 [1] : vector<8x8xf32> to vector<8xf32>
    %20 = vector.shape_cast %19 : vector<8xf32> to vector<8x1xf32>
    %21 = vector.broadcast %20 : vector<8x1xf32> to vector<8x8xf32>
    %22 = arith.subf %18, %21 : vector<8x8xf32>
    %23 = math.exp %22 : vector<8x8xf32>
    %cst_15 = arith.constant dense<0.000000e+00> : vector<8xf32>
    %24 = vector.multi_reduction <add>, %23, %cst_15 [1] : vector<8x8xf32> to vector<8xf32>
    %25 = vector.shape_cast %24 : vector<8xf32> to vector<8x1xf32>
    %26 = tpu.reciprocal %25 {approx = true} : vector<8x1xf32> -> vector<8x1xf32>
    %27 = vector.broadcast %26 : vector<8x1xf32> to vector<8x8xf32>
    %28 = arith.mulf %23, %27 : vector<8x8xf32>
    %cst_16 = arith.constant dense<0.000000e+00> : vector<8x16xf32>
    %29 = tpu.matmul %28, %11, %cst_16 {dimension_numbers = #tpu.dot_dimension_numbers<[1], [0], [0], [1], [0, 0, 1, 1], [], []>} : vector<8x8xf32>, vector<8x16xf32>, vector<8x16xf32> -> vector<8x16xf32>
    %30 = vector.extract_strided_slice %6 {offsets = [0, 16], sizes = [8, 16], strides = [1, 1]} : vector<16x96xf32> to vector<8x16xf32>
    %31 = vector.extract_strided_slice %6 {offsets = [0, 48], sizes = [8, 16], strides = [1, 1]} : vector<16x96xf32> to vector<8x16xf32>
    %32 = vector.extract_strided_slice %6 {offsets = [0, 80], sizes = [8, 16], strides = [1, 1]} : vector<16x96xf32> to vector<8x16xf32>
    %cst_17 = arith.constant dense<0.000000e+00> : vector<8x8xf32>
    %33 = tpu.matmul %30, %31, %cst_17 {dimension_numbers = #tpu.dot_dimension_numbers<[1], [1], [0], [0], [0, 0, 1, 0], [], []>} : vector<8x16xf32>, vector<8x16xf32>, vector<8x8xf32> -> vector<8x8xf32>
    %cst_18 = arith.constant 2.500000e-01 : f32
    %34 = vector.broadcast %cst_18 : f32 to vector<8x8xf32>
    %35 = arith.mulf %33, %34 : vector<8x8xf32>
    %cst_19 = arith.constant 0.000000e+00 : f32
    %36 = vector.broadcast %cst_19 : f32 to vector<8x8xf32>
    %37 = arith.cmpf ogt, %8, %36 : vector<8x8xf32>
    %cst_20 = arith.constant -1.000000e+09 : f32
    %38 = vector.broadcast %cst_20 : f32 to vector<8x8xf32>
    %39 = arith.select %37, %35, %38 : vector<8x8xi1>, vector<8x8xf32>
    %cst_21 = arith.constant dense<0xFF800000> : vector<8xf32>
    %40 = vector.multi_reduction <maximumf>, %39, %cst_21 [1] : vector<8x8xf32> to vector<8xf32>
    %41 = vector.shape_cast %40 : vector<8xf32> to vector<8x1xf32>
    %42 = vector.broadcast %41 : vector<8x1xf32> to vector<8x8xf32>
    %43 = arith.subf %39, %42 : vector<8x8xf32>
    %44 = math.exp %43 : vector<8x8xf32>
    %cst_22 = arith.constant dense<0.000000e+00> : vector<8xf32>
    %45 = vector.multi_reduction <add>, %44, %cst_22 [1] : vector<8x8xf32> to vector<8xf32>
    %46 = vector.shape_cast %45 : vector<8xf32> to vector<8x1xf32>
    %47 = tpu.reciprocal %46 {approx = true} : vector<8x1xf32> -> vector<8x1xf32>
    %48 = vector.broadcast %47 : vector<8x1xf32> to vector<8x8xf32>
    %49 = arith.mulf %44, %48 : vector<8x8xf32>
    %cst_23 = arith.constant dense<0.000000e+00> : vector<8x16xf32>
    %50 = tpu.matmul %49, %32, %cst_23 {dimension_numbers = #tpu.dot_dimension_numbers<[1], [0], [0], [1], [0, 0, 1, 1], [], []>} : vector<8x8xf32>, vector<8x16xf32>, vector<8x16xf32> -> vector<8x16xf32>
    %51 = tpu.concatenate %29, %50 in 1 : vector<8x16xf32>, vector<8x16xf32> -> vector<8x32xf32>
    %c1 = arith.constant 1 : index
    %c0_24 = arith.constant 0 : index
    %c0_25 = arith.constant 0 : index
    %52 = vector.load %arg3[%c1, %c0_24, %c0_25] : memref<2x8x8xf32, #tpu.memory_space<vmem>>, vector<1x8x8xf32>
    %53 = vector.shape_cast %52 : vector<1x8x8xf32> to vector<8x8xf32>
    %54 = vector.extract_strided_slice %6 {offsets = [8, 0], sizes = [8, 16], strides = [1, 1]} : vector<16x96xf32> to vector<8x16xf32>
    %55 = vector.extract_strided_slice %6 {offsets = [8, 32], sizes = [8, 16], strides = [1, 1]} : vector<16x96xf32> to vector<8x16xf32>
    %56 = vector.extract_strided_slice %6 {offsets = [8, 64], sizes = [8, 16], strides = [1, 1]} : vector<16x96xf32> to vector<8x16xf32>
    %cst_26 = arith.constant dense<0.000000e+00> : vector<8x8xf32>
    %57 = tpu.matmul %54, %55, %cst_26 {dimension_numbers = #tpu.dot_dimension_numbers<[1], [1], [0], [0], [0, 0, 1, 0], [], []>} : vector<8x16xf32>, vector<8x16xf32>, vector<8x8xf32> -> vector<8x8xf32>
    %cst_27 = arith.constant 2.500000e-01 : f32
    %58 = vector.broadcast %cst_27 : f32 to vector<8x8xf32>
    %59 = arith.mulf %57, %58 : vector<8x8xf32>
    %cst_28 = arith.constant 0.000000e+00 : f32
    %60 = vector.broadcast %cst_28 : f32 to vector<8x8xf32>
    %61 = arith.cmpf ogt, %53, %60 : vector<8x8xf32>
    %cst_29 = arith.constant -1.000000e+09 : f32
    %62 = vector.broadcast %cst_29 : f32 to vector<8x8xf32>
    %63 = arith.select %61, %59, %62 : vector<8x8xi1>, vector<8x8xf32>
    %cst_30 = arith.constant dense<0xFF800000> : vector<8xf32>
    %64 = vector.multi_reduction <maximumf>, %63, %cst_30 [1] : vector<8x8xf32> to vector<8xf32>
    %65 = vector.shape_cast %64 : vector<8xf32> to vector<8x1xf32>
    %66 = vector.broadcast %65 : vector<8x1xf32> to vector<8x8xf32>
    %67 = arith.subf %63, %66 : vector<8x8xf32>
    %68 = math.exp %67 : vector<8x8xf32>
    %cst_31 = arith.constant dense<0.000000e+00> : vector<8xf32>
    %69 = vector.multi_reduction <add>, %68, %cst_31 [1] : vector<8x8xf32> to vector<8xf32>
    %70 = vector.shape_cast %69 : vector<8xf32> to vector<8x1xf32>
    %71 = tpu.reciprocal %70 {approx = true} : vector<8x1xf32> -> vector<8x1xf32>
    %72 = vector.broadcast %71 : vector<8x1xf32> to vector<8x8xf32>
    %73 = arith.mulf %68, %72 : vector<8x8xf32>
    %cst_32 = arith.constant dense<0.000000e+00> : vector<8x16xf32>
    %74 = tpu.matmul %73, %56, %cst_32 {dimension_numbers = #tpu.dot_dimension_numbers<[1], [0], [0], [1], [0, 0, 1, 1], [], []>} : vector<8x8xf32>, vector<8x16xf32>, vector<8x16xf32> -> vector<8x16xf32>
    %75 = vector.extract_strided_slice %6 {offsets = [8, 16], sizes = [8, 16], strides = [1, 1]} : vector<16x96xf32> to vector<8x16xf32>
    %76 = vector.extract_strided_slice %6 {offsets = [8, 48], sizes = [8, 16], strides = [1, 1]} : vector<16x96xf32> to vector<8x16xf32>
    %77 = vector.extract_strided_slice %6 {offsets = [8, 80], sizes = [8, 16], strides = [1, 1]} : vector<16x96xf32> to vector<8x16xf32>
    %cst_33 = arith.constant dense<0.000000e+00> : vector<8x8xf32>
    %78 = tpu.matmul %75, %76, %cst_33 {dimension_numbers = #tpu.dot_dimension_numbers<[1], [1], [0], [0], [0, 0, 1, 0], [], []>} : vector<8x16xf32>, vector<8x16xf32>, vector<8x8xf32> -> vector<8x8xf32>
    %cst_34 = arith.constant 2.500000e-01 : f32
    %79 = vector.broadcast %cst_34 : f32 to vector<8x8xf32>
    %80 = arith.mulf %78, %79 : vector<8x8xf32>
    %cst_35 = arith.constant 0.000000e+00 : f32
    %81 = vector.broadcast %cst_35 : f32 to vector<8x8xf32>
    %82 = arith.cmpf ogt, %53, %81 : vector<8x8xf32>
    %cst_36 = arith.constant -1.000000e+09 : f32
    %83 = vector.broadcast %cst_36 : f32 to vector<8x8xf32>
    %84 = arith.select %82, %80, %83 : vector<8x8xi1>, vector<8x8xf32>
    %cst_37 = arith.constant dense<0xFF800000> : vector<8xf32>
    %85 = vector.multi_reduction <maximumf>, %84, %cst_37 [1] : vector<8x8xf32> to vector<8xf32>
    %86 = vector.shape_cast %85 : vector<8xf32> to vector<8x1xf32>
    %87 = vector.broadcast %86 : vector<8x1xf32> to vector<8x8xf32>
    %88 = arith.subf %84, %87 : vector<8x8xf32>
    %89 = math.exp %88 : vector<8x8xf32>
    %cst_38 = arith.constant dense<0.000000e+00> : vector<8xf32>
    %90 = vector.multi_reduction <add>, %89, %cst_38 [1] : vector<8x8xf32> to vector<8xf32>
    %91 = vector.shape_cast %90 : vector<8xf32> to vector<8x1xf32>
    %92 = tpu.reciprocal %91 {approx = true} : vector<8x1xf32> -> vector<8x1xf32>
    %93 = vector.broadcast %92 : vector<8x1xf32> to vector<8x8xf32>
    %94 = arith.mulf %89, %93 : vector<8x8xf32>
    %cst_39 = arith.constant dense<0.000000e+00> : vector<8x16xf32>
    %95 = tpu.matmul %94, %77, %cst_39 {dimension_numbers = #tpu.dot_dimension_numbers<[1], [0], [0], [1], [0, 0, 1, 1], [], []>} : vector<8x8xf32>, vector<8x16xf32>, vector<8x16xf32> -> vector<8x16xf32>
    %96 = tpu.concatenate %74, %95 in 1 : vector<8x16xf32>, vector<8x16xf32> -> vector<8x32xf32>
    %97 = tpu.concatenate %51, %96 in 0 : vector<8x32xf32>, vector<8x32xf32> -> vector<16x32xf32>
    %c32 = arith.constant 32 : index
    %c0_40 = arith.constant 0 : index
    %98 = vector.load %arg5[%c32, %c0_40] : memref<416x96xf32, #tpu.memory_space<vmem>>, vector<32x32xf32>
    %cst_41 = arith.constant dense<0.000000e+00> : vector<16x32xf32>
    %99 = tpu.matmul %97, %98, %cst_41 {dimension_numbers = #tpu.dot_dimension_numbers<[1], [0], [0], [1], [0, 0, 1, 1], [], []>} : vector<16x32xf32>, vector<32x32xf32>, vector<16x32xf32> -> vector<16x32xf32>
    %c1_42 = arith.constant 1 : index
    %c0_43 = arith.constant 0 : index
    %100 = vector.load %arg8[%c1_42, %c0_43] : memref<24x128xf32, #tpu.memory_space<vmem>>, vector<1x32xf32>
    %101 = vector.broadcast %100 : vector<1x32xf32> to vector<16x32xf32>
    %102 = arith.addf %99, %101 : vector<16x32xf32>
    %103 = arith.addf %0, %102 : vector<16x32xf32>
    %c2 = arith.constant 2 : index
    %c0_44 = arith.constant 0 : index
    %104 = vector.load %arg8[%c2, %c0_44] : memref<24x128xf32, #tpu.memory_space<vmem>>, vector<1x32xf32>
    %c3 = arith.constant 3 : index
    %c0_45 = arith.constant 0 : index
    %105 = vector.load %arg8[%c3, %c0_45] : memref<24x128xf32, #tpu.memory_space<vmem>>, vector<1x32xf32>
    %cst_46 = arith.constant dense<0.000000e+00> : vector<16xf32>
    %106 = vector.multi_reduction <add>, %103, %cst_46 [1] : vector<16x32xf32> to vector<16xf32>
    %107 = vector.shape_cast %106 : vector<16xf32> to vector<16x1xf32>
    %cst_47 = arith.constant 3.200000e+01 : f32
    %108 = vector.broadcast %cst_47 : f32 to vector<16x1xf32>
    %109 = arith.divf %107, %108 : vector<16x1xf32>
    %110 = vector.broadcast %109 : vector<16x1xf32> to vector<16x32xf32>
    %111 = arith.subf %103, %110 : vector<16x32xf32>
    %112 = arith.mulf %111, %111 : vector<16x32xf32>
    %cst_48 = arith.constant dense<0.000000e+00> : vector<16xf32>
    %113 = vector.multi_reduction <add>, %112, %cst_48 [1] : vector<16x32xf32> to vector<16xf32>
    %114 = vector.shape_cast %113 : vector<16xf32> to vector<16x1xf32>
    %cst_49 = arith.constant 3.200000e+01 : f32
    %115 = vector.broadcast %cst_49 : f32 to vector<16x1xf32>
    %116 = arith.divf %114, %115 : vector<16x1xf32>
    %117 = vector.broadcast %109 : vector<16x1xf32> to vector<16x32xf32>
    %118 = arith.subf %103, %117 : vector<16x32xf32>
    %cst_50 = arith.constant 9.99999974E-6 : f32
    %119 = vector.broadcast %cst_50 : f32 to vector<16x1xf32>
    %120 = arith.addf %116, %119 : vector<16x1xf32>
    %121 = math.rsqrt %120 : vector<16x1xf32>
    %122 = vector.broadcast %121 : vector<16x1xf32> to vector<16x32xf32>
    %123 = arith.mulf %118, %122 : vector<16x32xf32>
    %124 = vector.broadcast %104 : vector<1x32xf32> to vector<16x32xf32>
    %125 = arith.mulf %123, %124 : vector<16x32xf32>
    %126 = vector.broadcast %105 : vector<1x32xf32> to vector<16x32xf32>
    %127 = arith.addf %125, %126 : vector<16x32xf32>
    %c64 = arith.constant 64 : index
    %c0_51 = arith.constant 0 : index
    %128 = vector.load %arg5[%c64, %c0_51] : memref<416x96xf32, #tpu.memory_space<vmem>>, vector<32x64xf32>
    %cst_52 = arith.constant dense<0.000000e+00> : vector<16x64xf32>
    %129 = tpu.matmul %127, %128, %cst_52 {dimension_numbers = #tpu.dot_dimension_numbers<[1], [0], [0], [1], [0, 0, 1, 1], [], []>} : vector<16x32xf32>, vector<32x64xf32>, vector<16x64xf32> -> vector<16x64xf32>
    %c6 = arith.constant 6 : index
    %c0_53 = arith.constant 0 : index
    %130 = vector.load %arg8[%c6, %c0_53] : memref<24x128xf32, #tpu.memory_space<vmem>>, vector<1x64xf32>
    %131 = vector.broadcast %130 : vector<1x64xf32> to vector<16x64xf32>
    %132 = arith.addf %129, %131 : vector<16x64xf32>
    %cst_54 = arith.constant 0.000000e+00 : f32
    %133 = vector.broadcast %cst_54 : f32 to vector<16x64xf32>
    %134 = arith.maximumf %132, %133 : vector<16x64xf32>
    %c96 = arith.constant 96 : index
    %c0_55 = arith.constant 0 : index
    %135 = vector.load %arg5[%c96, %c0_55] : memref<416x96xf32, #tpu.memory_space<vmem>>, vector<64x32xf32>
    %cst_56 = arith.constant dense<0.000000e+00> : vector<16x32xf32>
    %136 = tpu.matmul %134, %135, %cst_56 {dimension_numbers = #tpu.dot_dimension_numbers<[1], [0], [0], [1], [0, 0, 1, 1], [], []>} : vector<16x64xf32>, vector<64x32xf32>, vector<16x32xf32> -> vector<16x32xf32>
    %c7 = arith.constant 7 : index
    %c0_57 = arith.constant 0 : index
    %137 = vector.load %arg8[%c7, %c0_57] : memref<24x128xf32, #tpu.memory_space<vmem>>, vector<1x32xf32>
    %138 = vector.broadcast %137 : vector<1x32xf32> to vector<16x32xf32>
    %139 = arith.addf %136, %138 : vector<16x32xf32>
    %140 = arith.addf %127, %139 : vector<16x32xf32>
    %c4 = arith.constant 4 : index
    %c0_58 = arith.constant 0 : index
    %141 = vector.load %arg8[%c4, %c0_58] : memref<24x128xf32, #tpu.memory_space<vmem>>, vector<1x32xf32>
    %c5 = arith.constant 5 : index
    %c0_59 = arith.constant 0 : index
    %142 = vector.load %arg8[%c5, %c0_59] : memref<24x128xf32, #tpu.memory_space<vmem>>, vector<1x32xf32>
    %cst_60 = arith.constant dense<0.000000e+00> : vector<16xf32>
    %143 = vector.multi_reduction <add>, %140, %cst_60 [1] : vector<16x32xf32> to vector<16xf32>
    %144 = vector.shape_cast %143 : vector<16xf32> to vector<16x1xf32>
    %cst_61 = arith.constant 3.200000e+01 : f32
    %145 = vector.broadcast %cst_61 : f32 to vector<16x1xf32>
    %146 = arith.divf %144, %145 : vector<16x1xf32>
    %147 = vector.broadcast %146 : vector<16x1xf32> to vector<16x32xf32>
    %148 = arith.subf %140, %147 : vector<16x32xf32>
    %149 = arith.mulf %148, %148 : vector<16x32xf32>
    %cst_62 = arith.constant dense<0.000000e+00> : vector<16xf32>
    %150 = vector.multi_reduction <add>, %149, %cst_62 [1] : vector<16x32xf32> to vector<16xf32>
    %151 = vector.shape_cast %150 : vector<16xf32> to vector<16x1xf32>
    %cst_63 = arith.constant 3.200000e+01 : f32
    %152 = vector.broadcast %cst_63 : f32 to vector<16x1xf32>
    %153 = arith.divf %151, %152 : vector<16x1xf32>
    %154 = vector.broadcast %146 : vector<16x1xf32> to vector<16x32xf32>
    %155 = arith.subf %140, %154 : vector<16x32xf32>
    %cst_64 = arith.constant 9.99999974E-6 : f32
    %156 = vector.broadcast %cst_64 : f32 to vector<16x1xf32>
    %157 = arith.addf %153, %156 : vector<16x1xf32>
    %158 = math.rsqrt %157 : vector<16x1xf32>
    %159 = vector.broadcast %158 : vector<16x1xf32> to vector<16x32xf32>
    %160 = arith.mulf %155, %159 : vector<16x32xf32>
    %161 = vector.broadcast %141 : vector<1x32xf32> to vector<16x32xf32>
    %162 = arith.mulf %160, %161 : vector<16x32xf32>
    %163 = vector.broadcast %142 : vector<1x32xf32> to vector<16x32xf32>
    %164 = arith.addf %162, %163 : vector<16x32xf32>
    %c160 = arith.constant 160 : index
    %c0_65 = arith.constant 0 : index
    %165 = vector.load %arg5[%c160, %c0_65] : memref<416x96xf32, #tpu.memory_space<vmem>>, vector<32x64xf32>
    %cst_66 = arith.constant dense<0.000000e+00> : vector<16x64xf32>
    %166 = tpu.matmul %164, %165, %cst_66 {dimension_numbers = #tpu.dot_dimension_numbers<[1], [0], [0], [1], [0, 0, 1, 1], [], []>} : vector<16x32xf32>, vector<32x64xf32>, vector<16x64xf32> -> vector<16x64xf32>
    %c8 = arith.constant 8 : index
    %c0_67 = arith.constant 0 : index
    %167 = vector.load %arg8[%c8, %c0_67] : memref<24x128xf32, #tpu.memory_space<vmem>>, vector<1x64xf32>
    %168 = vector.broadcast %167 : vector<1x64xf32> to vector<16x64xf32>
    %169 = arith.addf %166, %168 : vector<16x64xf32>
    %170 = vector.broadcast %1 : vector<16x1xf32> to vector<16x64xf32>
    %171 = arith.mulf %169, %170 : vector<16x64xf32>
    %172 = vector.broadcast %1 : vector<16x1xf32> to vector<16x32xf32>
    %173 = arith.mulf %164, %172 : vector<16x32xf32>
    %c192 = arith.constant 192 : index
    %c0_68 = arith.constant 0 : index
    %174 = vector.load %arg5[%c192, %c0_68] : memref<416x96xf32, #tpu.memory_space<vmem>>, vector<32x32xf32>
    %c224 = arith.constant 224 : index
    %c0_69 = arith.constant 0 : index
    %175 = vector.load %arg5[%c224, %c0_69] : memref<416x96xf32, #tpu.memory_space<vmem>>, vector<32x32xf32>
    %c256 = arith.constant 256 : index
    %c0_70 = arith.constant 0 : index
    %176 = vector.load %arg5[%c256, %c0_70] : memref<416x96xf32, #tpu.memory_space<vmem>>, vector<32x32xf32>
    %c9 = arith.constant 9 : index
    %c0_71 = arith.constant 0 : index
    %177 = vector.load %arg8[%c9, %c0_71] : memref<24x128xf32, #tpu.memory_space<vmem>>, vector<1x32xf32>
    %178 = tpu.iota {dimensions = array<i32: 0>} : vector<16x1xi32>
    %c7_i32 = arith.constant 7 : i32
    %179 = vector.broadcast %c7_i32 : i32 to vector<16x1xi32>
    %180 = arith.andi %178, %179 : vector<16x1xi32>
    %c0_i32 = arith.constant 0 : i32
    %181 = vector.broadcast %c0_i32 : i32 to vector<16x1xi32>
    %182 = arith.cmpi ne, %180, %181 : vector<16x1xi32>
    %c1_i32 = arith.constant 1 : i32
    %183 = vector.broadcast %c1_i32 : i32 to vector<16x1xi32>
    %184 = arith.addi %178, %183 : vector<16x1xi32>
    %c7_i32_72 = arith.constant 7 : i32
    %185 = vector.broadcast %c7_i32_72 : i32 to vector<16x1xi32>
    %186 = arith.andi %184, %185 : vector<16x1xi32>
    %c0_i32_73 = arith.constant 0 : i32
    %187 = vector.broadcast %c0_i32_73 : i32 to vector<16x1xi32>
    %188 = arith.cmpi ne, %186, %187 : vector<16x1xi32>
    %c1_i32_74 = arith.constant 1 : i32
    %189 = tpu.dynamic_rotate %173 by %c1_i32_74 dim 0 : vector<16x32xf32>, i32 -> vector<16x32xf32>
    %cst_75 = arith.constant 0.000000e+00 : f32
    %190 = vector.shape_cast %182 : vector<16x1xi1> to vector<16x1xi1>
    %191 = vector.broadcast %190 : vector<16x1xi1> to vector<16x32xi1>
    %192 = vector.broadcast %cst_75 : f32 to vector<16x32xf32>
    %193 = arith.select %191, %189, %192 : vector<16x32xi1>, vector<16x32xf32>
    %c15_i32 = arith.constant 15 : i32
    %194 = tpu.dynamic_rotate %173 by %c15_i32 dim 0 : vector<16x32xf32>, i32 -> vector<16x32xf32>
    %cst_76 = arith.constant 0.000000e+00 : f32
    %195 = vector.shape_cast %188 : vector<16x1xi1> to vector<16x1xi1>
    %196 = vector.broadcast %195 : vector<16x1xi1> to vector<16x32xi1>
    %197 = vector.broadcast %cst_76 : f32 to vector<16x32xf32>
    %198 = arith.select %196, %194, %197 : vector<16x32xi1>, vector<16x32xf32>
    %cst_77 = arith.constant dense<0.000000e+00> : vector<16x32xf32>
    %199 = tpu.matmul %193, %174, %cst_77 {dimension_numbers = #tpu.dot_dimension_numbers<[1], [0], [0], [1], [0, 0, 1, 1], [], []>} : vector<16x32xf32>, vector<32x32xf32>, vector<16x32xf32> -> vector<16x32xf32>
    %cst_78 = arith.constant dense<0.000000e+00> : vector<16x32xf32>
    %200 = tpu.matmul %173, %175, %cst_78 {dimension_numbers = #tpu.dot_dimension_numbers<[1], [0], [0], [1], [0, 0, 1, 1], [], []>} : vector<16x32xf32>, vector<32x32xf32>, vector<16x32xf32> -> vector<16x32xf32>
    %201 = arith.addf %199, %200 : vector<16x32xf32>
    %cst_79 = arith.constant dense<0.000000e+00> : vector<16x32xf32>
    %202 = tpu.matmul %198, %176, %cst_79 {dimension_numbers = #tpu.dot_dimension_numbers<[1], [0], [0], [1], [0, 0, 1, 1], [], []>} : vector<16x32xf32>, vector<32x32xf32>, vector<16x32xf32> -> vector<16x32xf32>
    %203 = arith.addf %201, %202 : vector<16x32xf32>
    %204 = vector.broadcast %177 : vector<1x32xf32> to vector<16x32xf32>
    %205 = arith.addf %203, %204 : vector<16x32xf32>
    %cst_80 = arith.constant 0.000000e+00 : f32
    %206 = vector.broadcast %cst_80 : f32 to vector<16x32xf32>
    %207 = arith.maximumf %205, %206 : vector<16x32xf32>
    %208 = vector.broadcast %1 : vector<16x1xf32> to vector<16x32xf32>
    %209 = arith.mulf %207, %208 : vector<16x32xf32>
    %c288 = arith.constant 288 : index
    %c0_81 = arith.constant 0 : index
    %210 = vector.load %arg5[%c288, %c0_81] : memref<416x96xf32, #tpu.memory_space<vmem>>, vector<32x32xf32>
    %c320 = arith.constant 320 : index
    %c0_82 = arith.constant 0 : index
    %211 = vector.load %arg5[%c320, %c0_82] : memref<416x96xf32, #tpu.memory_space<vmem>>, vector<32x32xf32>
    %c352 = arith.constant 352 : index
    %c0_83 = arith.constant 0 : index
    %212 = vector.load %arg5[%c352, %c0_83] : memref<416x96xf32, #tpu.memory_space<vmem>>, vector<32x32xf32>
    %c10 = arith.constant 10 : index
    %c0_84 = arith.constant 0 : index
    %213 = vector.load %arg8[%c10, %c0_84] : memref<24x128xf32, #tpu.memory_space<vmem>>, vector<1x32xf32>
    %214 = tpu.iota {dimensions = array<i32: 0>} : vector<16x1xi32>
    %c7_i32_85 = arith.constant 7 : i32
    %215 = vector.broadcast %c7_i32_85 : i32 to vector<16x1xi32>
    %216 = arith.andi %214, %215 : vector<16x1xi32>
    %c0_i32_86 = arith.constant 0 : i32
    %217 = vector.broadcast %c0_i32_86 : i32 to vector<16x1xi32>
    %218 = arith.cmpi ne, %216, %217 : vector<16x1xi32>
    %c1_i32_87 = arith.constant 1 : i32
    %219 = vector.broadcast %c1_i32_87 : i32 to vector<16x1xi32>
    %220 = arith.addi %214, %219 : vector<16x1xi32>
    %c7_i32_88 = arith.constant 7 : i32
    %221 = vector.broadcast %c7_i32_88 : i32 to vector<16x1xi32>
    %222 = arith.andi %220, %221 : vector<16x1xi32>
    %c0_i32_89 = arith.constant 0 : i32
    %223 = vector.broadcast %c0_i32_89 : i32 to vector<16x1xi32>
    %224 = arith.cmpi ne, %222, %223 : vector<16x1xi32>
    %c1_i32_90 = arith.constant 1 : i32
    %225 = tpu.dynamic_rotate %209 by %c1_i32_90 dim 0 : vector<16x32xf32>, i32 -> vector<16x32xf32>
    %cst_91 = arith.constant 0.000000e+00 : f32
    %226 = vector.shape_cast %218 : vector<16x1xi1> to vector<16x1xi1>
    %227 = vector.broadcast %226 : vector<16x1xi1> to vector<16x32xi1>
    %228 = vector.broadcast %cst_91 : f32 to vector<16x32xf32>
    %229 = arith.select %227, %225, %228 : vector<16x32xi1>, vector<16x32xf32>
    %c15_i32_92 = arith.constant 15 : i32
    %230 = tpu.dynamic_rotate %209 by %c15_i32_92 dim 0 : vector<16x32xf32>, i32 -> vector<16x32xf32>
    %cst_93 = arith.constant 0.000000e+00 : f32
    %231 = vector.shape_cast %224 : vector<16x1xi1> to vector<16x1xi1>
    %232 = vector.broadcast %231 : vector<16x1xi1> to vector<16x32xi1>
    %233 = vector.broadcast %cst_93 : f32 to vector<16x32xf32>
    %234 = arith.select %232, %230, %233 : vector<16x32xi1>, vector<16x32xf32>
    %cst_94 = arith.constant dense<0.000000e+00> : vector<16x32xf32>
    %235 = tpu.matmul %229, %210, %cst_94 {dimension_numbers = #tpu.dot_dimension_numbers<[1], [0], [0], [1], [0, 0, 1, 1], [], []>} : vector<16x32xf32>, vector<32x32xf32>, vector<16x32xf32> -> vector<16x32xf32>
    %cst_95 = arith.constant dense<0.000000e+00> : vector<16x32xf32>
    %236 = tpu.matmul %209, %211, %cst_95 {dimension_numbers = #tpu.dot_dimension_numbers<[1], [0], [0], [1], [0, 0, 1, 1], [], []>} : vector<16x32xf32>, vector<32x32xf32>, vector<16x32xf32> -> vector<16x32xf32>
    %237 = arith.addf %235, %236 : vector<16x32xf32>
    %cst_96 = arith.constant dense<0.000000e+00> : vector<16x32xf32>
    %238 = tpu.matmul %234, %212, %cst_96 {dimension_numbers = #tpu.dot_dimension_numbers<[1], [0], [0], [1], [0, 0, 1, 1], [], []>} : vector<16x32xf32>, vector<32x32xf32>, vector<16x32xf32> -> vector<16x32xf32>
    %239 = arith.addf %237, %238 : vector<16x32xf32>
    %240 = vector.broadcast %213 : vector<1x32xf32> to vector<16x32xf32>
    %241 = arith.addf %239, %240 : vector<16x32xf32>
    %cst_97 = arith.constant 0.000000e+00 : f32
    %242 = vector.broadcast %cst_97 : f32 to vector<16x32xf32>
    %243 = arith.maximumf %241, %242 : vector<16x32xf32>
    %c384 = arith.constant 384 : index
    %c0_98 = arith.constant 0 : index
    %244 = vector.load %arg5[%c384, %c0_98] : memref<416x96xf32, #tpu.memory_space<vmem>>, vector<32x1xf32>
    %cst_99 = arith.constant dense<0.000000e+00> : vector<16x1xf32>
    %245 = tpu.matmul %243, %244, %cst_99 {dimension_numbers = #tpu.dot_dimension_numbers<[1], [0], [0], [1], [0, 0, 1, 1], [], []>} : vector<16x32xf32>, vector<32x1xf32>, vector<16x1xf32> -> vector<16x1xf32>
    %c11 = arith.constant 11 : index
    %c0_100 = arith.constant 0 : index
    %246 = vector.load %arg8[%c11, %c0_100] : memref<24x128xf32, #tpu.memory_space<vmem>>, vector<1x1xf32>
    %247 = vector.broadcast %246 : vector<1x1xf32> to vector<16x1xf32>
    %248 = arith.addf %245, %247 : vector<16x1xf32>
    %249 = arith.mulf %248, %1 : vector<16x1xf32>
    %250 = math.exp %249 : vector<16x1xf32>
    %251 = arith.mulf %250, %1 : vector<16x1xf32>
    %cst_101 = arith.constant 1.000000e+00 : f32
    %252 = vector.broadcast %cst_101 : f32 to vector<16x1xf32>
    %253 = arith.mulf %251, %252 : vector<16x1xf32>
    %254 = math.ceil %253 : vector<16x1xf32>
    %cst_102 = arith.constant 1.000000e+00 : f32
    %cst_103 = arith.constant 4.000000e+00 : f32
    %255 = vector.broadcast %cst_102 : f32 to vector<16x1xf32>
    %256 = arith.maximumf %255, %254 : vector<16x1xf32>
    %257 = vector.broadcast %cst_103 : f32 to vector<16x1xf32>
    %258 = arith.minimumf %257, %256 : vector<16x1xf32>
    %259 = arith.mulf %258, %1 : vector<16x1xf32>
    %260 = tpu.iota {dimensions = array<i32: 0>} : vector<8x8xi32>
    %261 = tpu.iota {dimensions = array<i32: 1>} : vector<8x8xi32>
    %262 = arith.cmpi sle, %261, %260 : vector<8x8xi32>
    %263 = arith.extui %262 : vector<8x8xi1> to vector<8x8xi32>
    %264 = arith.sitofp %263 : vector<8x8xi32> to vector<8x8xf32>
    %265 = tpu.iota {dimensions = array<i32: 1>} : vector<8x32xi32>
    %266 = arith.sitofp %265 : vector<8x32xi32> to vector<8x32xf32>
    %267 = tpu.iota {dimensions = array<i32: 0>} : vector<32x1xi32>
    %268 = arith.sitofp %267 : vector<32x1xi32> to vector<32x1xf32>
    %269 = tpu.iota {dimensions = array<i32: 1>} : vector<1x32xi32>
    %270 = arith.sitofp %269 : vector<1x32xi32> to vector<1x32xf32>
    %271 = vector.extract_strided_slice %259 {offsets = [0, 0], sizes = [8, 1], strides = [1, 1]} : vector<16x1xf32> to vector<8x1xf32>
    %cst_104 = arith.constant dense<0.000000e+00> : vector<8x1xf32>
    %272 = tpu.matmul %264, %271, %cst_104 {dimension_numbers = #tpu.dot_dimension_numbers<[1], [0], [0], [1], [0, 0, 1, 1], [], []>} : vector<8x8xf32>, vector<8x1xf32>, vector<8x1xf32> -> vector<8x1xf32>
    %273 = vector.extract_strided_slice %272 {offsets = [7, 0], sizes = [1, 1], strides = [1, 1]} : vector<8x1xf32> to vector<1x1xf32>
    %cst_105 = arith.constant 1.000000e+00 : f32
    %cst_106 = arith.constant 3.200000e+01 : f32
    %274 = vector.broadcast %cst_105 : f32 to vector<1x1xf32>
    %275 = arith.maximumf %274, %273 : vector<1x1xf32>
    %276 = vector.broadcast %cst_106 : f32 to vector<1x1xf32>
    %277 = arith.minimumf %276, %275 : vector<1x1xf32>
    %278 = vector.broadcast %272 : vector<8x1xf32> to vector<8x32xf32>
    %279 = arith.cmpf olt, %266, %278 : vector<8x32xf32>
    %280 = arith.subf %272, %271 : vector<8x1xf32>
    %281 = vector.broadcast %280 : vector<8x1xf32> to vector<8x32xf32>
    %282 = arith.cmpf oge, %266, %281 : vector<8x32xf32>
    %283 = arith.andi %279, %282 : vector<8x32xi1>
    %284 = arith.extui %283 : vector<8x32xi1> to vector<8x32xi32>
    %285 = arith.sitofp %284 : vector<8x32xi32> to vector<8x32xf32>
    %286 = vector.broadcast %277 : vector<1x1xf32> to vector<1x32xf32>
    %287 = arith.cmpf olt, %270, %286 : vector<1x32xf32>
    %288 = arith.extui %287 : vector<1x32xi1> to vector<1x32xi32>
    %289 = arith.sitofp %288 : vector<1x32xi32> to vector<1x32xf32>
    %290 = vector.broadcast %289 : vector<1x32xf32> to vector<8x32xf32>
    %291 = arith.mulf %285, %290 : vector<8x32xf32>
    %292 = tpu.transpose %291, [1, 0] : vector<8x32xf32> -> vector<32x8xf32>
    %293 = vector.extract_strided_slice %171 {offsets = [0, 0], sizes = [8, 32], strides = [1, 1]} : vector<16x64xf32> to vector<8x32xf32>
    %294 = vector.extract_strided_slice %171 {offsets = [0, 32], sizes = [8, 32], strides = [1, 1]} : vector<16x64xf32> to vector<8x32xf32>
    %cst_107 = arith.constant dense<0.000000e+00> : vector<32x32xf32>
    %295 = tpu.matmul %292, %293, %cst_107 {dimension_numbers = #tpu.dot_dimension_numbers<[1], [0], [0], [1], [0, 0, 1, 1], [], []>} : vector<32x8xf32>, vector<8x32xf32>, vector<32x32xf32> -> vector<32x32xf32>
    %cst_108 = arith.constant dense<0.000000e+00> : vector<32x32xf32>
    %296 = tpu.matmul %292, %294, %cst_108 {dimension_numbers = #tpu.dot_dimension_numbers<[1], [0], [0], [1], [0, 0, 1, 1], [], []>} : vector<32x8xf32>, vector<8x32xf32>, vector<32x32xf32> -> vector<32x32xf32>
    %297 = vector.broadcast %277 : vector<1x1xf32> to vector<32x1xf32>
    %298 = arith.cmpf olt, %268, %297 : vector<32x1xf32>
    %299 = arith.extui %298 : vector<32x1xi1> to vector<32x1xi32>
    %300 = arith.sitofp %299 : vector<32x1xi32> to vector<32x1xf32>
    %301 = math.exp %296 : vector<32x32xf32>
    %c0_109 = arith.constant 0 : index
    %c0_110 = arith.constant 0 : index
    %c0_111 = arith.constant 0 : index
    %302 = vector.load %arg4[%c0_109, %c0_110, %c0_111] : memref<2x32x32xf32, #tpu.memory_space<vmem>>, vector<1x32x32xf32>
    %303 = vector.shape_cast %302 : vector<1x32x32xf32> to vector<32x32xf32>
    %304 = arith.mulf %301, %303 : vector<32x32xf32>
    %cst_112 = arith.constant 1.000000e+00 : f32
    %305 = vector.broadcast %cst_112 : f32 to vector<32x32xf32>
    %306 = arith.mulf %304, %305 : vector<32x32xf32>
    %307 = arith.addf %295, %306 : vector<32x32xf32>
    %308 = vector.broadcast %300 : vector<32x1xf32> to vector<32x32xf32>
    %309 = arith.mulf %307, %308 : vector<32x32xf32>
    %310 = vector.extract_strided_slice %259 {offsets = [8, 0], sizes = [8, 1], strides = [1, 1]} : vector<16x1xf32> to vector<8x1xf32>
    %cst_113 = arith.constant dense<0.000000e+00> : vector<8x1xf32>
    %311 = tpu.matmul %264, %310, %cst_113 {dimension_numbers = #tpu.dot_dimension_numbers<[1], [0], [0], [1], [0, 0, 1, 1], [], []>} : vector<8x8xf32>, vector<8x1xf32>, vector<8x1xf32> -> vector<8x1xf32>
    %312 = vector.extract_strided_slice %311 {offsets = [7, 0], sizes = [1, 1], strides = [1, 1]} : vector<8x1xf32> to vector<1x1xf32>
    %cst_114 = arith.constant 1.000000e+00 : f32
    %cst_115 = arith.constant 3.200000e+01 : f32
    %313 = vector.broadcast %cst_114 : f32 to vector<1x1xf32>
    %314 = arith.maximumf %313, %312 : vector<1x1xf32>
    %315 = vector.broadcast %cst_115 : f32 to vector<1x1xf32>
    %316 = arith.minimumf %315, %314 : vector<1x1xf32>
    %317 = vector.broadcast %311 : vector<8x1xf32> to vector<8x32xf32>
    %318 = arith.cmpf olt, %266, %317 : vector<8x32xf32>
    %319 = arith.subf %311, %310 : vector<8x1xf32>
    %320 = vector.broadcast %319 : vector<8x1xf32> to vector<8x32xf32>
    %321 = arith.cmpf oge, %266, %320 : vector<8x32xf32>
    %322 = arith.andi %318, %321 : vector<8x32xi1>
    %323 = arith.extui %322 : vector<8x32xi1> to vector<8x32xi32>
    %324 = arith.sitofp %323 : vector<8x32xi32> to vector<8x32xf32>
    %325 = vector.broadcast %316 : vector<1x1xf32> to vector<1x32xf32>
    %326 = arith.cmpf olt, %270, %325 : vector<1x32xf32>
    %327 = arith.extui %326 : vector<1x32xi1> to vector<1x32xi32>
    %328 = arith.sitofp %327 : vector<1x32xi32> to vector<1x32xf32>
    %329 = vector.broadcast %328 : vector<1x32xf32> to vector<8x32xf32>
    %330 = arith.mulf %324, %329 : vector<8x32xf32>
    %331 = tpu.transpose %330, [1, 0] : vector<8x32xf32> -> vector<32x8xf32>
    %332 = vector.extract_strided_slice %171 {offsets = [8, 0], sizes = [8, 32], strides = [1, 1]} : vector<16x64xf32> to vector<8x32xf32>
    %333 = vector.extract_strided_slice %171 {offsets = [8, 32], sizes = [8, 32], strides = [1, 1]} : vector<16x64xf32> to vector<8x32xf32>
    %cst_116 = arith.constant dense<0.000000e+00> : vector<32x32xf32>
    %334 = tpu.matmul %331, %332, %cst_116 {dimension_numbers = #tpu.dot_dimension_numbers<[1], [0], [0], [1], [0, 0, 1, 1], [], []>} : vector<32x8xf32>, vector<8x32xf32>, vector<32x32xf32> -> vector<32x32xf32>
    %cst_117 = arith.constant dense<0.000000e+00> : vector<32x32xf32>
    %335 = tpu.matmul %331, %333, %cst_117 {dimension_numbers = #tpu.dot_dimension_numbers<[1], [0], [0], [1], [0, 0, 1, 1], [], []>} : vector<32x8xf32>, vector<8x32xf32>, vector<32x32xf32> -> vector<32x32xf32>
    %336 = vector.broadcast %316 : vector<1x1xf32> to vector<32x1xf32>
    %337 = arith.cmpf olt, %268, %336 : vector<32x1xf32>
    %338 = arith.extui %337 : vector<32x1xi1> to vector<32x1xi32>
    %339 = arith.sitofp %338 : vector<32x1xi32> to vector<32x1xf32>
    %340 = math.exp %335 : vector<32x32xf32>
    %c1_118 = arith.constant 1 : index
    %c0_119 = arith.constant 0 : index
    %c0_120 = arith.constant 0 : index
    %341 = vector.load %arg4[%c1_118, %c0_119, %c0_120] : memref<2x32x32xf32, #tpu.memory_space<vmem>>, vector<1x32x32xf32>
    %342 = vector.shape_cast %341 : vector<1x32x32xf32> to vector<32x32xf32>
    %343 = arith.mulf %340, %342 : vector<32x32xf32>
    %cst_121 = arith.constant 1.000000e+00 : f32
    %344 = vector.broadcast %cst_121 : f32 to vector<32x32xf32>
    %345 = arith.mulf %343, %344 : vector<32x32xf32>
    %346 = arith.addf %334, %345 : vector<32x32xf32>
    %347 = vector.broadcast %339 : vector<32x1xf32> to vector<32x32xf32>
    %348 = arith.mulf %346, %347 : vector<32x32xf32>
    %349 = tpu.concatenate %309, %348 in 0 : vector<32x32xf32>, vector<32x32xf32> -> vector<64x32xf32>
    %350 = tpu.concatenate %300, %339 in 0 : vector<32x1xf32>, vector<32x1xf32> -> vector<64x1xf32>
    %351 = tpu.iota {dimensions = array<i32: 0>} : vector<16x16xi32>
    %352 = tpu.iota {dimensions = array<i32: 1>} : vector<16x16xi32>
    %353 = arith.addi %351, %352 : vector<16x16xi32>
    %c15_i32_122 = arith.constant 15 : i32
    %354 = vector.broadcast %c15_i32_122 : i32 to vector<16x16xi32>
    %355 = arith.cmpi eq, %353, %354 : vector<16x16xi32>
    %356 = arith.extui %355 : vector<16x16xi1> to vector<16x16xi32>
    %357 = arith.sitofp %356 : vector<16x16xi32> to vector<16x16xf32>
    %358 = vector.extract_strided_slice %349 {offsets = [0, 0], sizes = [64, 16], strides = [1, 1]} : vector<64x32xf32> to vector<64x16xf32>
    %359 = vector.extract_strided_slice %349 {offsets = [0, 16], sizes = [64, 16], strides = [1, 1]} : vector<64x32xf32> to vector<64x16xf32>
    %cst_123 = arith.constant dense<0.000000e+00> : vector<64x16xf32>
    %360 = tpu.matmul %359, %357, %cst_123 {dimension_numbers = #tpu.dot_dimension_numbers<[1], [0], [0], [1], [0, 0, 1, 1], [], []>} : vector<64x16xf32>, vector<16x16xf32>, vector<64x16xf32> -> vector<64x16xf32>
    %cst_124 = arith.constant dense<0.000000e+00> : vector<64x16xf32>
    %361 = tpu.matmul %358, %357, %cst_124 {dimension_numbers = #tpu.dot_dimension_numbers<[1], [0], [0], [1], [0, 0, 1, 1], [], []>} : vector<64x16xf32>, vector<16x16xf32>, vector<64x16xf32> -> vector<64x16xf32>
    %362 = vector.broadcast %350 : vector<64x1xf32> to vector<64x16xf32>
    %363 = arith.mulf %360, %362 : vector<64x16xf32>
    %c96_125 = arith.constant 96 : index
    %c0_126 = arith.constant 0 : index
    %364 = vector.load %arg6[%c96_125, %c0_126] : memref<192x16xf32, #tpu.memory_space<vmem>>, vector<16x16xf32>
    %c112 = arith.constant 112 : index
    %c0_127 = arith.constant 0 : index
    %365 = vector.load %arg6[%c112, %c0_127] : memref<192x16xf32, #tpu.memory_space<vmem>>, vector<16x16xf32>
    %c128 = arith.constant 128 : index
    %c0_128 = arith.constant 0 : index
    %366 = vector.load %arg6[%c128, %c0_128] : memref<192x16xf32, #tpu.memory_space<vmem>>, vector<16x16xf32>
    %c14 = arith.constant 14 : index
    %c0_129 = arith.constant 0 : index
    %367 = vector.load %arg8[%c14, %c0_129] : memref<24x128xf32, #tpu.memory_space<vmem>>, vector<1x16xf32>
    %368 = tpu.iota {dimensions = array<i32: 0>} : vector<64x1xi32>
    %c31_i32 = arith.constant 31 : i32
    %369 = vector.broadcast %c31_i32 : i32 to vector<64x1xi32>
    %370 = arith.andi %368, %369 : vector<64x1xi32>
    %c0_i32_130 = arith.constant 0 : i32
    %371 = vector.broadcast %c0_i32_130 : i32 to vector<64x1xi32>
    %372 = arith.cmpi ne, %370, %371 : vector<64x1xi32>
    %c1_i32_131 = arith.constant 1 : i32
    %373 = vector.broadcast %c1_i32_131 : i32 to vector<64x1xi32>
    %374 = arith.addi %368, %373 : vector<64x1xi32>
    %c31_i32_132 = arith.constant 31 : i32
    %375 = vector.broadcast %c31_i32_132 : i32 to vector<64x1xi32>
    %376 = arith.andi %374, %375 : vector<64x1xi32>
    %c0_i32_133 = arith.constant 0 : i32
    %377 = vector.broadcast %c0_i32_133 : i32 to vector<64x1xi32>
    %378 = arith.cmpi ne, %376, %377 : vector<64x1xi32>
    %c1_i32_134 = arith.constant 1 : i32
    %379 = tpu.dynamic_rotate %363 by %c1_i32_134 dim 0 : vector<64x16xf32>, i32 -> vector<64x16xf32>
    %cst_135 = arith.constant 0.000000e+00 : f32
    %380 = vector.shape_cast %372 : vector<64x1xi1> to vector<64x1xi1>
    %381 = vector.broadcast %380 : vector<64x1xi1> to vector<64x16xi1>
    %382 = vector.broadcast %cst_135 : f32 to vector<64x16xf32>
    %383 = arith.select %381, %379, %382 : vector<64x16xi1>, vector<64x16xf32>
    %c63_i32 = arith.constant 63 : i32
    %384 = tpu.dynamic_rotate %363 by %c63_i32 dim 0 : vector<64x16xf32>, i32 -> vector<64x16xf32>
    %cst_136 = arith.constant 0.000000e+00 : f32
    %385 = vector.shape_cast %378 : vector<64x1xi1> to vector<64x1xi1>
    %386 = vector.broadcast %385 : vector<64x1xi1> to vector<64x16xi1>
    %387 = vector.broadcast %cst_136 : f32 to vector<64x16xf32>
    %388 = arith.select %386, %384, %387 : vector<64x16xi1>, vector<64x16xf32>
    %cst_137 = arith.constant dense<0.000000e+00> : vector<64x16xf32>
    %389 = tpu.matmul %383, %364, %cst_137 {dimension_numbers = #tpu.dot_dimension_numbers<[1], [0], [0], [1], [0, 0, 1, 1], [], []>} : vector<64x16xf32>, vector<16x16xf32>, vector<64x16xf32> -> vector<64x16xf32>
    %cst_138 = arith.constant dense<0.000000e+00> : vector<64x16xf32>
    %390 = tpu.matmul %363, %365, %cst_138 {dimension_numbers = #tpu.dot_dimension_numbers<[1], [0], [0], [1], [0, 0, 1, 1], [], []>} : vector<64x16xf32>, vector<16x16xf32>, vector<64x16xf32> -> vector<64x16xf32>
    %391 = arith.addf %389, %390 : vector<64x16xf32>
    %cst_139 = arith.constant dense<0.000000e+00> : vector<64x16xf32>
    %392 = tpu.matmul %388, %366, %cst_139 {dimension_numbers = #tpu.dot_dimension_numbers<[1], [0], [0], [1], [0, 0, 1, 1], [], []>} : vector<64x16xf32>, vector<16x16xf32>, vector<64x16xf32> -> vector<64x16xf32>
    %393 = arith.addf %391, %392 : vector<64x16xf32>
    %394 = vector.broadcast %367 : vector<1x16xf32> to vector<64x16xf32>
    %395 = arith.addf %393, %394 : vector<64x16xf32>
    %cst_140 = arith.constant 0.000000e+00 : f32
    %396 = vector.broadcast %cst_140 : f32 to vector<64x16xf32>
    %397 = arith.maximumf %395, %396 : vector<64x16xf32>
    %c144 = arith.constant 144 : index
    %c0_141 = arith.constant 0 : index
    %398 = vector.load %arg6[%c144, %c0_141] : memref<192x16xf32, #tpu.memory_space<vmem>>, vector<16x16xf32>
    %c160_142 = arith.constant 160 : index
    %c0_143 = arith.constant 0 : index
    %399 = vector.load %arg6[%c160_142, %c0_143] : memref<192x16xf32, #tpu.memory_space<vmem>>, vector<16x16xf32>
    %c176 = arith.constant 176 : index
    %c0_144 = arith.constant 0 : index
    %400 = vector.load %arg6[%c176, %c0_144] : memref<192x16xf32, #tpu.memory_space<vmem>>, vector<16x16xf32>
    %c15 = arith.constant 15 : index
    %c0_145 = arith.constant 0 : index
    %401 = vector.load %arg8[%c15, %c0_145] : memref<24x128xf32, #tpu.memory_space<vmem>>, vector<1x16xf32>
    %402 = tpu.iota {dimensions = array<i32: 0>} : vector<64x1xi32>
    %c31_i32_146 = arith.constant 31 : i32
    %403 = vector.broadcast %c31_i32_146 : i32 to vector<64x1xi32>
    %404 = arith.andi %402, %403 : vector<64x1xi32>
    %c0_i32_147 = arith.constant 0 : i32
    %405 = vector.broadcast %c0_i32_147 : i32 to vector<64x1xi32>
    %406 = arith.cmpi ne, %404, %405 : vector<64x1xi32>
    %c1_i32_148 = arith.constant 1 : i32
    %407 = vector.broadcast %c1_i32_148 : i32 to vector<64x1xi32>
    %408 = arith.addi %402, %407 : vector<64x1xi32>
    %c31_i32_149 = arith.constant 31 : i32
    %409 = vector.broadcast %c31_i32_149 : i32 to vector<64x1xi32>
    %410 = arith.andi %408, %409 : vector<64x1xi32>
    %c0_i32_150 = arith.constant 0 : i32
    %411 = vector.broadcast %c0_i32_150 : i32 to vector<64x1xi32>
    %412 = arith.cmpi ne, %410, %411 : vector<64x1xi32>
    %c1_i32_151 = arith.constant 1 : i32
    %413 = tpu.dynamic_rotate %397 by %c1_i32_151 dim 0 : vector<64x16xf32>, i32 -> vector<64x16xf32>
    %cst_152 = arith.constant 0.000000e+00 : f32
    %414 = vector.shape_cast %406 : vector<64x1xi1> to vector<64x1xi1>
    %415 = vector.broadcast %414 : vector<64x1xi1> to vector<64x16xi1>
    %416 = vector.broadcast %cst_152 : f32 to vector<64x16xf32>
    %417 = arith.select %415, %413, %416 : vector<64x16xi1>, vector<64x16xf32>
    %c63_i32_153 = arith.constant 63 : i32
    %418 = tpu.dynamic_rotate %397 by %c63_i32_153 dim 0 : vector<64x16xf32>, i32 -> vector<64x16xf32>
    %cst_154 = arith.constant 0.000000e+00 : f32
    %419 = vector.shape_cast %412 : vector<64x1xi1> to vector<64x1xi1>
    %420 = vector.broadcast %419 : vector<64x1xi1> to vector<64x16xi1>
    %421 = vector.broadcast %cst_154 : f32 to vector<64x16xf32>
    %422 = arith.select %420, %418, %421 : vector<64x16xi1>, vector<64x16xf32>
    %cst_155 = arith.constant dense<0.000000e+00> : vector<64x16xf32>
    %423 = tpu.matmul %417, %398, %cst_155 {dimension_numbers = #tpu.dot_dimension_numbers<[1], [0], [0], [1], [0, 0, 1, 1], [], []>} : vector<64x16xf32>, vector<16x16xf32>, vector<64x16xf32> -> vector<64x16xf32>
    %cst_156 = arith.constant dense<0.000000e+00> : vector<64x16xf32>
    %424 = tpu.matmul %397, %399, %cst_156 {dimension_numbers = #tpu.dot_dimension_numbers<[1], [0], [0], [1], [0, 0, 1, 1], [], []>} : vector<64x16xf32>, vector<16x16xf32>, vector<64x16xf32> -> vector<64x16xf32>
    %425 = arith.addf %423, %424 : vector<64x16xf32>
    %cst_157 = arith.constant dense<0.000000e+00> : vector<64x16xf32>
    %426 = tpu.matmul %422, %400, %cst_157 {dimension_numbers = #tpu.dot_dimension_numbers<[1], [0], [0], [1], [0, 0, 1, 1], [], []>} : vector<64x16xf32>, vector<16x16xf32>, vector<64x16xf32> -> vector<64x16xf32>
    %427 = arith.addf %425, %426 : vector<64x16xf32>
    %428 = vector.broadcast %401 : vector<1x16xf32> to vector<64x16xf32>
    %429 = arith.addf %427, %428 : vector<64x16xf32>
    %430 = arith.subf %361, %429 : vector<64x16xf32>
    %431 = vector.broadcast %350 : vector<64x1xf32> to vector<64x16xf32>
    %432 = arith.mulf %430, %431 : vector<64x16xf32>
    %cst_158 = arith.constant dense<0.000000e+00> : vector<64x16xf32>
    %433 = tpu.matmul %432, %357, %cst_158 {dimension_numbers = #tpu.dot_dimension_numbers<[1], [0], [0], [1], [0, 0, 1, 1], [], []>} : vector<64x16xf32>, vector<16x16xf32>, vector<64x16xf32> -> vector<64x16xf32>
    %cst_159 = arith.constant dense<0.000000e+00> : vector<64x16xf32>
    %434 = tpu.matmul %360, %357, %cst_159 {dimension_numbers = #tpu.dot_dimension_numbers<[1], [0], [0], [1], [0, 0, 1, 1], [], []>} : vector<64x16xf32>, vector<16x16xf32>, vector<64x16xf32> -> vector<64x16xf32>
    %435 = vector.broadcast %350 : vector<64x1xf32> to vector<64x16xf32>
    %436 = arith.mulf %433, %435 : vector<64x16xf32>
    %c0_160 = arith.constant 0 : index
    %c0_161 = arith.constant 0 : index
    %437 = vector.load %arg6[%c0_160, %c0_161] : memref<192x16xf32, #tpu.memory_space<vmem>>, vector<16x16xf32>
    %c16 = arith.constant 16 : index
    %c0_162 = arith.constant 0 : index
    %438 = vector.load %arg6[%c16, %c0_162] : memref<192x16xf32, #tpu.memory_space<vmem>>, vector<16x16xf32>
    %c32_163 = arith.constant 32 : index
    %c0_164 = arith.constant 0 : index
    %439 = vector.load %arg6[%c32_163, %c0_164] : memref<192x16xf32, #tpu.memory_space<vmem>>, vector<16x16xf32>
    %c12 = arith.constant 12 : index
    %c0_165 = arith.constant 0 : index
    %440 = vector.load %arg8[%c12, %c0_165] : memref<24x128xf32, #tpu.memory_space<vmem>>, vector<1x16xf32>
    %441 = tpu.iota {dimensions = array<i32: 0>} : vector<64x1xi32>
    %c31_i32_166 = arith.constant 31 : i32
    %442 = vector.broadcast %c31_i32_166 : i32 to vector<64x1xi32>
    %443 = arith.andi %441, %442 : vector<64x1xi32>
    %c0_i32_167 = arith.constant 0 : i32
    %444 = vector.broadcast %c0_i32_167 : i32 to vector<64x1xi32>
    %445 = arith.cmpi ne, %443, %444 : vector<64x1xi32>
    %c1_i32_168 = arith.constant 1 : i32
    %446 = vector.broadcast %c1_i32_168 : i32 to vector<64x1xi32>
    %447 = arith.addi %441, %446 : vector<64x1xi32>
    %c31_i32_169 = arith.constant 31 : i32
    %448 = vector.broadcast %c31_i32_169 : i32 to vector<64x1xi32>
    %449 = arith.andi %447, %448 : vector<64x1xi32>
    %c0_i32_170 = arith.constant 0 : i32
    %450 = vector.broadcast %c0_i32_170 : i32 to vector<64x1xi32>
    %451 = arith.cmpi ne, %449, %450 : vector<64x1xi32>
    %c1_i32_171 = arith.constant 1 : i32
    %452 = tpu.dynamic_rotate %436 by %c1_i32_171 dim 0 : vector<64x16xf32>, i32 -> vector<64x16xf32>
    %cst_172 = arith.constant 0.000000e+00 : f32
    %453 = vector.shape_cast %445 : vector<64x1xi1> to vector<64x1xi1>
    %454 = vector.broadcast %453 : vector<64x1xi1> to vector<64x16xi1>
    %455 = vector.broadcast %cst_172 : f32 to vector<64x16xf32>
    %456 = arith.select %454, %452, %455 : vector<64x16xi1>, vector<64x16xf32>
    %c63_i32_173 = arith.constant 63 : i32
    %457 = tpu.dynamic_rotate %436 by %c63_i32_173 dim 0 : vector<64x16xf32>, i32 -> vector<64x16xf32>
    %cst_174 = arith.constant 0.000000e+00 : f32
    %458 = vector.shape_cast %451 : vector<64x1xi1> to vector<64x1xi1>
    %459 = vector.broadcast %458 : vector<64x1xi1> to vector<64x16xi1>
    %460 = vector.broadcast %cst_174 : f32 to vector<64x16xf32>
    %461 = arith.select %459, %457, %460 : vector<64x16xi1>, vector<64x16xf32>
    %cst_175 = arith.constant dense<0.000000e+00> : vector<64x16xf32>
    %462 = tpu.matmul %456, %437, %cst_175 {dimension_numbers = #tpu.dot_dimension_numbers<[1], [0], [0], [1], [0, 0, 1, 1], [], []>} : vector<64x16xf32>, vector<16x16xf32>, vector<64x16xf32> -> vector<64x16xf32>
    %cst_176 = arith.constant dense<0.000000e+00> : vector<64x16xf32>
    %463 = tpu.matmul %436, %438, %cst_176 {dimension_numbers = #tpu.dot_dimension_numbers<[1], [0], [0], [1], [0, 0, 1, 1], [], []>} : vector<64x16xf32>, vector<16x16xf32>, vector<64x16xf32> -> vector<64x16xf32>
    %464 = arith.addf %462, %463 : vector<64x16xf32>
    %cst_177 = arith.constant dense<0.000000e+00> : vector<64x16xf32>
    %465 = tpu.matmul %461, %439, %cst_177 {dimension_numbers = #tpu.dot_dimension_numbers<[1], [0], [0], [1], [0, 0, 1, 1], [], []>} : vector<64x16xf32>, vector<16x16xf32>, vector<64x16xf32> -> vector<64x16xf32>
    %466 = arith.addf %464, %465 : vector<64x16xf32>
    %467 = vector.broadcast %440 : vector<1x16xf32> to vector<64x16xf32>
    %468 = arith.addf %466, %467 : vector<64x16xf32>
    %cst_178 = arith.constant 0.000000e+00 : f32
    %469 = vector.broadcast %cst_178 : f32 to vector<64x16xf32>
    %470 = arith.maximumf %468, %469 : vector<64x16xf32>
    %c48 = arith.constant 48 : index
    %c0_179 = arith.constant 0 : index
    %471 = vector.load %arg6[%c48, %c0_179] : memref<192x16xf32, #tpu.memory_space<vmem>>, vector<16x16xf32>
    %c64_180 = arith.constant 64 : index
    %c0_181 = arith.constant 0 : index
    %472 = vector.load %arg6[%c64_180, %c0_181] : memref<192x16xf32, #tpu.memory_space<vmem>>, vector<16x16xf32>
    %c80 = arith.constant 80 : index
    %c0_182 = arith.constant 0 : index
    %473 = vector.load %arg6[%c80, %c0_182] : memref<192x16xf32, #tpu.memory_space<vmem>>, vector<16x16xf32>
    %c13 = arith.constant 13 : index
    %c0_183 = arith.constant 0 : index
    %474 = vector.load %arg8[%c13, %c0_183] : memref<24x128xf32, #tpu.memory_space<vmem>>, vector<1x16xf32>
    %475 = tpu.iota {dimensions = array<i32: 0>} : vector<64x1xi32>
    %c31_i32_184 = arith.constant 31 : i32
    %476 = vector.broadcast %c31_i32_184 : i32 to vector<64x1xi32>
    %477 = arith.andi %475, %476 : vector<64x1xi32>
    %c0_i32_185 = arith.constant 0 : i32
    %478 = vector.broadcast %c0_i32_185 : i32 to vector<64x1xi32>
    %479 = arith.cmpi ne, %477, %478 : vector<64x1xi32>
    %c1_i32_186 = arith.constant 1 : i32
    %480 = vector.broadcast %c1_i32_186 : i32 to vector<64x1xi32>
    %481 = arith.addi %475, %480 : vector<64x1xi32>
    %c31_i32_187 = arith.constant 31 : i32
    %482 = vector.broadcast %c31_i32_187 : i32 to vector<64x1xi32>
    %483 = arith.andi %481, %482 : vector<64x1xi32>
    %c0_i32_188 = arith.constant 0 : i32
    %484 = vector.broadcast %c0_i32_188 : i32 to vector<64x1xi32>
    %485 = arith.cmpi ne, %483, %484 : vector<64x1xi32>
    %c1_i32_189 = arith.constant 1 : i32
    %486 = tpu.dynamic_rotate %470 by %c1_i32_189 dim 0 : vector<64x16xf32>, i32 -> vector<64x16xf32>
    %cst_190 = arith.constant 0.000000e+00 : f32
    %487 = vector.shape_cast %479 : vector<64x1xi1> to vector<64x1xi1>
    %488 = vector.broadcast %487 : vector<64x1xi1> to vector<64x16xi1>
    %489 = vector.broadcast %cst_190 : f32 to vector<64x16xf32>
    %490 = arith.select %488, %486, %489 : vector<64x16xi1>, vector<64x16xf32>
    %c63_i32_191 = arith.constant 63 : i32
    %491 = tpu.dynamic_rotate %470 by %c63_i32_191 dim 0 : vector<64x16xf32>, i32 -> vector<64x16xf32>
    %cst_192 = arith.constant 0.000000e+00 : f32
    %492 = vector.shape_cast %485 : vector<64x1xi1> to vector<64x1xi1>
    %493 = vector.broadcast %492 : vector<64x1xi1> to vector<64x16xi1>
    %494 = vector.broadcast %cst_192 : f32 to vector<64x16xf32>
    %495 = arith.select %493, %491, %494 : vector<64x16xi1>, vector<64x16xf32>
    %cst_193 = arith.constant dense<0.000000e+00> : vector<64x16xf32>
    %496 = tpu.matmul %490, %471, %cst_193 {dimension_numbers = #tpu.dot_dimension_numbers<[1], [0], [0], [1], [0, 0, 1, 1], [], []>} : vector<64x16xf32>, vector<16x16xf32>, vector<64x16xf32> -> vector<64x16xf32>
    %cst_194 = arith.constant dense<0.000000e+00> : vector<64x16xf32>
    %497 = tpu.matmul %470, %472, %cst_194 {dimension_numbers = #tpu.dot_dimension_numbers<[1], [0], [0], [1], [0, 0, 1, 1], [], []>} : vector<64x16xf32>, vector<16x16xf32>, vector<64x16xf32> -> vector<64x16xf32>
    %498 = arith.addf %496, %497 : vector<64x16xf32>
    %cst_195 = arith.constant dense<0.000000e+00> : vector<64x16xf32>
    %499 = tpu.matmul %495, %473, %cst_195 {dimension_numbers = #tpu.dot_dimension_numbers<[1], [0], [0], [1], [0, 0, 1, 1], [], []>} : vector<64x16xf32>, vector<16x16xf32>, vector<64x16xf32> -> vector<64x16xf32>
    %500 = arith.addf %498, %499 : vector<64x16xf32>
    %501 = vector.broadcast %474 : vector<1x16xf32> to vector<64x16xf32>
    %502 = arith.addf %500, %501 : vector<64x16xf32>
    %503 = arith.subf %434, %502 : vector<64x16xf32>
    %504 = vector.broadcast %350 : vector<64x1xf32> to vector<64x16xf32>
    %505 = arith.mulf %503, %504 : vector<64x16xf32>
    %506 = vector.broadcast %350 : vector<64x1xf32> to vector<64x16xf32>
    %507 = arith.mulf %433, %506 : vector<64x16xf32>
    %508 = vector.broadcast %350 : vector<64x1xf32> to vector<64x16xf32>
    %509 = arith.mulf %505, %508 : vector<64x16xf32>
    %510 = tpu.concatenate %507, %509 in 1 : vector<64x16xf32>, vector<64x16xf32> -> vector<64x32xf32>
    %c0_196 = arith.constant 0 : index
    %c0_197 = arith.constant 0 : index
    %511 = vector.load %arg7[%c0_196, %c0_197] : memref<576x32xf32, #tpu.memory_space<vmem>>, vector<32x32xf32>
    %c32_198 = arith.constant 32 : index
    %c0_199 = arith.constant 0 : index
    %512 = vector.load %arg7[%c32_198, %c0_199] : memref<576x32xf32, #tpu.memory_space<vmem>>, vector<32x32xf32>
    %c64_200 = arith.constant 64 : index
    %c0_201 = arith.constant 0 : index
    %513 = vector.load %arg7[%c64_200, %c0_201] : memref<576x32xf32, #tpu.memory_space<vmem>>, vector<32x32xf32>
    %c16_202 = arith.constant 16 : index
    %c0_203 = arith.constant 0 : index
    %514 = vector.load %arg8[%c16_202, %c0_203] : memref<24x128xf32, #tpu.memory_space<vmem>>, vector<1x32xf32>
    %515 = tpu.iota {dimensions = array<i32: 0>} : vector<64x1xi32>
    %c31_i32_204 = arith.constant 31 : i32
    %516 = vector.broadcast %c31_i32_204 : i32 to vector<64x1xi32>
    %517 = arith.andi %515, %516 : vector<64x1xi32>
    %c0_i32_205 = arith.constant 0 : i32
    %518 = vector.broadcast %c0_i32_205 : i32 to vector<64x1xi32>
    %519 = arith.cmpi ne, %517, %518 : vector<64x1xi32>
    %c1_i32_206 = arith.constant 1 : i32
    %520 = vector.broadcast %c1_i32_206 : i32 to vector<64x1xi32>
    %521 = arith.addi %515, %520 : vector<64x1xi32>
    %c31_i32_207 = arith.constant 31 : i32
    %522 = vector.broadcast %c31_i32_207 : i32 to vector<64x1xi32>
    %523 = arith.andi %521, %522 : vector<64x1xi32>
    %c0_i32_208 = arith.constant 0 : i32
    %524 = vector.broadcast %c0_i32_208 : i32 to vector<64x1xi32>
    %525 = arith.cmpi ne, %523, %524 : vector<64x1xi32>
    %c1_i32_209 = arith.constant 1 : i32
    %526 = tpu.dynamic_rotate %510 by %c1_i32_209 dim 0 : vector<64x32xf32>, i32 -> vector<64x32xf32>
    %cst_210 = arith.constant 0.000000e+00 : f32
    %527 = vector.shape_cast %519 : vector<64x1xi1> to vector<64x1xi1>
    %528 = vector.broadcast %527 : vector<64x1xi1> to vector<64x32xi1>
    %529 = vector.broadcast %cst_210 : f32 to vector<64x32xf32>
    %530 = arith.select %528, %526, %529 : vector<64x32xi1>, vector<64x32xf32>
    %c63_i32_211 = arith.constant 63 : i32
    %531 = tpu.dynamic_rotate %510 by %c63_i32_211 dim 0 : vector<64x32xf32>, i32 -> vector<64x32xf32>
    %cst_212 = arith.constant 0.000000e+00 : f32
    %532 = vector.shape_cast %525 : vector<64x1xi1> to vector<64x1xi1>
    %533 = vector.broadcast %532 : vector<64x1xi1> to vector<64x32xi1>
    %534 = vector.broadcast %cst_212 : f32 to vector<64x32xf32>
    %535 = arith.select %533, %531, %534 : vector<64x32xi1>, vector<64x32xf32>
    %cst_213 = arith.constant dense<0.000000e+00> : vector<64x32xf32>
    %536 = tpu.matmul %530, %511, %cst_213 {dimension_numbers = #tpu.dot_dimension_numbers<[1], [0], [0], [1], [0, 0, 1, 1], [], []>} : vector<64x32xf32>, vector<32x32xf32>, vector<64x32xf32> -> vector<64x32xf32>
    %cst_214 = arith.constant dense<0.000000e+00> : vector<64x32xf32>
    %537 = tpu.matmul %510, %512, %cst_214 {dimension_numbers = #tpu.dot_dimension_numbers<[1], [0], [0], [1], [0, 0, 1, 1], [], []>} : vector<64x32xf32>, vector<32x32xf32>, vector<64x32xf32> -> vector<64x32xf32>
    %538 = arith.addf %536, %537 : vector<64x32xf32>
    %cst_215 = arith.constant dense<0.000000e+00> : vector<64x32xf32>
    %539 = tpu.matmul %535, %513, %cst_215 {dimension_numbers = #tpu.dot_dimension_numbers<[1], [0], [0], [1], [0, 0, 1, 1], [], []>} : vector<64x32xf32>, vector<32x32xf32>, vector<64x32xf32> -> vector<64x32xf32>
    %540 = arith.addf %538, %539 : vector<64x32xf32>
    %541 = vector.broadcast %514 : vector<1x32xf32> to vector<64x32xf32>
    %542 = arith.addf %540, %541 : vector<64x32xf32>
    %543 = tpu.iota {dimensions = array<i32: 0>} : vector<128x64xi32>
    %544 = tpu.iota {dimensions = array<i32: 1>} : vector<128x64xi32>
    %c1_i32_216 = arith.constant 1 : i32
    %545 = vector.broadcast %c1_i32_216 : i32 to vector<128x64xi32>
    %546 = arith.shrsi %543, %545 : vector<128x64xi32>
    %547 = arith.cmpi eq, %546, %544 : vector<128x64xi32>
    %548 = arith.extui %547 : vector<128x64xi1> to vector<128x64xi32>
    %549 = arith.sitofp %548 : vector<128x64xi32> to vector<128x64xf32>
    %cst_217 = arith.constant dense<0.000000e+00> : vector<128x32xf32>
    %550 = tpu.matmul %549, %542, %cst_217 {dimension_numbers = #tpu.dot_dimension_numbers<[1], [0], [0], [1], [0, 0, 1, 1], [], []>} : vector<128x64xf32>, vector<64x32xf32>, vector<128x32xf32> -> vector<128x32xf32>
    %c96_218 = arith.constant 96 : index
    %c0_219 = arith.constant 0 : index
    %551 = vector.load %arg7[%c96_218, %c0_219] : memref<576x32xf32, #tpu.memory_space<vmem>>, vector<32x32xf32>
    %c128_220 = arith.constant 128 : index
    %c0_221 = arith.constant 0 : index
    %552 = vector.load %arg7[%c128_220, %c0_221] : memref<576x32xf32, #tpu.memory_space<vmem>>, vector<32x32xf32>
    %c160_222 = arith.constant 160 : index
    %c0_223 = arith.constant 0 : index
    %553 = vector.load %arg7[%c160_222, %c0_223] : memref<576x32xf32, #tpu.memory_space<vmem>>, vector<32x32xf32>
    %c17 = arith.constant 17 : index
    %c0_224 = arith.constant 0 : index
    %554 = vector.load %arg8[%c17, %c0_224] : memref<24x128xf32, #tpu.memory_space<vmem>>, vector<1x32xf32>
    %555 = tpu.iota {dimensions = array<i32: 0>} : vector<128x1xi32>
    %c63_i32_225 = arith.constant 63 : i32
    %556 = vector.broadcast %c63_i32_225 : i32 to vector<128x1xi32>
    %557 = arith.andi %555, %556 : vector<128x1xi32>
    %c0_i32_226 = arith.constant 0 : i32
    %558 = vector.broadcast %c0_i32_226 : i32 to vector<128x1xi32>
    %559 = arith.cmpi ne, %557, %558 : vector<128x1xi32>
    %c1_i32_227 = arith.constant 1 : i32
    %560 = vector.broadcast %c1_i32_227 : i32 to vector<128x1xi32>
    %561 = arith.addi %555, %560 : vector<128x1xi32>
    %c63_i32_228 = arith.constant 63 : i32
    %562 = vector.broadcast %c63_i32_228 : i32 to vector<128x1xi32>
    %563 = arith.andi %561, %562 : vector<128x1xi32>
    %c0_i32_229 = arith.constant 0 : i32
    %564 = vector.broadcast %c0_i32_229 : i32 to vector<128x1xi32>
    %565 = arith.cmpi ne, %563, %564 : vector<128x1xi32>
    %c1_i32_230 = arith.constant 1 : i32
    %566 = tpu.dynamic_rotate %550 by %c1_i32_230 dim 0 : vector<128x32xf32>, i32 -> vector<128x32xf32>
    %cst_231 = arith.constant 0.000000e+00 : f32
    %567 = vector.shape_cast %559 : vector<128x1xi1> to vector<128x1xi1>
    %568 = vector.broadcast %567 : vector<128x1xi1> to vector<128x32xi1>
    %569 = vector.broadcast %cst_231 : f32 to vector<128x32xf32>
    %570 = arith.select %568, %566, %569 : vector<128x32xi1>, vector<128x32xf32>
    %c127_i32 = arith.constant 127 : i32
    %571 = tpu.dynamic_rotate %550 by %c127_i32 dim 0 : vector<128x32xf32>, i32 -> vector<128x32xf32>
    %cst_232 = arith.constant 0.000000e+00 : f32
    %572 = vector.shape_cast %565 : vector<128x1xi1> to vector<128x1xi1>
    %573 = vector.broadcast %572 : vector<128x1xi1> to vector<128x32xi1>
    %574 = vector.broadcast %cst_232 : f32 to vector<128x32xf32>
    %575 = arith.select %573, %571, %574 : vector<128x32xi1>, vector<128x32xf32>
    %cst_233 = arith.constant dense<0.000000e+00> : vector<128x32xf32>
    %576 = tpu.matmul %570, %551, %cst_233 {dimension_numbers = #tpu.dot_dimension_numbers<[1], [0], [0], [1], [0, 0, 1, 1], [], []>} : vector<128x32xf32>, vector<32x32xf32>, vector<128x32xf32> -> vector<128x32xf32>
    %cst_234 = arith.constant dense<0.000000e+00> : vector<128x32xf32>
    %577 = tpu.matmul %550, %552, %cst_234 {dimension_numbers = #tpu.dot_dimension_numbers<[1], [0], [0], [1], [0, 0, 1, 1], [], []>} : vector<128x32xf32>, vector<32x32xf32>, vector<128x32xf32> -> vector<128x32xf32>
    %578 = arith.addf %576, %577 : vector<128x32xf32>
    %cst_235 = arith.constant dense<0.000000e+00> : vector<128x32xf32>
    %579 = tpu.matmul %575, %553, %cst_235 {dimension_numbers = #tpu.dot_dimension_numbers<[1], [0], [0], [1], [0, 0, 1, 1], [], []>} : vector<128x32xf32>, vector<32x32xf32>, vector<128x32xf32> -> vector<128x32xf32>
    %580 = arith.addf %578, %579 : vector<128x32xf32>
    %581 = vector.broadcast %554 : vector<1x32xf32> to vector<128x32xf32>
    %582 = arith.addf %580, %581 : vector<128x32xf32>
    %cst_236 = arith.constant 0.000000e+00 : f32
    %583 = vector.broadcast %cst_236 : f32 to vector<128x32xf32>
    %584 = arith.cmpf ogt, %582, %583 : vector<128x32xf32>
    %cst_237 = arith.constant 1.000000e-01 : f32
    %585 = vector.broadcast %cst_237 : f32 to vector<128x32xf32>
    %586 = arith.mulf %585, %582 : vector<128x32xf32>
    %587 = arith.select %584, %582, %586 : vector<128x32xi1>, vector<128x32xf32>
    %c192_238 = arith.constant 192 : index
    %c0_239 = arith.constant 0 : index
    %588 = vector.load %arg7[%c192_238, %c0_239] : memref<576x32xf32, #tpu.memory_space<vmem>>, vector<32x32xf32>
    %c224_240 = arith.constant 224 : index
    %c0_241 = arith.constant 0 : index
    %589 = vector.load %arg7[%c224_240, %c0_241] : memref<576x32xf32, #tpu.memory_space<vmem>>, vector<32x32xf32>
    %c256_242 = arith.constant 256 : index
    %c0_243 = arith.constant 0 : index
    %590 = vector.load %arg7[%c256_242, %c0_243] : memref<576x32xf32, #tpu.memory_space<vmem>>, vector<32x32xf32>
    %c18 = arith.constant 18 : index
    %c0_244 = arith.constant 0 : index
    %591 = vector.load %arg8[%c18, %c0_244] : memref<24x128xf32, #tpu.memory_space<vmem>>, vector<1x32xf32>
    %592 = tpu.iota {dimensions = array<i32: 0>} : vector<128x1xi32>
    %c63_i32_245 = arith.constant 63 : i32
    %593 = vector.broadcast %c63_i32_245 : i32 to vector<128x1xi32>
    %594 = arith.andi %592, %593 : vector<128x1xi32>
    %c0_i32_246 = arith.constant 0 : i32
    %595 = vector.broadcast %c0_i32_246 : i32 to vector<128x1xi32>
    %596 = arith.cmpi ne, %594, %595 : vector<128x1xi32>
    %c1_i32_247 = arith.constant 1 : i32
    %597 = vector.broadcast %c1_i32_247 : i32 to vector<128x1xi32>
    %598 = arith.addi %592, %597 : vector<128x1xi32>
    %c63_i32_248 = arith.constant 63 : i32
    %599 = vector.broadcast %c63_i32_248 : i32 to vector<128x1xi32>
    %600 = arith.andi %598, %599 : vector<128x1xi32>
    %c0_i32_249 = arith.constant 0 : i32
    %601 = vector.broadcast %c0_i32_249 : i32 to vector<128x1xi32>
    %602 = arith.cmpi ne, %600, %601 : vector<128x1xi32>
    %c1_i32_250 = arith.constant 1 : i32
    %603 = tpu.dynamic_rotate %587 by %c1_i32_250 dim 0 : vector<128x32xf32>, i32 -> vector<128x32xf32>
    %cst_251 = arith.constant 0.000000e+00 : f32
    %604 = vector.shape_cast %596 : vector<128x1xi1> to vector<128x1xi1>
    %605 = vector.broadcast %604 : vector<128x1xi1> to vector<128x32xi1>
    %606 = vector.broadcast %cst_251 : f32 to vector<128x32xf32>
    %607 = arith.select %605, %603, %606 : vector<128x32xi1>, vector<128x32xf32>
    %c127_i32_252 = arith.constant 127 : i32
    %608 = tpu.dynamic_rotate %587 by %c127_i32_252 dim 0 : vector<128x32xf32>, i32 -> vector<128x32xf32>
    %cst_253 = arith.constant 0.000000e+00 : f32
    %609 = vector.shape_cast %602 : vector<128x1xi1> to vector<128x1xi1>
    %610 = vector.broadcast %609 : vector<128x1xi1> to vector<128x32xi1>
    %611 = vector.broadcast %cst_253 : f32 to vector<128x32xf32>
    %612 = arith.select %610, %608, %611 : vector<128x32xi1>, vector<128x32xf32>
    %cst_254 = arith.constant dense<0.000000e+00> : vector<128x32xf32>
    %613 = tpu.matmul %607, %588, %cst_254 {dimension_numbers = #tpu.dot_dimension_numbers<[1], [0], [0], [1], [0, 0, 1, 1], [], []>} : vector<128x32xf32>, vector<32x32xf32>, vector<128x32xf32> -> vector<128x32xf32>
    %cst_255 = arith.constant dense<0.000000e+00> : vector<128x32xf32>
    %614 = tpu.matmul %587, %589, %cst_255 {dimension_numbers = #tpu.dot_dimension_numbers<[1], [0], [0], [1], [0, 0, 1, 1], [], []>} : vector<128x32xf32>, vector<32x32xf32>, vector<128x32xf32> -> vector<128x32xf32>
    %615 = arith.addf %613, %614 : vector<128x32xf32>
    %cst_256 = arith.constant dense<0.000000e+00> : vector<128x32xf32>
    %616 = tpu.matmul %612, %590, %cst_256 {dimension_numbers = #tpu.dot_dimension_numbers<[1], [0], [0], [1], [0, 0, 1, 1], [], []>} : vector<128x32xf32>, vector<32x32xf32>, vector<128x32xf32> -> vector<128x32xf32>
    %617 = arith.addf %615, %616 : vector<128x32xf32>
    %618 = vector.broadcast %591 : vector<1x32xf32> to vector<128x32xf32>
    %619 = arith.addf %617, %618 : vector<128x32xf32>
    %cst_257 = arith.constant 0.000000e+00 : f32
    %620 = vector.broadcast %cst_257 : f32 to vector<128x32xf32>
    %621 = arith.cmpf ogt, %619, %620 : vector<128x32xf32>
    %cst_258 = arith.constant 1.000000e-01 : f32
    %622 = vector.broadcast %cst_258 : f32 to vector<128x32xf32>
    %623 = arith.mulf %622, %619 : vector<128x32xf32>
    %624 = arith.select %621, %619, %623 : vector<128x32xi1>, vector<128x32xf32>
    %625 = arith.addf %587, %624 : vector<128x32xf32>
    %626 = tpu.iota {dimensions = array<i32: 0>} : vector<256x128xi32>
    %627 = tpu.iota {dimensions = array<i32: 1>} : vector<256x128xi32>
    %c1_i32_259 = arith.constant 1 : i32
    %628 = vector.broadcast %c1_i32_259 : i32 to vector<256x128xi32>
    %629 = arith.shrsi %626, %628 : vector<256x128xi32>
    %630 = arith.cmpi eq, %629, %627 : vector<256x128xi32>
    %631 = arith.extui %630 : vector<256x128xi1> to vector<256x128xi32>
    %632 = arith.sitofp %631 : vector<256x128xi32> to vector<256x128xf32>
    %cst_260 = arith.constant dense<0.000000e+00> : vector<256x32xf32>
    %633 = tpu.matmul %632, %625, %cst_260 {dimension_numbers = #tpu.dot_dimension_numbers<[1], [0], [0], [1], [0, 0, 1, 1], [], []>} : vector<256x128xf32>, vector<128x32xf32>, vector<256x32xf32> -> vector<256x32xf32>
    %c288_261 = arith.constant 288 : index
    %c0_262 = arith.constant 0 : index
    %634 = vector.load %arg7[%c288_261, %c0_262] : memref<576x32xf32, #tpu.memory_space<vmem>>, vector<32x32xf32>
    %c320_263 = arith.constant 320 : index
    %c0_264 = arith.constant 0 : index
    %635 = vector.load %arg7[%c320_263, %c0_264] : memref<576x32xf32, #tpu.memory_space<vmem>>, vector<32x32xf32>
    %c352_265 = arith.constant 352 : index
    %c0_266 = arith.constant 0 : index
    %636 = vector.load %arg7[%c352_265, %c0_266] : memref<576x32xf32, #tpu.memory_space<vmem>>, vector<32x32xf32>
    %c19 = arith.constant 19 : index
    %c0_267 = arith.constant 0 : index
    %637 = vector.load %arg8[%c19, %c0_267] : memref<24x128xf32, #tpu.memory_space<vmem>>, vector<1x32xf32>
    %638 = tpu.iota {dimensions = array<i32: 0>} : vector<256x1xi32>
    %c127_i32_268 = arith.constant 127 : i32
    %639 = vector.broadcast %c127_i32_268 : i32 to vector<256x1xi32>
    %640 = arith.andi %638, %639 : vector<256x1xi32>
    %c0_i32_269 = arith.constant 0 : i32
    %641 = vector.broadcast %c0_i32_269 : i32 to vector<256x1xi32>
    %642 = arith.cmpi ne, %640, %641 : vector<256x1xi32>
    %c1_i32_270 = arith.constant 1 : i32
    %643 = vector.broadcast %c1_i32_270 : i32 to vector<256x1xi32>
    %644 = arith.addi %638, %643 : vector<256x1xi32>
    %c127_i32_271 = arith.constant 127 : i32
    %645 = vector.broadcast %c127_i32_271 : i32 to vector<256x1xi32>
    %646 = arith.andi %644, %645 : vector<256x1xi32>
    %c0_i32_272 = arith.constant 0 : i32
    %647 = vector.broadcast %c0_i32_272 : i32 to vector<256x1xi32>
    %648 = arith.cmpi ne, %646, %647 : vector<256x1xi32>
    %c1_i32_273 = arith.constant 1 : i32
    %649 = tpu.dynamic_rotate %633 by %c1_i32_273 dim 0 : vector<256x32xf32>, i32 -> vector<256x32xf32>
    %cst_274 = arith.constant 0.000000e+00 : f32
    %650 = vector.shape_cast %642 : vector<256x1xi1> to vector<256x1xi1>
    %651 = vector.broadcast %650 : vector<256x1xi1> to vector<256x32xi1>
    %652 = vector.broadcast %cst_274 : f32 to vector<256x32xf32>
    %653 = arith.select %651, %649, %652 : vector<256x32xi1>, vector<256x32xf32>
    %c255_i32 = arith.constant 255 : i32
    %654 = tpu.dynamic_rotate %633 by %c255_i32 dim 0 : vector<256x32xf32>, i32 -> vector<256x32xf32>
    %cst_275 = arith.constant 0.000000e+00 : f32
    %655 = vector.shape_cast %648 : vector<256x1xi1> to vector<256x1xi1>
    %656 = vector.broadcast %655 : vector<256x1xi1> to vector<256x32xi1>
    %657 = vector.broadcast %cst_275 : f32 to vector<256x32xf32>
    %658 = arith.select %656, %654, %657 : vector<256x32xi1>, vector<256x32xf32>
    %cst_276 = arith.constant dense<0.000000e+00> : vector<256x32xf32>
    %659 = tpu.matmul %653, %634, %cst_276 {dimension_numbers = #tpu.dot_dimension_numbers<[1], [0], [0], [1], [0, 0, 1, 1], [], []>} : vector<256x32xf32>, vector<32x32xf32>, vector<256x32xf32> -> vector<256x32xf32>
    %cst_277 = arith.constant dense<0.000000e+00> : vector<256x32xf32>
    %660 = tpu.matmul %633, %635, %cst_277 {dimension_numbers = #tpu.dot_dimension_numbers<[1], [0], [0], [1], [0, 0, 1, 1], [], []>} : vector<256x32xf32>, vector<32x32xf32>, vector<256x32xf32> -> vector<256x32xf32>
    %661 = arith.addf %659, %660 : vector<256x32xf32>
    %cst_278 = arith.constant dense<0.000000e+00> : vector<256x32xf32>
    %662 = tpu.matmul %658, %636, %cst_278 {dimension_numbers = #tpu.dot_dimension_numbers<[1], [0], [0], [1], [0, 0, 1, 1], [], []>} : vector<256x32xf32>, vector<32x32xf32>, vector<256x32xf32> -> vector<256x32xf32>
    %663 = arith.addf %661, %662 : vector<256x32xf32>
    %664 = vector.broadcast %637 : vector<1x32xf32> to vector<256x32xf32>
    %665 = arith.addf %663, %664 : vector<256x32xf32>
    %cst_279 = arith.constant 0.000000e+00 : f32
    %666 = vector.broadcast %cst_279 : f32 to vector<256x32xf32>
    %667 = arith.cmpf ogt, %665, %666 : vector<256x32xf32>
    %cst_280 = arith.constant 1.000000e-01 : f32
    %668 = vector.broadcast %cst_280 : f32 to vector<256x32xf32>
    %669 = arith.mulf %668, %665 : vector<256x32xf32>
    %670 = arith.select %667, %665, %669 : vector<256x32xi1>, vector<256x32xf32>
    %c384_281 = arith.constant 384 : index
    %c0_282 = arith.constant 0 : index
    %671 = vector.load %arg7[%c384_281, %c0_282] : memref<576x32xf32, #tpu.memory_space<vmem>>, vector<32x32xf32>
    %c416 = arith.constant 416 : index
    %c0_283 = arith.constant 0 : index
    %672 = vector.load %arg7[%c416, %c0_283] : memref<576x32xf32, #tpu.memory_space<vmem>>, vector<32x32xf32>
    %c448 = arith.constant 448 : index
    %c0_284 = arith.constant 0 : index
    %673 = vector.load %arg7[%c448, %c0_284] : memref<576x32xf32, #tpu.memory_space<vmem>>, vector<32x32xf32>
    %c20 = arith.constant 20 : index
    %c0_285 = arith.constant 0 : index
    %674 = vector.load %arg8[%c20, %c0_285] : memref<24x128xf32, #tpu.memory_space<vmem>>, vector<1x32xf32>
    %675 = tpu.iota {dimensions = array<i32: 0>} : vector<256x1xi32>
    %c127_i32_286 = arith.constant 127 : i32
    %676 = vector.broadcast %c127_i32_286 : i32 to vector<256x1xi32>
    %677 = arith.andi %675, %676 : vector<256x1xi32>
    %c0_i32_287 = arith.constant 0 : i32
    %678 = vector.broadcast %c0_i32_287 : i32 to vector<256x1xi32>
    %679 = arith.cmpi ne, %677, %678 : vector<256x1xi32>
    %c1_i32_288 = arith.constant 1 : i32
    %680 = vector.broadcast %c1_i32_288 : i32 to vector<256x1xi32>
    %681 = arith.addi %675, %680 : vector<256x1xi32>
    %c127_i32_289 = arith.constant 127 : i32
    %682 = vector.broadcast %c127_i32_289 : i32 to vector<256x1xi32>
    %683 = arith.andi %681, %682 : vector<256x1xi32>
    %c0_i32_290 = arith.constant 0 : i32
    %684 = vector.broadcast %c0_i32_290 : i32 to vector<256x1xi32>
    %685 = arith.cmpi ne, %683, %684 : vector<256x1xi32>
    %c1_i32_291 = arith.constant 1 : i32
    %686 = tpu.dynamic_rotate %670 by %c1_i32_291 dim 0 : vector<256x32xf32>, i32 -> vector<256x32xf32>
    %cst_292 = arith.constant 0.000000e+00 : f32
    %687 = vector.shape_cast %679 : vector<256x1xi1> to vector<256x1xi1>
    %688 = vector.broadcast %687 : vector<256x1xi1> to vector<256x32xi1>
    %689 = vector.broadcast %cst_292 : f32 to vector<256x32xf32>
    %690 = arith.select %688, %686, %689 : vector<256x32xi1>, vector<256x32xf32>
    %c255_i32_293 = arith.constant 255 : i32
    %691 = tpu.dynamic_rotate %670 by %c255_i32_293 dim 0 : vector<256x32xf32>, i32 -> vector<256x32xf32>
    %cst_294 = arith.constant 0.000000e+00 : f32
    %692 = vector.shape_cast %685 : vector<256x1xi1> to vector<256x1xi1>
    %693 = vector.broadcast %692 : vector<256x1xi1> to vector<256x32xi1>
    %694 = vector.broadcast %cst_294 : f32 to vector<256x32xf32>
    %695 = arith.select %693, %691, %694 : vector<256x32xi1>, vector<256x32xf32>
    %cst_295 = arith.constant dense<0.000000e+00> : vector<256x32xf32>
    %696 = tpu.matmul %690, %671, %cst_295 {dimension_numbers = #tpu.dot_dimension_numbers<[1], [0], [0], [1], [0, 0, 1, 1], [], []>} : vector<256x32xf32>, vector<32x32xf32>, vector<256x32xf32> -> vector<256x32xf32>
    %cst_296 = arith.constant dense<0.000000e+00> : vector<256x32xf32>
    %697 = tpu.matmul %670, %672, %cst_296 {dimension_numbers = #tpu.dot_dimension_numbers<[1], [0], [0], [1], [0, 0, 1, 1], [], []>} : vector<256x32xf32>, vector<32x32xf32>, vector<256x32xf32> -> vector<256x32xf32>
    %698 = arith.addf %696, %697 : vector<256x32xf32>
    %cst_297 = arith.constant dense<0.000000e+00> : vector<256x32xf32>
    %699 = tpu.matmul %695, %673, %cst_297 {dimension_numbers = #tpu.dot_dimension_numbers<[1], [0], [0], [1], [0, 0, 1, 1], [], []>} : vector<256x32xf32>, vector<32x32xf32>, vector<256x32xf32> -> vector<256x32xf32>
    %700 = arith.addf %698, %699 : vector<256x32xf32>
    %701 = vector.broadcast %674 : vector<1x32xf32> to vector<256x32xf32>
    %702 = arith.addf %700, %701 : vector<256x32xf32>
    %cst_298 = arith.constant 0.000000e+00 : f32
    %703 = vector.broadcast %cst_298 : f32 to vector<256x32xf32>
    %704 = arith.cmpf ogt, %702, %703 : vector<256x32xf32>
    %cst_299 = arith.constant 1.000000e-01 : f32
    %705 = vector.broadcast %cst_299 : f32 to vector<256x32xf32>
    %706 = arith.mulf %705, %702 : vector<256x32xf32>
    %707 = arith.select %704, %702, %706 : vector<256x32xi1>, vector<256x32xf32>
    %708 = arith.addf %670, %707 : vector<256x32xf32>
    %c480 = arith.constant 480 : index
    %c0_300 = arith.constant 0 : index
    %709 = vector.load %arg7[%c480, %c0_300] : memref<576x32xf32, #tpu.memory_space<vmem>>, vector<32x32xf32>
    %c512 = arith.constant 512 : index
    %c0_301 = arith.constant 0 : index
    %710 = vector.load %arg7[%c512, %c0_301] : memref<576x32xf32, #tpu.memory_space<vmem>>, vector<32x32xf32>
    %c544 = arith.constant 544 : index
    %c0_302 = arith.constant 0 : index
    %711 = vector.load %arg7[%c544, %c0_302] : memref<576x32xf32, #tpu.memory_space<vmem>>, vector<32x32xf32>
    %c21 = arith.constant 21 : index
    %c0_303 = arith.constant 0 : index
    %712 = vector.load %arg8[%c21, %c0_303] : memref<24x128xf32, #tpu.memory_space<vmem>>, vector<1x32xf32>
    %713 = tpu.iota {dimensions = array<i32: 0>} : vector<256x1xi32>
    %c127_i32_304 = arith.constant 127 : i32
    %714 = vector.broadcast %c127_i32_304 : i32 to vector<256x1xi32>
    %715 = arith.andi %713, %714 : vector<256x1xi32>
    %c0_i32_305 = arith.constant 0 : i32
    %716 = vector.broadcast %c0_i32_305 : i32 to vector<256x1xi32>
    %717 = arith.cmpi ne, %715, %716 : vector<256x1xi32>
    %c1_i32_306 = arith.constant 1 : i32
    %718 = vector.broadcast %c1_i32_306 : i32 to vector<256x1xi32>
    %719 = arith.addi %713, %718 : vector<256x1xi32>
    %c127_i32_307 = arith.constant 127 : i32
    %720 = vector.broadcast %c127_i32_307 : i32 to vector<256x1xi32>
    %721 = arith.andi %719, %720 : vector<256x1xi32>
    %c0_i32_308 = arith.constant 0 : i32
    %722 = vector.broadcast %c0_i32_308 : i32 to vector<256x1xi32>
    %723 = arith.cmpi ne, %721, %722 : vector<256x1xi32>
    %c1_i32_309 = arith.constant 1 : i32
    %724 = tpu.dynamic_rotate %708 by %c1_i32_309 dim 0 : vector<256x32xf32>, i32 -> vector<256x32xf32>
    %cst_310 = arith.constant 0.000000e+00 : f32
    %725 = vector.shape_cast %717 : vector<256x1xi1> to vector<256x1xi1>
    %726 = vector.broadcast %725 : vector<256x1xi1> to vector<256x32xi1>
    %727 = vector.broadcast %cst_310 : f32 to vector<256x32xf32>
    %728 = arith.select %726, %724, %727 : vector<256x32xi1>, vector<256x32xf32>
    %c255_i32_311 = arith.constant 255 : i32
    %729 = tpu.dynamic_rotate %708 by %c255_i32_311 dim 0 : vector<256x32xf32>, i32 -> vector<256x32xf32>
    %cst_312 = arith.constant 0.000000e+00 : f32
    %730 = vector.shape_cast %723 : vector<256x1xi1> to vector<256x1xi1>
    %731 = vector.broadcast %730 : vector<256x1xi1> to vector<256x32xi1>
    %732 = vector.broadcast %cst_312 : f32 to vector<256x32xf32>
    %733 = arith.select %731, %729, %732 : vector<256x32xi1>, vector<256x32xf32>
    %cst_313 = arith.constant dense<0.000000e+00> : vector<256x32xf32>
    %734 = tpu.matmul %728, %709, %cst_313 {dimension_numbers = #tpu.dot_dimension_numbers<[1], [0], [0], [1], [0, 0, 1, 1], [], []>} : vector<256x32xf32>, vector<32x32xf32>, vector<256x32xf32> -> vector<256x32xf32>
    %cst_314 = arith.constant dense<0.000000e+00> : vector<256x32xf32>
    %735 = tpu.matmul %708, %710, %cst_314 {dimension_numbers = #tpu.dot_dimension_numbers<[1], [0], [0], [1], [0, 0, 1, 1], [], []>} : vector<256x32xf32>, vector<32x32xf32>, vector<256x32xf32> -> vector<256x32xf32>
    %736 = arith.addf %734, %735 : vector<256x32xf32>
    %cst_315 = arith.constant dense<0.000000e+00> : vector<256x32xf32>
    %737 = tpu.matmul %733, %711, %cst_315 {dimension_numbers = #tpu.dot_dimension_numbers<[1], [0], [0], [1], [0, 0, 1, 1], [], []>} : vector<256x32xf32>, vector<32x32xf32>, vector<256x32xf32> -> vector<256x32xf32>
    %738 = arith.addf %736, %737 : vector<256x32xf32>
    %739 = vector.broadcast %712 : vector<1x32xf32> to vector<256x32xf32>
    %740 = arith.addf %738, %739 : vector<256x32xf32>
    %741 = math.tanh %740 : vector<256x32xf32>
    %742 = tpu.transpose %741, [1, 0] : vector<256x32xf32> -> vector<32x256xf32>
    %743 = vector.extract_strided_slice %742 {offsets = [0, 0], sizes = [1, 128], strides = [1, 1]} : vector<32x256xf32> to vector<1x128xf32>
    %c0_316 = arith.constant 0 : index
    %c0_317 = arith.constant 0 : index
    %c0_318 = arith.constant 0 : index
    %744 = vector.load %arg9[%c0_316, %c0_317, %c0_318] : memref<2x1x128xf32, #tpu.memory_space<vmem>>, vector<1x1x128xf32>
    %745 = vector.shape_cast %744 : vector<1x1x128xf32> to vector<1x128xf32>
    %746 = vector.shape_cast %743 : vector<1x128xf32> to vector<1x1x128xf32>
    tpu.vector_store %arg9[%c0_316, %c0_317, %c0_318], %746 {strides = array<i32>} : memref<2x1x128xf32, #tpu.memory_space<vmem>>, vector<1x1x128xf32>,
    %747 = vector.extract_strided_slice %742 {offsets = [0, 128], sizes = [1, 128], strides = [1, 1]} : vector<32x256xf32> to vector<1x128xf32>
    %c1_319 = arith.constant 1 : index
    %c0_320 = arith.constant 0 : index
    %c0_321 = arith.constant 0 : index
    %748 = vector.load %arg9[%c1_319, %c0_320, %c0_321] : memref<2x1x128xf32, #tpu.memory_space<vmem>>, vector<1x1x128xf32>
    %749 = vector.shape_cast %748 : vector<1x1x128xf32> to vector<1x128xf32>
    %750 = vector.shape_cast %747 : vector<1x128xf32> to vector<1x1x128xf32>
    tpu.vector_store %arg9[%c1_319, %c0_320, %c0_321], %750 {strides = array<i32>} : memref<2x1x128xf32, #tpu.memory_space<vmem>>, vector<1x1x128xf32>,
    return
  }
  func.func @transform_0(%arg0: i32) -> (i32, i32) {
    %c0_i32 = arith.constant 0 : i32
    %c0_i32_0 = arith.constant 0 : i32
    %c0_i32_1 = arith.constant 0 : i32
    return %c0_i32, %c0_i32_0 : i32, i32
  }
  func.func @transform_1(%arg0: i32) -> (i32, i32) {
    %c0_i32 = arith.constant 0 : i32
    %c0_i32_0 = arith.constant 0 : i32
    %c0_i32_1 = arith.constant 0 : i32
    return %c0_i32, %c0_i32_0 : i32, i32
  }
  func.func @transform_2(%arg0: i32) -> (i32, i32, i32) {
    %c0_i32 = arith.constant 0 : i32
    %c0_i32_0 = arith.constant 0 : i32
    %c0_i32_1 = arith.constant 0 : i32
    %c0_i32_2 = arith.constant 0 : i32
    return %c0_i32, %c0_i32_0, %c0_i32_1 : i32, i32, i32
  }
  func.func @transform_3(%arg0: i32) -> (i32, i32, i32) {
    %c0_i32 = arith.constant 0 : i32
    %c0_i32_0 = arith.constant 0 : i32
    %c0_i32_1 = arith.constant 0 : i32
    %c0_i32_2 = arith.constant 0 : i32
    return %c0_i32, %c0_i32_0, %c0_i32_1 : i32, i32, i32
  }
  func.func @transform_4(%arg0: i32) -> (i32, i32) {
    %c0_i32 = arith.constant 0 : i32
    %c0_i32_0 = arith.constant 0 : i32
    %c0_i32_1 = arith.constant 0 : i32
    return %c0_i32, %c0_i32_0 : i32, i32
  }
  func.func @transform_5(%arg0: i32) -> (i32, i32) {
    %c0_i32 = arith.constant 0 : i32
    %c0_i32_0 = arith.constant 0 : i32
    %c0_i32_1 = arith.constant 0 : i32
    return %c0_i32, %c0_i32_0 : i32, i32
  }
  func.func @transform_6(%arg0: i32) -> (i32, i32) {
    %c0_i32 = arith.constant 0 : i32
    %c0_i32_0 = arith.constant 0 : i32
    %c0_i32_1 = arith.constant 0 : i32
    return %c0_i32, %c0_i32_0 : i32, i32
  }
  func.func @transform_7(%arg0: i32) -> (i32, i32) {
    %c0_i32 = arith.constant 0 : i32
    %c0_i32_0 = arith.constant 0 : i32
    %c0_i32_1 = arith.constant 0 : i32
    return %c0_i32, %c0_i32_0 : i32, i32
  }
  func.func @transform_8(%arg0: i32) -> (i32, i32, i32) {
    %c0_i32 = arith.constant 0 : i32
    %c0_i32_0 = arith.constant 0 : i32
    %c0_i32_1 = arith.constant 0 : i32
    %c0_i32_2 = arith.constant 0 : i32
    return %c0_i32, %c0_i32_0, %c0_i32_1 : i32, i32, i32
  }
}

</mosaic_0001>

<bundles_post_ra>
// kernel: onnx_model_infer.1
= control target key start
LH: loop header
LB: loop body
LE: loop exit
PB: predicated region body
PF: predicated region fallthrough
CT: control target
= control target key end

     0   :  { %vm19701_vm0 = vcmask 261120   ;;  %s19682_s0 = inlined_call_operand.vmem [shape: f32[16,32], index: 0, kind: input, shape index: {}]   ;;  %s19683_s1 = inlined_call_operand.vmem [shape: f32[16,1], index: 1, kind: input, shape index: {}]   ;;  %s19684_s2 = inlined_call_operand.vmem [shape: f32[2,8,8], index: 2, kind: input, shape index: {}]   ;;  %s19685_s3 = inlined_call_operand.vmem [shape: f32[2,32,32], index: 3, kind: input, shape index: {}]   ;;  %s19686_s4 = inlined_call_operand.vmem [shape: f32[416,96], index: 4, kind: input, shape index: {}]   ;;  %s19687_s5 = inlined_call_operand.vmem [shape: f32[192,16], index: 5, kind: input, shape index: {}]   ;;  %s19688_s6 = inlined_call_operand.vmem [shape: f32[576,32], index: 6, kind: input, shape index: {}]   ;;  %s19689_s7 = inlined_call_operand.vmem [shape: f32[24,128], index: 7, kind: input, shape index: {}]   ;;  %s19690_s8 = inlined_call_operand.hbm [shape: f32[2,1,128], index: 8, kind: output, shape index: {}]  }
   0x1   :  { %v37_v0 = vld [vmem:[%s19686_s4 + $0x18] sm:$0xff]  ;;  %v36_v1 = vld [vmem:[%s19686_s4 + $0x10] sm:$0xff]  ;;  %v15478_v2 = vld [vmem:[%s19682_s0] sm:$0xff] }
   0x2   :  { %13894 = vmatprep.subr.mxu0 %v37_v0  ;;  %v35_v3 = vld [vmem:[%s19686_s4 + $0x8] sm:$0xff]  ;;  %13902 = vmatprep.mubr.msk.f32.mxu0 %vm19701_vm0, %v15478_v2 }
   0x3   :  { %13895 = vmatpush3.msra.mxu0 %v37_v0 }
   0x4   :  { %13 = vsyncpa [#allocation3], 0  ;;  %13896 = vmatprep.subr.mxu0 %v36_v1  ;;  %v34_v4 = vld [vmem:[%s19686_s4] sm:$0xff]  ;;  %v15491_v5 = vld [vmem:[%s19682_s0 + $0x8] sm:$0xff]  ;;  %v19691_v6 = vmov 0.0   ;;  %vm15413_vm1 = vmmov 0  }
   0x5   :  { %13897 = vmatpush3.msra.mxu0 %v36_v1  ;;  %13905 = vmatprep.subr.mxu1 %v19691_v6  ;;  %v12346_v8 = vld [vmem:[%s19689_s7] ss:$0 sm:$0xff]  ;;  %s15414_s18 = smov 112   ;;  %s15415_s19 = smov 96   ;;  %vm129_vm2 = vcmask 130048   ;;  %vm207_vm4 = vcmask 64512  }
   0x6   :  { %13898 = vmatprep.subr.mxu0 %v35_v3  ;;  %13907 = vmatprep.mubr.msk.f32.mxu1 %vm15413_vm1, %v19691_v6  ;;  %s15416_s20 = smov 80   ;;  %v125_v18 = vld [vmem:[%s19684_s2] sm:$0xff]  ;;  %v12355_v26 = vld [vmem:[%s19684_s2 + $0x8] sm:$0xff]  ;;  %s15417_s2 = smov 64   ;;  %vm1046_vm6 = vcmask 523264  }
   0x7   :  { %13899 = vmatpush3.msra.mxu0 %v35_v3  ;;  %vm205_vm3 = vcmp.gt.f32.partialorder %v125_v18, 0.0  ;;  %vm547_vm5 = vcmp.gt.f32.partialorder %v12355_v26, 0.0  ;;  %s15418_s25 = smov 48   ;;  %v808_v18 = vld [vmem:[%s19686_s4 + $0x20] sm:$0xff]  ;;  %s15419_s12 = smov 16  }
   0x8   :  { %13900 = vmatprep.subr.mxu0 %v34_v4 }
   0x9   :  { %13901 = vmatpush3.msra.mxu0 %v34_v4 }
   0xa   :  { %13903 = vmatmul.mubr.msk.f32.vlgmr.msra.gmra.mxu0 %vm19701_vm0, %v15491_v5  ;;  %13915 = vmatprep.subr.mxu0 %v19691_v6 }
   0xb   :  { %13917 = vmatprep.mubr.msk.f32.mxu0 %vm15413_vm1, %v19691_v6 }
  0xca   :  { %v13904_v7 = vpop.f32.mrf.mxu0 }
  0xcb   :  { %v15510_v11 = vadd.f32 %v13904_v7, %v12346_v8 }
  0xcc   :  { %v116_v9 = vpop.f32.mrf.mxu0 }
  0xcd   :  { %v15504_v10 = vadd.f32 %v12346_v8, %v116_v9 }
  0xcf   :  { %295 = vrot.lane.b32.xlu1 %v15504_v10, %s15414_s18  ;;  %127 = vrot.lane.b32.xlu0 %v15504_v10, %s15415_s19 }
  0xd3   :  { %470 = vrot.lane.b32.xlu1 %v15510_v11, %s15415_s19  ;;  %297 = vrot.lane.b32.xlu0 %v15504_v10, %s15416_s20 }
  0xd7   :  { %636 = vrot.lane.b32.xlu1 %v15510_v11, %s15414_s18  ;;  %638 = vrot.lane.b32.xlu0 %v15510_v11, %s15416_s20 }
 0x141   :  { %v128_v12 = vpop.permute.xlu0 %127  ;;  %v296_v13 = vpop.permute.xlu1 %295 }
 0x142   :  { %13906 = vmatpush3.xpose.msk.msra.mxu1 %vm129_vm2, %v128_v12 }
 0x143   :  { %13910 = vmatprep.subr.mxu1 %v19691_v6 }
 0x145   :  { %13908 = vmatmul.mubr.msk.f32.vlgmr.msra.gmra.mxu1 %vm129_vm2, %v15504_v10  ;;  %v298_v14 = vpop.permute.xlu0 %297  ;;  %v471_v15 = vpop.permute.xlu1 %470 }
 0x146   :  { %13916 = vmatpush3.xpose.msk.msra.mxu0 %vm129_vm2, %v298_v14  ;;  %13912 = vmatprep.mubr.msk.f32.mxu1 %vm15413_vm1, %v19691_v6 }
 0x147   :  { %13925 = vmatprep.subr.mxu0 %v19691_v6 }
 0x149   :  { %13918 = vmatmul.mubr.msk.f32.vlgmr.msra.gmra.mxu0 %vm129_vm2, %v296_v13  ;;  %v639_v16 = vpop.permute.xlu0 %638  ;;  %v637_v17 = vpop.permute.xlu1 %636 }
 0x14a   :  { %13926 = vmatpush3.xpose.msk.msra.mxu0 %vm129_vm2, %v471_v15  ;;  %13927 = vmatprep.mubr.msk.f32.mxu0 %vm15413_vm1, %v19691_v6  ;;  %v811_v15 = vld [vmem:[%s19686_s4 + $0x38] sm:$0xff] }
 0x14b   :  { %13935 = vmatprep.subr.mxu0 %v19691_v6 }
 0x14d   :  { %13928 = vmatmul.mubr.msk.f32.vlgmr.msra.gmra.mxu0 %vm129_vm2, %v15510_v11 }
 0x14e   :  { %13936 = vmatpush3.xpose.msk.msra.mxu0 %vm129_vm2, %v639_v16  ;;  %13937 = vmatprep.mubr.msk.f32.mxu0 %vm15413_vm1, %v19691_v6  ;;  %v810_v16 = vld [vmem:[%s19686_s4 + $0x30] sm:$0xff] }
 0x14f   :  { %13945 = vmatprep.subr.mxu0 %v811_v15 }
 0x151   :  { %13938 = vmatmul.mubr.msk.f32.vlgmr.msra.gmra.mxu0 %vm129_vm2, %v637_v17  ;;  %v809_v17 = vld [vmem:[%s19686_s4 + $0x28] sm:$0xff] }
 0x152   :  { %13946 = vmatpush3.msra.mxu0 %v811_v15  ;;  %v12367_v15 = vld [vmem:[%s19689_s7 + $0x6] ss:$0 sm:$0xff] }
 0x153   :  { %13947 = vmatprep.subr.mxu0 %v810_v16 }
 0x154   :  { %13948 = vmatpush3.msra.mxu0 %v810_v16 }
 0x155   :  { %13949 = vmatprep.subr.mxu0 %v809_v17 }
 0x156   :  { %13950 = vmatpush3.msra.mxu0 %v809_v17 }
 0x157   :  { %13951 = vmatprep.subr.mxu0 %v808_v18 }
 0x158   :  { %13952 = vmatpush3.msra.mxu0 %v808_v18 }
 0x205   :  { %v200_v19 = vpop.f32.mrf.mxu1 }
 0x206   :  { %v204_v20 = vmul.f32 0.25, %v200_v19 }
 0x207   :  { %v13909_v21 = vpop.f32.mrf.mxu1 }
 0x208   :  { %v206_v22 = vsel %vm205_vm3, %v204_v20, -1e+09 }
 0x209   :  { %v369_v23 = vpop.f32.mrf.mxu0  ;;  %v208_v24 = vsel %vm207_vm4, %v206_v22, -inf }
 0x20a   :  { %v373_v25 = vmul.f32 0.25, %v369_v23  ;;  %209 = vmax.xlane.f32.xlu0 %v208_v24 }
 0x20b   :  { %v13919_v27 = vpop.f32.mrf.mxu0 }
 0x20c   :  { %v374_v28 = vsel %vm205_vm3, %v373_v25, -1e+09 }
 0x20d   :  { %v542_v29 = vpop.f32.mrf.mxu0  ;;  %v375_v30 = vsel %vm207_vm4, %v374_v28, -inf }
 0x20e   :  { %v546_v31 = vmul.f32 0.25, %v542_v29  ;;  %376 = vmax.xlane.f32.xlu1 %v375_v30 }
 0x20f   :  { %v13929_v32 = vpop.f32.mrf.mxu0 }
 0x210   :  { %v548_v33 = vsel %vm547_vm5, %v546_v31, -1e+09  ;;  %v12362_v31 = vld [vmem:[%s19689_s7 + $0x1] ss:$0 sm:$0xff] }
 0x211   :  { %v710_v34 = vpop.f32.mrf.mxu0  ;;  %v549_v35 = vsel %vm207_vm4, %v548_v33, -inf }
 0x212   :  { %v714_v36 = vmul.f32 0.25, %v710_v34  ;;  %550 = vmax.xlane.f32.xlu0 %v549_v35 }
 0x213   :  { %v13939_v37 = vpop.f32.mrf.mxu0 }
 0x214   :  { %v715_v38 = vsel %vm547_vm5, %v714_v36, -1e+09 }
 0x215   :  { %v716_v39 = vsel %vm207_vm4, %v715_v38, -inf }
 0x216   :  { %717 = vmax.xlane.f32.xlu0 %v716_v39 }
 0x21f   :  { %219 = vrot.lane.b32.xlu1 %v15504_v10, %s15417_s2 }
 0x293   :  { %v210_v40 = vpop.xlane.xlu0 %209 }
 0x294   :  { %v211_v41 = vsub.f32 %v206_v22, %v210_v40 }
 0x296   :  { %v212_v42 = vmul.f32 1.442695, %v211_v41 }
 0x297   :  { %v377_v43 = vpop.xlane.xlu1 %376 }
 0x298   :  { %15282 = vpow2.f32 %v212_v42  ;;  %v378_v44 = vsub.f32 %v374_v28, %v377_v43 }
 0x29a   :  { %v379_v45 = vmul.f32 1.442695, %v378_v44 }
 0x29b   :  { %v220_v46 = vpop.permute.xlu1 %219  ;;  %v551_v47 = vpop.xlane.xlu0 %550 }
 0x29c   :  { %15284 = vpow2.f32 %v379_v45  ;;  %v552_v48 = vsub.f32 %v548_v33, %v551_v47  ;;  %13911 = vmatpush3.msra.mxu1 %v220_v46 }
 0x29d   :  { %13920 = vmatprep.subr.mxu1 %v19691_v6 }
 0x29e   :  { %v553_v49 = vmul.f32 1.442695, %v552_v48 }
 0x29f   :  { %v718_v50 = vpop.xlane.xlu0 %717 }
 0x2a0   :  { %15286 = vpow2.f32 %v553_v49  ;;  %v719_v51 = vsub.f32 %v715_v38, %v718_v50  ;;  %v943_v49 = vld [vmem:[%s19686_s4 + $0x50] sm:$0xff]  ;;  %v942_v50 = vld [vmem:[%s19686_s4 + $0x48] sm:$0xff] }
 0x2a2   :  { %v720_v52 = vmul.f32 1.442695, %v719_v51  ;;  %v941_v51 = vld [vmem:[%s19686_s4 + $0x40] sm:$0xff] }
 0x2a4   :  { %15288 = vpow2.f32 %v720_v52  ;;  %v1040_v52 = vld [vmem:[%s19686_s4 + $0x98] sm:$0xff] }
 0x2a5   :  { %v15283_v53 = vpop.eup %15282 }
 0x2a6   :  { %v214_v54 = vsel %vm207_vm4, %v15283_v53, 0.0 }
 0x2a7   :  { %215 = vadd.xlane.f32.xlu1 %v214_v54 }
 0x2a9   :  { %v15285_v55 = vpop.eup %15284 }
 0x2aa   :  { %v381_v56 = vsel %vm207_vm4, %v15285_v55, 0.0 }
 0x2ab   :  { %382 = vadd.xlane.f32.xlu0 %v381_v56 }
 0x2ad   :  { %v15287_v57 = vpop.eup %15286 }
 0x2ae   :  { %v555_v58 = vsel %vm207_vm4, %v15287_v57, 0.0 }
 0x2af   :  { %556 = vadd.xlane.f32.xlu1 %v555_v58 }
 0x2b1   :  { %v15289_v59 = vpop.eup %15288 }
 0x2b2   :  { %v722_v60 = vsel %vm207_vm4, %v15289_v59, 0.0 }
 0x2b3   :  { %723 = vadd.xlane.f32.xlu0 %v722_v60  ;;  %v12365_v60 = vld [vmem:[%s19689_s7 + $0x2] ss:$0 sm:$0xff] }
 0x2c0   :  { %560 = vrot.lane.b32.xlu1 %v15510_v11, %s15417_s2 }
 0x2c4   :  { %727 = vrot.lane.b32.xlu1 %v15510_v11, %s15418_s25 }
 0x2c9   :  { %386 = vrot.lane.b32.xlu0 %v15504_v10, %s15418_s25 }
 0x330   :  { %v216_v61 = vpop.xlane.xlu1 %215 }
 0x331   :  { %15290 = vrcp.f32 %v216_v61 }
 0x334   :  { %v383_v62 = vpop.xlane.xlu0 %382 }
 0x335   :  { %15292 = vrcp.f32 %v383_v62  ;;  %v12366_v62 = vld [vmem:[%s19689_s7 + $0x3] ss:$0 sm:$0xff] }
 0x338   :  { %v557_v63 = vpop.xlane.xlu1 %556 }
 0x339   :  { %15294 = vrcp.f32 %v557_v63 }
 0x33c   :  { %v724_v0 = vpop.xlane.xlu0 %723  ;;  %v561_v8 = vpop.permute.xlu1 %560 }
 0x33d   :  { %15296 = vrcp.f32 %v724_v0 }
 0x33e   :  { %v15291_v1 = vpop.eup %15290 }
 0x33f   :  { %v218_v3 = vmul.f32 %v15291_v1, %v15283_v53 }
 0x340   :  { %v387_v4 = vpop.permute.xlu0 %386  ;;  %v728_v12 = vpop.permute.xlu1 %727 }
 0x341   :  { %13913 = vmatmul.mubr.msk.f32.vlgmr.msra.gmra.mxu1 %vm207_vm4, %v218_v3 }
 0x342   :  { %v15293_v7 = vpop.eup %15292  ;;  %13921 = vmatpush3.msra.mxu1 %v387_v4  ;;  %13922 = vmatprep.mubr.msk.f32.mxu1 %vm15413_vm1, %v19691_v6 }
 0x343   :  { %13930 = vmatprep.subr.mxu1 %v19691_v6  ;;  %v385_v9 = vmul.f32 %v15293_v7, %v15285_v55 }
 0x345   :  { %13923 = vmatmul.mubr.msk.f32.vlgmr.msra.gmra.mxu1 %vm207_vm4, %v385_v9  ;;  %v1038_v9 = vld [vmem:[%s19686_s4 + $0x88] sm:$0xff] }
 0x346   :  { %v15295_v10 = vpop.eup %15294  ;;  %13931 = vmatpush3.msra.mxu1 %v561_v8  ;;  %13932 = vmatprep.mubr.msk.f32.mxu1 %vm15413_vm1, %v19691_v6  ;;  %v1039_v8 = vld [vmem:[%s19686_s4 + $0x90] sm:$0xff] }
 0x347   :  { %13940 = vmatprep.subr.mxu1 %v19691_v6  ;;  %v559_v11 = vmul.f32 %v15295_v10, %v15287_v57  ;;  %v1037_v10 = vld [vmem:[%s19686_s4 + $0x80] sm:$0xff] }
 0x349   :  { %13933 = vmatmul.mubr.msk.f32.vlgmr.msra.gmra.mxu1 %vm207_vm4, %v559_v11  ;;  %v1036_v11 = vld [vmem:[%s19686_s4 + $0x78] sm:$0xff] }
 0x34a   :  { %v15297_v13 = vpop.eup %15296  ;;  %13941 = vmatpush3.msra.mxu1 %v728_v12  ;;  %13942 = vmatprep.mubr.msk.f32.mxu1 %vm15413_vm1, %v19691_v6  ;;  %v1035_v12 = vld [vmem:[%s19686_s4 + $0x70] sm:$0xff] }
 0x34b   :  { %v726_v14 = vmul.f32 %v15297_v13, %v15289_v59  ;;  %v1034_v13 = vld [vmem:[%s19686_s4 + $0x68] sm:$0xff] }
 0x34d   :  { %13943 = vmatmul.mubr.msk.f32.vlgmr.msra.gmra.mxu1 %vm207_vm4, %v726_v14  ;;  %v1033_v14 = vld [vmem:[%s19686_s4 + $0x60] sm:$0xff] }
 0x401   :  { %v291_v19 = vpop.f32.mrf.mxu1 }
 0x403   :  { %v13914_v20 = vpop.f32.mrf.mxu1 }
 0x405   :  { %v458_v21 = vpop.f32.mrf.mxu1 }
 0x406   :  { %463 = vrot.lane.b32.xlu0 %v458_v21, %s15419_s12 }
 0x407   :  { %v13924_v22 = vpop.f32.mrf.mxu1 }
 0x408   :  { %v12370_v22 = vld [vmem:[%s19689_s7 + $0x7] ss:$0 sm:$0xff] }
 0x409   :  { %v632_v23 = vpop.f32.mrf.mxu1 }
 0x40b   :  { %v13934_v24 = vpop.f32.mrf.mxu1 }
 0x40d   :  { %v799_v25 = vpop.f32.mrf.mxu1 }
 0x40e   :  { %804 = vrot.lane.b32.xlu1 %v799_v25, %s15419_s12 }
 0x40f   :  { %v13944_v26 = vpop.f32.mrf.mxu1 }
 0x478   :  { %v464_v27 = vpop.permute.xlu0 %463 }
 0x479   :  { %v466_v28 = vsel %vm129_vm2, %v291_v19, %v464_v27 }
 0x47a   :  { %13953 = vmatprep.mubr.msk.f32.mxu0 %vm19701_vm0, %v466_v28 }
 0x480   :  { %v805_v29 = vpop.permute.xlu1 %804 }
 0x481   :  { %v807_v30 = vsel %vm129_vm2, %v632_v23, %v805_v29 }
 0x482   :  { %13954 = vmatmul.mubr.msk.f32.vlgmr.msra.gmra.mxu0 %vm19701_vm0, %v807_v30 }
 0x542   :  { %v13955_v32 = vpop.f32.mrf.mxu0 }
 0x543   :  { %v895_v33 = vadd.f32 %v13955_v32, %v12362_v31 }
 0x544   :  { %v889_v34 = vpop.f32.mrf.mxu0 }
 0x545   :  { %v890_v35 = vadd.f32 %v12362_v31, %v889_v34  ;;  %v899_v36 = vadd.f32 %v895_v33, %v15491_v5  ;;  %v15420_v31 = vmov 0  }
 0x546   :  { %15261 = vset.pattern.permute.xlu0 %v15420_v31  ;;  %15260 = vset.pattern.permute.xlu1 %v15420_v31  ;;  %v1285_v31 = vld [vmem:[%s19686_s4 + $0x118] sm:$0xff] }
 0x547   :  { %v905_v37 = vsel %vm19701_vm0, %v899_v36, 0.0  ;;  %v898_v38 = vadd.f32 %v890_v35, %v15478_v2  ;;  %v944_v2 = vld [vmem:[%s19686_s4 + $0x58] sm:$0xff] }
 0x548   :  { %906 = vadd.xlane.f32.xlu1 %v905_v37  ;;  %13956 = vmatprep.subr.mxu0 %v944_v2 }
 0x549   :  { %v902_v39 = vsel %vm19701_vm0, %v898_v38, 0.0  ;;  %13957 = vmatpush3.msra.mxu0 %v944_v2  ;;  %v1276_v2 = vld [vmem:[%s19686_s4 + $0xd0] sm:$0xff] }
 0x54a   :  { %903 = vadd.xlane.f32.xlu0 %v902_v39  ;;  %13958 = vmatprep.subr.mxu0 %v943_v49 }
 0x54b   :  { %13959 = vmatpush3.msra.mxu0 %v943_v49  ;;  %v1275_v49 = vld [vmem:[%s19686_s4 + $0xc8] sm:$0xff] }
 0x54c   :  { %13960 = vmatprep.subr.mxu0 %v942_v50 }
 0x54d   :  { %13961 = vmatpush3.msra.mxu0 %v942_v50  ;;  %v1274_v50 = vld [vmem:[%s19686_s4 + $0xc0] sm:$0xff] }
 0x54e   :  { %13962 = vmatprep.subr.mxu0 %v941_v51 }
 0x54f   :  { %13963 = vmatpush3.msra.mxu0 %v941_v51 }
 0x550   :  { %13967 = vmatprep.subr.mxu0 %v1040_v52 }
 0x5d1   :  { %v907_v40 = vpop.xlane.xlu1 %906 }
 0x5d2   :  { %v910_v41 = vmul.f32 0.03125, %v907_v40 }
 0x5d3   :  { %v904_v42 = vpop.xlane.xlu0 %903 }
 0x5d4   :  { %v909_v43 = vmul.f32 0.03125, %v904_v42  ;;  %v912_v44 = vsub.f32 %v899_v36, %v910_v41  ;;  %v15656_v42 = vld [vmem:[%s19683_s1] sm:$0xff] }
 0x5d6   :  { %v911_v45 = vsub.f32 %v898_v38, %v909_v43  ;;  %v914_v48 = vmul.f32 %v912_v44, %v912_v44  ;;  %v1173_v43 = vld [vmem:[%s19686_s4 + $0xb8] sm:$0xff] }
 0x5d7   :  { %13986 = vmatprep.subr.mxu1 %v1173_v43 }
 0x5d8   :  { %v913_v46 = vmul.f32 %v911_v45, %v911_v45  ;;  %v918_v5 = vsel %vm19701_vm0, %v914_v48, 0.0  ;;  %13987 = vmatpush3.msra.mxu1 %v1173_v43  ;;  %v1277_v48 = vld [vmem:[%s19686_s4 + $0xd8] sm:$0xff] }
 0x5d9   :  { %v1584_v43 = vld [vmem:[%s19686_s4 + $0x158] sm:$0xff] }
 0x5da   :  { %v915_v47 = vsel %vm19701_vm0, %v913_v46, 0.0  ;;  %v15670_v46 = vld [vmem:[%s19683_s1 + $0x8] sm:$0xff] }
 0x5db   :  { %916 = vadd.xlane.f32.xlu0 %v915_v47  ;;  %v1170_v47 = vld [vmem:[%s19686_s4 + $0xa0] sm:$0xff] }
 0x5df   :  { %919 = vadd.xlane.f32.xlu0 %v918_v5  ;;  %v1281_v5 = vld [vmem:[%s19686_s4 + $0xf8] sm:$0xff] }
 0x664   :  { %v917_v53 = vpop.xlane.xlu0 %916 }
 0x665   :  { %v921_v54 = vmul.f32 0.03125, %v917_v53 }
 0x667   :  { %v923_v55 = vadd.f32 1e-05, %v921_v54 }
 0x668   :  { %v920_v56 = vpop.xlane.xlu0 %919 }
 0x669   :  { %15298 = vrsqrt.f32 %v923_v55  ;;  %v922_v57 = vmul.f32 0.03125, %v920_v56 }
 0x66b   :  { %v924_v58 = vadd.f32 1e-05, %v922_v57  ;;  %v1287_v57 = vlaneseq }
 0x66d   :  { %15300 = vrsqrt.f32 %v924_v58 }
 0x676   :  { %v15299_v59 = vpop.eup %15298 }
 0x677   :  { %v927_v61 = vmul.f32 %v15299_v59, %v911_v45  ;;  %v1171_v45 = vld [vmem:[%s19686_s4 + $0xa8] sm:$0xff]  ;;  %v12373_v59 = vld [vmem:[%s19689_s7 + $0x4] ss:$0 sm:$0xff] }
 0x679   :  { %v933_v63 = vmul.f32 %v12365_v60, %v927_v61  ;;  %v15696_v61 = vshrl.u32 %v1287_v57, 7 }
 0x67a   :  { %v15301_v0 = vpop.eup %15300 }
 0x67b   :  { %v928_v1 = vmul.f32 %v15301_v0, %v912_v44  ;;  %v939_v3 = vadd.f32 %v12366_v62, %v933_v63  ;;  %v1172_v44 = vld [vmem:[%s19686_s4 + $0xb0] sm:$0xff]  ;;  %19767 = vst [vmem:[#allocation5_spill] sm:$0xff] %v15696_v61  ;;  %v12374_v63 = vld [vmem:[%s19689_s7 + $0x5] ss:$0 sm:$0xff]  ;;  %vm19700_vm8 = vcmp.lt.s32.totalorder %v15696_v61, 1  ;;  %vm19699_vm10 = vcmp.lt.s32.totalorder %v15696_v61, 7 }
 0x67c   :  { %13988 = vmatprep.subr.mxu1 %v1172_v44 }
 0x67d   :  { %v934_v4 = vmul.f32 %v12365_v60, %v928_v1  ;;  %13964 = vmatprep.mubr.msk.f32.mxu0 %vm19701_vm0, %v939_v3  ;;  %13989 = vmatpush3.msra.mxu1 %v1172_v44  ;;  %v1583_v44 = vld [vmem:[%s19686_s4 + $0x150] sm:$0xff] }
 0x67e   :  { %13990 = vmatprep.subr.mxu1 %v1171_v45 }
 0x67f   :  { %v940_v7 = vadd.f32 %v12366_v62, %v934_v4  ;;  %13991 = vmatpush3.msra.mxu1 %v1171_v45  ;;  %v1582_v45 = vld [vmem:[%s19686_s4 + $0x148] sm:$0xff] }
 0x680   :  { %13992 = vmatprep.subr.mxu1 %v1170_v47 }
 0x681   :  { %13965 = vmatmul.mubr.msk.f32.vlgmr.msra.gmra.mxu0 %vm19701_vm0, %v940_v7  ;;  %13993 = vmatpush3.msra.mxu1 %v1170_v47  ;;  %v1580_v47 = vld [vmem:[%s19686_s4 + $0x138] sm:$0xff] }
 0x682   :  { %13968 = vmatpush3.msra.mxu0 %v1040_v52  ;;  %13997 = vmatprep.subr.mxu1 %v1281_v5 }
 0x683   :  { %13969 = vmatprep.subr.mxu0 %v1039_v8 }
 0x684   :  { %13970 = vmatpush3.msra.mxu0 %v1039_v8  ;;  %v15704_v8 = vadd.s32 8, %v15696_v61 }
 0x685   :  { %13971 = vmatprep.subr.mxu0 %v1038_v9 }
 0x686   :  { %13972 = vmatpush3.msra.mxu0 %v1038_v9 }
 0x687   :  { %13973 = vmatprep.subr.mxu0 %v1037_v10 }
 0x688   :  { %13974 = vmatpush3.msra.mxu0 %v1037_v10  ;;  %v1290_v10 = vand.u32 7, %v15696_v61 }
 0x689   :  { %13975 = vmatprep.subr.mxu0 %v1036_v11 }
 0x68a   :  { %13976 = vmatpush3.msra.mxu0 %v1036_v11  ;;  %v1294_v11 = vadd.s32 1, %v15696_v61  ;;  %vm15718_vm7 = vcmp.ne.s32.totalorder %v1290_v10, 0 }
 0x68b   :  { %13977 = vmatprep.subr.mxu0 %v1035_v12 }
 0x68c   :  { %13978 = vmatpush3.msra.mxu0 %v1035_v12 }
 0x68d   :  { %13979 = vmatprep.subr.mxu0 %v1034_v13 }
 0x68e   :  { %13980 = vmatpush3.msra.mxu0 %v1034_v13 }
 0x68f   :  { %13981 = vmatprep.subr.mxu0 %v1033_v14 }
 0x690   :  { %13982 = vmatpush3.msra.mxu0 %v1033_v14  ;;  %v1291_v14 = vand.u32 7, %v15704_v8 }
 0x691   :  { %14008 = vmatprep.subr.mxu0 %v1277_v48 }
 0x692   :  { %vm15727_vm9 = vcmp.ne.s32.totalorder %v1291_v14, 0 }
 0x741   :  { %v13966_v16 = vpop.f32.mrf.mxu0 }
 0x742   :  { %v1028_v17 = vadd.f32 %v13966_v16, %v12367_v15  ;;  %v1280_v16 = vld [vmem:[%s19686_s4 + $0xf0] sm:$0xff] }
 0x743   :  { %v1022_v18 = vpop.f32.mrf.mxu0 }
 0x744   :  { %v1023_v19 = vadd.f32 %v12367_v15, %v1022_v18  ;;  %v1032_v21 = vmax.f32 %v1028_v17, 0.0  ;;  %v1296_v18 = vand.u32 7, %v1294_v11 }
 0x746   :  { %v1031_v20 = vmax.f32 %v1023_v19, 0.0  ;;  %vm15748_vm11 = vcmp.ne.s32.totalorder %v1296_v18, 0 }
 0x748   :  { %13983 = vmatprep.mubr.msk.f32.mxu0 %vm1046_vm6, %v1031_v20 }
 0x749   :  { %13984 = vmatmul.mubr.msk.f32.vlgmr.msra.gmra.mxu0 %vm1046_vm6, %v1032_v21 }
 0x74a   :  { %14009 = vmatpush3.msra.mxu0 %v1277_v48  ;;  %v1581_v48 = vld [vmem:[%s19686_s4 + $0x140] sm:$0xff] }
 0x74b   :  { %14010 = vmatprep.subr.mxu0 %v1276_v2 }
 0x74c   :  { %14011 = vmatpush3.msra.mxu0 %v1276_v2  ;;  %v1588_v2 = vld [vmem:[%s19686_s4 + $0x178] sm:$0xff] }
 0x74d   :  { %14012 = vmatprep.subr.mxu0 %v1275_v49 }
 0x74e   :  { %14013 = vmatpush3.msra.mxu0 %v1275_v49  ;;  %v1578_v49 = vld [vmem:[%s19686_s4 + $0x128] sm:$0xff] }
 0x74f   :  { %14014 = vmatprep.subr.mxu0 %v1274_v50 }
 0x750   :  { %14015 = vmatpush3.msra.mxu0 %v1274_v50  ;;  %v1577_v50 = vld [vmem:[%s19686_s4 + $0x120] sm:$0xff] }
 0x751   :  { %14030 = vmatprep.subr.mxu0 %v1584_v43 }
 0x809   :  { %v13985_v23 = vpop.f32.mrf.mxu0 }
 0x80a   :  { %v1125_v24 = vadd.f32 %v13985_v23, %v12370_v22 }
 0x80b   :  { %v1119_v25 = vpop.f32.mrf.mxu0 }
 0x80c   :  { %v1120_v26 = vadd.f32 %v12370_v22, %v1119_v25  ;;  %v1129_v27 = vadd.f32 %v1125_v24, %v940_v7  ;;  %v1279_v22 = vld [vmem:[%s19686_s4 + $0xe8] sm:$0xff]  ;;  %v1278_v25 = vld [vmem:[%s19686_s4 + $0xe0] sm:$0xff] }
 0x80e   :  { %v1135_v28 = vsel %vm19701_vm0, %v1129_v27, 0.0  ;;  %v1128_v29 = vadd.f32 %v1120_v26, %v939_v3 }
 0x80f   :  { %1136 = vadd.xlane.f32.xlu0 %v1135_v28 }
 0x810   :  { %v1132_v30 = vsel %vm19701_vm0, %v1128_v29, 0.0 }
 0x811   :  { %1133 = vadd.xlane.f32.xlu1 %v1132_v30  ;;  %v1295_v30 = vadd.s32 1, %v15704_v8 }
 0x898   :  { %v1137_v32 = vpop.xlane.xlu0 %1136 }
 0x899   :  { %v1139_v33 = vmul.f32 0.03125, %v1137_v32  ;;  %v1857_v32 = vld [vmem:[%s19686_s4 + $0x190] sm:$0xff] }
 0x89a   :  { %v1134_v34 = vpop.xlane.xlu1 %1133 }
 0x89b   :  { %v1141_v35 = vsub.f32 %v1129_v27, %v1139_v33  ;;  %v1138_v36 = vmul.f32 0.03125, %v1134_v34  ;;  %v1284_v34 = vld [vmem:[%s19686_s4 + $0x110] sm:$0xff] }
 0x89d   :  { %v1140_v37 = vsub.f32 %v1128_v29, %v1138_v36  ;;  %v1143_v38 = vmul.f32 %v1141_v35, %v1141_v35  ;;  %v1297_v36 = vand.u32 7, %v1295_v30  ;;  %v1585_v30 = vld [vmem:[%s19686_s4 + $0x160] sm:$0xff] }
 0x89f   :  { %v1147_v39 = vsel %vm19701_vm0, %v1143_v38, 0.0  ;;  %v1142_v40 = vmul.f32 %v1140_v37, %v1140_v37  ;;  %v1282_v38 = vld [vmem:[%s19686_s4 + $0x100] sm:$0xff]  ;;  %vm15768_vm12 = vcmp.ne.s32.totalorder %v1297_v36, 0 }
 0x8a0   :  { %1148 = vadd.xlane.f32.xlu0 %v1147_v39 }
 0x8a1   :  { %v1144_v41 = vsel %vm19701_vm0, %v1142_v40, 0.0 }
 0x8a2   :  { %1145 = vadd.xlane.f32.xlu1 %v1144_v41 }
 0x8b3   :  { %1262 = vperm.xlu1 %15260, %v15656_v42  }
 0x8b6   :  { %1267 = vperm.xlu0 %15261, %v15670_v46  }
 0x929   :  { %v1149_v51 = vpop.xlane.xlu0 %1148 }
 0x92a   :  { %v1151_v52 = vmul.f32 0.03125, %v1149_v51  ;;  %v15807_v51 = vld [vmem:[%s19689_s7 + $0x8] ss:$0 sm:$0xff] }
 0x92b   :  { %v1146_v53 = vpop.xlane.xlu1 %1145 }
 0x92c   :  { %v1153_v54 = vadd.f32 1e-05, %v1151_v52  ;;  %v1150_v55 = vmul.f32 0.03125, %v1146_v53 }
 0x92e   :  { %15302 = vrsqrt.f32 %v1153_v54  ;;  %v1152_v56 = vadd.f32 1e-05, %v1150_v55 }
 0x92f   :  { %v15706_v9 = vpop.permute.xlu1 %1262 }
 0x930   :  { %15304 = vrsqrt.f32 %v1152_v56 }
 0x931   :  { %v15701_v3 = vpop.permute.xlu0 %1267 }
 0x93b   :  { %v15303_v58 = vpop.eup %15302 }
 0x93c   :  { %v1157_v60 = vmul.f32 %v15303_v58, %v1141_v35 }
 0x93d   :  { %v15305_v62 = vpop.eup %15304 }
 0x93e   :  { %v1163_v0 = vmul.f32 %v12373_v59, %v1157_v60  ;;  %v1156_v1 = vmul.f32 %v15305_v62, %v1140_v37  ;;  %v1283_v37 = vld [vmem:[%s19686_s4 + $0x108] sm:$0xff] }
 0x93f   :  { %v12384_v62 = vld [vmem:[%s19689_s7 + $0x9] ss:$0 sm:$0xff] }
 0x940   :  { %v1169_v4 = vadd.f32 %v12374_v63, %v1163_v0  ;;  %v1162_v7 = vmul.f32 %v12373_v59, %v1156_v1 }
 0x942   :  { %v1273_v12 = vmul.f32 %v15701_v3, %v1169_v4  ;;  %v1168_v13 = vadd.f32 %v12374_v63, %v1162_v7 }
 0x944   :  { %v1272_v15 = vmul.f32 %v15706_v9, %v1168_v13  ;;  %13994 = vmatprep.mubr.msk.f32.mxu1 %vm19701_vm0, %v1168_v13  ;;  %v1301_v19 = vrot.slane %v1273_v12, 7  ;;  %v1312_v24 = vrot.slane %v1273_v12, 1 }
 0x945   :  { %13995 = vmatmul.mubr.msk.f32.vlgmr.msra.gmra.mxu1 %vm19701_vm0, %v1169_v4 }
 0x946   :  { %v1300_v20 = vrot.slane %v1272_v15, 7  ;;  %v1311_v21 = vrot.slane %v1272_v15, 1  ;;  %13998 = vmatpush3.msra.mxu1 %v1281_v5  ;;  %14005 = vmatprep.mubr.msk.f32.mxu1 %vm19701_vm0, %v1272_v15  ;;  %v1579_v5 = vld [vmem:[%s19686_s4 + $0x130] sm:$0xff] }
 0x947   :  { %13999 = vmatprep.subr.mxu1 %v1280_v16 }
 0x948   :  { %14000 = vmatpush3.msra.mxu1 %v1280_v16  ;;  %v1304_v26 = vsel %vm19700_vm8, %v1301_v19, %v1300_v20  ;;  %v1303_v27 = vsel %vm19700_vm8, %v1300_v20, %v1301_v19  ;;  %v1314_v33 = vsel %vm19699_vm10, %v1311_v21, %v1312_v24  ;;  %v1315_v40 = vsel %vm19699_vm10, %v1312_v24, %v1311_v21  ;;  %v1587_v16 = vld [vmem:[%s19686_s4 + $0x170] sm:$0xff]  ;;  %v1586_v24 = vld [vmem:[%s19686_s4 + $0x168] sm:$0xff] }
 0x949   :  { %14001 = vmatprep.subr.mxu1 %v1279_v22  ;;  %v1309_v28 = vsel %vm15718_vm7, %v1304_v26, 0.0  ;;  %v1310_v29 = vsel %vm15727_vm9, %v1303_v27, 0.0  ;;  %v1320_v35 = vsel %vm15748_vm11, %v1314_v33, 0.0  ;;  %v1321_v41 = vsel %vm15768_vm12, %v1315_v40, 0.0  ;;  %v1856_v33 = vld [vmem:[%s19686_s4 + $0x188] sm:$0xff] }
 0x94a   :  { %14002 = vmatpush3.msra.mxu1 %v1279_v22  ;;  %14016 = vmatprep.mubr.msk.f32.mxu0 %vm19701_vm0, %v1309_v28 }
 0x94b   :  { %14003 = vmatprep.subr.mxu1 %v1278_v25  ;;  %14017 = vmatmul.mubr.msk.f32.vlgmr.msra.gmra.mxu0 %vm19701_vm0, %v1310_v29 }
 0x94c   :  { %14004 = vmatpush3.msra.mxu1 %v1278_v25  ;;  %14031 = vmatpush3.msra.mxu0 %v1584_v43  ;;  %v12391_v43 = vld [vmem:[%s19689_s7 + $0xa] ss:$0 sm:$0xff] }
 0x94d   :  { %14006 = vmatmul.mubr.msk.f32.vlgmr.msra.gmra.mxu1 %vm19701_vm0, %v1273_v12  ;;  %14019 = vmatprep.subr.mxu1 %v1285_v31 }
 0x94e   :  { %14020 = vmatpush3.msra.mxu1 %v1285_v31  ;;  %14027 = vmatprep.mubr.msk.f32.mxu1 %vm19701_vm0, %v1320_v35  ;;  %v1858_v31 = vld [vmem:[%s19686_s4 + $0x198] sm:$0xff] }
 0x94f   :  { %14021 = vmatprep.subr.mxu1 %v1284_v34  ;;  %14032 = vmatprep.subr.mxu0 %v1583_v44 }
 0x950   :  { %14022 = vmatpush3.msra.mxu1 %v1284_v34  ;;  %14033 = vmatpush3.msra.mxu0 %v1583_v44  ;;  %v1855_v34 = vld [vmem:[%s19686_s4 + $0x180] sm:$0xff] }
 0x951   :  { %14023 = vmatprep.subr.mxu1 %v1283_v37  ;;  %14034 = vmatprep.subr.mxu0 %v1582_v45 }
 0x952   :  { %14024 = vmatpush3.msra.mxu1 %v1283_v37  ;;  %14035 = vmatpush3.msra.mxu0 %v1582_v45 }
 0x953   :  { %14025 = vmatprep.subr.mxu1 %v1282_v38  ;;  %14036 = vmatprep.subr.mxu0 %v1581_v48 }
 0x954   :  { %14026 = vmatpush3.msra.mxu1 %v1282_v38  ;;  %14037 = vmatpush3.msra.mxu0 %v1581_v48 }
 0x955   :  { %14028 = vmatmul.mubr.msk.f32.vlgmr.msra.gmra.mxu1 %vm19701_vm0, %v1321_v41  ;;  %14041 = vmatprep.subr.mxu1 %v1580_v47 }
 0x956   :  { %14042 = vmatpush3.msra.mxu1 %v1580_v47  ;;  %14052 = vmatprep.subr.mxu0 %v1588_v2 }
 0x957   :  { %14043 = vmatprep.subr.mxu1 %v1579_v5 }
 0x958   :  { %14044 = vmatpush3.msra.mxu1 %v1579_v5 }
 0x959   :  { %14045 = vmatprep.subr.mxu1 %v1578_v49 }
 0x95a   :  { %14046 = vmatpush3.msra.mxu1 %v1578_v49 }
 0x95b   :  { %14047 = vmatprep.subr.mxu1 %v1577_v50 }
 0x95c   :  { %14048 = vmatpush3.msra.mxu1 %v1577_v50  ;;  %v12392_v50 = vld [vmem:[%s19689_s7 + $0xb] ss:$0 sm:$0xff] }
 0x95d   :  { %14063 = vmatprep.subr.mxu1 %v1858_v31 }
 0xa05   :  { %v13996_v52 = vpop.f32.mrf.mxu1 }
 0xa06   :  { %v15810_v53 = vadd.f32 %v13996_v52, %v15807_v51 }
 0xa07   :  { %v15812_v54 = vpop.f32.mrf.mxu1 }
 0xa0b   :  { %v14018_v55 = vpop.f32.mrf.mxu0 }
 0xa0d   :  { %v14007_v56 = vpop.f32.mrf.mxu1  ;;  %v1475_v58 = vpop.f32.mrf.mxu0 }
 0xa0e   :  { %v1481_v60 = vadd.f32 %v14018_v55, %v14007_v56 }
 0xa0f   :  { %v1394_v59 = vpop.f32.mrf.mxu1 }
 0xa10   :  { %v1476_v0 = vadd.f32 %v1475_v58, %v1394_v59 }
 0xa15   :  { %v14029_v63 = vpop.f32.mrf.mxu1 }
 0xa16   :  { %v1566_v1 = vadd.f32 %v14029_v63, %v1481_v60 }
 0xa17   :  { %v1556_v4 = vpop.f32.mrf.mxu1 }
 0xa18   :  { %v1572_v7 = vadd.f32 %v12384_v62, %v1566_v1  ;;  %v1565_v10 = vadd.f32 %v1556_v4, %v1476_v0  ;;  %v15876_v0 = vand.u32 127, %v1287_v57 }
 0xa1a   :  { %v1574_v11 = vmax.f32 %v1572_v7, 0.0  ;;  %v1571_v12 = vadd.f32 %v12384_v62, %v1565_v10  ;;  %19776 = vst [vmem:[#allocation6_spill] sm:$0xff] %v15876_v0  ;;  %v1252_v7 = vadd.f32 %v15807_v51, %v15812_v54  ;;  %vm1963_vm13 = vcmp.le.s32.totalorder %v15876_v0, %v15696_v61 }
 0xa1c   :  { %v1576_v13 = vmul.f32 %v1574_v11, %v15701_v3  ;;  %v1573_v14 = vmax.f32 %v1571_v12, 0.0  ;;  %v15884_v12 = vsel %vm1963_vm13, 1.0, %v19691_v6 }
 0xa1e   :  { %v1575_v15 = vmul.f32 %v1573_v14, %v15706_v9  ;;  %v1591_v19 = vrot.slane %v1576_v13, 7  ;;  %v1597_v21 = vrot.slane %v1576_v13, 1 }
 0xa20   :  { %14038 = vmatprep.mubr.msk.f32.mxu0 %vm19701_vm0, %v1575_v15  ;;  %v1590_v18 = vrot.slane %v1575_v15, 7  ;;  %v1596_v20 = vrot.slane %v1575_v15, 1 }
 0xa21   :  { %14039 = vmatmul.mubr.msk.f32.vlgmr.msra.gmra.mxu0 %vm19701_vm0, %v1576_v13  ;;  %v1270_v13 = vmul.f32 %v15706_v9, %v1252_v7 }
 0xa22   :  { %14053 = vmatpush3.msra.mxu0 %v1588_v2  ;;  %v1593_v22 = vsel %vm19700_vm8, %v1591_v19, %v1590_v18  ;;  %v1598_v25 = vsel %vm19699_vm10, %v1596_v20, %v1597_v21  ;;  %v1592_v26 = vsel %vm19700_vm8, %v1590_v18, %v1591_v19  ;;  %v1599_v17 = vsel %vm19699_vm10, %v1597_v21, %v1596_v20 }
 0xa23   :  { %14054 = vmatprep.subr.mxu0 %v1587_v16  ;;  %v1594_v27 = vsel %vm15718_vm7, %v1593_v22, 0.0  ;;  %v1600_v28 = vsel %vm15748_vm11, %v1598_v25, 0.0  ;;  %v1595_v29 = vsel %vm15727_vm9, %v1592_v26, 0.0  ;;  %v1601_v23 = vsel %vm15768_vm12, %v1599_v17, 0.0 }
 0xa24   :  { %14055 = vmatpush3.msra.mxu0 %v1587_v16  ;;  %14049 = vmatprep.mubr.msk.f32.mxu1 %vm19701_vm0, %v1594_v27  ;;  %v15891_v16 = vcvt.s32.f32 %v15876_v0  ;;  %v15896_v19 = vsub.s32 7, %v15696_v61  ;;  %v1969_v27 = vcvt.s32.f32 %v15696_v61 }
 0xa25   :  { %14056 = vmatprep.subr.mxu0 %v1586_v24  ;;  %14060 = vmatprep.mubr.msk.f32.mxu0 %vm19701_vm0, %v1600_v28  ;;  %v1970_v28 = vcvt.s32.f32 %v15704_v8 }
 0xa26   :  { %14050 = vmatmul.mubr.msk.f32.vlgmr.msra.gmra.mxu1 %vm19701_vm0, %v1595_v29  ;;  %14057 = vmatpush3.msra.mxu0 %v1586_v24 }
 0xa27   :  { %14058 = vmatprep.subr.mxu0 %v1585_v30  ;;  %14064 = vmatpush3.msra.mxu1 %v1858_v31 }
 0xa28   :  { %14059 = vmatpush3.msra.mxu0 %v1585_v30  ;;  %14065 = vmatprep.subr.mxu1 %v1857_v32 }
 0xa29   :  { %14061 = vmatmul.mubr.msk.f32.vlgmr.msra.gmra.mxu0 %vm19701_vm0, %v1601_v23  ;;  %14074 = vmatprep.subr.mxu0 %v19691_v6 }
 0xa2a   :  { %14076 = vmatprep.mubr.msk.f32.mxu0 %vm15413_vm1, %v19691_v6  ;;  %14066 = vmatpush3.msra.mxu1 %v1857_v32 }
 0xa2b   :  { %14067 = vmatprep.subr.mxu1 %v1856_v33 }
 0xa2c   :  { %14068 = vmatpush3.msra.mxu1 %v1856_v33 }
 0xa2d   :  { %14069 = vmatprep.subr.mxu1 %v1855_v34 }
 0xa2e   :  { %14070 = vmatpush3.msra.mxu1 %v1855_v34 }
 0xae1   :  { %v14040_v35 = vpop.f32.mrf.mxu0 }
 0xae3   :  { %v1674_v37 = vpop.f32.mrf.mxu0 }
 0xae6   :  { %v14051_v36 = vpop.f32.mrf.mxu1 }
 0xae7   :  { %v1761_v38 = vadd.f32 %v14051_v36, %v14040_v35 }
 0xae8   :  { %v1755_v39 = vpop.f32.mrf.mxu1 }
 0xae9   :  { %v1756_v40 = vadd.f32 %v1755_v39, %v1674_v37  ;;  %v14062_v41 = vpop.f32.mrf.mxu0 }
 0xaea   :  { %v1846_v44 = vadd.f32 %v14062_v41, %v1761_v38 }
 0xaeb   :  { %v1836_v45 = vpop.f32.mrf.mxu0 }
 0xaec   :  { %v1845_v47 = vadd.f32 %v1836_v45, %v1756_v40  ;;  %v1852_v48 = vadd.f32 %v12391_v43, %v1846_v44  ;;  %v1271_v40 = vmul.f32 %v15701_v3, %v15810_v53 }
 0xaee   :  { %v1851_v5 = vadd.f32 %v12391_v43, %v1845_v47  ;;  %v1854_v49 = vmax.f32 %v1852_v48, 0.0 }
 0xaf0   :  { %v1853_v2 = vmax.f32 %v1851_v5, 0.0 }
 0xaf2   :  { %14071 = vmatprep.mubr.msk.f32.mxu1 %vm19701_vm0, %v1853_v2 }
 0xaf3   :  { %14072 = vmatmul.mubr.msk.f32.vlgmr.msra.gmra.mxu1 %vm19701_vm0, %v1854_v49  ;;  %v15934_v49 = vadd.s32 16, %v15696_v61 }
 0xbb3   :  { %v14073_v52 = vpop.f32.mrf.mxu1 }
 0xbb4   :  { %v1942_v55 = vadd.f32 %v14073_v52, %v12392_v50 }
 0xbb5   :  { %v1936_v56 = vpop.f32.mrf.mxu1 }
 0xbb6   :  { %v1937_v58 = vadd.f32 %v12392_v50, %v1936_v56  ;;  %v1946_v23 = vmul.f32 %v1942_v55, %v15670_v46  ;;  %v15937_v50 = vadd.s32 24, %v15696_v61 }
 0xbb8   :  { %v1945_v59 = vmul.f32 %v1937_v58, %v15656_v42  ;;  %v1949_v31 = vmul.f32 1.442695, %v1946_v23  ;;  %19777 = vst [vmem:[#allocation7_spill] sm:$0xff] %v15937_v50  ;;  %v2234_v58 = vld [vmem:[%s19685_s3] sm:$0xff] }
 0xbba   :  { %v1947_v60 = vmul.f32 1.442695, %v1945_v59  ;;  %v1971_v59 = vcvt.s32.f32 %v15934_v49 }
 0xbbc   :  { %15306 = vpow2.f32 %v1947_v60  ;;  %v1972_v60 = vcvt.s32.f32 %v15937_v50 }
 0xbbd   :  { %15308 = vpow2.f32 %v1949_v31  ;;  %v15969_v31 = vadd.s32 %v15876_v0, %v15704_v8 }
 0xbc9   :  { %v15307_v62 = vpop.eup %15306 }
 0xbca   :  { %v1951_v63 = vmul.f32 %v15307_v62, %v15656_v42  ;;  %v15309_v32 = vpop.eup %15308 }
 0xbcb   :  { %v1952_v33 = vmul.f32 %v15309_v32, %v15670_v46  ;;  %v19693_v32 = vmov 1.0  }
 0xbcc   :  { %v1953_v1 = vceil.f32 %v1951_v63 }
 0xbcd   :  { %v1954_v34 = vceil.f32 %v1952_v33 }
 0xbce   :  { %v1955_v4 = vmax.f32 %v1953_v1, 1.0 }
 0xbcf   :  { %v1956_v35 = vmax.f32 %v1954_v34, 1.0 }
 0xbd0   :  { %v1957_v10 = vmin.f32 %v1955_v4, 4.0 }
 0xbd1   :  { %v1958_v37 = vmin.f32 %v1956_v35, 4.0 }
 0xbd2   :  { %v1959_v11 = vmul.f32 %v1957_v10, %v15656_v42 }
 0xbd3   :  { %v1960_v39 = vmul.f32 %v1958_v37, %v15670_v46 }
 0xbd4   :  { %14075 = vmatpush3.msra.mxu0 %v1959_v11 }
 0xbd5   :  { %14077 = vmatmul.mubr.msk.f32.vlgmr.msra.gmra.mxu0 %vm207_vm4, %v15884_v12  ;;  %14087 = vmatprep.subr.mxu0 %v1270_v13 }
 0xbd6   :  { %14088 = vmatpush3.msra.mxu0 %v1270_v13 }
 0xc95   :  { %v2042_v57 = vpop.f32.mrf.mxu0 }
 0xc96   :  { %v2046_v14 = vmax.f32 %v2042_v57, 1.0  ;;  %2050 = vperm.xlu1 %15260, %v2042_v57   ;;  %v2054_v15 = vsub.f32 %v2042_v57, %v1959_v11 }
 0xc97   :  { %v14078_v51 = vpop.f32.mrf.mxu0 }
 0xc98   :  { %v2047_v54 = vmin.f32 %v2046_v14, 32.0 }
 0xc9a   :  { %2066 = vperm.xlu1 %15260, %v2047_v54   ;;  %v15904_v26 = vrot.slane %v2047_v54, %v15896_v19 }
 0xc9c   :  { %vm2214_vm7 = vcmp.lt.f32.partialorder %v1969_v27, %v15904_v26  ;;  %vm2215_vm9 = vcmp.lt.f32.partialorder %v1970_v28, %v15904_v26 }
 0xc9d   :  { %v12403_v29 = vsel %vm2214_vm7, 1.0, %v19691_v6  ;;  %v12404_v30 = vsel %vm2215_vm9, 1.0, %v19691_v6  ;;  %vm2730_vm7 = vcmp.eq.s32.totalorder %v15969_v31, 15  ;;  %vm2216_vm9 = vcmp.lt.f32.partialorder %v1971_v59, %v15904_v26 }
 0xc9e   :  { %2057 = vperm.xlu1 %15260, %v2054_v15   ;;  %v15262_v17 = vpack.i.bf16 %v12404_v30, %v12403_v29 }
 0xca2   :  { %2110 = vrot.lane.b32.xlu1 %v1270_v13, %s15415_s19 }
 0xd11   :  { %v2051_v42 = vpop.permute.xlu1 %2050 }
 0xd12   :  { %vm2053_vm15 = vcmp.lt.f32.partialorder %v15891_v16, %v2051_v42 }
 0xd15   :  { %v2067_v9 = vpop.permute.xlu1 %2066 }
 0xd16   :  { %vm2069_vm14 = vcmp.lt.f32.partialorder %v15891_v16, %v2067_v9 }
 0xd17   :  { %v12398_v18 = vsel %vm2069_vm14, 1.0, %v19691_v6 }
 0xd18   :  { %v2075_v21 = vrot.slane %v12398_v18, %v15896_v19 }
 0xd19   :  { %v2058_v20 = vpop.permute.xlu1 %2057 }
 0xd1a   :  { %vm2060_vm3 = vcmp.ge.f32.partialorder %v15891_v16, %v2058_v20 }
 0xd1b   :  { %vm2061_vm5 = vmand %vm2053_vm15, %vm2060_vm3 }
 0xd1c   :  { %v12397_v22 = vsel %vm2061_vm5, 1.0, %v19691_v6 }
 0xd1d   :  { %v2076_v24 = vmul.f32 %v12397_v22, %v2075_v21  ;;  %v2111_v25 = vpop.permute.xlu1 %2110 }
 0xd1e   :  { %14079 = vmatprep.subr.mxu1 %v2111_v25 }
 0xd1f   :  { %2077 = vxpose.xlu1.b32.start.end [1/1] (short) (narrow) %v2076_v24, 32  ;;  %14080 = vmatpush3.msra.mxu1 %v2111_v25 }
 0xd20   :  { %14095 = vmatprep.subr.mxu1 %v19691_v6 }
 0xd49   :  { %15263 = vperm.xlu1 %15260, %v15262_v17  }
 0xd9b   :  { %v2093_v36 = vpop.trf.xlu1 }
 0xd9c   :  { %14081 = vmatprep.mubr.msk.f32.mxu1 %vm207_vm4, %v2093_v36  ;;  %14089 = vmatprep.mubr.msk.f32.mxu0 %vm207_vm4, %v2093_v36  ;;  %v15986_v36 = vadd.s32 %v15876_v0, %v15696_v61 }
 0xd9f   :  { %v2094_v38 = vpop.trf.xlu1 }
 0xda0   :  { %14082 = vmatmul.mubr.msk.f32.vlgmr.msra.gmra.mxu1 %vm207_vm4, %v2094_v38  ;;  %14090 = vmatmul.mubr.msk.f32.vlgmr.msra.gmra.mxu0 %vm207_vm4, %v2094_v38 }
 0xda1   :  { %14096 = vmatpush3.msra.mxu1 %v1960_v39 }
 0xda2   :  { %14108 = vmatprep.subr.mxu1 %v1271_v40 }
 0xda3   :  { %v2095_v41 = vpop.trf.xlu1 }
 0xda4   :  { %14084 = vmatprep.mubr.msk.f32.mxu1 %vm207_vm4, %v2095_v41  ;;  %14092 = vmatprep.mubr.msk.f32.mxu0 %vm207_vm4, %v2095_v41 }
 0xda7   :  { %v2096_v43 = vpop.trf.xlu1 }
 0xda8   :  { %14085 = vmatmul.mubr.msk.f32.gmra.mxu1 %vm207_vm4, %v2096_v43  ;;  %14093 = vmatmul.mubr.msk.f32.gmra.mxu0 %vm207_vm4, %v2096_v43 }
 0xda9   :  { %14097 = vmatprep.mubr.msk.f32.mxu1 %vm15413_vm1, %v19691_v6 }
 0xdac   :  { %14098 = vmatmul.mubr.msk.f32.vlgmr.msra.gmra.mxu1 %vm207_vm4, %v15884_v12  ;;  %v2235_v12 = vld [vmem:[%s19685_s3 + $0x8] sm:$0xff] }
 0xdad   :  { %14109 = vmatpush3.msra.mxu1 %v1271_v40 }
 0xdae   :  { %14132 = vmatprep.subr.msk.mxu1 %vm2730_vm7, %v19693_v32 }
 0xdc4   :  { %v15264_v14 = vpop.permute.xlu1 %15263 }
 0xdc5   :  { %v15953_v9 = vunpack.i.l.bf16 %v15264_v14  ;;  %v15956_v21 = vunpack.i.h.bf16 %v15264_v14 }
 0xe60   :  { %v14083_v46 = vpop.f32.mrf.mxu1  ;;  %v14091_v63 = vpop.f32.mrf.mxu0 }
 0xe61   :  { %v2228_v44 = vmul.f32 1.442695, %v14083_v46 }
 0xe62   :  { %v2191_v3 = vpop.f32.mrf.mxu1  ;;  %v2308_v51 = vpop.f32.mrf.mxu0 }
 0xe63   :  { %v2226_v53 = vmul.f32 1.442695, %v2191_v3 }
 0xe65   :  { %15310 = vpow2.f32 %v2226_v53 }
 0xe66   :  { %15312 = vpow2.f32 %v2228_v44  ;;  %v2237_v44 = vld [vmem:[%s19685_s3 + $0x18] sm:$0xff] }
 0xe68   :  { %v15929_v45 = vpop.f32.mrf.mxu1 }
 0xe69   :  { %v2232_v43 = vmul.f32 1.442695, %v15929_v45 }
 0xe6a   :  { %v15931_v47 = vpop.f32.mrf.mxu1 }
 0xe6b   :  { %v2230_v46 = vmul.f32 1.442695, %v15931_v47  ;;  %15314 = vpow2.f32 %v2232_v43 }
 0xe6c   :  { %v2417_v48 = vpop.f32.mrf.mxu1 }
 0xe6d   :  { %v2421_v5 = vmax.f32 %v2417_v48, 1.0  ;;  %2425 = vperm.xlu0 %15261, %v2417_v48   ;;  %v2429_v62 = vsub.f32 %v2417_v48, %v1960_v39  ;;  %15316 = vpow2.f32 %v2230_v46  ;;  %v2236_v48 = vld [vmem:[%s19685_s3 + $0x10] sm:$0xff] }
 0xe6e   :  { %v14099_v2 = vpop.f32.mrf.mxu1 }
 0xe6f   :  { %v2422_v52 = vmin.f32 %v2421_v5, 32.0  ;;  %v14094_v5 = vpop.f32.mrf.mxu0 }
 0xe71   :  { %2441 = vperm.xlu0 %15261, %v2422_v52   ;;  %v2588_v55 = vrot.slane %v2422_v52, %v15896_v19 }
 0xe72   :  { %v15311_v56 = vpop.eup %15310 }
 0xe73   :  { %vm2589_vm1 = vcmp.lt.f32.partialorder %v1969_v27, %v2588_v55  ;;  %vm2590_vm11 = vcmp.lt.f32.partialorder %v1970_v28, %v2588_v55  ;;  %vm2591_vm12 = vcmp.lt.f32.partialorder %v1971_v59, %v2588_v55  ;;  %vm2592_vm13 = vcmp.lt.f32.partialorder %v1972_v60, %v2588_v55  ;;  %v15313_v11 = vpop.eup %15312  ;;  %v2318_v55 = vpop.f32.mrf.mxu0 }
 0xe74   :  { %v12418_v1 = vsel %vm2589_vm1, 1.0, %v19691_v6  ;;  %v12419_v4 = vsel %vm2590_vm11, 1.0, %v19691_v6  ;;  %v2238_v7 = vmul.f32 %v15311_v56, %v2234_v58  ;;  %v12420_v13 = vsel %vm2591_vm12, 1.0, %v19691_v6 }
 0xe75   :  { %2432 = vperm.xlu0 %15261, %v2429_v62   ;;  %v15272_v10 = vpack.i.bf16 %v12419_v4, %v12418_v1  ;;  %v12421_v57 = vsel %vm2592_vm13, 1.0, %v19691_v6  ;;  %v2239_v54 = vmul.f32 %v15313_v11, %v2235_v12  ;;  %vm2217_vm1 = vcmp.lt.f32.partialorder %v1972_v60, %v15904_v26 }
 0xe76   :  { %v2309_v15 = vadd.f32 %v2308_v51, %v2238_v7  ;;  %v15277_v42 = vpack.i.bf16 %v12421_v57, %v12420_v13  ;;  %vm2729_vm11 = vcmp.eq.s32.totalorder %v15986_v36, 15  ;;  %v12423_v51 = vld [vmem:[%s19685_s3 + $0x28] sm:$0xff] }
 0xe77   :  { %15273 = vperm.xlu1 %15260, %v15272_v10   ;;  %v2314_v18 = vadd.f32 %v14091_v63, %v2239_v54 }
 0xe78   :  { %v2347_v20 = vmul.f32 %v15953_v9, %v2309_v15  ;;  %v15315_v3 = vpop.eup %15314 }
 0xe79   :  { %2485 = vrot.lane.b32.xlu0 %v1271_v40, %s15415_s19  ;;  %v2348_v22 = vmul.f32 %v15956_v21, %v2314_v18  ;;  %v2241_v2 = vmul.f32 %v15315_v3, %v2237_v44 }
 0xe7a   :  { %v15317_v53 = vpop.eup %15316 }
 0xe7b   :  { %15278 = vperm.xlu1 %15260, %v15277_v42   ;;  %v2240_v52 = vmul.f32 %v15317_v53, %v2236_v48  ;;  %v2324_v45 = vadd.f32 %v14094_v5, %v2241_v2  ;;  %v12422_v42 = vld [vmem:[%s19685_s3 + $0x20] sm:$0xff] }
 0xe7d   :  { %v2319_v58 = vadd.f32 %v2318_v55, %v2240_v52 }
 0xe7f   :  { %2743 = vrot.lane.b32.xlu1 %v2347_v20, %s15414_s18 }
 0xe83   :  { %2745 = vrot.lane.b32.xlu1 %v2348_v22, %s15414_s18 }
 0xee8   :  { %v2426_v24 = vpop.permute.xlu0 %2425 }
 0xee9   :  { %vm2428_vm15 = vcmp.lt.f32.partialorder %v15891_v16, %v2426_v24 }
 0xeec   :  { %v2442_v25 = vpop.permute.xlu0 %2441 }
 0xeed   :  { %vm2444_vm14 = vcmp.lt.f32.partialorder %v15891_v16, %v2442_v25 }
 0xeee   :  { %v12413_v27 = vsel %vm2444_vm14, 1.0, %v19691_v6 }
 0xeef   :  { %v2450_v29 = vrot.slane %v12413_v27, %v15896_v19  ;;  %v12406_v19 = vsel %vm2217_vm1, 1.0, %v19691_v6 }
 0xef0   :  { %v2433_v28 = vpop.permute.xlu0 %2432 }
 0xef1   :  { %vm2435_vm3 = vcmp.ge.f32.partialorder %v15891_v16, %v2433_v28  ;;  %v12405_v16 = vsel %vm2216_vm9, 1.0, %v19691_v6 }
 0xef2   :  { %vm2436_vm5 = vmand %vm2428_vm15, %vm2435_vm3  ;;  %v15267_v33 = vpack.i.bf16 %v12406_v19, %v12405_v16  ;;  %v15982_v34 = vpop.permute.xlu1 %15273 }
 0xef3   :  { %v12412_v30 = vsel %vm2436_vm5, 1.0, %v19691_v6  ;;  %v16048_v27 = vunpack.i.l.bf16 %v15982_v34 }
 0xef4   :  { %v2451_v17 = vmul.f32 %v12412_v30, %v2450_v29  ;;  %v2486_v23 = vpop.permute.xlu0 %2485  ;;  %v3012_v29 = vld [vmem:[%s19687_s5 + $0x78] sm:$0xff]  ;;  %v16054_v30 = vunpack.i.h.bf16 %v15982_v34  ;;  %v12424_v34 = vld [vmem:[%s19685_s3 + $0x30] sm:$0xff] }
 0xef5   :  { %14100 = vmatprep.subr.mxu0 %v2486_v23 }
 0xef6   :  { %2452 = vxpose.xlu0.b32.start.end [1/1] (short) (narrow) %v2451_v17, 32  ;;  %14101 = vmatpush3.msra.mxu0 %v2486_v23  ;;  %v15990_v37 = vpop.permute.xlu1 %15278  ;;  %v12425_v17 = vld [vmem:[%s19685_s3 + $0x38] sm:$0xff]  ;;  %v3011_v23 = vld [vmem:[%s19687_s5 + $0x70] sm:$0xff] }
 0xef7   :  { %14116 = vmatprep.subr.msk.mxu0 %vm2730_vm7, %v19693_v32  ;;  %v16071_v43 = vunpack.i.h.bf16 %v15990_v37  ;;  %v16074_v46 = vunpack.i.l.bf16 %v15990_v37  ;;  %v3010_v37 = vld [vmem:[%s19687_s5 + $0x68] sm:$0xff] }
 0xefa   :  { %v2744_v39 = vpop.permute.xlu1 %2743 }
 0xefe   :  { %v2746_v41 = vpop.permute.xlu1 %2745 }
 0xf2b   :  { %15268 = vperm.xlu0 %15261, %v15267_v33  }
 0xf72   :  { %v2468_v35 = vpop.trf.xlu0 }
 0xf73   :  { %14102 = vmatprep.mubr.msk.f32.mxu0 %vm207_vm4, %v2468_v35  ;;  %14110 = vmatprep.mubr.msk.f32.mxu1 %vm207_vm4, %v2468_v35 }
 0xf76   :  { %v2469_v26 = vpop.trf.xlu0 }
 0xf77   :  { %14103 = vmatmul.mubr.msk.f32.vlgmr.msra.gmra.mxu0 %vm207_vm4, %v2469_v26  ;;  %14111 = vmatmul.mubr.msk.f32.vlgmr.msra.gmra.mxu1 %vm207_vm4, %v2469_v26 }
 0xf78   :  { %14117 = vmatpush3.msk.msra.mxu0 %vm2730_vm7, %v19693_v32  ;;  %14133 = vmatpush3.msk.msra.mxu1 %vm2730_vm7, %v19693_v32 }
 0xf79   :  { %14118 = vmatprep.subr.msk.mxu0 %vm2729_vm11, %v19693_v32  ;;  %14134 = vmatprep.subr.msk.mxu1 %vm2729_vm11, %v19693_v32 }
 0xf7a   :  { %v2470_v38 = vpop.trf.xlu0  ;;  %14119 = vmatpush3.msk.msra.mxu0 %vm2729_vm11, %v19693_v32  ;;  %14135 = vmatpush3.msk.msra.mxu1 %vm2729_vm11, %v19693_v32 }
 0xf7b   :  { %14105 = vmatprep.mubr.msk.f32.mxu0 %vm207_vm4, %v2470_v38  ;;  %14113 = vmatprep.mubr.msk.f32.mxu1 %vm207_vm4, %v2470_v38 }
 0xf7c   :  { %14148 = vmatprep.subr.mxu0 %v3012_v29  ;;  %14164 = vmatprep.subr.mxu1 %v3010_v37 }
 0xf7e   :  { %v2471_v40 = vpop.trf.xlu0 }
 0xf7f   :  { %14106 = vmatmul.mubr.msk.f32.gmra.mxu0 %vm207_vm4, %v2471_v40  ;;  %14114 = vmatmul.mubr.msk.f32.gmra.mxu1 %vm207_vm4, %v2471_v40 }
 0xf80   :  { %14120 = vmatprep.mubr.msk.f32.mxu0 %vm129_vm2, %v2744_v39  ;;  %14136 = vmatprep.mubr.msk.f32.mxu1 %vm129_vm2, %v2347_v20 }
 0xf83   :  { %14121 = vmatmul.mubr.msk.f32.vlgmr.msra.gmra.mxu0 %vm129_vm2, %v2746_v41  ;;  %14137 = vmatmul.mubr.msk.f32.vlgmr.msra.gmra.mxu1 %vm129_vm2, %v2348_v22 }
 0xf84   :  { %14149 = vmatpush3.msra.mxu0 %v3012_v29  ;;  %14165 = vmatpush3.msra.mxu1 %v3010_v37 }
 0xf85   :  { %14150 = vmatprep.subr.mxu0 %v3011_v23 }
 0xf86   :  { %14151 = vmatpush3.msra.mxu0 %v3011_v23  ;;  %v3037_v23 = vadd.s32 1, %v15937_v50 }
 0xfa6   :  { %v15269_v56 = vpop.permute.xlu0 %15268 }
 0xfa7   :  { %v16029_v47 = vunpack.i.h.bf16 %v15269_v56  ;;  %v16031_v59 = vunpack.i.l.bf16 %v15269_v56 }
 0xfa9   :  { %v2349_v60 = vmul.f32 %v16031_v59, %v2319_v58  ;;  %v2350_v62 = vmul.f32 %v16029_v47, %v2324_v45 }
 0xfab   :  { %2747 = vrot.lane.b32.xlu1 %v2349_v60, %s15414_s18  ;;  %14139 = vmatprep.mubr.msk.f32.mxu1 %vm129_vm2, %v2349_v60 }
 0xfac   :  { %14140 = vmatmul.mubr.msk.f32.gmra.mxu1 %vm129_vm2, %v2350_v62 }
 0xfaf   :  { %2749 = vrot.lane.b32.xlu1 %v2350_v62, %s15414_s18 }
0x101d   :  { %v2748_v63 = vpop.permute.xlu1 %2747 }
0x101e   :  { %14123 = vmatprep.mubr.msk.f32.mxu0 %vm129_vm2, %v2748_v63 }
0x1021   :  { %v2750_v1 = vpop.permute.xlu1 %2749 }
0x1022   :  { %14124 = vmatmul.mubr.msk.f32.gmra.mxu0 %vm129_vm2, %v2750_v1 }
0x1037   :  { %v14104_v4 = vpop.f32.mrf.mxu0  ;;  %v14112_v15 = vpop.f32.mrf.mxu1 }
0x1038   :  { %v2603_v7 = vmul.f32 1.442695, %v14104_v4 }
0x1039   :  { %v2566_v10 = vpop.f32.mrf.mxu0  ;;  %v2684_v25 = vpop.f32.mrf.mxu1 }
0x103a   :  { %15318 = vpow2.f32 %v2603_v7  ;;  %v2601_v11 = vmul.f32 1.442695, %v2566_v10 }
0x103c   :  { %15320 = vpow2.f32 %v2601_v11 }
0x103f   :  { %v14107_v12 = vpop.f32.mrf.mxu0  ;;  %v14115_v35 = vpop.f32.mrf.mxu1 }
0x1040   :  { %v2607_v13 = vmul.f32 1.442695, %v14107_v12 }
0x1041   :  { %v2576_v57 = vpop.f32.mrf.mxu0  ;;  %v2694_v41 = vpop.f32.mrf.mxu1 }
0x1042   :  { %15322 = vpow2.f32 %v2607_v13  ;;  %v2605_v14 = vmul.f32 1.442695, %v2576_v57  ;;  %v3014_v57 = vld [vmem:[%s19687_s5 + $0x88] sm:$0xff] }
0x1043   :  { %v16087_v5 = vpop.f32.mrf.mxu0  ;;  %14180 = vmatprep.subr.mxu0 %v3014_v57 }
0x1044   :  { %15324 = vpow2.f32 %v2605_v14  ;;  %v3002_v58 = vmul.f32 %v15956_v21, %v16087_v5  ;;  %v3009_v14 = vld [vmem:[%s19687_s5 + $0x60] sm:$0xff] }
0x1045   :  { %v16090_v52 = vpop.f32.mrf.mxu0  ;;  %14166 = vmatprep.subr.mxu1 %v3009_v14 }
0x1046   :  { %v16094_v45 = vmul.f32 %v15953_v9, %v16090_v52  ;;  %14167 = vmatpush3.msra.mxu1 %v3009_v14  ;;  %v3099_v29 = vrot.slane %v3002_v58, 1 }
0x1047   :  { %v15319_v54 = vpop.eup %15318 }
0x1048   :  { %v2615_v18 = vmul.f32 %v15319_v54, %v12423_v51  ;;  %v3013_v51 = vld [vmem:[%s19687_s5 + $0x80] sm:$0xff] }
0x1049   :  { %v15321_v20 = vpop.eup %15320 }
0x104a   :  { %v2614_v22 = vmul.f32 %v15321_v20, %v12422_v42  ;;  %v2690_v24 = vadd.f32 %v14112_v15, %v2615_v18  ;;  %v3020_v20 = vand.u32 31, %v15696_v61 }
0x104c   :  { %v2685_v28 = vadd.f32 %v2684_v25, %v2614_v22  ;;  %v2724_v33 = vmul.f32 %v16054_v30, %v2690_v24  ;;  %v3098_v25 = vrot.slane %v16094_v45, 1  ;;  %vm16151_vm4 = vcmp.ne.s32.totalorder %v3020_v20, 0 }
0x104e   :  { %v2723_v16 = vmul.f32 %v16048_v27, %v2685_v28  ;;  %v16143_v28 = vadd.s32 32, %v15696_v61 }
0x104f   :  { %v15323_v19 = vpop.eup %15322 }
0x1050   :  { %v2617_v26 = vmul.f32 %v15323_v19, %v12425_v17  ;;  %2751 = vrot.lane.b32.xlu1 %v2723_v16, %s15414_s18  ;;  %14142 = vmatprep.mubr.msk.f32.mxu1 %vm129_vm2, %v2723_v16  ;;  %19778 = vst [vmem:[#allocation8_spill] sm:$0xff] %v16143_v28  ;;  %v3058_v16 = vrot.slane %v16094_v45, 7 }
0x1051   :  { %v15325_v38 = vpop.eup %15324  ;;  %14143 = vmatmul.mubr.msk.f32.gmra.mxu1 %vm129_vm2, %v2724_v33 }
0x1052   :  { %v2700_v39 = vadd.f32 %v14115_v35, %v2617_v26  ;;  %v2616_v40 = vmul.f32 %v15325_v38, %v12424_v34  ;;  %v3059_v34 = vrot.slane %v3002_v58, 7 }
0x1054   :  { %v2695_v3 = vadd.f32 %v2694_v41, %v2616_v40  ;;  %2753 = vrot.lane.b32.xlu1 %v2724_v33, %s15414_s18  ;;  %v2726_v53 = vmul.f32 %v16071_v43, %v2700_v39  ;;  %v3112_v39 = vsel %vm19699_vm10, %v3098_v25, %v3099_v29  ;;  %v3024_v40 = vand.u32 31, %v16143_v28 }
0x1055   :  { %v3072_v37 = vsel %vm19700_vm8, %v3058_v16, %v3059_v34 }
0x1056   :  { %v2725_v44 = vmul.f32 %v16074_v46, %v2695_v3  ;;  %vm16177_vm12 = vcmp.ne.s32.totalorder %v3024_v40, 0 }
0x1058   :  { %2755 = vrot.lane.b32.xlu0 %v2725_v44, %s15414_s18  ;;  %2757 = vrot.lane.b32.xlu1 %v2726_v53, %s15414_s18 }
0x1059   :  { %14145 = vmatprep.mubr.msk.f32.mxu1 %vm129_vm2, %v2725_v44  ;;  %v16165_v44 = vadd.s32 56, %v15696_v61 }
0x105a   :  { %14146 = vmatmul.mubr.msk.f32.gmra.mxu1 %vm129_vm2, %v2726_v53  ;;  %v3045_v53 = vand.u32 31, %v3037_v23 }
0x105b   :  { %19781 = vst [vmem:[#allocation9_spill] sm:$0xff] %v16165_v44 }
0x105c   :  { %vm16184_vm13 = vcmp.ne.s32.totalorder %v3045_v53, 0 }
0x10c2   :  { %v2752_v48 = vpop.permute.xlu1 %2751 }
0x10c3   :  { %14126 = vmatprep.mubr.msk.f32.mxu0 %vm129_vm2, %v2752_v48 }
0x10c6   :  { %v2754_v2 = vpop.permute.xlu1 %2753 }
0x10c7   :  { %14127 = vmatmul.mubr.msk.f32.gmra.mxu0 %vm129_vm2, %v2754_v2 }
0x10ca   :  { %v2756_v55 = vpop.permute.xlu0 %2755  ;;  %v2758_v56 = vpop.permute.xlu1 %2757 }
0x10cb   :  { %14129 = vmatprep.mubr.msk.f32.mxu0 %vm129_vm2, %v2756_v55 }
0x10cc   :  { %14130 = vmatmul.mubr.msk.f32.gmra.mxu0 %vm129_vm2, %v2758_v56 }
0x10cd   :  { %14152 = vmatprep.mubr.msk.f32.mxu0 %vm129_vm2, %v16094_v45 }
0x10d0   :  { %14153 = vmatmul.mubr.msk.f32.vlgmr.msra.gmra.mxu0 %vm129_vm2, %v3002_v58 }
0x10d1   :  { %14181 = vmatpush3.msra.mxu0 %v3014_v57 }
0x10d2   :  { %14182 = vmatprep.subr.mxu0 %v3013_v51 }
0x10d3   :  { %14183 = vmatpush3.msra.mxu0 %v3013_v51 }
0x10e2   :  { %v16103_v60 = vpop.f32.mrf.mxu0 }
0x10e3   :  { %v3004_v62 = vmul.f32 %v16029_v47, %v16103_v60 }
0x10e4   :  { %v16107_v63 = vpop.f32.mrf.mxu0 }
0x10e5   :  { %v3003_v1 = vmul.f32 %v16031_v59, %v16107_v63  ;;  %v3061_v4 = vrot.slane %v3004_v62, 7  ;;  %v3101_v7 = vrot.slane %v3004_v62, 1 }
0x10e7   :  { %v3100_v10 = vrot.slane %v3003_v1, 1  ;;  %14155 = vmatprep.mubr.msk.f32.mxu0 %vm129_vm2, %v3003_v1  ;;  %v3060_v11 = vrot.slane %v3003_v1, 7 }
0x10e8   :  { %14156 = vmatmul.mubr.msk.f32.gmra.mxu0 %vm129_vm2, %v3004_v62  ;;  %v16191_v62 = vadd.s32 1, %v16165_v44 }
0x10e9   :  { %v3110_v12 = vsel %vm19699_vm10, %v3100_v10, %v3101_v7  ;;  %v3070_v13 = vsel %vm19700_vm8, %v3060_v11, %v3061_v4  ;;  %v3071_v48 = vsel %vm19700_vm8, %v3059_v34, %v3060_v11  ;;  %v3111_v2 = vsel %vm19699_vm10, %v3099_v29, %v3100_v10  ;;  %v3558_v34 = vld [vmem:[%s19687_s5 + $0xb8] sm:$0xff] }
0x10ea   :  { %19786 = vst [vmem:[#allocation10_spill] sm:$0xff] %v16191_v62  ;;  %v3049_v51 = vand.u32 31, %v16191_v62 }
0x10ec   :  { %vm16216_vm14 = vcmp.ne.s32.totalorder %v3049_v51, 0 }
0x1187   :  { %v16126_v54 = vpop.f32.mrf.mxu0 }
0x1188   :  { %v3006_v18 = vmul.f32 %v16054_v30, %v16126_v54 }
0x1189   :  { %v16128_v15 = vpop.f32.mrf.mxu0 }
0x118a   :  { %v3005_v42 = vmul.f32 %v16048_v27, %v16128_v15  ;;  %v3103_v1 = vrot.slane %v3006_v18, 1  ;;  %v3063_v11 = vrot.slane %v3006_v18, 7 }
0x118c   :  { %v16135_v22 = vpop.f32.mrf.mxu0  ;;  %14158 = vmatprep.mubr.msk.f32.mxu0 %vm129_vm2, %v3005_v42  ;;  %v3062_v26 = vrot.slane %v3005_v42, 7  ;;  %v3102_v41 = vrot.slane %v3005_v42, 1 }
0x118d   :  { %v3008_v24 = vmul.f32 %v16071_v43, %v16135_v22  ;;  %14159 = vmatmul.mubr.msk.f32.gmra.mxu0 %vm129_vm2, %v3006_v18 }
0x118e   :  { %v16145_v17 = vpop.f32.mrf.mxu0  ;;  %v3069_v56 = vsel %vm19700_vm8, %v3061_v4, %v3062_v26  ;;  %v3109_v58 = vsel %vm19699_vm10, %v3101_v7, %v3102_v41 }
0x118f   :  { %v3065_v19 = vrot.slane %v3008_v24, 7  ;;  %v3007_v33 = vmul.f32 %v16074_v46, %v16145_v17  ;;  %v3094_v4 = vsel %vm16177_vm12, %v3069_v56, 0.0  ;;  %v3133_v57 = vsel %vm16184_vm13, %v3109_v58, 0.0 }
0x1190   :  { %v3105_v7 = vrot.slane %v3008_v24, 1  ;;  %v14154_v40 = vpop.f32.mrf.mxu0 }
0x1191   :  { %14161 = vmatprep.mubr.msk.f32.mxu0 %vm129_vm2, %v3007_v33  ;;  %v3073_v38 = vsel %vm19700_vm8, %v3065_v19, %v3058_v16  ;;  %v3064_v10 = vrot.slane %v3007_v33, 7  ;;  %v3104_v14 = vrot.slane %v3007_v33, 1  ;;  %v3556_v33 = vld [vmem:[%s19687_s5 + $0xa8] sm:$0xff] }
0x1192   :  { %14162 = vmatmul.mubr.msk.f32.gmra.mxu0 %vm129_vm2, %v3008_v24  ;;  %v3090_v3 = vsel %vm16151_vm4, %v3073_v38, 0.0  ;;  %v3113_v29 = vsel %vm19699_vm10, %v3105_v7, %v3098_v25  ;;  %14196 = vmatprep.subr.mxu1 %v3556_v33  ;;  %v3555_v25 = vld [vmem:[%s19687_s5 + $0xa0] sm:$0xff]  ;;  %v16247_v38 = vpop.f32.mrf.mxu1  ;;  %v6033_v24 = vld [vmem:[%s19688_s6 + $0x98] sm:$0xff] }
0x1193   :  { %14168 = vmatprep.mubr.msk.f32.mxu1 %vm129_vm2, %v3090_v3  ;;  %14184 = vmatprep.mubr.msk.f32.mxu0 %vm129_vm2, %v3112_v39  ;;  %v3067_v42 = vsel %vm19700_vm8, %v3063_v11, %v3064_v10  ;;  %v3107_v18 = vsel %vm19699_vm10, %v3103_v1, %v3104_v14  ;;  %v3106_v20 = vsel %vm19699_vm10, %v3104_v14, %v3105_v7  ;;  %v3137_v16 = vsel %vm16216_vm14, %v3113_v29, 0.0  ;;  %v3228_v3 = vpop.f32.mrf.mxu0 }
0x1194   :  { %14169 = vmatmul.mubr.msk.f32.vlgmr.msra.gmra.mxu1 %vm129_vm2, %v3072_v37  ;;  %v3066_v23 = vsel %vm19700_vm8, %v3064_v10, %v3065_v19  ;;  %v3554_v19 = vld [vmem:[%s19687_s5 + $0x98] sm:$0xff]  ;;  %v16249_v39 = vpop.f32.mrf.mxu1 }
0x1195   :  { %14171 = vmatprep.mubr.msk.f32.mxu1 %vm129_vm2, %v3071_v48  ;;  %14197 = vmatpush3.msra.mxu1 %v3556_v33 }
0x1196   :  { %14185 = vmatmul.mubr.msk.f32.vlgmr.msra.gmra.mxu0 %vm129_vm2, %v3111_v2  ;;  %14198 = vmatprep.subr.mxu1 %v3555_v25 }
0x1197   :  { %14187 = vmatprep.mubr.msk.f32.mxu0 %vm129_vm2, %v3110_v12  ;;  %v3108_v12 = vsel %vm19699_vm10, %v3102_v41, %v3103_v1  ;;  %14199 = vmatpush3.msra.mxu1 %v3555_v25  ;;  %v16251_v41 = vpop.f32.mrf.mxu1 }
0x1198   :  { %14172 = vmatmul.mubr.msk.f32.gmra.mxu1 %vm129_vm2, %v3070_v13  ;;  %v3068_v13 = vsel %vm19700_vm8, %v3062_v26, %v3063_v11  ;;  %14212 = vmatprep.subr.mxu0 %v3554_v19  ;;  %v3553_v26 = vld [vmem:[%s19687_s5 + $0x90] sm:$0xff] }
0x1199   :  { %14174 = vmatprep.mubr.msk.f32.mxu1 %vm129_vm2, %v3094_v4  ;;  %14213 = vmatpush3.msra.mxu0 %v3554_v19  ;;  %v16253_v53 = vpop.f32.mrf.mxu1 }
0x119a   :  { %14188 = vmatmul.mubr.msk.f32.gmra.mxu0 %vm129_vm2, %v3133_v57  ;;  %14228 = vmatprep.subr.mxu1 %v3558_v34 }
0x119b   :  { %14190 = vmatprep.mubr.msk.f32.mxu0 %vm129_vm2, %v3108_v12  ;;  %14214 = vmatprep.subr.mxu0 %v3553_v26  ;;  %v16255_v48 = vpop.f32.mrf.mxu1 }
0x119c   :  { %14175 = vmatmul.mubr.msk.f32.gmra.mxu1 %vm129_vm2, %v3068_v13  ;;  %14215 = vmatpush3.msra.mxu0 %v3553_v26 }
0x119d   :  { %14177 = vmatprep.mubr.msk.f32.mxu1 %vm129_vm2, %v3067_v42  ;;  %14244 = vmatprep.subr.msk.mxu0 %vm2730_vm7, %v19693_v32  ;;  %v16257_v56 = vpop.f32.mrf.mxu1  ;;  %v12476_v42 = vld [vmem:[%s19689_s7 + $0xe] ss:$0 sm:$0xff] }
0x119e   :  { %14191 = vmatmul.mubr.msk.f32.gmra.mxu0 %vm129_vm2, %v3107_v18 }
0x119f   :  { %14193 = vmatprep.mubr.msk.f32.mxu0 %vm129_vm2, %v3106_v20  ;;  %v16259_v1 = vpop.f32.mrf.mxu1 }
0x11a0   :  { %14178 = vmatmul.mubr.msk.f32.gmra.mxu1 %vm129_vm2, %v3066_v23 }
0x11a1   :  { %v16261_v10 = vpop.f32.mrf.mxu1 }
0x11a2   :  { %14194 = vmatmul.mubr.msk.f32.gmra.mxu0 %vm129_vm2, %v3137_v16 }
0x11a8   :  { %v14157_v37 = vpop.f32.mrf.mxu0 }
0x11aa   :  { %v3238_v2 = vpop.f32.mrf.mxu0 }
0x124d   :  { %v14160_v58 = vpop.f32.mrf.mxu0 }
0x124f   :  { %v3248_v4 = vpop.f32.mrf.mxu0 }
0x1252   :  { %v14163_v11 = vpop.f32.mrf.mxu0 }
0x1254   :  { %v3258_v57 = vpop.f32.mrf.mxu0  ;;  %v14170_v14 = vpop.f32.mrf.mxu1 }
0x1255   :  { %v3363_v7 = vadd.f32 %v14170_v14, %v14154_v40 }
0x1256   :  { %v3357_v12 = vpop.f32.mrf.mxu1  ;;  %v14186_v51 = vpop.f32.mrf.mxu0 }
0x1257   :  { %v3358_v13 = vadd.f32 %v3357_v12, %v3228_v3  ;;  %v3526_v18 = vadd.f32 %v14186_v51, %v3363_v7 }
0x1258   :  { %v14173_v20 = vpop.f32.mrf.mxu1  ;;  %v3486_v29 = vpop.f32.mrf.mxu0 }
0x1259   :  { %v3373_v23 = vadd.f32 %v14173_v20, %v14157_v37  ;;  %v3525_v16 = vadd.f32 %v3486_v29, %v3358_v13  ;;  %v3538_v33 = vadd.f32 %v12476_v42, %v3526_v18  ;;  %v3557_v37 = vld [vmem:[%s19687_s5 + $0xb0] sm:$0xff] }
0x125a   :  { %v3367_v25 = vpop.f32.mrf.mxu1  ;;  %v14189_v19 = vpop.f32.mrf.mxu0 }
0x125b   :  { %v3537_v26 = vadd.f32 %v12476_v42, %v3525_v16  ;;  %v3368_v6 = vadd.f32 %v3367_v25, %v3238_v2  ;;  %v3528_v32 = vadd.f32 %v14189_v19, %v3373_v23  ;;  %v16268_v3 = vmax.f32 %v3538_v33, 0.0 }
0x125c   :  { %v14176_v62 = vpop.f32.mrf.mxu1  ;;  %v3496_v40 = vpop.f32.mrf.mxu0 }
0x125d   :  { %v16266_v14 = vmax.f32 %v3537_v26, 0.0  ;;  %v3540_v12 = vadd.f32 %v12476_v42, %v3528_v32  ;;  %v3383_v44 = vadd.f32 %v14176_v62, %v14160_v58  ;;  %v3527_v28 = vadd.f32 %v3496_v40, %v3368_v6 }
0x125e   :  { %v3377_v7 = vpop.f32.mrf.mxu1  ;;  %v14192_v51 = vpop.f32.mrf.mxu0 }
0x125f   :  { %v3378_v50 = vadd.f32 %v3377_v7, %v3248_v4  ;;  %14200 = vmatprep.mubr.msk.f32.mxu1 %vm129_vm2, %v16266_v14  ;;  %v3539_v2 = vadd.f32 %v12476_v42, %v3527_v28  ;;  %v3530_v13 = vadd.f32 %v14192_v51, %v3383_v44  ;;  %v3548_v6 = vmax.f32 %v3540_v12, 0.0 }
0x1260   :  { %v14179_v18 = vpop.f32.mrf.mxu1  ;;  %v3506_v20 = vpop.f32.mrf.mxu0  ;;  %14201 = vmatmul.mubr.msk.f32.vlgmr.msra.gmra.mxu1 %vm129_vm2, %v16268_v3  ;;  %v19789_v44 = vmov 1.0   ;;  %v3584_v51 = vrot.slane %v16266_v14, 1 }
0x1261   :  { %v3393_v32 = vadd.f32 %v14179_v18, %v14163_v11  ;;  %v3529_v62 = vadd.f32 %v3506_v20, %v3378_v50  ;;  %14229 = vmatpush3.msra.mxu1 %v3558_v34  ;;  %v3547_v58 = vmax.f32 %v3539_v2, 0.0  ;;  %v3542_v23 = vadd.f32 %v12476_v42, %v3530_v13 }
0x1262   :  { %v3387_v4 = vpop.f32.mrf.mxu1  ;;  %v14195_v29 = vpop.f32.mrf.mxu0  ;;  %14230 = vmatprep.subr.mxu1 %v3557_v37  ;;  %v3561_v2 = vrot.slane %v16268_v3, 7  ;;  %v3585_v13 = vrot.slane %v16268_v3, 1 }
0x1263   :  { %v3541_v16 = vadd.f32 %v12476_v42, %v3529_v62  ;;  %v3388_v33 = vadd.f32 %v3387_v4, %v3258_v57  ;;  %v3532_v25 = vadd.f32 %v14195_v29, %v3393_v32  ;;  %14231 = vmatpush3.msra.mxu1 %v3557_v37  ;;  %14203 = vmatprep.mubr.msk.f32.mxu1 %vm129_vm2, %v3547_v58  ;;  %v3550_v19 = vmax.f32 %v3542_v23, 0.0 }
0x1264   :  { %v3516_v28 = vpop.f32.mrf.mxu0  ;;  %14260 = vmatprep.subr.msk.mxu1 %vm2730_vm7, %v19789_v44  ;;  %14204 = vmatmul.mubr.msk.f32.gmra.mxu1 %vm129_vm2, %v3548_v6  ;;  %v3560_v57 = vrot.slane %v16266_v14, 7  ;;  %v3562_v37 = vrot.slane %v3547_v58, 7  ;;  %v3586_v20 = vrot.slane %v3547_v58, 1  ;;  %v3563_v62 = vrot.slane %v3548_v6, 7 }
0x1265   :  { %v3549_v11 = vmax.f32 %v3541_v16, 0.0  ;;  %v3544_v50 = vadd.f32 %v12476_v42, %v3532_v25  ;;  %v3531_v34 = vadd.f32 %v3516_v28, %v3388_v33  ;;  %v3598_v14 = vsel %vm19699_vm10, %v3584_v51, %v3585_v13 }
0x1266   :  { %v3574_v3 = vsel %vm19700_vm8, %v3560_v57, %v3561_v2  ;;  %v3573_v58 = vsel %vm19700_vm8, %v3561_v2, %v3562_v37  ;;  %v3587_v29 = vrot.slane %v3548_v6, 1  ;;  %v3597_v16 = vsel %vm19699_vm10, %v3585_v13, %v3586_v20 }
0x1267   :  { %v3552_v26 = vmax.f32 %v3544_v50, 0.0  ;;  %v3543_v40 = vadd.f32 %v12476_v42, %v3531_v34  ;;  %14206 = vmatprep.mubr.msk.f32.mxu1 %vm129_vm2, %v3549_v11  ;;  %v3564_v18 = vrot.slane %v3549_v11, 7  ;;  %v3588_v4 = vrot.slane %v3549_v11, 1 }
0x1268   :  { %14207 = vmatmul.mubr.msk.f32.gmra.mxu1 %vm129_vm2, %v3550_v19  ;;  %v3596_v6 = vsel %vm19699_vm10, %v3586_v20, %v3587_v29  ;;  %v3572_v33 = vsel %vm19700_vm8, %v3562_v37, %v3563_v62  ;;  %v3565_v50 = vrot.slane %v3550_v19, 7  ;;  %v3589_v34 = vrot.slane %v3550_v19, 1 }
0x1269   :  { %v3567_v12 = vrot.slane %v3552_v26, 7  ;;  %v3551_v7 = vmax.f32 %v3543_v40, 0.0  ;;  %v3571_v23 = vsel %vm19700_vm8, %v3563_v62, %v3564_v18  ;;  %v3595_v25 = vsel %vm19699_vm10, %v3587_v29, %v3588_v4 }
0x126a   :  { %v3580_v28 = vsel %vm16177_vm12, %v3571_v23, 0.0  ;;  %v3603_v40 = vsel %vm16184_vm13, %v3595_v25, 0.0  ;;  %v3591_v37 = vrot.slane %v3552_v26, 1  ;;  %v3594_v19 = vsel %vm19699_vm10, %v3588_v4, %v3589_v34 }
0x126b   :  { %14209 = vmatprep.mubr.msk.f32.mxu1 %vm129_vm2, %v3551_v7  ;;  %v3575_v42 = vsel %vm19700_vm8, %v3567_v12, %v3560_v57  ;;  %v3566_v11 = vrot.slane %v3551_v7, 7  ;;  %v3590_v57 = vrot.slane %v3551_v7, 1  ;;  %v3570_v2 = vsel %vm19700_vm8, %v3564_v18, %v3565_v50 }
0x126c   :  { %v3576_v32 = vsel %vm16151_vm4, %v3575_v42, 0.0  ;;  %14210 = vmatmul.mubr.msk.f32.gmra.mxu1 %vm129_vm2, %v3552_v26  ;;  %v3599_v18 = vsel %vm19699_vm10, %v3591_v37, %v3584_v51 }
0x126d   :  { %14216 = vmatprep.mubr.msk.f32.mxu0 %vm129_vm2, %v3576_v32  ;;  %14232 = vmatprep.mubr.msk.f32.mxu1 %vm129_vm2, %v3598_v14  ;;  %v3569_v31 = vsel %vm19700_vm8, %v3565_v50, %v3566_v11  ;;  %v3593_v26 = vsel %vm19699_vm10, %v3589_v34, %v3590_v57  ;;  %v3592_v7 = vsel %vm19699_vm10, %v3590_v57, %v3591_v37  ;;  %v3607_v36 = vsel %vm16216_vm14, %v3599_v18, 0.0 }
0x126e   :  { %14217 = vmatmul.mubr.msk.f32.vlgmr.msra.gmra.mxu0 %vm129_vm2, %v3574_v3  ;;  %v3568_v13 = vsel %vm19700_vm8, %v3566_v11, %v3567_v12 }
0x126f   :  { %14219 = vmatprep.mubr.msk.f32.mxu0 %vm129_vm2, %v3573_v58  ;;  %14245 = vmatpush3.msk.msra.mxu0 %vm2730_vm7, %v19789_v44 }
0x1270   :  { %14246 = vmatprep.subr.msk.mxu0 %vm2729_vm11, %v19789_v44  ;;  %14233 = vmatmul.mubr.msk.f32.vlgmr.msra.gmra.mxu1 %vm129_vm2, %v3597_v16 }
0x1271   :  { %14247 = vmatpush3.msk.msra.mxu0 %vm2729_vm11, %v19789_v44  ;;  %14235 = vmatprep.mubr.msk.f32.mxu1 %vm129_vm2, %v3596_v6 }
0x1272   :  { %14220 = vmatmul.mubr.msk.f32.gmra.mxu0 %vm129_vm2, %v3572_v33  ;;  %14261 = vmatpush3.msk.msra.mxu1 %vm2730_vm7, %v19789_v44 }
0x1273   :  { %14222 = vmatprep.mubr.msk.f32.mxu0 %vm129_vm2, %v3580_v28  ;;  %14262 = vmatprep.subr.msk.mxu1 %vm2729_vm11, %v19789_v44 }
0x1274   :  { %14236 = vmatmul.mubr.msk.f32.gmra.mxu1 %vm129_vm2, %v3603_v40 }
0x1275   :  { %14238 = vmatprep.mubr.msk.f32.mxu1 %vm129_vm2, %v3594_v19  ;;  %14263 = vmatpush3.msk.msra.mxu1 %vm2729_vm11, %v19789_v44 }
0x1276   :  { %14223 = vmatmul.mubr.msk.f32.gmra.mxu0 %vm129_vm2, %v3570_v2 }
0x1277   :  { %14225 = vmatprep.mubr.msk.f32.mxu0 %vm129_vm2, %v3569_v31 }
0x1278   :  { %14239 = vmatmul.mubr.msk.f32.gmra.mxu1 %vm129_vm2, %v3593_v26 }
0x1279   :  { %14241 = vmatprep.mubr.msk.f32.mxu1 %vm129_vm2, %v3592_v7 }
0x127a   :  { %14226 = vmatmul.mubr.msk.f32.gmra.mxu0 %vm129_vm2, %v3568_v13 }
0x127c   :  { %14242 = vmatmul.mubr.msk.f32.gmra.mxu1 %vm129_vm2, %v3607_v36 }
0x127d   :  { %14264 = vmatprep.mubr.msk.f32.mxu1 %vm129_vm2, %v16090_v52 }
0x1280   :  { %14265 = vmatmul.mubr.msk.f32.vlgmr.msra.gmra.mxu1 %vm129_vm2, %v16087_v5  ;;  %v4300_v5 = vld [vmem:[%s19687_s5 + $0x18] sm:$0xff] }
0x1281   :  { %14267 = vmatprep.mubr.msk.f32.mxu1 %vm129_vm2, %v16107_v63  ;;  %14276 = vmatprep.subr.mxu0 %v4300_v5 }
0x1284   :  { %14268 = vmatmul.mubr.msk.f32.gmra.mxu1 %vm129_vm2, %v16103_v60 }
0x1285   :  { %14270 = vmatprep.mubr.msk.f32.mxu1 %vm129_vm2, %v16128_v15 }
0x1288   :  { %14271 = vmatmul.mubr.msk.f32.gmra.mxu1 %vm129_vm2, %v16126_v54 }
0x1289   :  { %14273 = vmatprep.mubr.msk.f32.mxu1 %vm129_vm2, %v16145_v17 }
0x128c   :  { %14274 = vmatmul.mubr.msk.f32.gmra.mxu1 %vm129_vm2, %v16135_v22  ;;  %v12501_v22 = vld [vmem:[%s19689_s7 + $0xf] ss:$0 sm:$0xff] }
0x1320   :  { %v14202_v52 = vpop.f32.mrf.mxu1 }
0x1322   :  { %v3698_v63 = vpop.f32.mrf.mxu1 }
0x1324   :  { %v14205_v60 = vpop.f32.mrf.mxu1 }
0x1326   :  { %v3708_v12 = vpop.f32.mrf.mxu1 }
0x1328   :  { %v14208_v51 = vpop.f32.mrf.mxu1 }
0x132a   :  { %v3718_v15 = vpop.f32.mrf.mxu1 }
0x132c   :  { %v14211_v42 = vpop.f32.mrf.mxu1 }
0x132e   :  { %v14218_v20 = vpop.f32.mrf.mxu0  ;;  %v3728_v54 = vpop.f32.mrf.mxu1 }
0x132f   :  { %v3833_v32 = vadd.f32 %v14218_v20, %v14202_v52 }
0x1330   :  { %v3827_v62 = vpop.f32.mrf.mxu0  ;;  %v14234_v4 = vpop.f32.mrf.mxu1 }
0x1331   :  { %v3828_v17 = vadd.f32 %v3827_v62, %v3698_v63  ;;  %v3996_v14 = vadd.f32 %v14234_v4, %v3833_v32 }
0x1332   :  { %v14221_v3 = vpop.f32.mrf.mxu0  ;;  %v3956_v29 = vpop.f32.mrf.mxu1 }
0x1333   :  { %v3843_v58 = vadd.f32 %v14221_v3, %v14205_v60  ;;  %v4008_v23 = vadd.f32 %v12501_v22, %v3996_v14  ;;  %v3995_v16 = vadd.f32 %v3956_v29, %v3828_v17 }
0x1334   :  { %v3837_v6 = vpop.f32.mrf.mxu0  ;;  %v14237_v25 = vpop.f32.mrf.mxu1 }
0x1335   :  { %v3838_v33 = vadd.f32 %v3837_v6, %v3708_v12  ;;  %v4007_v28 = vadd.f32 %v12501_v22, %v3995_v16  ;;  %v3998_v11 = vadd.f32 %v14237_v25, %v3843_v58  ;;  %v4016_v34 = vsub.f32 %v16247_v38, %v4008_v23 }
0x1336   :  { %v14224_v50 = vpop.f32.mrf.mxu0  ;;  %v3966_v57 = vpop.f32.mrf.mxu1 }
0x1337   :  { %v3853_v40 = vadd.f32 %v14224_v50, %v14208_v51  ;;  %v4015_v37 = vsub.f32 %v16249_v39, %v4007_v28  ;;  %v4010_v19 = vadd.f32 %v12501_v22, %v3998_v11  ;;  %v3997_v2 = vadd.f32 %v3966_v57, %v3838_v33  ;;  %v4297_v33 = vld [vmem:[%s19687_s5] sm:$0xff] }
0x1338   :  { %v3847_v31 = vpop.f32.mrf.mxu0  ;;  %v14240_v7 = vpop.f32.mrf.mxu1  ;;  %v4024_v63 = vmul.f32 %v15956_v21, %v4016_v34 }
0x1339   :  { %v3848_v26 = vadd.f32 %v3847_v31, %v3718_v15  ;;  %v4009_v13 = vadd.f32 %v12501_v22, %v3997_v2  ;;  %v4000_v18 = vadd.f32 %v14240_v7, %v3853_v40  ;;  %v4023_v52 = vmul.f32 %v15953_v9, %v4015_v37  ;;  %v4301_v40 = vld [vmem:[%s19687_s5 + $0x20] sm:$0xff] }
0x133a   :  { %v14227_v36 = vpop.f32.mrf.mxu0  ;;  %v4018_v60 = vsub.f32 %v16251_v41, %v4010_v19  ;;  %v3976_v38 = vpop.f32.mrf.mxu1 }
0x133b   :  { %v3863_v12 = vadd.f32 %v14227_v36, %v14211_v42  ;;  %v4017_v51 = vsub.f32 %v16253_v53, %v4009_v13  ;;  %v4012_v20 = vadd.f32 %v12501_v22, %v4000_v18  ;;  %v3999_v39 = vadd.f32 %v3976_v38, %v3848_v26  ;;  %14248 = vmatprep.mubr.msk.f32.mxu0 %vm129_vm2, %v4023_v52 }
0x133c   :  { %v3857_v32 = vpop.f32.mrf.mxu0  ;;  %v14243_v62 = vpop.f32.mrf.mxu1  ;;  %14249 = vmatmul.mubr.msk.f32.vlgmr.msra.gmra.mxu0 %vm129_vm2, %v4024_v63  ;;  %v4026_v41 = vmul.f32 %v16029_v47, %v4018_v60 }
0x133d   :  { %v3858_v15 = vadd.f32 %v3857_v32, %v3728_v54  ;;  %v4011_v17 = vadd.f32 %v12501_v22, %v3999_v39  ;;  %v4002_v4 = vadd.f32 %v14243_v62, %v3863_v12  ;;  %v4025_v14 = vmul.f32 %v16031_v59, %v4017_v51  ;;  %14277 = vmatpush3.msra.mxu0 %v4300_v5 }
0x133e   :  { %v4020_v42 = vsub.f32 %v16255_v48, %v4012_v20  ;;  %v3986_v3 = vpop.f32.mrf.mxu1 }
0x133f   :  { %v4019_v53 = vsub.f32 %v16257_v56, %v4011_v17  ;;  %v4014_v58 = vadd.f32 %v12501_v22, %v4002_v4  ;;  %v4001_v29 = vadd.f32 %v3986_v3, %v3858_v15  ;;  %14251 = vmatprep.mubr.msk.f32.mxu0 %vm129_vm2, %v4025_v14 }
0x1340   :  { %14252 = vmatmul.mubr.msk.f32.gmra.mxu0 %vm129_vm2, %v4026_v41  ;;  %v4028_v16 = vmul.f32 %v16054_v30, %v4020_v42 }
0x1341   :  { %v4013_v54 = vadd.f32 %v12501_v22, %v4001_v29  ;;  %v4027_v23 = vmul.f32 %v16048_v27, %v4019_v53  ;;  %v4022_v5 = vsub.f32 %v16259_v1, %v4014_v58  ;;  %v4299_v22 = vld [vmem:[%s19687_s5 + $0x10] sm:$0xff]  ;;  %v4298_v1 = vld [vmem:[%s19687_s5 + $0x8] sm:$0xff] }
0x1342   :  { %14278 = vmatprep.subr.mxu0 %v4299_v22  ;;  %14292 = vmatprep.subr.mxu1 %v4298_v1 }
0x1343   :  { %v4021_v6 = vsub.f32 %v16261_v10, %v4013_v54  ;;  %14254 = vmatprep.mubr.msk.f32.mxu0 %vm129_vm2, %v4027_v23  ;;  %v4030_v56 = vmul.f32 %v16071_v43, %v4022_v5  ;;  %14279 = vmatpush3.msra.mxu0 %v4299_v22  ;;  %v4302_v10 = vld [vmem:[%s19687_s5 + $0x28] sm:$0xff] }
0x1344   :  { %14255 = vmatmul.mubr.msk.f32.gmra.mxu0 %vm129_vm2, %v4028_v16  ;;  %14308 = vmatprep.subr.mxu0 %v4302_v10 }
0x1345   :  { %v4029_v48 = vmul.f32 %v16074_v46, %v4021_v6  ;;  %14293 = vmatpush3.msra.mxu1 %v4298_v1 }
0x1346   :  { %14294 = vmatprep.subr.mxu1 %v4297_v33 }
0x1347   :  { %14257 = vmatprep.mubr.msk.f32.mxu0 %vm129_vm2, %v4029_v48  ;;  %14295 = vmatpush3.msra.mxu1 %v4297_v33 }
0x1348   :  { %14258 = vmatmul.mubr.msk.f32.gmra.mxu0 %vm129_vm2, %v4030_v56 }
0x13fc   :  { %v14250_v25 = vpop.f32.mrf.mxu0 }
0x13fd   :  { %v16426_v50 = vmul.f32 %v15956_v21, %v14250_v25 }
0x13fe   :  { %v4121_v28 = vpop.f32.mrf.mxu0 }
0x13ff   :  { %v16423_v11 = vmul.f32 %v15953_v9, %v4121_v28  ;;  %v4329_v38 = vrot.slane %v16426_v50, 1  ;;  %v4305_v20 = vrot.slane %v16426_v50, 7 }
0x1400   :  { %v14253_v34 = vpop.f32.mrf.mxu0 }
0x1401   :  { %14280 = vmatprep.mubr.msk.f32.mxu0 %vm129_vm2, %v16423_v11  ;;  %v16439_v19 = vmul.f32 %v16029_v47, %v14253_v34  ;;  %v4328_v52 = vrot.slane %v16423_v11, 1  ;;  %v4304_v12 = vrot.slane %v16423_v11, 7 }
0x1402   :  { %v4131_v57 = vpop.f32.mrf.mxu0  ;;  %14281 = vmatmul.mubr.msk.f32.vlgmr.msra.gmra.mxu0 %vm129_vm2, %v16426_v50 }
0x1403   :  { %v16436_v37 = vmul.f32 %v16031_v59, %v4131_v57  ;;  %14309 = vmatpush3.msra.mxu0 %v4302_v10  ;;  %v4342_v17 = vsel %vm19699_vm10, %v4328_v52, %v4329_v38  ;;  %v4318_v14 = vsel %vm19700_vm8, %v4304_v12, %v4305_v20  ;;  %v4307_v41 = vrot.slane %v16439_v19, 7 }
0x1404   :  { %v14256_v2 = vpop.f32.mrf.mxu0  ;;  %14310 = vmatprep.subr.mxu0 %v4301_v40  ;;  %v4331_v3 = vrot.slane %v16439_v19, 1 }
0x1405   :  { %14283 = vmatprep.mubr.msk.f32.mxu0 %vm129_vm2, %v16436_v37  ;;  %14311 = vmatpush3.msra.mxu0 %v4301_v40  ;;  %v16449_v7 = vmul.f32 %v16054_v30, %v14256_v2  ;;  %v4306_v51 = vrot.slane %v16436_v37, 7  ;;  %v4330_v39 = vrot.slane %v16436_v37, 1 }
0x1406   :  { %v4141_v31 = vpop.f32.mrf.mxu0  ;;  %14284 = vmatmul.mubr.msk.f32.gmra.mxu0 %vm129_vm2, %v16439_v19 }
0x1407   :  { %v16446_v26 = vmul.f32 %v16048_v27, %v4141_v31  ;;  %v4317_v42 = vsel %vm19700_vm8, %v4305_v20, %v4306_v51  ;;  %v4341_v53 = vsel %vm19699_vm10, %v4329_v38, %v4330_v39  ;;  %v4340_v29 = vsel %vm19699_vm10, %v4330_v39, %v4331_v3  ;;  %v4770_v31 = vld [vmem:[%s19687_s5 + $0x48] sm:$0xff] }
0x1408   :  { %v14259_v13 = vpop.f32.mrf.mxu0  ;;  %v4316_v23 = vsel %vm19700_vm8, %v4306_v51, %v4307_v41  ;;  %v4333_v5 = vrot.slane %v16449_v7, 1  ;;  %v4309_v56 = vrot.slane %v16449_v7, 7  ;;  %14324 = vmatprep.subr.mxu1 %v4770_v31 }
0x1409   :  { %v16452_v18 = vmul.f32 %v16071_v43, %v14259_v13  ;;  %14286 = vmatprep.mubr.msk.f32.mxu0 %vm129_vm2, %v16446_v26  ;;  %v4308_v15 = vrot.slane %v16446_v26, 7  ;;  %v4332_v4 = vrot.slane %v16446_v26, 1  ;;  %v4769_v13 = vld [vmem:[%s19687_s5 + $0x40] sm:$0xff] }
0x140a   :  { %v4151_v36 = vpop.f32.mrf.mxu0  ;;  %14287 = vmatmul.mubr.msk.f32.gmra.mxu0 %vm129_vm2, %v16449_v7 }
0x140b   :  { %v4311_v63 = vrot.slane %v16452_v18, 7  ;;  %v16461_v60 = vmul.f32 %v16074_v46, %v4151_v36  ;;  %v4315_v58 = vsel %vm19700_vm8, %v4307_v41, %v4308_v15  ;;  %v4339_v54 = vsel %vm19699_vm10, %v4331_v3, %v4332_v4  ;;  %v4768_v36 = vld [vmem:[%s19687_s5 + $0x38] sm:$0xff] }
0x140c   :  { %v4324_v16 = vsel %vm16177_vm12, %v4315_v58, 0.0  ;;  %v4347_v48 = vsel %vm16184_vm13, %v4339_v54, 0.0  ;;  %v4338_v1 = vsel %vm19699_vm10, %v4332_v4, %v4333_v5  ;;  %v4335_v10 = vrot.slane %v16452_v18, 1  ;;  %14340 = vmatprep.subr.mxu0 %v4768_v36 }
0x140d   :  { %14289 = vmatprep.mubr.msk.f32.mxu0 %vm129_vm2, %v16461_v60  ;;  %v4319_v32 = vsel %vm19700_vm8, %v4311_v63, %v4304_v12  ;;  %v4310_v6 = vrot.slane %v16461_v60, 7  ;;  %v4334_v22 = vrot.slane %v16461_v60, 1  ;;  %v4314_v33 = vsel %vm19700_vm8, %v4308_v15, %v4309_v56  ;;  %v16552_v12 = vpop.f32.mrf.mxu1 }
0x140e   :  { %14290 = vmatmul.mubr.msk.f32.gmra.mxu0 %vm129_vm2, %v16452_v18  ;;  %v4320_v62 = vsel %vm16151_vm4, %v4319_v32, 0.0  ;;  %v4343_v40 = vsel %vm19699_vm10, %v4335_v10, %v4328_v52  ;;  %v4772_v52 = vld [vmem:[%s19687_s5 + $0x58] sm:$0xff] }
0x140f   :  { %14296 = vmatprep.mubr.msk.f32.mxu1 %vm129_vm2, %v4320_v62  ;;  %14312 = vmatprep.mubr.msk.f32.mxu0 %vm129_vm2, %v4342_v17  ;;  %v4313_v25 = vsel %vm19700_vm8, %v4309_v56, %v4310_v6  ;;  %v4337_v28 = vsel %vm19699_vm10, %v4333_v5, %v4334_v22  ;;  %v4336_v34 = vsel %vm19699_vm10, %v4334_v22, %v4335_v10  ;;  %v4351_v2 = vsel %vm16216_vm14, %v4343_v40, 0.0  ;;  %v16554_v38 = vpop.f32.mrf.mxu1 }
0x1410   :  { %14297 = vmatmul.mubr.msk.f32.vlgmr.msra.gmra.mxu1 %vm129_vm2, %v4318_v14  ;;  %v4312_v57 = vsel %vm19700_vm8, %v4310_v6, %v4311_v63  ;;  %v4767_v63 = vld [vmem:[%s19687_s5 + $0x30] sm:$0xff]  ;;  %v12546_v6 = vld [vmem:[%s19689_s7 + $0xc] ss:$0 sm:$0xff] }
0x1411   :  { %14299 = vmatprep.mubr.msk.f32.mxu1 %vm129_vm2, %v4317_v42  ;;  %14325 = vmatpush3.msra.mxu1 %v4770_v31  ;;  %v16556_v51 = vpop.f32.mrf.mxu1 }
0x1412   :  { %14313 = vmatmul.mubr.msk.f32.vlgmr.msra.gmra.mxu0 %vm129_vm2, %v4341_v53  ;;  %14326 = vmatprep.subr.mxu1 %v4769_v13 }
0x1413   :  { %14315 = vmatprep.mubr.msk.f32.mxu0 %vm129_vm2, %v4340_v29  ;;  %14327 = vmatpush3.msra.mxu1 %v4769_v13  ;;  %v16558_v20 = vpop.f32.mrf.mxu1 }
0x1414   :  { %14300 = vmatmul.mubr.msk.f32.gmra.mxu1 %vm129_vm2, %v4316_v23  ;;  %14341 = vmatpush3.msra.mxu0 %v4768_v36 }
0x1415   :  { %14302 = vmatprep.mubr.msk.f32.mxu1 %vm129_vm2, %v4324_v16  ;;  %14356 = vmatprep.subr.mxu1 %v4772_v52  ;;  %v16560_v39 = vpop.f32.mrf.mxu1 }
0x1416   :  { %14316 = vmatmul.mubr.msk.f32.gmra.mxu0 %vm129_vm2, %v4347_v48  ;;  %14342 = vmatprep.subr.mxu0 %v4767_v63 }
0x1417   :  { %14318 = vmatprep.mubr.msk.f32.mxu0 %vm129_vm2, %v4338_v1  ;;  %14343 = vmatpush3.msra.mxu0 %v4767_v63  ;;  %v16562_v62 = vpop.f32.mrf.mxu1 }
0x1418   :  { %14303 = vmatmul.mubr.msk.f32.gmra.mxu1 %vm129_vm2, %v4314_v33 }
0x1419   :  { %14305 = vmatprep.mubr.msk.f32.mxu1 %vm129_vm2, %v4313_v25  ;;  %v16564_v14 = vpop.f32.mrf.mxu1 }
0x141a   :  { %14319 = vmatmul.mubr.msk.f32.gmra.mxu0 %vm129_vm2, %v4337_v28 }
0x141b   :  { %14321 = vmatprep.mubr.msk.f32.mxu0 %vm129_vm2, %v4336_v34  ;;  %v16566_v3 = vpop.f32.mrf.mxu1 }
0x141c   :  { %14306 = vmatmul.mubr.msk.f32.gmra.mxu1 %vm129_vm2, %v4312_v57 }
0x141e   :  { %14322 = vmatmul.mubr.msk.f32.gmra.mxu0 %vm129_vm2, %v4351_v2 }
0x14c2   :  { %v14282_v32 = vpop.f32.mrf.mxu0 }
0x14c4   :  { %v4442_v15 = vpop.f32.mrf.mxu0 }
0x14c6   :  { %v14285_v17 = vpop.f32.mrf.mxu0 }
0x14c8   :  { %v4452_v4 = vpop.f32.mrf.mxu0 }
0x14ca   :  { %v14288_v41 = vpop.f32.mrf.mxu0 }
0x14cc   :  { %v4462_v42 = vpop.f32.mrf.mxu0 }
0x14ce   :  { %v14291_v53 = vpop.f32.mrf.mxu0 }
0x14d0   :  { %v4472_v58 = vpop.f32.mrf.mxu0  ;;  %v14298_v29 = vpop.f32.mrf.mxu1 }
0x14d1   :  { %v4577_v54 = vadd.f32 %v14298_v29, %v14282_v32 }
0x14d2   :  { %v4571_v23 = vpop.f32.mrf.mxu1  ;;  %v14314_v16 = vpop.f32.mrf.mxu0 }
0x14d3   :  { %v4572_v5 = vadd.f32 %v4571_v23, %v4442_v15  ;;  %v4740_v48 = vadd.f32 %v14314_v16, %v4577_v54 }
0x14d4   :  { %v14301_v56 = vpop.f32.mrf.mxu1  ;;  %v4700_v22 = vpop.f32.mrf.mxu0 }
0x14d5   :  { %v4587_v1 = vadd.f32 %v14301_v56, %v14285_v17  ;;  %v4739_v10 = vadd.f32 %v4700_v22, %v4572_v5  ;;  %v4752_v33 = vadd.f32 %v12546_v6, %v4740_v48  ;;  %v4771_v17 = vld [vmem:[%s19687_s5 + $0x50] sm:$0xff] }
0x14d6   :  { %v4581_v25 = vpop.f32.mrf.mxu1  ;;  %v14317_v28 = vpop.f32.mrf.mxu0 }
0x14d7   :  { %v4751_v34 = vadd.f32 %v12546_v6, %v4739_v10  ;;  %v4582_v40 = vadd.f32 %v4581_v25, %v4452_v4  ;;  %v4742_v57 = vadd.f32 %v14317_v28, %v4587_v1  ;;  %v16573_v36 = vmax.f32 %v4752_v33, 0.0 }
0x14d8   :  { %v14304_v2 = vpop.f32.mrf.mxu1  ;;  %v4710_v31 = vpop.f32.mrf.mxu0 }
0x14d9   :  { %v16571_v13 = vmax.f32 %v4751_v34, 0.0  ;;  %v4754_v63 = vadd.f32 %v12546_v6, %v4742_v57  ;;  %v4597_v32 = vadd.f32 %v14304_v2, %v14288_v41  ;;  %v4741_v15 = vadd.f32 %v4710_v31, %v4582_v40 }
0x14da   :  { %v4591_v29 = vpop.f32.mrf.mxu1  ;;  %v14320_v54 = vpop.f32.mrf.mxu0 }
0x14db   :  { %v4592_v23 = vadd.f32 %v4591_v29, %v4462_v42  ;;  %14328 = vmatprep.mubr.msk.f32.mxu1 %vm129_vm2, %v16571_v13  ;;  %v4753_v4 = vadd.f32 %v12546_v6, %v4741_v15  ;;  %v4744_v16 = vadd.f32 %v14320_v54, %v4597_v32  ;;  %v4762_v22 = vmax.f32 %v4754_v63, 0.0 }
0x14dc   :  { %v14307_v5 = vpop.f32.mrf.mxu1  ;;  %v4720_v48 = vpop.f32.mrf.mxu0  ;;  %14329 = vmatmul.mubr.msk.f32.vlgmr.msra.gmra.mxu1 %vm129_vm2, %v16573_v36  ;;  %v4774_v32 = vrot.slane %v16571_v13, 7 }
0x14dd   :  { %v4607_v56 = vadd.f32 %v14307_v5, %v14291_v53  ;;  %v4743_v41 = vadd.f32 %v4720_v48, %v4592_v23  ;;  %14357 = vmatpush3.msra.mxu1 %v4772_v52  ;;  %v4761_v1 = vmax.f32 %v4753_v4, 0.0  ;;  %v4756_v33 = vadd.f32 %v12546_v6, %v4744_v16 }
0x14de   :  { %v4601_v42 = vpop.f32.mrf.mxu1  ;;  %v14323_v10 = vpop.f32.mrf.mxu0  ;;  %14358 = vmatprep.subr.mxu1 %v4771_v17  ;;  %v4775_v23 = vrot.slane %v16573_v36, 7  ;;  %v4777_v48 = vrot.slane %v4762_v22, 7 }
0x14df   :  { %v4755_v25 = vadd.f32 %v12546_v6, %v4743_v41  ;;  %v4602_v28 = vadd.f32 %v4601_v42, %v4472_v58  ;;  %v4746_v34 = vadd.f32 %v14323_v10, %v4607_v56  ;;  %14359 = vmatpush3.msra.mxu1 %v4771_v17  ;;  %14331 = vmatprep.mubr.msk.f32.mxu1 %vm129_vm2, %v4761_v1  ;;  %v4764_v53 = vmax.f32 %v4756_v33, 0.0 }
0x14e0   :  { %v4730_v40 = vpop.f32.mrf.mxu0  ;;  %14332 = vmatmul.mubr.msk.f32.gmra.mxu1 %vm129_vm2, %v4762_v22  ;;  %v4798_v58 = vrot.slane %v16571_v13, 1  ;;  %v4776_v54 = vrot.slane %v4761_v1, 7  ;;  %v4799_v17 = vrot.slane %v16573_v36, 1  ;;  %v4800_v16 = vrot.slane %v4761_v1, 1 }
0x14e1   :  { %v4763_v57 = vmax.f32 %v4755_v25, 0.0  ;;  %v4758_v2 = vadd.f32 %v12546_v6, %v4746_v34  ;;  %v4745_v31 = vadd.f32 %v4730_v40, %v4602_v28  ;;  %v4788_v36 = vsel %vm19700_vm8, %v4774_v32, %v4775_v23 }
0x14e2   :  { %v4812_v13 = vsel %vm19699_vm10, %v4798_v58, %v4799_v17  ;;  %v4787_v41 = vsel %vm19700_vm8, %v4775_v23, %v4776_v54  ;;  %v4801_v1 = vrot.slane %v4762_v22, 1  ;;  %v4811_v10 = vsel %vm19699_vm10, %v4799_v17, %v4800_v16 }
0x14e3   :  { %v4766_v52 = vmax.f32 %v4758_v2, 0.0  ;;  %v4757_v63 = vadd.f32 %v12546_v6, %v4745_v31  ;;  %14334 = vmatprep.mubr.msk.f32.mxu1 %vm129_vm2, %v4763_v57  ;;  %v4778_v4 = vrot.slane %v4763_v57, 7  ;;  %v4802_v56 = vrot.slane %v4763_v57, 1 }
0x14e4   :  { %14335 = vmatmul.mubr.msk.f32.gmra.mxu1 %vm129_vm2, %v4764_v53  ;;  %v4810_v33 = vsel %vm19699_vm10, %v4800_v16, %v4801_v1  ;;  %v4786_v25 = vsel %vm19700_vm8, %v4776_v54, %v4777_v48  ;;  %v4779_v40 = vrot.slane %v4764_v53, 7  ;;  %v4803_v57 = vrot.slane %v4764_v53, 1 }
0x14e5   :  { %v4781_v15 = vrot.slane %v4766_v52, 7  ;;  %v4765_v29 = vmax.f32 %v4757_v63, 0.0  ;;  %v4785_v42 = vsel %vm19700_vm8, %v4777_v48, %v4778_v4  ;;  %v4809_v28 = vsel %vm19699_vm10, %v4801_v1, %v4802_v56 }
0x14e6   :  { %v4794_v22 = vsel %vm16177_vm12, %v4785_v42, 0.0  ;;  %v4817_v2 = vsel %vm16184_vm13, %v4809_v28, 0.0  ;;  %v4805_v63 = vrot.slane %v4766_v52, 1  ;;  %v4784_v54 = vsel %vm19700_vm8, %v4778_v4, %v4779_v40  ;;  %v16660_v28 = vld [vmem:[%s19689_s7 + $0xd] ss:$0 sm:$0xff] }
0x14e7   :  { %14337 = vmatprep.mubr.msk.f32.mxu1 %vm129_vm2, %v4765_v29  ;;  %v4789_v6 = vsel %vm19700_vm8, %v4781_v15, %v4774_v32  ;;  %v4780_v34 = vrot.slane %v4765_v29, 7  ;;  %v4804_v31 = vrot.slane %v4765_v29, 1  ;;  %v4808_v32 = vsel %vm19699_vm10, %v4802_v56, %v4803_v57 }
0x14e8   :  { %v4790_v5 = vsel %vm16151_vm4, %v4789_v6, 0.0  ;;  %14338 = vmatmul.mubr.msk.f32.gmra.mxu1 %vm129_vm2, %v4766_v52  ;;  %v4813_v17 = vsel %vm19699_vm10, %v4805_v63, %v4798_v58  ;;  %v5300_v6 = vld [vmem:[%s19688_s6 + $0x38] sm:$0xff] }
0x14e9   :  { %14344 = vmatprep.mubr.msk.f32.mxu0 %vm129_vm2, %v4790_v5  ;;  %14360 = vmatprep.mubr.msk.f32.mxu1 %vm129_vm2, %v4812_v13  ;;  %v4783_v53 = vsel %vm19700_vm8, %v4779_v40, %v4780_v34  ;;  %v4807_v52 = vsel %vm19699_vm10, %v4803_v57, %v4804_v31  ;;  %v4806_v29 = vsel %vm19699_vm10, %v4804_v31, %v4805_v63  ;;  %v4821_v4 = vsel %vm16216_vm14, %v4813_v17, 0.0  ;;  %v5297_v57 = vld [vmem:[%s19688_s6 + $0x20] sm:$0xff] }
0x14ea   :  { %14345 = vmatmul.mubr.msk.f32.vlgmr.msra.gmra.mxu0 %vm129_vm2, %v4788_v36  ;;  %v4782_v23 = vsel %vm19700_vm8, %v4780_v34, %v4781_v15  ;;  %v5299_v15 = vld [vmem:[%s19688_s6 + $0x30] sm:$0xff]  ;;  %14372 = vmatprep.subr.mxu0 %v5300_v6 }
0x14eb   :  { %14347 = vmatprep.mubr.msk.f32.mxu0 %vm129_vm2, %v4787_v41  ;;  %14373 = vmatpush3.msra.mxu0 %v5300_v6 }
0x14ec   :  { %14361 = vmatmul.mubr.msk.f32.vlgmr.msra.gmra.mxu1 %vm129_vm2, %v4811_v10  ;;  %14374 = vmatprep.subr.mxu0 %v5299_v15 }
0x14ed   :  { %14363 = vmatprep.mubr.msk.f32.mxu1 %vm129_vm2, %v4810_v33  ;;  %14375 = vmatpush3.msra.mxu0 %v5299_v15  ;;  %v5298_v33 = vld [vmem:[%s19688_s6 + $0x28] sm:$0xff] }
0x14ee   :  { %14348 = vmatmul.mubr.msk.f32.gmra.mxu0 %vm129_vm2, %v4786_v25  ;;  %14376 = vmatprep.subr.mxu0 %v5298_v33 }
0x14ef   :  { %14350 = vmatprep.mubr.msk.f32.mxu0 %vm129_vm2, %v4794_v22  ;;  %14377 = vmatpush3.msra.mxu0 %v5298_v33 }
0x14f0   :  { %14364 = vmatmul.mubr.msk.f32.gmra.mxu1 %vm129_vm2, %v4817_v2  ;;  %14378 = vmatprep.subr.mxu0 %v5297_v57 }
0x14f1   :  { %14366 = vmatprep.mubr.msk.f32.mxu1 %vm129_vm2, %v4808_v32  ;;  %14379 = vmatpush3.msra.mxu0 %v5297_v57 }
0x14f2   :  { %14351 = vmatmul.mubr.msk.f32.gmra.mxu0 %vm129_vm2, %v4784_v54 }
0x14f3   :  { %14353 = vmatprep.mubr.msk.f32.mxu0 %vm129_vm2, %v4783_v53 }
0x14f4   :  { %14367 = vmatmul.mubr.msk.f32.gmra.mxu1 %vm129_vm2, %v4807_v52 }
0x14f5   :  { %14369 = vmatprep.mubr.msk.f32.mxu1 %vm129_vm2, %v4806_v29 }
0x14f6   :  { %14354 = vmatmul.mubr.msk.f32.gmra.mxu0 %vm129_vm2, %v4782_v23 }
0x14f8   :  { %14370 = vmatmul.mubr.msk.f32.gmra.mxu1 %vm129_vm2, %v4821_v4 }
0x159c   :  { %v14330_v58 = vpop.f32.mrf.mxu1 }
0x159e   :  { %v4912_v16 = vpop.f32.mrf.mxu1 }
0x15a0   :  { %v14333_v5 = vpop.f32.mrf.mxu1 }
0x15a2   :  { %v4922_v48 = vpop.f32.mrf.mxu1 }
0x15a4   :  { %v14336_v56 = vpop.f32.mrf.mxu1 }
0x15a6   :  { %v4932_v13 = vpop.f32.mrf.mxu1 }
0x15a8   :  { %v14339_v36 = vpop.f32.mrf.mxu1 }
0x15aa   :  { %v14346_v41 = vpop.f32.mrf.mxu0  ;;  %v4942_v1 = vpop.f32.mrf.mxu1 }
0x15ab   :  { %v5047_v42 = vadd.f32 %v14346_v41, %v14330_v58  ;;  %v5296_v58 = vld [vmem:[%s19688_s6 + $0x18] sm:$0xff] }
0x15ac   :  { %v5041_v10 = vpop.f32.mrf.mxu0  ;;  %v14362_v22 = vpop.f32.mrf.mxu1  ;;  %14392 = vmatprep.subr.mxu1 %v5296_v58 }
0x15ad   :  { %v5042_v25 = vadd.f32 %v5041_v10, %v4912_v16  ;;  %v5210_v34 = vadd.f32 %v14362_v22, %v5047_v42  ;;  %14393 = vmatpush3.msra.mxu1 %v5296_v58  ;;  %v5293_v58 = vld [vmem:[%s19688_s6] sm:$0xff] }
0x15ae   :  { %v14349_v40 = vpop.f32.mrf.mxu0  ;;  %v5170_v31 = vpop.f32.mrf.mxu1 }
0x15af   :  { %v5057_v2 = vadd.f32 %v14349_v40, %v14333_v5  ;;  %v5222_v63 = vadd.f32 %v16660_v28, %v5210_v34  ;;  %v5209_v32 = vadd.f32 %v5170_v31, %v5042_v25 }
0x15b0   :  { %v5051_v54 = vpop.f32.mrf.mxu0  ;;  %v14365_v52 = vpop.f32.mrf.mxu1 }
0x15b1   :  { %v5052_v53 = vadd.f32 %v5051_v54, %v4922_v48  ;;  %v5230_v29 = vsub.f32 %v16552_v12, %v5222_v63  ;;  %v5221_v23 = vadd.f32 %v16660_v28, %v5209_v32  ;;  %v5212_v17 = vadd.f32 %v14365_v52, %v5057_v2  ;;  %v16677_v12 = vld [vmem:[%s19688_s6 + $0x58] sm:$0xff] }
0x15b2   :  { %v14352_v4 = vpop.f32.mrf.mxu0  ;;  %v5180_v15 = vpop.f32.mrf.mxu1  ;;  %14412 = vmatprep.subr.mxu0 %v16677_v12 }
0x15b3   :  { %v5067_v6 = vadd.f32 %v14352_v4, %v14336_v56  ;;  %v5229_v16 = vsub.f32 %v16554_v38, %v5221_v23  ;;  %v5224_v5 = vadd.f32 %v16660_v28, %v5212_v17  ;;  %v5211_v41 = vadd.f32 %v5180_v15, %v5052_v53 }
0x15b4   :  { %v5061_v42 = vpop.f32.mrf.mxu0  ;;  %v5238_v48 = vmul.f32 %v15956_v21, %v5230_v29  ;;  %v14368_v10 = vpop.f32.mrf.mxu1 }
0x15b5   :  { %v5062_v56 = vadd.f32 %v5061_v42, %v4932_v13  ;;  %v5232_v33 = vsub.f32 %v16556_v51, %v5224_v5  ;;  %v5223_v38 = vadd.f32 %v16660_v28, %v5211_v41  ;;  %v5214_v25 = vadd.f32 %v14368_v10, %v5067_v6  ;;  %v5295_v13 = vld [vmem:[%s19688_s6 + $0x10] sm:$0xff] }
0x15b6   :  { %v14355_v22 = vpop.f32.mrf.mxu0  ;;  %v5246_v34 = vmul.f32 %v15956_v21, %v5238_v48  ;;  %v5190_v57 = vpop.f32.mrf.mxu1  ;;  %v5237_v2 = vmul.f32 %v15953_v9, %v5229_v16  ;;  %14394 = vmatprep.subr.mxu1 %v5295_v13 }
0x15b7   :  { %v5077_v40 = vadd.f32 %v14355_v22, %v14339_v36  ;;  %v5231_v31 = vsub.f32 %v16558_v20, %v5223_v38  ;;  %v5226_v63 = vadd.f32 %v16660_v28, %v5214_v25  ;;  %v5213_v32 = vadd.f32 %v5190_v57, %v5062_v56  ;;  %14395 = vmatpush3.msra.mxu1 %v5295_v13  ;;  %v5301_v25 = vld [vmem:[%s19688_s6 + $0x40] sm:$0xff] }
0x15b8   :  { %5263 = vrot.lane.b32.xlu1 %v5246_v34, %s15419_s12  ;;  %v5071_v51 = vpop.f32.mrf.mxu0  ;;  %v5240_v54 = vmul.f32 %v16029_v47, %v5232_v33  ;;  %v14371_v21 = vpop.f32.mrf.mxu1  ;;  %v5245_v36 = vmul.f32 %v15953_v9, %v5237_v2 }
0x15b9   :  { %v5072_v53 = vadd.f32 %v5071_v51, %v4942_v1  ;;  %v5234_v52 = vsub.f32 %v16560_v39, %v5226_v63  ;;  %v5225_v29 = vadd.f32 %v16660_v28, %v5213_v32  ;;  %v5216_v23 = vadd.f32 %v14371_v21, %v5077_v40  ;;  %v5294_v1 = vld [vmem:[%s19688_s6 + $0x8] sm:$0xff] }
0x15ba   :  { %v5248_v20 = vmul.f32 %v16029_v47, %v5240_v54  ;;  %5261 = vrot.lane.b32.xlu0 %v5245_v36, %s15419_s12  ;;  %v5200_v17 = vpop.f32.mrf.mxu1  ;;  %v5239_v4 = vmul.f32 %v16031_v59, %v5231_v31  ;;  %14396 = vmatprep.subr.mxu1 %v5294_v1 }
0x15bb   :  { %v5233_v9 = vsub.f32 %v16562_v62, %v5225_v29  ;;  %v5228_v6 = vadd.f32 %v16660_v28, %v5216_v23  ;;  %v5215_v39 = vadd.f32 %v5200_v17, %v5072_v53  ;;  %v5242_v15 = vmul.f32 %v16054_v30, %v5234_v52  ;;  %14397 = vmatpush3.msra.mxu1 %v5294_v1 }
0x15bc   :  { %5267 = vrot.lane.b32.xlu1 %v5248_v20, %s15419_s12  ;;  %v5247_v47 = vmul.f32 %v16031_v59, %v5239_v4  ;;  %14398 = vmatprep.subr.mxu1 %v5293_v58 }
0x15bd   :  { %v5236_v16 = vsub.f32 %v16564_v14, %v5228_v6  ;;  %v5227_v5 = vadd.f32 %v16660_v28, %v5215_v39  ;;  %v5250_v62 = vmul.f32 %v16054_v30, %v5242_v15  ;;  %v5241_v41 = vmul.f32 %v16048_v27, %v5233_v9  ;;  %14399 = vmatpush3.msra.mxu1 %v5293_v58 }
0x15be   :  { %5265 = vrot.lane.b32.xlu0 %v5247_v47, %s15419_s12 }
0x15bf   :  { %v5235_v42 = vsub.f32 %v16566_v3, %v5227_v5  ;;  %v5249_v59 = vmul.f32 %v16048_v27, %v5241_v41  ;;  %v5244_v48 = vmul.f32 %v16071_v43, %v5236_v16 }
0x15c0   :  { %5271 = vrot.lane.b32.xlu1 %v5250_v62, %s15419_s12 }
0x15c1   :  { %v5243_v14 = vmul.f32 %v16074_v46, %v5235_v42  ;;  %v5252_v28 = vmul.f32 %v16071_v43, %v5244_v48  ;;  %v5303_v43 = vld [vmem:[%s19688_s6 + $0x50] sm:$0xff] }
0x15c2   :  { %5269 = vrot.lane.b32.xlu0 %v5249_v59, %s15419_s12 }
0x15c3   :  { %v5251_v30 = vmul.f32 %v16074_v46, %v5243_v14  ;;  %v5769_v14 = vshra.s32 %v15696_v61, 1 }
0x15c5   :  { %5273 = vrot.lane.b32.xlu1 %v5251_v30, %s15419_s12 }
0x15c6   :  { %5275 = vrot.lane.b32.xlu0 %v5252_v28, %s15419_s12  ;;  %v19792_v28 = vmov 0.0  }
0x162a   :  { %v5264_v3 = vpop.permute.xlu1 %5263 }
0x162b   :  { %v5286_v33 = vsel %vm129_vm2, %v16426_v50, %v5264_v3 }
0x162c   :  { %v5262_v56 = vpop.permute.xlu0 %5261  ;;  %v5331_v13 = vrot.slane %v5286_v33, 1  ;;  %v5307_v53 = vrot.slane %v5286_v33, 7 }
0x162d   :  { %v16725_v27 = vsel %vm129_vm2, %v16423_v11, %v5262_v56  ;;  %v5302_v11 = vld [vmem:[%s19688_s6 + $0x48] sm:$0xff]  ;;  %v6032_v56 = vld [vmem:[%s19688_s6 + $0x90] sm:$0xff] }
0x162e   :  { %v5268_v10 = vpop.permute.xlu1 %5267  ;;  %14380 = vmatprep.mubr.msk.f32.mxu0 %vm19701_vm0, %v16725_v27  ;;  %v5330_v34 = vrot.slane %v16725_v27, 1 }
0x162f   :  { %14381 = vmatmul.mubr.msk.f32.vlgmr.msra.gmra.mxu0 %vm19701_vm0, %v5286_v33  ;;  %v5288_v50 = vsel %vm129_vm2, %v16439_v19, %v5268_v10 }
0x1630   :  { %v5266_v46 = vpop.permute.xlu0 %5265  ;;  %14413 = vmatpush3.msra.mxu0 %v16677_v12  ;;  %v5344_v54 = vsel %vm19699_vm10, %v5330_v34, %v5331_v13  ;;  %v5309_v52 = vrot.slane %v5288_v50, 7 }
0x1631   :  { %v5287_v38 = vsel %vm129_vm2, %v16436_v37, %v5266_v46  ;;  %14414 = vmatprep.subr.mxu0 %v5303_v43 }
0x1632   :  { %14383 = vmatprep.mubr.msk.f32.mxu0 %vm19701_vm0, %v5287_v38  ;;  %14415 = vmatpush3.msra.mxu0 %v5303_v43  ;;  %v5272_v22 = vpop.permute.xlu1 %5271  ;;  %v5332_v31 = vrot.slane %v5287_v38, 1  ;;  %v5308_v32 = vrot.slane %v5287_v38, 7 }
0x1633   :  { %14384 = vmatmul.mubr.msk.f32.gmra.mxu0 %vm19701_vm0, %v5288_v50  ;;  %14416 = vmatprep.subr.mxu0 %v5302_v11  ;;  %v5290_v19 = vsel %vm129_vm2, %v16449_v7, %v5272_v22  ;;  %v5306_v7 = vrot.slane %v16725_v27, 7  ;;  %v6031_v27 = vld [vmem:[%s19688_s6 + $0x88] sm:$0xff] }
0x1634   :  { %v5270_v12 = vpop.permute.xlu0 %5269  ;;  %14417 = vmatpush3.msra.mxu0 %v5302_v11  ;;  %v5343_v23 = vsel %vm19699_vm10, %v5331_v13, %v5332_v31  ;;  %v5319_v20 = vsel %vm19700_vm8, %v5307_v53, %v5308_v32  ;;  %v5335_v1 = vrot.slane %v5290_v19, 1  ;;  %v5318_v6 = vsel %vm19700_vm8, %v5308_v32, %v5309_v52 }
0x1635   :  { %v5289_v37 = vsel %vm129_vm2, %v16446_v26, %v5270_v12  ;;  %14418 = vmatprep.subr.mxu0 %v5301_v25  ;;  %v5320_v29 = vsel %vm19700_vm8, %v5306_v7, %v5307_v53  ;;  %v5311_v5 = vrot.slane %v5290_v19, 7 }
0x1636   :  { %14386 = vmatprep.mubr.msk.f32.mxu0 %vm19701_vm0, %v5289_v37  ;;  %14419 = vmatpush3.msra.mxu0 %v5301_v25  ;;  %v5334_v51 = vrot.slane %v5289_v37, 1  ;;  %v5310_v21 = vrot.slane %v5289_v37, 7 }
0x1637   :  { %14387 = vmatmul.mubr.msk.f32.gmra.mxu0 %vm19701_vm0, %v5290_v19  ;;  %v5274_v40 = vpop.permute.xlu1 %5273  ;;  %14472 = vmatprep.subr.mxu0 %v6033_v24 }
0x1638   :  { %v5276_v57 = vpop.permute.xlu0 %5275  ;;  %v5291_v2 = vsel %vm129_vm2, %v16461_v60, %v5274_v40  ;;  %v5333_v60 = vrot.slane %v5288_v50, 1  ;;  %v5317_v4 = vsel %vm19700_vm8, %v5309_v52, %v5310_v21  ;;  %v5340_v16 = vsel %vm19699_vm10, %v5334_v51, %v5335_v1 }
0x1639   :  { %v5292_v26 = vsel %vm129_vm2, %v16452_v18, %v5276_v57  ;;  %14389 = vmatprep.mubr.msk.f32.mxu0 %vm19701_vm0, %v5291_v2  ;;  %v5336_v9 = vrot.slane %v5291_v2, 1  ;;  %v5312_v47 = vrot.slane %v5291_v2, 7  ;;  %v5326_v58 = vsel %vm16177_vm12, %v5317_v4, 0.0 }
0x163a   :  { %v5313_v63 = vrot.slane %v5292_v26, 7  ;;  %v5342_v35 = vsel %vm19699_vm10, %v5332_v31, %v5333_v60  ;;  %v5341_v17 = vsel %vm19699_vm10, %v5333_v60, %v5334_v51  ;;  %v5337_v15 = vrot.slane %v5292_v26, 1 }
0x163b   :  { %14390 = vmatmul.mubr.msk.f32.gmra.mxu0 %vm19701_vm0, %v5292_v26  ;;  %v5349_v39 = vsel %vm16184_vm13, %v5341_v17, 0.0  ;;  %v5316_v45 = vsel %vm19700_vm8, %v5310_v21, %v5311_v5  ;;  %v5339_v62 = vsel %vm19699_vm10, %v5335_v1, %v5336_v9  ;;  %v5315_v55 = vsel %vm19700_vm8, %v5311_v5, %v5312_v47 }
0x163c   :  { %14420 = vmatprep.mubr.msk.f32.mxu0 %vm19701_vm0, %v5344_v54  ;;  %v5321_v18 = vsel %vm19700_vm8, %v5313_v63, %v5306_v7  ;;  %v5338_v41 = vsel %vm19699_vm10, %v5336_v9, %v5337_v15  ;;  %v5345_v42 = vsel %vm19699_vm10, %v5337_v15, %v5330_v34  ;;  %v5314_v59 = vsel %vm19700_vm8, %v5312_v47, %v5313_v63 }
0x163d   :  { %v5322_v36 = vsel %vm16151_vm4, %v5321_v18, 0.0  ;;  %v5353_v48 = vsel %vm16216_vm14, %v5345_v42, 0.0  ;;  %vm16820_vm2 = vcmp.eq.s32.totalorder %v5769_v14, %v15876_v0 }
0x163e   :  { %14400 = vmatprep.mubr.msk.f32.mxu1 %vm19701_vm0, %v5322_v36  ;;  %v12597_v3 = vsel %vm16820_vm2, 1.0, %v19792_v28  ;;  %v12596_v36 = vld [vmem:[%s19689_s7 + $0x10] ss:$0 sm:$0xff] }
0x163f   :  { %14401 = vmatmul.mubr.msk.f32.vlgmr.msra.gmra.mxu1 %vm19701_vm0, %v5320_v29  ;;  %14421 = vmatmul.mubr.msk.f32.vlgmr.msra.gmra.mxu0 %vm19701_vm0, %v5343_v23 }
0x1640   :  { %14403 = vmatprep.mubr.msk.f32.mxu1 %vm19701_vm0, %v5319_v20  ;;  %14423 = vmatprep.mubr.msk.f32.mxu0 %vm19701_vm0, %v5342_v35 }
0x1641   :  { %14473 = vmatpush3.msra.mxu0 %v6033_v24 }
0x1642   :  { %14474 = vmatprep.subr.mxu0 %v6032_v56 }
0x1643   :  { %14404 = vmatmul.mubr.msk.f32.gmra.mxu1 %vm19701_vm0, %v5318_v6  ;;  %14424 = vmatmul.mubr.msk.f32.gmra.mxu0 %vm19701_vm0, %v5349_v39 }
0x1644   :  { %14406 = vmatprep.mubr.msk.f32.mxu1 %vm19701_vm0, %v5326_v58  ;;  %14426 = vmatprep.mubr.msk.f32.mxu0 %vm19701_vm0, %v5340_v16 }
0x1645   :  { %14475 = vmatpush3.msra.mxu0 %v6032_v56  ;;  %v3018_v56 = vadd.s32 48, %v15696_v61 }
0x1646   :  { %14476 = vmatprep.subr.mxu0 %v6031_v27 }
0x1647   :  { %14407 = vmatmul.mubr.msk.f32.gmra.mxu1 %vm19701_vm0, %v5316_v45  ;;  %14427 = vmatmul.mubr.msk.f32.gmra.mxu0 %vm19701_vm0, %v5339_v62  ;;  %v5770_v45 = vshra.s32 %v15704_v8, 1  ;;  %v5771_v62 = vshra.s32 %v15934_v49, 1  ;;  %v19797_v8 = vmov 0  ;;  %v19800_v49 = vld [vmem:[#allocation8_spill] sm:$0xff] }
0x1648   :  { %14409 = vmatprep.mubr.msk.f32.mxu1 %vm19701_vm0, %v5315_v55  ;;  %14429 = vmatprep.mubr.msk.f32.mxu0 %vm19701_vm0, %v5338_v41  ;;  %v5773_v24 = vshra.s32 %v19800_v49, 1 }
0x1649   :  { %14477 = vmatpush3.msra.mxu0 %v6031_v27  ;;  %vm16843_vm15 = vcmp.eq.s32.totalorder %v5770_v45, %v15876_v0  ;;  %vm16850_vm3 = vcmp.eq.s32.totalorder %v5771_v62, %v15876_v0  ;;  %v19838_v62 = vmov 0 }
0x164a   :  { %v19798_v8 = vsel %vm16850_vm3, 4294967295, %v19797_v8  ;;  %vm16868_vm7 = vcmp.eq.s32.totalorder %v5773_v24, %v15876_v0 }
0x164b   :  { %14410 = vmatmul.mubr.msk.f32.gmra.mxu1 %vm19701_vm0, %v5314_v59  ;;  %14430 = vmatmul.mubr.msk.f32.gmra.mxu0 %vm19701_vm0, %v5353_v48  ;;  %v19793_v59 = vmov 0  ;;  %v19796_v48 = vld [vmem:[#allocation7_spill] sm:$0xff] }
0x164c   :  { %14448 = vmatprep.mubr.msk.f32.mxu1 %vm1046_vm6, %v12597_v3  ;;  %v19794_v59 = vsel %vm16843_vm15, 4294967295, %v19793_v59  ;;  %v5772_v14 = vshra.s32 %v19796_v48, 1  ;;  %v3017_v3 = vadd.s32 40, %v15696_v61  ;;  %19799 = vst [vmem:[#allocation7_spill] sm:$0xff] %v19798_v8  ;;  %v6037_v48 = vld [vmem:[%s19688_s6 + $0xb8] sm:$0xff] }
0x164d   :  { %19795 = vst [vmem:[#allocation11_spill] sm:$0xff] %v19794_v59 }
0x164e   :  { %vm16863_vm5 = vcmp.eq.s32.totalorder %v5772_v14, %v15876_v0  ;;  %v6027_v14 = vld [vmem:[%s19688_s6 + $0x68] sm:$0xff] }
0x16ef   :  { %v14382_v10 = vpop.f32.mrf.mxu0 }
0x16f1   :  { %v5444_v33 = vpop.f32.mrf.mxu0 }
0x16f3   :  { %v14385_v43 = vpop.f32.mrf.mxu0 }
0x16f5   :  { %v5454_v46 = vpop.f32.mrf.mxu0 }
0x16f7   :  { %v14388_v11 = vpop.f32.mrf.mxu0 }
0x16f9   :  { %v5464_v38 = vpop.f32.mrf.mxu0 }
0x16fb   :  { %v14391_v50 = vpop.f32.mrf.mxu0 }
0x16fd   :  { %v5474_v25 = vpop.f32.mrf.mxu0 }
0x16ff   :  { %v14402_v22 = vpop.f32.mrf.mxu1  ;;  %v14422_v12 = vpop.f32.mrf.mxu0 }
0x1700   :  { %v5579_v9 = vadd.f32 %v14402_v22, %v14382_v10  ;;  %v12598_v10 = vsel %vm16843_vm15, 1.0, %v19792_v28  ;;  %v12601_v22 = vsel %vm16868_vm7, 1.0, %v19792_v28 }
0x1701   :  { %v5573_v37 = vpop.f32.mrf.mxu1  ;;  %v5702_v19 = vpop.f32.mrf.mxu0 }
0x1702   :  { %v5574_v15 = vadd.f32 %v5573_v37, %v5444_v33  ;;  %v5742_v16 = vadd.f32 %v14422_v12, %v5579_v9  ;;  %v12599_v33 = vsel %vm16850_vm3, 1.0, %v19792_v28  ;;  %v19807_v12 = vmov 0  ;;  %v19810_v37 = vld [vmem:[#allocation9_spill] sm:$0xff] }
0x1703   :  { %v14405_v34 = vpop.f32.mrf.mxu1  ;;  %v14425_v40 = vpop.f32.mrf.mxu0  ;;  %v19829_v9 = vmov 0 }
0x1704   :  { %v5589_v29 = vadd.f32 %v14405_v34, %v14385_v43  ;;  %v5741_v55 = vadd.f32 %v5702_v19, %v5574_v15  ;;  %v5754_v42 = vadd.f32 %v12596_v36, %v5742_v16  ;;  %v19801_v43 = vmov 0 }
0x1705   :  { %v5583_v57 = vpop.f32.mrf.mxu1  ;;  %v5712_v2 = vpop.f32.mrf.mxu0  ;;  %v19802_v43 = vsel %vm16863_vm5, 4294967295, %v19801_v43  ;;  %v5776_v19 = vshra.s32 %v19810_v37, 1  ;;  %v5762_v34 = vadd.s32 72, %v15696_v61  ;;  %v19835_v16 = vmov 0 }
0x1706   :  { %v5584_v17 = vadd.f32 %v5583_v57, %v5454_v46  ;;  %v5744_v6 = vadd.f32 %v14425_v40, %v5589_v29  ;;  %v5753_v27 = vadd.f32 %v12596_v36, %v5741_v55  ;;  %19803 = vst [vmem:[#allocation8_spill] sm:$0xff] %v19802_v43  ;;  %v5774_v46 = vshra.s32 %v3017_v3, 1  ;;  %v6026_v3 = vld [vmem:[%s19688_s6 + $0x60] sm:$0xff] }
0x1707   :  { %v14408_v13 = vpop.f32.mrf.mxu1  ;;  %v14428_v26 = vpop.f32.mrf.mxu0  ;;  %v19811_v40 = vmov 0  ;;  %vm16906_vm11 = vcmp.eq.s32.totalorder %v5776_v19, %v15876_v0 }
0x1708   :  { %v5599_v51 = vadd.f32 %v14408_v13, %v14388_v11  ;;  %v5743_v47 = vadd.f32 %v5712_v2, %v5584_v17  ;;  %v5756_v5 = vadd.f32 %v12596_v36, %v5744_v6  ;;  %v19804_v11 = vmov 0 }
0x1709   :  { %v5593_v7 = vpop.f32.mrf.mxu1  ;;  %v5722_v31 = vpop.f32.mrf.mxu0  ;;  %v19805_v11 = vsel %vm16868_vm7, 4294967295, %v19804_v11  ;;  %vm16884_vm9 = vcmp.eq.s32.totalorder %v5774_v46, %v15876_v0  ;;  %v5763_v2 = vadd.s32 80, %v15696_v61  ;;  %v19826_v17 = vmov 0  ;;  %v6034_v46 = vld [vmem:[%s19688_s6 + $0xa0] sm:$0xff] }
0x170a   :  { %v5594_v21 = vadd.f32 %v5593_v7, %v5464_v38  ;;  %v5746_v23 = vadd.f32 %v14428_v26, %v5599_v51  ;;  %v5755_v41 = vadd.f32 %v12596_v36, %v5743_v47  ;;  %19806 = vst [vmem:[#allocation12_spill] sm:$0xff] %v19805_v11  ;;  %v5775_v38 = vshra.s32 %v3018_v56, 1  ;;  %v6036_v56 = vld [vmem:[%s19688_s6 + $0xb0] sm:$0xff] }
0x170b   :  { %v14411_v63 = vpop.f32.mrf.mxu1  ;;  %v14431_v32 = vpop.f32.mrf.mxu0  ;;  %v19808_v12 = vsel %vm16884_vm9, 4294967295, %v19807_v12  ;;  %v12602_v13 = vsel %vm16884_vm9, 1.0, %v19792_v28  ;;  %v19814_v7 = vmov 0  ;;  %v5779_v51 = vshra.s32 %v5763_v2, 1 }
0x170c   :  { %v5609_v54 = vadd.f32 %v14411_v63, %v14391_v50  ;;  %v5745_v4 = vadd.f32 %v5722_v31, %v5594_v21  ;;  %v5758_v39 = vadd.f32 %v12596_v36, %v5746_v23  ;;  %v16873_v50 = vadd.s32 64, %v15696_v61  ;;  %19809 = vst [vmem:[#allocation13_spill] sm:$0xff] %v19808_v12 }
0x170d   :  { %v5603_v53 = vpop.f32.mrf.mxu1  ;;  %v5732_v52 = vpop.f32.mrf.mxu0  ;;  %vm16891_vm1 = vcmp.eq.s32.totalorder %v5775_v38, %v15876_v0  ;;  %v19815_v7 = vsel %vm16906_vm11, 4294967295, %v19814_v7  ;;  %v5778_v31 = vshra.s32 %v5762_v34, 1  ;;  %v5764_v63 = vadd.s32 88, %v15696_v61 }
0x170e   :  { %v5748_v18 = vadd.f32 %v14431_v32, %v5609_v54  ;;  %v5604_v60 = vadd.f32 %v5603_v53, %v5474_v25  ;;  %v5757_v58 = vadd.f32 %v12596_v36, %v5745_v4  ;;  %v12600_v25 = vsel %vm16863_vm5, 1.0, %v19792_v28  ;;  %19816 = vst [vmem:[#allocation14_spill] sm:$0xff] %v19815_v7 }
0x170f   :  { %v19812_v40 = vsel %vm16891_vm1, 4294967295, %v19811_v40  ;;  %v5777_v57 = vshra.s32 %v16873_v50, 1  ;;  %v12603_v26 = vsel %vm16891_vm1, 1.0, %v19792_v28  ;;  %v19817_v32 = vmov 0 }
0x1710   :  { %v5760_v20 = vadd.f32 %v12596_v36, %v5748_v18  ;;  %v5747_v35 = vadd.f32 %v5732_v52, %v5604_v60  ;;  %19813 = vst [vmem:[#allocation9_spill] sm:$0xff] %v19812_v40  ;;  %v5765_v54 = vadd.s32 96, %v15696_v61  ;;  %v12604_v53 = vsel %vm16906_vm11, 1.0, %v19792_v28 }
0x1711   :  { %vm16912_vm4 = vcmp.eq.s32.totalorder %v5777_v57, %v15876_v0  ;;  %vm16926_vm12 = vcmp.eq.s32.totalorder %v5778_v31, %v15876_v0  ;;  %v19820_v18 = vmov 0  ;;  %v5780_v60 = vshra.s32 %v5764_v63, 1 }
0x1712   :  { %v5759_v1 = vadd.f32 %v12596_v36, %v5747_v35  ;;  %14432 = vmatprep.subr.mxu1 %v5760_v20  ;;  %v19818_v32 = vsel %vm16912_vm4, 4294967295, %v19817_v32  ;;  %v12605_v21 = vsel %vm16912_vm4, 1.0, %v19792_v28  ;;  %v19821_v18 = vsel %vm16926_vm12, 4294967295, %v19820_v18 }
0x1713   :  { %14433 = vmatpush3.msra.mxu1 %v5760_v20  ;;  %19819 = vst [vmem:[#allocation15_spill] sm:$0xff] %v19818_v32  ;;  %19822 = vst [vmem:[#allocation16_spill] sm:$0xff] %v19821_v18  ;;  %v5766_v36 = vadd.s32 104, %v15696_v61  ;;  %vm16932_vm13 = vcmp.eq.s32.totalorder %v5779_v51, %v15876_v0  ;;  %v19823_v52 = vmov 0  ;;  %v5781_v29 = vshra.s32 %v5765_v54, 1 }
0x1714   :  { %14434 = vmatprep.subr.mxu1 %v5759_v1  ;;  %v19824_v52 = vsel %vm16932_vm13, 4294967295, %v19823_v52  ;;  %v5767_v23 = vadd.s32 112, %v15696_v61  ;;  %v12606_v20 = vsel %vm16926_vm12, 1.0, %v19792_v28  ;;  %v12607_v35 = vsel %vm16932_vm13, 1.0, %v19792_v28 }
0x1715   :  { %14435 = vmatpush3.msra.mxu1 %v5759_v1  ;;  %19825 = vst [vmem:[#allocation17_spill] sm:$0xff] %v19824_v52  ;;  %vm16946_vm14 = vcmp.eq.s32.totalorder %v5780_v60, %v15876_v0  ;;  %v5782_v4 = vshra.s32 %v5766_v36, 1  ;;  %v16951_v1 = vadd.s32 120, %v15696_v61  ;;  %vm16954_vm10 = vcmp.eq.s32.totalorder %v5781_v29, %v15876_v0 }
0x1716   :  { %14436 = vmatprep.subr.mxu1 %v5758_v39  ;;  %v19827_v17 = vsel %vm16946_vm14, 4294967295, %v19826_v17  ;;  %v19830_v9 = vsel %vm16954_vm10, 4294967295, %v19829_v9  ;;  %v5783_v6 = vshra.s32 %v5767_v23, 1  ;;  %v12609_v15 = vsel %vm16954_vm10, 1.0, %v19792_v28 }
0x1717   :  { %14437 = vmatpush3.msra.mxu1 %v5758_v39  ;;  %19828 = vst [vmem:[#allocation18_spill] sm:$0xff] %v19827_v17  ;;  %19831 = vst [vmem:[#allocation19_spill] sm:$0xff] %v19830_v9  ;;  %v12608_v39 = vsel %vm16946_vm14, 1.0, %v19792_v28  ;;  %vm16967_vm8 = vcmp.eq.s32.totalorder %v5782_v4, %v15876_v0  ;;  %v19832_v47 = vmov 0 }
0x1718   :  { %14438 = vmatprep.subr.mxu1 %v5757_v58  ;;  %v19833_v47 = vsel %vm16967_vm8, 4294967295, %v19832_v47  ;;  %vm16973_vm0 = vcmp.eq.s32.totalorder %v5783_v6, %v15876_v0 }
0x1719   :  { %14439 = vmatpush3.msra.mxu1 %v5757_v58  ;;  %19834 = vst [vmem:[#allocation20_spill] sm:$0xff] %v19833_v47  ;;  %v5784_v58 = vshra.s32 %v16951_v1, 1  ;;  %v19836_v16 = vsel %vm16973_vm0, 4294967295, %v19835_v16  ;;  %v12611_v45 = vsel %vm16973_vm0, 1.0, %v19792_v28 }
0x171a   :  { %14440 = vmatprep.subr.mxu1 %v5756_v5  ;;  %19837 = vst [vmem:[#allocation21_spill] sm:$0xff] %v19836_v16 }
0x171b   :  { %14441 = vmatpush3.msra.mxu1 %v5756_v5  ;;  %v12610_v5 = vsel %vm16967_vm8, 1.0, %v19792_v28  ;;  %vm16986_vm10 = vcmp.eq.s32.totalorder %v5784_v58, %v15876_v0 }
0x171c   :  { %14442 = vmatprep.subr.mxu1 %v5755_v41  ;;  %v19839_v62 = vsel %vm16986_vm10, 4294967295, %v19838_v62  ;;  %v12612_v55 = vsel %vm16986_vm10, 1.0, %v19792_v28  ;;  %v6028_v28 = vld [vmem:[%s19688_s6 + $0x70] sm:$0xff] }
0x171d   :  { %14443 = vmatpush3.msra.mxu1 %v5755_v41  ;;  %19840 = vst [vmem:[#allocation22_spill] sm:$0xff] %v19839_v62  ;;  %v6030_v41 = vld [vmem:[%s19688_s6 + $0x80] sm:$0xff] }
0x171e   :  { %14444 = vmatprep.subr.mxu1 %v5754_v42  ;;  %14478 = vmatprep.subr.mxu0 %v6030_v41 }
0x171f   :  { %14445 = vmatpush3.msra.mxu1 %v5754_v42  ;;  %14479 = vmatpush3.msra.mxu0 %v6030_v41  ;;  %v6029_v42 = vld [vmem:[%s19688_s6 + $0x78] sm:$0xff] }
0x1720   :  { %14446 = vmatprep.subr.mxu1 %v5753_v27  ;;  %14536 = vmatprep.subr.mxu0 %v6037_v48 }
0x1721   :  { %14447 = vmatpush3.msra.mxu1 %v5753_v27 }
0x1722   :  { %14449 = vmatmul.mubr.msk.f32.vlgmr.msra.gmra.mxu1 %vm1046_vm6, %v12598_v10  ;;  %14504 = vmatprep.subr.mxu1 %v6029_v42  ;;  %v6035_v10 = vld [vmem:[%s19688_s6 + $0xa8] sm:$0xff] }
0x1723   :  { %14451 = vmatprep.mubr.msk.f32.mxu1 %vm1046_vm6, %v12599_v33  ;;  %14505 = vmatpush3.msra.mxu1 %v6029_v42 }
0x1724   :  { %14506 = vmatprep.subr.mxu1 %v6028_v28 }
0x1725   :  { %14507 = vmatpush3.msra.mxu1 %v6028_v28 }
0x1726   :  { %14452 = vmatmul.mubr.msk.f32.gmra.mxu1 %vm1046_vm6, %v12600_v25  ;;  %14508 = vmatprep.subr.mxu1 %v6027_v14 }
0x1727   :  { %14454 = vmatprep.mubr.msk.f32.mxu1 %vm1046_vm6, %v12601_v22  ;;  %14509 = vmatpush3.msra.mxu1 %v6027_v14 }
0x1728   :  { %14510 = vmatprep.subr.mxu1 %v6026_v3 }
0x1729   :  { %14511 = vmatpush3.msra.mxu1 %v6026_v3 }
0x172a   :  { %14455 = vmatmul.mubr.msk.f32.gmra.mxu1 %vm1046_vm6, %v12602_v13 }
0x172b   :  { %14457 = vmatprep.mubr.msk.f32.mxu1 %vm1046_vm6, %v12603_v26  ;;  %v6039_v26 = vand.u32 63, %v15696_v61 }
0x172e   :  { %14458 = vmatmul.mubr.msk.f32.gmra.mxu1 %vm1046_vm6, %v12604_v53 }
0x172f   :  { %14460 = vmatprep.mubr.msk.f32.mxu1 %vm1046_vm6, %v12605_v21 }
0x1732   :  { %14461 = vmatmul.mubr.msk.f32.gmra.mxu1 %vm1046_vm6, %v12606_v20 }
0x1733   :  { %14463 = vmatprep.mubr.msk.f32.mxu1 %vm1046_vm6, %v12607_v35 }
0x1736   :  { %14464 = vmatmul.mubr.msk.f32.gmra.mxu1 %vm1046_vm6, %v12608_v39 }
0x1737   :  { %14466 = vmatprep.mubr.msk.f32.mxu1 %vm1046_vm6, %v12609_v15 }
0x173a   :  { %14467 = vmatmul.mubr.msk.f32.gmra.mxu1 %vm1046_vm6, %v12610_v5 }
0x173b   :  { %14469 = vmatprep.mubr.msk.f32.mxu1 %vm1046_vm6, %v12611_v45 }
0x173e   :  { %14470 = vmatmul.mubr.msk.f32.gmra.mxu1 %vm1046_vm6, %v12612_v55  ;;  %vm19841_vm6 = vcmask 261120  }
0x173f   :  { %vm19842_vm10 = vmmov %vm19841_vm6 }
0x1740   :  { %vm19843_vm0 = vmmov %vm19841_vm6 }
0x1741   :  { %vm19846_vm8 = vmmov %vm19843_vm0 }
0x1742   :  { %vm19849_vm14 = vmmov %vm19843_vm0 }
0x1743   :  { %vm19859_vm12 = vmmov %vm19843_vm0 }
0x1744   :  { %vm19864_vm4 = vmmov %vm19843_vm0 }
0x17e2   :  { %v17014_v49 = vpop.f32.mrf.mxu1 }
0x17e3   :  { %v6192_v60 = vrot.slane %v17014_v49, 1  ;;  %v6112_v23 = vrot.slane %v17014_v49, 7 }
0x17e4   :  { %v17016_v24 = vpop.f32.mrf.mxu1 }
0x17e5   :  { %14480 = vmatprep.mubr.msk.f32.mxu0 %vm19841_vm6, %v17016_v24  ;;  %vm19844_vm6 = vmmov %vm19843_vm0  ;;  %v6191_v63 = vrot.slane %v17016_v24, 1  ;;  %v6111_v54 = vrot.slane %v17016_v24, 7  ;;  %v6941_v24 = vld [vmem:[%s19688_s6 + $0xf8] sm:$0xff] }
0x17e6   :  { %v17023_v27 = vpop.f32.mrf.mxu1  ;;  %14481 = vmatmul.mubr.msk.f32.vlgmr.msra.gmra.mxu0 %vm19842_vm10, %v17014_v49  ;;  %vm19845_vm10 = vmmov %vm19843_vm0  ;;  %v6047_v49 = vand.u32 63, %v16873_v50  ;;  %14568 = vmatprep.subr.mxu1 %v6941_v24 }
0x17e7   :  { %14537 = vmatpush3.msra.mxu0 %v6037_v48  ;;  %v6194_v15 = vrot.slane %v17023_v27, 1  ;;  %v6114_v45 = vrot.slane %v17023_v27, 7 }
0x17e8   :  { %v5957_v33 = vpop.f32.mrf.mxu1  ;;  %14538 = vmatprep.subr.mxu0 %v6036_v56 }
0x17e9   :  { %14483 = vmatprep.mubr.msk.f32.mxu0 %vm19843_vm0, %v5957_v33  ;;  %14539 = vmatpush3.msra.mxu0 %v6036_v56  ;;  %v6113_v36 = vrot.slane %v5957_v33, 7  ;;  %v6193_v20 = vrot.slane %v5957_v33, 1 }
0x17ea   :  { %v17034_v38 = vpop.f32.mrf.mxu1  ;;  %14484 = vmatmul.mubr.msk.f32.gmra.mxu0 %vm19844_vm6, %v17023_v27  ;;  %14540 = vmatprep.subr.mxu0 %v6035_v10  ;;  %vm19847_vm6 = vmmov %vm19843_vm0 }
0x17eb   :  { %14541 = vmatpush3.msra.mxu0 %v6035_v10  ;;  %v6196_v28 = vrot.slane %v17034_v38, 1  ;;  %v6116_v56 = vrot.slane %v17034_v38, 7 }
0x17ec   :  { %v17038_v25 = vpop.f32.mrf.mxu1  ;;  %14542 = vmatprep.subr.mxu0 %v6034_v46 }
0x17ed   :  { %14486 = vmatprep.mubr.msk.f32.mxu0 %vm19845_vm10, %v17038_v25  ;;  %14543 = vmatpush3.msra.mxu0 %v6034_v46  ;;  %vm19848_vm10 = vmmov %vm19843_vm0  ;;  %v6115_v58 = vrot.slane %v17038_v25, 7  ;;  %v6195_v41 = vrot.slane %v17038_v25, 1 }
0x17ee   :  { %v17042_v22 = vpop.f32.mrf.mxu1  ;;  %14487 = vmatmul.mubr.msk.f32.gmra.mxu0 %vm19843_vm0, %v17034_v38 }
0x17ef   :  { %v6118_v38 = vrot.slane %v17042_v22, 7 }
0x17f0   :  { %v17046_v37 = vpop.f32.mrf.mxu1 }
0x17f1   :  { %14489 = vmatprep.mubr.msk.f32.mxu0 %vm19846_vm8, %v17046_v37  ;;  %vm19850_vm8 = vmmov %vm19843_vm0  ;;  %v6117_v14 = vrot.slane %v17046_v37, 7  ;;  %v6197_v27 = vrot.slane %v17046_v37, 1 }
0x17f2   :  { %v17050_v19 = vpop.f32.mrf.mxu1  ;;  %14490 = vmatmul.mubr.msk.f32.gmra.mxu0 %vm19847_vm6, %v17042_v22  ;;  %vm19851_vm6 = vmmov %vm19843_vm0 }
0x17f4   :  { %v17054_v34 = vpop.f32.mrf.mxu1 }
0x17f5   :  { %14492 = vmatprep.mubr.msk.f32.mxu0 %vm19848_vm10, %v17054_v34  ;;  %vm17082_vm10 = vcmp.ne.s32.totalorder %v6039_v26, 0  ;;  %v6119_v10 = vrot.slane %v17054_v34, 7  ;;  %v6199_v46 = vrot.slane %v17054_v34, 1  ;;  %v19870_v26 = vld [vmem:[#allocation10_spill] sm:$0xff] }
0x17f6   :  { %v17058_v57 = vpop.f32.mrf.mxu1  ;;  %14493 = vmatmul.mubr.msk.f32.gmra.mxu0 %vm19849_vm14, %v17050_v19  ;;  %vm19852_vm14 = vmmov %vm19843_vm0  ;;  %v6086_v50 = vand.u32 63, %v19870_v26 }
0x17f8   :  { %v17062_v2 = vpop.f32.mrf.mxu1 }
0x17f9   :  { %14495 = vmatprep.mubr.msk.f32.mxu0 %vm19843_vm0, %v17062_v2 }
0x17fa   :  { %v17066_v13 = vpop.f32.mrf.mxu1  ;;  %14496 = vmatmul.mubr.msk.f32.gmra.mxu0 %vm19850_vm8, %v17058_v57  ;;  %vm19855_vm8 = vcmp.lt.s32.totalorder %v15696_v61, 1 }
0x17fb   :  { %vm19858_vm13 = vmmov %vm19855_vm8 }
0x17fc   :  { %v17071_v31 = vpop.f32.mrf.mxu1  ;;  %v6141_v39 = vsel %vm19858_vm13, %v6111_v54, %v6112_v23 }
0x17fd   :  { %14498 = vmatprep.mubr.msk.f32.mxu0 %vm19851_vm6, %v17071_v31  ;;  %vm19856_vm6 = vmmov %vm19843_vm0 }
0x17fe   :  { %v17076_v51 = vpop.f32.mrf.mxu1  ;;  %14499 = vmatmul.mubr.msk.f32.gmra.mxu0 %vm19852_vm14, %v17066_v13  ;;  %vm19857_vm14 = vcmp.lt.s32.totalorder %v15696_v61, 7 }
0x17ff   :  { %v6126_v53 = vrot.slane %v17076_v51, 7  ;;  %v6221_v6 = vsel %vm19857_vm14, %v6191_v63, %v6192_v60  ;;  %v6220_v55 = vsel %vm19857_vm14, %v6192_v60, %v6193_v20 }
0x1800   :  { %v17087_v29 = vpop.f32.mrf.mxu1 }
0x1801   :  { %14501 = vmatprep.mubr.msk.f32.mxu0 %vm19843_vm0, %v17087_v29  ;;  %v6142_v35 = vsel %vm19855_vm8, %v6126_v53, %v6111_v54  ;;  %vm19860_vm8 = vmmov %vm19843_vm0  ;;  %v6198_v54 = vrot.slane %v17042_v22, 1 }
0x1802   :  { %14502 = vmatmul.mubr.msk.f32.gmra.mxu0 %vm19856_vm6, %v17076_v51  ;;  %v6175_v4 = vsel %vm17082_vm10, %v6142_v35, 0.0  ;;  %vm19861_vm6 = vmmov %vm19858_vm13 }
0x1803   :  { %14512 = vmatprep.mubr.msk.f32.mxu1 %vm19843_vm0, %v6175_v4  ;;  %14544 = vmatprep.mubr.msk.f32.mxu0 %vm19859_vm12, %v6221_v6  ;;  %v6140_v5 = vsel %vm19861_vm6, %v6112_v23, %v6113_v36  ;;  %vm19862_vm13 = vmmov %vm19843_vm0  ;;  %v6200_v6 = vrot.slane %v17050_v19, 1 }
0x1804   :  { %14513 = vmatmul.mubr.msk.f32.vlgmr.msra.gmra.mxu1 %vm19860_vm8, %v6141_v39  ;;  %vm19863_vm12 = vmmov %vm19857_vm14  ;;  %v6121_v39 = vrot.slane %v17062_v2, 7 }
0x1805   :  { %14515 = vmatprep.mubr.msk.f32.mxu1 %vm19862_vm13, %v6140_v5  ;;  %v6219_v42 = vsel %vm19863_vm12, %v6193_v20, %v6194_v15  ;;  %vm19865_vm8 = vmmov %vm19861_vm6  ;;  %v6217_v25 = vsel %vm19863_vm12, %v6195_v41, %v6196_v28  ;;  %v6201_v5 = vrot.slane %v17062_v2, 1  ;;  %14569 = vmatpush3.msra.mxu1 %v6941_v24 }
0x1806   :  { %14545 = vmatmul.mubr.msk.f32.vlgmr.msra.gmra.mxu0 %vm19843_vm0, %v6220_v55  ;;  %v6139_v48 = vsel %vm19865_vm8, %v6113_v36, %v6114_v45  ;;  %vm19866_vm6 = vmmov %vm19843_vm0 }
0x1807   :  { %14547 = vmatprep.mubr.msk.f32.mxu0 %vm19864_vm4, %v6219_v42  ;;  %vm19867_vm14 = vmmov %vm19865_vm8  ;;  %v6202_v42 = vrot.slane %v17058_v57, 1 }
0x1808   :  { %14516 = vmatmul.mubr.msk.f32.gmra.mxu1 %vm19866_vm6, %v6139_v48  ;;  %v6138_v3 = vsel %vm19867_vm14, %v6114_v45, %v6115_v58  ;;  %vm19868_vm4 = vmmov %vm19843_vm0  ;;  %v6122_v48 = vrot.slane %v17058_v57, 7 }
0x1809   :  { %14518 = vmatprep.mubr.msk.f32.mxu1 %vm19868_vm4, %v6138_v3  ;;  %vm19869_vm13 = vmmov %vm19863_vm12 }
0x180a   :  { %v6218_v33 = vsel %vm19869_vm13, %v6194_v15, %v6195_v41  ;;  %vm19871_vm8 = vmmov %vm19843_vm0 }
0x180b   :  { %14548 = vmatmul.mubr.msk.f32.gmra.mxu0 %vm19843_vm0, %v6218_v33  ;;  %vm19872_vm6 = vmmov %vm19867_vm14  ;;  %v6205_v33 = vrot.slane %v17087_v29, 1 }
0x180c   :  { %14550 = vmatprep.mubr.msk.f32.mxu0 %vm19871_vm8, %v6217_v25  ;;  %v6137_v37 = vsel %vm19872_vm6, %v6115_v58, %v6116_v56  ;;  %vm19873_vm14 = vmmov %vm19843_vm0  ;;  %v6120_v58 = vrot.slane %v17050_v19, 7  ;;  %v6123_v19 = vrot.slane %v17071_v31, 7 }
0x180d   :  { %14519 = vmatmul.mubr.msk.f32.gmra.mxu1 %vm19873_vm14, %v6137_v37  ;;  %vm19874_vm4 = vmmov %vm19872_vm6  ;;  %vm17161_vm14 = vcmp.ne.s32.totalorder %v6086_v50, 0 }
0x180e   :  { %v6136_v34 = vsel %vm19874_vm4, %v6116_v56, %v6117_v14  ;;  %vm19875_vm13 = vmmov %vm19843_vm0  ;;  %v6125_v56 = vrot.slane %v17087_v29, 7 }
0x180f   :  { %14521 = vmatprep.mubr.msk.f32.mxu1 %vm19875_vm13, %v6136_v34  ;;  %vm19876_vm0 = vmmov %vm19863_vm12  ;;  %vm17152_vm12 = vcmp.ne.s32.totalorder %v6047_v49, 0  ;;  %v17200_v49 = vadd.s32 1, %v16951_v1 }
0x1810   :  { %v6216_v60 = vsel %vm19876_vm0, %v6196_v28, %v6197_v27  ;;  %vm19879_vm8 = vmmov %vm19874_vm4  ;;  %v6203_v28 = vrot.slane %v17071_v31, 1  ;;  %v6204_v31 = vrot.slane %v17066_v13, 1 }
0x1811   :  { %v6134_v23 = vsel %vm19879_vm8, %v6118_v38, %v6119_v10  ;;  %vm19880_vm6 = vmmov %vm19875_vm13  ;;  %19894 = vst [vmem:[#allocation10_spill] sm:$0xff] %v17200_v49  ;;  %v6094_v26 = vand.u32 63, %v17200_v49 }
0x1812   :  { %14551 = vmatmul.mubr.msk.f32.gmra.mxu0 %vm19880_vm6, %v6216_v60  ;;  %vm19881_vm11 = vmmov %vm19876_vm0  ;;  %v6183_v15 = vsel %vm17152_vm12, %v6134_v23, 0.0  ;;  %v6937_v23 = vld [vmem:[%s19688_s6 + $0xd8] sm:$0xff] }
0x1813   :  { %v6215_v22 = vsel %vm19881_vm11, %v6197_v27, %v6198_v54  ;;  %vm19884_vm4 = vmmov %vm19876_vm0  ;;  %vm17232_vm7 = vcmp.ne.s32.totalorder %v6094_v26, 0  ;;  %14600 = vmatprep.subr.mxu0 %v6937_v23 }
0x1814   :  { %v6214_v35 = vsel %vm19884_vm4, %v6198_v54, %v6199_v46  ;;  %vm19885_vm13 = vmmov %vm19880_vm6  ;;  %v6213_v55 = vsel %vm19884_vm4, %v6199_v46, %v6200_v6  ;;  %v6206_v46 = vrot.slane %v17076_v51, 1  ;;  %v6939_v51 = vld [vmem:[%s19688_s6 + $0xe8] sm:$0xff]  ;;  %14601 = vmatpush3.msra.mxu0 %v6937_v23 }
0x1815   :  { %14553 = vmatprep.mubr.msk.f32.mxu0 %vm19885_vm13, %v6215_v22  ;;  %vm19886_vm0 = vmmov %vm19879_vm8  ;;  %v6262_v45 = vsel %vm17161_vm14, %v6214_v35, 0.0  ;;  %v17267_v22 = vld [vmem:[%s19688_s6 + $0x118] sm:$0xff]  ;;  %v6936_v35 = vld [vmem:[%s19688_s6 + $0xd0] sm:$0xff] }
0x1816   :  { %v6135_v4 = vsel %vm19886_vm0, %v6117_v14, %v6118_v38  ;;  %vm19887_vm8 = vmmov %vm19880_vm6  ;;  %14554 = vmatmul.mubr.msk.f32.gmra.mxu0 %vm19880_vm6, %v6262_v45  ;;  %v6133_v41 = vsel %vm19886_vm0, %v6119_v10, %v6120_v58  ;;  %v6212_v14 = vsel %vm19884_vm4, %v6200_v6, %v6201_v5  ;;  %v6124_v10 = vrot.slane %v17066_v13, 7  ;;  %14602 = vmatprep.subr.mxu0 %v6936_v35  ;;  %v6934_v6 = vld [vmem:[%s19688_s6 + $0xc0] sm:$0xff] }
0x1817   :  { %14522 = vmatmul.mubr.msk.f32.gmra.mxu1 %vm19887_vm8, %v6135_v4  ;;  %vm19888_vm11 = vmmov %vm19880_vm6  ;;  %14603 = vmatpush3.msra.mxu0 %v6936_v35  ;;  %v6935_v4 = vld [vmem:[%s19688_s6 + $0xc8] sm:$0xff] }
0x1818   :  { %14524 = vmatprep.mubr.msk.f32.mxu1 %vm19888_vm11, %v6183_v15  ;;  %vm19889_vm13 = vmmov %vm19880_vm6  ;;  %14604 = vmatprep.subr.mxu0 %v6935_v4 }
0x1819   :  { %14556 = vmatprep.mubr.msk.f32.mxu0 %vm19889_vm13, %v6213_v55  ;;  %vm19890_vm8 = vmmov %vm19880_vm6  ;;  %14605 = vmatpush3.msra.mxu0 %v6935_v4 }
0x181a   :  { %vm19891_vm11 = vmmov %vm19886_vm0  ;;  %14606 = vmatprep.subr.mxu0 %v6934_v6 }
0x181b   :  { %14525 = vmatmul.mubr.msk.f32.gmra.mxu1 %vm19890_vm8, %v6133_v41  ;;  %v6132_v2 = vsel %vm19891_vm11, %v6120_v58, %v6121_v39  ;;  %vm19892_vm13 = vmmov %vm19880_vm6  ;;  %v6131_v57 = vsel %vm19891_vm11, %v6121_v39, %v6122_v48  ;;  %14607 = vmatpush3.msra.mxu0 %v6934_v6 }
0x181c   :  { %14527 = vmatprep.mubr.msk.f32.mxu1 %vm19880_vm6, %v6132_v2  ;;  %14557 = vmatmul.mubr.msk.f32.gmra.mxu0 %vm19892_vm13, %v6212_v14  ;;  %vm19893_vm0 = vmmov %vm19884_vm4 }
0x181d   :  { %v6211_v3 = vsel %vm19893_vm0, %v6201_v5, %v6202_v42  ;;  %vm19895_vm8 = vmmov %vm19880_vm6  ;;  %v6210_v1 = vsel %vm19893_vm0, %v6202_v42, %v6203_v28 }
0x181e   :  { %14559 = vmatprep.mubr.msk.f32.mxu0 %vm19895_vm8, %v6211_v3  ;;  %vm19896_vm4 = vmmov %vm19891_vm11 }
0x181f   :  { %14528 = vmatmul.mubr.msk.f32.gmra.mxu1 %vm19880_vm6, %v6131_v57  ;;  %v6130_v27 = vsel %vm19896_vm4, %v6122_v48, %v6123_v19  ;;  %vm19897_vm13 = vmmov %vm19880_vm6  ;;  %v6129_v13 = vsel %vm19896_vm4, %v6123_v19, %v6124_v10 }
0x1820   :  { %14530 = vmatprep.mubr.msk.f32.mxu1 %vm19897_vm13, %v6130_v27  ;;  %vm19898_vm8 = vmmov %vm19880_vm6 }
0x1821   :  { %14560 = vmatmul.mubr.msk.f32.gmra.mxu0 %vm19898_vm8, %v6210_v1  ;;  %vm19899_vm11 = vmmov %vm19893_vm0 }
0x1822   :  { %v6209_v25 = vsel %vm19899_vm11, %v6203_v28, %v6204_v31  ;;  %vm19900_vm1 = vmmov %vm19880_vm6 }
0x1823   :  { %14562 = vmatprep.mubr.msk.f32.mxu0 %vm19880_vm6, %v6209_v25  ;;  %14531 = vmatmul.mubr.msk.f32.gmra.mxu1 %vm19900_vm1, %v6129_v13  ;;  %vm19901_vm13 = vmmov %vm19896_vm4 }
0x1824   :  { %v6128_v29 = vsel %vm19901_vm13, %v6124_v10, %v6125_v56  ;;  %vm19902_vm0 = vmmov %vm19900_vm1 }
0x1825   :  { %14533 = vmatprep.mubr.msk.f32.mxu1 %vm19902_vm0, %v6128_v29  ;;  %vm19903_vm9 = vmmov %vm19899_vm11 }
0x1826   :  { %v6208_v50 = vsel %vm19903_vm9, %v6204_v31, %v6205_v33  ;;  %vm19904_vm8 = vmmov %vm19902_vm0 }
0x1827   :  { %14563 = vmatmul.mubr.msk.f32.gmra.mxu0 %vm19904_vm8, %v6208_v50  ;;  %vm19905_vm11 = vmmov %vm19903_vm9 }
0x1828   :  { %v6207_v38 = vsel %vm19905_vm11, %v6205_v33, %v6206_v46  ;;  %vm19908_vm1 = vmmov %vm19903_vm9  ;;  %v17298_v33 = vld [vmem:[%s19689_s7 + $0x11] ss:$0 sm:$0xff] }
0x1829   :  { %v6222_v54 = vsel %vm19908_vm1, %v6206_v46, %v6191_v63  ;;  %vm19909_vm6 = vmmov %vm19902_vm0  ;;  %v6940_v63 = vld [vmem:[%s19688_s6 + $0xf0] sm:$0xff] }
0x182a   :  { %14565 = vmatprep.mubr.msk.f32.mxu0 %vm19909_vm6, %v6207_v38  ;;  %vm19910_vm9 = vmmov %vm19896_vm4  ;;  %v6270_v60 = vsel %vm17232_vm7, %v6222_v54, 0.0  ;;  %14570 = vmatprep.subr.mxu1 %v6940_v63 }
0x182b   :  { %v6127_v34 = vsel %vm19910_vm9, %v6125_v56, %v6126_v53  ;;  %vm19911_vm4 = vmmov %vm19902_vm0  ;;  %14571 = vmatpush3.msra.mxu1 %v6940_v63  ;;  %v6938_v53 = vld [vmem:[%s19688_s6 + $0xe0] sm:$0xff] }
0x182c   :  { %14534 = vmatmul.mubr.msk.f32.gmra.mxu1 %vm19911_vm4, %v6127_v34  ;;  %vm19912_vm13 = vmmov %vm19902_vm0  ;;  %14572 = vmatprep.subr.mxu1 %v6939_v51 }
0x182d   :  { %14566 = vmatmul.mubr.msk.f32.gmra.mxu0 %vm19912_vm13, %v6270_v60  ;;  %14573 = vmatpush3.msra.mxu1 %v6939_v51  ;;  %vm19915_vm11 = vmmov %vm19911_vm4 }
0x182e   :  { %14574 = vmatprep.subr.mxu1 %v6938_v53  ;;  %vm19916_vm6 = vmmov %vm19911_vm4 }
0x182f   :  { %14575 = vmatpush3.msra.mxu1 %v6938_v53  ;;  %vm19918_vm13 = vmmov %vm19916_vm6 }
0x1830   :  { %14632 = vmatprep.subr.mxu1 %v17267_v22 }
0x18a6   :  { %v14482_v39 = vpop.f32.mrf.mxu0 }
0x18a8   :  { %v6385_v15 = vpop.f32.mrf.mxu0 }
0x18aa   :  { %v14485_v58 = vpop.f32.mrf.mxu0 }
0x18ac   :  { %v6395_v5 = vpop.f32.mrf.mxu0 }
0x18ae   :  { %v14488_v45 = vpop.f32.mrf.mxu0 }
0x18b0   :  { %v6405_v55 = vpop.f32.mrf.mxu0 }
0x18b2   :  { %v14491_v41 = vpop.f32.mrf.mxu0 }
0x18b4   :  { %v6415_v42 = vpop.f32.mrf.mxu0 }
0x18b6   :  { %v17279_v19 = vpop.f32.mrf.mxu0 }
0x18b8   :  { %v17281_v2 = vpop.f32.mrf.mxu0 }
0x18ba   :  { %v17283_v48 = vpop.f32.mrf.mxu0 }
0x18bc   :  { %v17285_v28 = vpop.f32.mrf.mxu0 }
0x18be   :  { %v17287_v14 = vpop.f32.mrf.mxu0 }
0x18c0   :  { %v17289_v3 = vpop.f32.mrf.mxu0 }
0x18c2   :  { %v17291_v57 = vpop.f32.mrf.mxu0 }
0x18c4   :  { %v17293_v31 = vpop.f32.mrf.mxu0  ;;  %v14514_v56 = vpop.f32.mrf.mxu1 }
0x18c5   :  { %v6584_v27 = vadd.f32 %v14514_v56, %v14482_v39 }
0x18c6   :  { %v6578_v10 = vpop.f32.mrf.mxu1  ;;  %v14546_v1 = vpop.f32.mrf.mxu0 }
0x18c7   :  { %v6579_v46 = vadd.f32 %v6578_v10, %v6385_v15  ;;  %v6851_v25 = vadd.f32 %v14546_v1, %v6584_v27 }
0x18c8   :  { %v14517_v26 = vpop.f32.mrf.mxu1  ;;  %v6771_v13 = vpop.f32.mrf.mxu0 }
0x18c9   :  { %v6871_v29 = vadd.f32 %v17298_v33, %v6851_v25  ;;  %v6594_v50 = vadd.f32 %v14517_v26, %v14485_v58  ;;  %v6850_v38 = vadd.f32 %v6771_v13, %v6579_v46 }
0x18ca   :  { %v6588_v54 = vpop.f32.mrf.mxu1 }
0x18cb   :  { %v14549_v34 = vpop.f32.mrf.mxu0  ;;  %v6870_v60 = vadd.f32 %v17298_v33, %v6850_v38  ;;  %v6589_v24 = vadd.f32 %v6588_v54, %v6395_v5  ;;  %v6903_v63 = vmul.f32 0.1, %v6871_v29  ;;  %vm6887_vm0 = vcmp.gt.f32.partialorder %v6871_v29, 0.0  ;;  %v6944_v38 = vld [vmem:[%s19688_s6 + $0x110] sm:$0xff] }
0x18cc   :  { %v6853_v51 = vadd.f32 %v14549_v34, %v6594_v50 }
0x18cd   :  { %v14520_v53 = vpop.f32.mrf.mxu1  ;;  %v6781_v23 = vpop.f32.mrf.mxu0  ;;  %vm6886_vm8 = vcmp.gt.f32.partialorder %v6870_v60, 0.0  ;;  %v6902_v56 = vmul.f32 0.1, %v6870_v60  ;;  %v17304_v1 = vsel %vm6887_vm0, %v6871_v29, %v6903_v63  ;;  %vm19920_vm0 = vmmov %vm19916_vm6 }
0x18ce   :  { %v6604_v35 = vadd.f32 %v14520_v53, %v14488_v45  ;;  %v6852_v4 = vadd.f32 %v6781_v23, %v6589_v24  ;;  %v6873_v6 = vadd.f32 %v17298_v33, %v6853_v51  ;;  %19913 = vst [vmem:[#allocation23_spill] sm:$0xff] %v17304_v1 }
0x18cf   :  { %v6598_v39 = vpop.f32.mrf.mxu1  ;;  %v17306_v25 = vsel %vm6886_vm8, %v6870_v60, %v6902_v56 }
0x18d0   :  { %v6872_v58 = vadd.f32 %v17298_v33, %v6852_v4  ;;  %v6599_v27 = vadd.f32 %v6598_v39, %v6405_v55  ;;  %19914 = vst [vmem:[#allocation24_spill] sm:$0xff] %v17306_v25  ;;  %v6905_v26 = vmul.f32 0.1, %v6873_v6  ;;  %14576 = vmatprep.mubr.msk.f32.mxu1 %vm19915_vm11, %v17306_v25  ;;  %vm6889_vm1 = vcmp.gt.f32.partialorder %v6873_v6, 0.0  ;;  %vm19923_vm11 = vmmov %vm19920_vm0 }
0x18d1   :  { %14577 = vmatmul.mubr.msk.f32.vlgmr.msra.gmra.mxu1 %vm19916_vm6, %v17304_v1  ;;  %vm19924_vm6 = vmmov %vm19920_vm0 }
0x18d2   :  { %v14552_v15 = vpop.f32.mrf.mxu0  ;;  %vm6888_vm9 = vcmp.gt.f32.partialorder %v6872_v58, 0.0  ;;  %v6904_v54 = vmul.f32 0.1, %v6872_v58  ;;  %14633 = vmatpush3.msra.mxu1 %v17267_v22  ;;  %v17327_v22 = vsel %vm6889_vm1, %v6873_v6, %v6905_v26 }
0x18d3   :  { %v6855_v10 = vadd.f32 %v14552_v15, %v6604_v35  ;;  %14634 = vmatprep.subr.mxu1 %v6944_v38  ;;  %19919 = vst [vmem:[#allocation26_spill] sm:$0xff] %v17327_v22 }
0x18d4   :  { %v6791_v46 = vpop.f32.mrf.mxu0  ;;  %v17321_v23 = vsel %vm6888_vm9, %v6872_v58, %v6904_v54  ;;  %14635 = vmatpush3.msra.mxu1 %v6944_v38 }
0x18d5   :  { %v6875_v45 = vadd.f32 %v17298_v33, %v6855_v10  ;;  %v6854_v50 = vadd.f32 %v6791_v46, %v6599_v27  ;;  %19917 = vst [vmem:[#allocation25_spill] sm:$0xff] %v17321_v23  ;;  %14579 = vmatprep.mubr.msk.f32.mxu1 %vm19918_vm13, %v17321_v23  ;;  %vm19926_vm13 = vmmov %vm19920_vm0 }
0x18d6   :  { %v14555_v29 = vpop.f32.mrf.mxu0  ;;  %14580 = vmatmul.mubr.msk.f32.gmra.mxu1 %vm19920_vm0, %v17327_v22 }
0x18d7   :  { %v14523_v5 = vpop.f32.mrf.mxu1  ;;  %v6874_v34 = vadd.f32 %v17298_v33, %v6854_v50  ;;  %v6907_v24 = vmul.f32 0.1, %v6875_v45  ;;  %vm6891_vm4 = vcmp.gt.f32.partialorder %v6875_v45, 0.0 }
0x18d8   :  { %v6614_v13 = vadd.f32 %v14523_v5, %v14491_v41  ;;  %v6943_v41 = vld [vmem:[%s19688_s6 + $0x108] sm:$0xff]  ;;  %v6801_v53 = vpop.f32.mrf.mxu0 }
0x18d9   :  { %v6608_v55 = vpop.f32.mrf.mxu1  ;;  %vm6890_vm8 = vcmp.gt.f32.partialorder %v6874_v34, 0.0  ;;  %14636 = vmatprep.subr.mxu1 %v6943_v41  ;;  %v17340_v26 = vsel %vm6891_vm4, %v6875_v45, %v6907_v24 }
0x18da   :  { %v6609_v60 = vadd.f32 %v6608_v55, %v6415_v42  ;;  %v6857_v63 = vadd.f32 %v14555_v29, %v6614_v13  ;;  %v6942_v42 = vld [vmem:[%s19688_s6 + $0x100] sm:$0xff]  ;;  %14637 = vmatpush3.msra.mxu1 %v6943_v41  ;;  %19922 = vst [vmem:[#allocation28_spill] sm:$0xff] %v17340_v26 }
0x18db   :  { %v14526_v51 = vpop.f32.mrf.mxu1  ;;  %14638 = vmatprep.subr.mxu1 %v6942_v42 }
0x18dc   :  { %v6624_v35 = vadd.f32 %v14526_v51, %v17279_v19  ;;  %v6856_v4 = vadd.f32 %v6801_v53, %v6609_v60  ;;  %v6877_v39 = vadd.f32 %v17298_v33, %v6857_v63  ;;  %v14558_v56 = vpop.f32.mrf.mxu0  ;;  %v6906_v19 = vmul.f32 0.1, %v6874_v34  ;;  %14639 = vmatpush3.msra.mxu1 %v6942_v42 }
0x18dd   :  { %v6618_v15 = vpop.f32.mrf.mxu1 }
0x18de   :  { %v6876_v58 = vadd.f32 %v17298_v33, %v6856_v4  ;;  %v6619_v6 = vadd.f32 %v6618_v15, %v17281_v2  ;;  %v6859_v27 = vadd.f32 %v14558_v56, %v6624_v35  ;;  %v6811_v5 = vpop.f32.mrf.mxu0  ;;  %v17337_v46 = vsel %vm6890_vm8, %v6874_v34, %v6906_v19 }
0x18df   :  { %v14529_v10 = vpop.f32.mrf.mxu1  ;;  %19921 = vst [vmem:[#allocation27_spill] sm:$0xff] %v17337_v46  ;;  %v6909_v13 = vmul.f32 0.1, %v6877_v39  ;;  %14582 = vmatprep.mubr.msk.f32.mxu1 %vm19923_vm11, %v17337_v46  ;;  %vm6893_vm1 = vcmp.gt.f32.partialorder %v6877_v39, 0.0  ;;  %vm19928_vm11 = vmmov %vm19920_vm0 }
0x18e0   :  { %v6879_v50 = vadd.f32 %v17298_v33, %v6859_v27  ;;  %v6634_v38 = vadd.f32 %v14529_v10, %v17283_v48  ;;  %v6858_v55 = vadd.f32 %v6811_v5, %v6619_v6  ;;  %14583 = vmatmul.mubr.msk.f32.gmra.mxu1 %vm19924_vm6, %v17340_v26  ;;  %vm6892_vm9 = vcmp.gt.f32.partialorder %v6876_v58, 0.0  ;;  %vm19929_vm6 = vmmov %vm19920_vm0 }
0x18e1   :  { %v6628_v2 = vpop.f32.mrf.mxu1  ;;  %v14561_v29 = vpop.f32.mrf.mxu0  ;;  %v6908_v45 = vmul.f32 0.1, %v6876_v58  ;;  %v17356_v35 = vsel %vm6893_vm1, %v6877_v39, %v6909_v13 }
0x18e2   :  { %v6878_v54 = vadd.f32 %v17298_v33, %v6858_v55  ;;  %v6629_v34 = vadd.f32 %v6628_v2, %v17285_v28  ;;  %v6911_v60 = vmul.f32 0.1, %v6879_v50  ;;  %v6861_v41 = vadd.f32 %v14561_v29, %v6634_v38  ;;  %19927 = vst [vmem:[#allocation30_spill] sm:$0xff] %v17356_v35 }
0x18e3   :  { %v14532_v48 = vpop.f32.mrf.mxu1  ;;  %v6821_v24 = vpop.f32.mrf.mxu0  ;;  %v17350_v63 = vsel %vm6892_vm9, %v6876_v58, %v6908_v45  ;;  %vm6895_vm4 = vcmp.gt.f32.partialorder %v6879_v50, 0.0 }
0x18e4   :  { %19925 = vst [vmem:[#allocation29_spill] sm:$0xff] %v17350_v63  ;;  %v6644_v51 = vadd.f32 %v14532_v48, %v17287_v14  ;;  %v6860_v53 = vadd.f32 %v6821_v24, %v6629_v34  ;;  %14585 = vmatprep.mubr.msk.f32.mxu1 %vm19926_vm13, %v17350_v63  ;;  %v6881_v4 = vadd.f32 %v17298_v33, %v6861_v41  ;;  %vm6894_vm8 = vcmp.gt.f32.partialorder %v6878_v54, 0.0 }
0x18e5   :  { %14586 = vmatmul.mubr.msk.f32.gmra.mxu1 %vm19920_vm0, %v17356_v35  ;;  %v6638_v28 = vpop.f32.mrf.mxu1  ;;  %v6910_v15 = vmul.f32 0.1, %v6878_v54  ;;  %v17366_v39 = vsel %vm6895_vm4, %v6879_v50, %v6911_v60  ;;  %vm19930_vm4 = vmmov %vm19920_vm0 }
0x18e6   :  { %v6880_v56 = vadd.f32 %v17298_v33, %v6860_v53  ;;  %v6639_v14 = vadd.f32 %v6638_v28, %v17289_v3  ;;  %v6913_v10 = vmul.f32 0.1, %v6881_v4  ;;  %vm6897_vm1 = vcmp.gt.f32.partialorder %v6881_v4, 0.0 }
0x18e7   :  { %v14564_v42 = vpop.f32.mrf.mxu0  ;;  %v17363_v27 = vsel %vm6894_vm8, %v6878_v54, %v6910_v15  ;;  %vm19931_vm8 = vmmov %vm19930_vm4 }
0x18e8   :  { %v6863_v19 = vadd.f32 %v14564_v42, %v6644_v51  ;;  %14588 = vmatprep.mubr.msk.f32.mxu1 %vm19928_vm11, %v17363_v27  ;;  %vm6896_vm9 = vcmp.gt.f32.partialorder %v6880_v56, 0.0  ;;  %v6912_v2 = vmul.f32 0.1, %v6880_v56  ;;  %v17380_v41 = vsel %vm6897_vm1, %v6881_v4, %v6913_v10 }
0x18e9   :  { %v6831_v6 = vpop.f32.mrf.mxu0  ;;  %14589 = vmatmul.mubr.msk.f32.gmra.mxu1 %vm19929_vm6, %v17366_v39  ;;  %vm19932_vm6 = vmmov %vm19930_vm4  ;;  %v6995_v42 = vrot.slane %v17306_v25, 1  ;;  %v6997_v10 = vrot.slane %v17321_v23, 1  ;;  %v7006_v20 = vrot.slane %v17380_v41, 1 }
0x18ea   :  { %v6883_v5 = vadd.f32 %v17298_v33, %v6863_v19  ;;  %v6862_v38 = vadd.f32 %v6831_v6, %v6639_v14  ;;  %v17376_v34 = vsel %vm6896_vm9, %v6880_v56, %v6912_v2  ;;  %vm19933_vm9 = vmmov %vm19930_vm4  ;;  %v6949_v19 = vrot.slane %v17321_v23, 7 }
0x18eb   :  { %14591 = vmatprep.mubr.msk.f32.mxu1 %vm19930_vm4, %v17376_v34  ;;  %v6948_v6 = vrot.slane %v17304_v1, 7  ;;  %v6998_v2 = vrot.slane %v17327_v22, 1 }
0x18ec   :  { %v14535_v58 = vpop.f32.mrf.mxu1  ;;  %v6882_v50 = vadd.f32 %v17298_v33, %v6862_v38  ;;  %vm6899_vm0 = vcmp.gt.f32.partialorder %v6883_v5, 0.0 }
0x18ed   :  { %v6654_v13 = vadd.f32 %v14535_v58, %v17291_v57  ;;  %v14567_v55 = vpop.f32.mrf.mxu0  ;;  %v6915_v57 = vmul.f32 0.1, %v6883_v5  ;;  %14592 = vmatmul.mubr.msk.f32.gmra.mxu1 %vm19931_vm8, %v17380_v41  ;;  %v6996_v58 = vrot.slane %v17304_v1, 1  ;;  %vm19936_vm8 = vcmp.lt.s32.totalorder %v15696_v61, 7 }
0x18ee   :  { %v6648_v3 = vpop.f32.mrf.mxu1  ;;  %vm6898_vm13 = vcmp.gt.f32.partialorder %v6882_v50, 0.0  ;;  %v6914_v24 = vmul.f32 0.1, %v6882_v50 }
0x18ef   :  { %v6649_v29 = vadd.f32 %v6648_v3, %v17293_v31  ;;  %v6865_v45 = vadd.f32 %v14567_v55, %v6654_v13  ;;  %v6841_v54 = vpop.f32.mrf.mxu0  ;;  %v17390_v28 = vsel %vm6899_vm0, %v6883_v5, %v6915_v57  ;;  %vm19935_vm0 = vmmov %vm19930_vm4  ;;  %v7025_v38 = vsel %vm19936_vm8, %v6995_v42, %v6996_v58 }
0x18f0   :  { %v17386_v53 = vsel %vm6898_vm13, %v6882_v50, %v6914_v24  ;;  %vm19934_vm13 = vcmp.lt.s32.totalorder %v15696_v61, 1  ;;  %v6951_v55 = vrot.slane %v17337_v46, 7  ;;  %v6950_v50 = vrot.slane %v17327_v22, 7 }
0x18f1   :  { %v6864_v60 = vadd.f32 %v6841_v54, %v6649_v29  ;;  %v6885_v48 = vadd.f32 %v17298_v33, %v6865_v45  ;;  %14594 = vmatprep.mubr.msk.f32.mxu1 %vm19932_vm6, %v17386_v53  ;;  %vm19938_vm6 = vmmov %vm19935_vm0  ;;  %v6999_v29 = vrot.slane %v17337_v46, 1  ;;  %v7023_v54 = vsel %vm19936_vm8, %v6997_v10, %v6998_v2 }
0x18f2   :  { %14595 = vmatmul.mubr.msk.f32.gmra.mxu1 %vm19933_vm9, %v17390_v28  ;;  %vm19940_vm9 = vmmov %vm19935_vm0  ;;  %v7000_v24 = vrot.slane %v17340_v26, 1 }
0x18f3   :  { %v6884_v31 = vadd.f32 %v17298_v33, %v6864_v60  ;;  %vm6901_vm11 = vcmp.gt.f32.partialorder %v6885_v48, 0.0  ;;  %v6917_v51 = vmul.f32 0.1, %v6885_v48  ;;  %v6947_v33 = vrot.slane %v17306_v25, 7 }
0x18f4   :  { %v6953_v60 = vrot.slane %v17350_v63, 7 }
0x18f5   :  { %vm6900_vm1 = vcmp.gt.f32.partialorder %v6884_v31, 0.0  ;;  %v6916_v4 = vmul.f32 0.1, %v6884_v31  ;;  %v17395_v15 = vsel %vm6901_vm11, %v6885_v48, %v6917_v51  ;;  %vm19937_vm11 = vmmov %vm19935_vm0  ;;  %v7001_v51 = vrot.slane %v17350_v63, 1  ;;  %v17604_v63 = vld [vmem:[%s19689_s7 + $0x12] ss:$0 sm:$0xff] }
0x18f6   :  { %v6962_v14 = vrot.slane %v17395_v15, 7 }
0x18f7   :  { %v17398_v56 = vsel %vm6900_vm1, %v6884_v31, %v6916_v4  ;;  %vm19939_vm1 = vmmov %vm19934_vm13  ;;  %v6952_v31 = vrot.slane %v17340_v26, 7  ;;  %v6955_v4 = vrot.slane %v17363_v27, 7 }
0x18f8   :  { %14597 = vmatprep.mubr.msk.f32.mxu1 %vm19930_vm4, %v17398_v56  ;;  %v6978_v5 = vsel %vm19934_vm13, %v6962_v14, %v6947_v33  ;;  %v6977_v3 = vsel %vm19939_vm1, %v6947_v33, %v6948_v6  ;;  %vm19941_vm4 = vmmov %vm19939_vm1 }
0x18f9   :  { %14598 = vmatmul.mubr.msk.f32.gmra.mxu1 %vm19935_vm0, %v17395_v15  ;;  %v6979_v13 = vsel %vm17082_vm10, %v6978_v5, 0.0  ;;  %v6976_v21 = vsel %vm19941_vm4, %v6948_v6, %v6949_v19  ;;  %vm19942_vm10 = vmmov %vm19935_vm0  ;;  %v6954_v6 = vrot.slane %v17356_v35, 7 }
0x18fa   :  { %14608 = vmatprep.mubr.msk.f32.mxu0 %vm19937_vm11, %v6979_v13  ;;  %14640 = vmatprep.mubr.msk.f32.mxu1 %vm19938_vm6, %v7025_v38  ;;  %vm19943_vm13 = vmmov %vm19936_vm8  ;;  %v7002_v13 = vrot.slane %v17356_v35, 1 }
0x18fb   :  { %14609 = vmatmul.mubr.msk.f32.vlgmr.msra.gmra.mxu0 %vm19940_vm9, %v6977_v3  ;;  %v7024_v45 = vsel %vm19943_vm13, %v6996_v58, %v6997_v10  ;;  %vm19944_vm11 = vmmov %vm19935_vm0 }
0x18fc   :  { %14611 = vmatprep.mubr.msk.f32.mxu0 %vm19942_vm10, %v6976_v21  ;;  %vm19945_vm6 = vmmov %vm19939_vm1 }
0x18fd   :  { %14641 = vmatmul.mubr.msk.f32.vlgmr.msra.gmra.mxu1 %vm19935_vm0, %v7024_v45  ;;  %v6975_v57 = vsel %vm19945_vm6, %v6949_v19, %v6950_v50  ;;  %vm19946_vm1 = vmmov %vm19935_vm0  ;;  %v7003_v19 = vrot.slane %v17363_v27, 1  ;;  %v7004_v45 = vrot.slane %v17366_v39, 1 }
0x18fe   :  { %14643 = vmatprep.mubr.msk.f32.mxu1 %vm19944_vm11, %v7023_v54  ;;  %vm19947_vm9 = vmmov %vm19941_vm4  ;;  %v6956_v54 = vrot.slane %v17366_v39, 7 }
0x18ff   :  { %14612 = vmatmul.mubr.msk.f32.gmra.mxu0 %vm19946_vm1, %v6975_v57  ;;  %v6974_v48 = vsel %vm19947_vm9, %v6950_v50, %v6951_v55  ;;  %vm19948_vm4 = vmmov %vm19935_vm0  ;;  %v6957_v50 = vrot.slane %v17376_v34, 7  ;;  %v7005_v57 = vrot.slane %v17376_v34, 1 }
0x1900   :  { %14614 = vmatprep.mubr.msk.f32.mxu0 %vm19948_vm4, %v6974_v48  ;;  %vm19949_vm10 = vmmov %vm19936_vm8 }
0x1901   :  { %v7022_v33 = vsel %vm19949_vm10, %v6998_v2, %v6999_v29  ;;  %vm19950_vm13 = vmmov %vm19935_vm0 }
0x1902   :  { %14644 = vmatmul.mubr.msk.f32.gmra.mxu1 %vm19950_vm13, %v7022_v33  ;;  %vm19951_vm0 = vmmov %vm19936_vm8  ;;  %v7007_v33 = vrot.slane %v17386_v53, 1 }
0x1903   :  { %v7021_v58 = vsel %vm19951_vm0, %v6999_v29, %v7000_v24  ;;  %vm19952_vm8 = vmmov %vm19946_vm1 }
0x1904   :  { %14646 = vmatprep.mubr.msk.f32.mxu1 %vm19952_vm8, %v7021_v58  ;;  %vm19953_vm11 = vmmov %vm19945_vm6 }
0x1905   :  { %v6973_v10 = vsel %vm19953_vm11, %v6951_v55, %v6952_v31  ;;  %vm19954_vm6 = vmmov %vm19946_vm1  ;;  %v7019_v55 = vsel %vm19951_vm0, %v7001_v51, %v7002_v13 }
0x1906   :  { %14615 = vmatmul.mubr.msk.f32.gmra.mxu0 %vm19954_vm6, %v6973_v10  ;;  %vm19955_vm1 = vmmov %vm19947_vm9 }
0x1907   :  { %v6972_v5 = vsel %vm19955_vm1, %v6952_v31, %v6953_v60  ;;  %vm19956_vm9 = vmmov %vm19948_vm4 }
0x1908   :  { %14617 = vmatprep.mubr.msk.f32.mxu0 %vm19956_vm9, %v6972_v5  ;;  %vm19957_vm4 = vmmov %vm19951_vm0  ;;  %v7008_v5 = vrot.slane %v17390_v28, 1 }
0x1909   :  { %v7020_v38 = vsel %vm19957_vm4, %v7000_v24, %v7001_v51  ;;  %vm19958_vm10 = vmmov %vm19955_vm1  ;;  %v6959_v24 = vrot.slane %v17386_v53, 7  ;;  %v6958_v51 = vrot.slane %v17380_v41, 7 }
0x190a   :  { %v6970_v3 = vsel %vm19958_vm10, %v6954_v6, %v6955_v4  ;;  %vm19959_vm13 = vmmov %vm19954_vm6 }
0x190b   :  { %14647 = vmatmul.mubr.msk.f32.gmra.mxu1 %vm19959_vm13, %v7020_v38  ;;  %vm19960_vm8 = vmmov %vm19951_vm0  ;;  %v6987_v29 = vsel %vm17152_vm12, %v6970_v3, 0.0  ;;  %v7009_v38 = vrot.slane %v17398_v56, 1 }
0x190c   :  { %v7018_v21 = vsel %vm19960_vm8, %v7002_v13, %v7003_v19  ;;  %vm19961_vm11 = vmmov %vm19954_vm6  ;;  %v6960_v13 = vrot.slane %v17390_v28, 7 }
0x190d   :  { %14649 = vmatprep.mubr.msk.f32.mxu1 %vm19961_vm11, %v7019_v55  ;;  %vm19962_vm6 = vmmov %vm19955_vm1  ;;  %v7034_v48 = vsel %vm17161_vm14, %v7018_v21, 0.0  ;;  %v7010_v21 = vrot.slane %v17395_v15, 1 }
0x190e   :  { %v6971_v2 = vsel %vm19962_vm6, %v6953_v60, %v6954_v6  ;;  %vm19963_vm1 = vmmov %vm19956_vm9  ;;  %v6961_v6 = vrot.slane %v17398_v56, 7 }
0x190f   :  { %14618 = vmatmul.mubr.msk.f32.gmra.mxu0 %vm19963_vm1, %v6971_v2  ;;  %vm19964_vm9 = vmmov %vm19963_vm1 }
0x1910   :  { %14620 = vmatprep.mubr.msk.f32.mxu0 %vm19964_vm9, %v6987_v29  ;;  %vm19965_vm4 = vmmov %vm19963_vm1 }
0x1911   :  { %14650 = vmatmul.mubr.msk.f32.gmra.mxu1 %vm19965_vm4, %v7034_v48  ;;  %vm19966_vm10 = vmmov %vm19951_vm0 }
0x1912   :  { %v7017_v60 = vsel %vm19966_vm10, %v7003_v19, %v7004_v45  ;;  %vm19967_vm13 = vmmov %vm19963_vm1 }
0x1913   :  { %14652 = vmatprep.mubr.msk.f32.mxu1 %vm19967_vm13, %v7017_v60  ;;  %vm19968_vm12 = vmmov %vm19962_vm6 }
0x1914   :  { %v6969_v36 = vsel %vm19968_vm12, %v6955_v4, %v6956_v54  ;;  %vm19969_vm0 = vmmov %vm19963_vm1 }
0x1915   :  { %14621 = vmatmul.mubr.msk.f32.gmra.mxu0 %vm19969_vm0, %v6969_v36  ;;  %vm19970_vm8 = vmmov %vm19962_vm6 }
0x1916   :  { %v6968_v31 = vsel %vm19970_vm8, %v6956_v54, %v6957_v50  ;;  %vm19971_vm14 = vmmov %vm19969_vm0 }
0x1917   :  { %14623 = vmatprep.mubr.msk.f32.mxu0 %vm19971_vm14, %v6968_v31  ;;  %vm19972_vm11 = vmmov %vm19966_vm10 }
0x1918   :  { %v7016_v19 = vsel %vm19972_vm11, %v7004_v45, %v7005_v57  ;;  %vm19973_vm6 = vmmov %vm19969_vm0 }
0x1919   :  { %14653 = vmatmul.mubr.msk.f32.gmra.mxu1 %vm19973_vm6, %v7016_v19  ;;  %vm19974_vm1 = vmmov %vm19966_vm10 }
0x191a   :  { %v7015_v4 = vsel %vm19974_vm1, %v7005_v57, %v7006_v20  ;;  %vm19975_vm9 = vmmov %vm19969_vm0 }
0x191b   :  { %14655 = vmatprep.mubr.msk.f32.mxu1 %vm19975_vm9, %v7015_v4  ;;  %vm19976_vm4 = vmmov %vm19970_vm8 }
0x191c   :  { %v6967_v58 = vsel %vm19976_vm4, %v6957_v50, %v6958_v51  ;;  %vm19977_vm10 = vmmov %vm19969_vm0 }
0x191d   :  { %14624 = vmatmul.mubr.msk.f32.gmra.mxu0 %vm19977_vm10, %v6967_v58  ;;  %vm19978_vm13 = vmmov %vm19976_vm4 }
0x191e   :  { %v6966_v10 = vsel %vm19978_vm13, %v6958_v51, %v6959_v24  ;;  %vm19979_vm12 = vmmov %vm19969_vm0 }
0x191f   :  { %14626 = vmatprep.mubr.msk.f32.mxu0 %vm19979_vm12, %v6966_v10  ;;  %vm19980_vm0 = vmmov %vm19974_vm1 }
0x1920   :  { %v7014_v3 = vsel %vm19980_vm0, %v7006_v20, %v7007_v33  ;;  %vm19981_vm8 = vmmov %vm19973_vm6  ;;  %v7026_v54 = vsel %vm19980_vm0, %v7010_v21, %v6995_v42 }
0x1921   :  { %14656 = vmatmul.mubr.msk.f32.gmra.mxu1 %vm19981_vm8, %v7014_v3  ;;  %vm19982_vm14 = vmmov %vm19980_vm0  ;;  %v7042_v48 = vsel %vm17232_vm7, %v7026_v54, 0.0 }
0x1922   :  { %v7013_v55 = vsel %vm19982_vm14, %v7007_v33, %v7008_v5  ;;  %vm19983_vm11 = vmmov %vm19973_vm6 }
0x1923   :  { %14658 = vmatprep.mubr.msk.f32.mxu1 %vm19983_vm11, %v7013_v55  ;;  %vm19984_vm6 = vmmov %vm19976_vm4 }
0x1924   :  { %v6965_v2 = vsel %vm19984_vm6, %v6959_v24, %v6960_v13  ;;  %vm19985_vm1 = vmmov %vm19981_vm8 }
0x1925   :  { %14627 = vmatmul.mubr.msk.f32.gmra.mxu0 %vm19985_vm1, %v6965_v2  ;;  %vm19986_vm9 = vmmov %vm19976_vm4  ;;  %v8033_v2 = vld [vmem:[%s19688_s6 + $0x150] sm:$0xff] }
0x1926   :  { %v6964_v50 = vsel %vm19986_vm9, %v6960_v13, %v6961_v6  ;;  %vm19987_vm4 = vmmov %vm19985_vm1 }
0x1927   :  { %14629 = vmatprep.mubr.msk.f32.mxu0 %vm19987_vm4, %v6964_v50  ;;  %vm19988_vm10 = vmmov %vm19980_vm0 }
0x1928   :  { %v7012_v29 = vsel %vm19988_vm10, %v7008_v5, %v7009_v38  ;;  %vm19989_vm13 = vmmov %vm19985_vm1 }
0x1929   :  { %14659 = vmatmul.mubr.msk.f32.gmra.mxu1 %vm19989_vm13, %v7012_v29  ;;  %vm19990_vm12 = vmmov %vm19980_vm0 }
0x192a   :  { %v7011_v45 = vsel %vm19990_vm12, %v7009_v38, %v7010_v21  ;;  %vm19991_vm8 = vmmov %vm19985_vm1  ;;  %v8034_v21 = vld [vmem:[%s19688_s6 + $0x158] sm:$0xff] }
0x192b   :  { %14661 = vmatprep.mubr.msk.f32.mxu1 %vm19991_vm8, %v7011_v45  ;;  %vm19992_vm14 = vmmov %vm19984_vm6  ;;  %14744 = vmatprep.subr.mxu1 %v8034_v21  ;;  %v8032_v45 = vld [vmem:[%s19688_s6 + $0x148] sm:$0xff] }
0x192c   :  { %v6963_v57 = vsel %vm19992_vm14, %v6961_v6, %v6962_v14  ;;  %vm19993_vm11 = vmmov %vm19985_vm1  ;;  %14745 = vmatpush3.msra.mxu1 %v8034_v21 }
0x192d   :  { %14630 = vmatmul.mubr.msk.f32.gmra.mxu0 %vm19993_vm11, %v6963_v57  ;;  %vm19994_vm6 = vmmov %vm19985_vm1  ;;  %14746 = vmatprep.subr.mxu1 %v8033_v2 }
0x192e   :  { %14696 = vmatprep.mubr.msk.f32.mxu0 %vm16820_vm2, %v19789_v44  ;;  %14662 = vmatmul.mubr.msk.f32.gmra.mxu1 %vm19994_vm6, %v7042_v48  ;;  %v8031_v48 = vld [vmem:[%s19688_s6 + $0x140] sm:$0xff] }
0x192f   :  { %14747 = vmatpush3.msra.mxu1 %v8033_v2 }
0x1930   :  { %14748 = vmatprep.subr.mxu1 %v8032_v45 }
0x1931   :  { %14749 = vmatpush3.msra.mxu1 %v8032_v45 }
0x1932   :  { %14750 = vmatprep.subr.mxu1 %v8031_v48 }
0x1933   :  { %14751 = vmatpush3.msra.mxu1 %v8031_v48 }
0x1991   :  { %v17549_v60 = vpop.f32.mrf.mxu1 }
0x1993   :  { %v17551_v42 = vpop.f32.mrf.mxu1 }
0x1996   :  { %v17553_v36 = vpop.f32.mrf.mxu1 }
0x1998   :  { %v17555_v24 = vpop.f32.mrf.mxu1 }
0x19a0   :  { %v17557_v14 = vpop.f32.mrf.mxu1 }
0x19a2   :  { %v17559_v31 = vpop.f32.mrf.mxu1 }
0x19a5   :  { %v17561_v37 = vpop.f32.mrf.mxu1 }
0x19a7   :  { %v17563_v20 = vpop.f32.mrf.mxu1 }
0x19a9   :  { %v14590_v30 = vpop.f32.mrf.mxu1 }
0x19ab   :  { %v17565_v51 = vpop.f32.mrf.mxu1 }
0x19ad   :  { %v14593_v33 = vpop.f32.mrf.mxu1 }
0x19af   :  { %v7207_v19 = vpop.f32.mrf.mxu1 }
0x19b2   :  { %v14596_v4 = vpop.f32.mrf.mxu1 }
0x19b4   :  { %v7217_v58 = vpop.f32.mrf.mxu1 }
0x19b9   :  { %v14599_v6 = vpop.f32.mrf.mxu1 }
0x19bb   :  { %v7227_v10 = vpop.f32.mrf.mxu1  ;;  %v17567_v5 = vpop.f32.mrf.mxu0 }
0x19bd   :  { %v17569_v13 = vpop.f32.mrf.mxu0  ;;  %v17571_v38 = vpop.f32.mrf.mxu1 }
0x19bf   :  { %v17573_v3 = vpop.f32.mrf.mxu0  ;;  %v17575_v55 = vpop.f32.mrf.mxu1 }
0x19c0   :  { %19995 = vst [vmem:[#allocation31_spill] sm:$0xff] %v17575_v55 }
0x19c1   :  { %v17583_v50 = vpop.f32.mrf.mxu0 }
0x19c2   :  { %v17585_v29 = vpop.f32.mrf.mxu1 }
0x19c4   :  { %v17590_v57 = vpop.f32.mrf.mxu1 }
0x19c6   :  { %v14616_v54 = vpop.f32.mrf.mxu0 }
0x19c8   :  { %v17595_v49 = vpop.f32.mrf.mxu0 }
0x19cb   :  { %v17597_v62 = vpop.f32.mrf.mxu1 }
0x19cd   :  { %v17599_v0 = vpop.f32.mrf.mxu1 }
0x19cf   :  { %v14619_v21 = vpop.f32.mrf.mxu0 }
0x19d1   :  { %v7380_v16 = vpop.f32.mrf.mxu0  ;;  %v14651_v47 = vpop.f32.mrf.mxu1 }
0x19d3   :  { %v7573_v17 = vpop.f32.mrf.mxu1 }
0x19d5   :  { %v14622_v9 = vpop.f32.mrf.mxu0 }
0x19d6   :  { %v7396_v35 = vadd.f32 %v14622_v9, %v14590_v30 }
0x19d7   :  { %v7390_v2 = vpop.f32.mrf.mxu0 }
0x19d9   :  { %v14654_v61 = vpop.f32.mrf.mxu1 }
0x19db   :  { %v7583_v18 = vpop.f32.mrf.mxu1 }
0x19dd   :  { %v14625_v52 = vpop.f32.mrf.mxu0 }
0x19de   :  { %v7406_v59 = vadd.f32 %v14625_v52, %v14593_v33  ;;  %v7391_v33 = vadd.f32 %v7390_v2, %v17565_v51 }
0x19df   :  { %v7400_v32 = vpop.f32.mrf.mxu0 }
0x19e0   :  { %v7401_v23 = vadd.f32 %v7400_v32, %v7207_v19  ;;  %v7376_v19 = vadd.f32 %v14616_v54, %v17557_v14 }
0x19e1   :  { %v14657_v7 = vpop.f32.mrf.mxu1 }
0x19e3   :  { %v7593_v12 = vpop.f32.mrf.mxu1 }
0x19e5   :  { %v14628_v40 = vpop.f32.mrf.mxu0 }
0x19e6   :  { %v7416_v11 = vadd.f32 %v14628_v40, %v14596_v4  ;;  %v7633_v40 = vadd.f32 %v14657_v7, %v7406_v59 }
0x19e7   :  { %v7410_v43 = vpop.f32.mrf.mxu0 }
0x19e8   :  { %v7411_v8 = vadd.f32 %v7410_v43, %v7217_v58  ;;  %v7386_v58 = vadd.f32 %v14619_v21, %v17561_v37  ;;  %v7653_v59 = vadd.f32 %v17604_v63, %v7633_v40 }
0x19e9   :  { %v14660_v45 = vpop.f32.mrf.mxu1 }
0x19ea   :  { %v7635_v44 = vadd.f32 %v14660_v45, %v7416_v11  ;;  %v7629_v14 = vadd.f32 %v14651_v47, %v7386_v58  ;;  %v7685_v30 = vmul.f32 0.1, %v7653_v59  ;;  %vm7669_vm4 = vcmp.gt.f32.partialorder %v7653_v59, 0.0 }
0x19eb   :  { %v7603_v48 = vpop.f32.mrf.mxu1 }
0x19ec   :  { %v7634_v22 = vadd.f32 %v7603_v48, %v7411_v8  ;;  %v7655_v4 = vadd.f32 %v17604_v63, %v7635_v44  ;;  %v7649_v21 = vadd.f32 %v17604_v63, %v7629_v14 }
0x19ed   :  { %v14631_v25 = vpop.f32.mrf.mxu0 }
0x19ee   :  { %v7426_v1 = vadd.f32 %v14631_v25, %v14599_v6  ;;  %v14663_v26 = vpop.f32.mrf.mxu1  ;;  %v7632_v25 = vadd.f32 %v7593_v12, %v7401_v23  ;;  %v7654_v8 = vadd.f32 %v17604_v63, %v7634_v22  ;;  %v7631_v6 = vadd.f32 %v14654_v61, %v7396_v35 }
0x19ef   :  { %v7420_v46 = vpop.f32.mrf.mxu0  ;;  %v7687_v44 = vmul.f32 0.1, %v7655_v4  ;;  %vm7671_vm7 = vcmp.gt.f32.partialorder %v7655_v4, 0.0  ;;  %v7630_v23 = vadd.f32 %v7583_v18, %v7391_v33  ;;  %v7681_v40 = vmul.f32 0.1, %v7649_v21 }
0x19f0   :  { %v7421_v55 = vadd.f32 %v7420_v46, %v7227_v10  ;;  %v7637_v43 = vadd.f32 %v14663_v26, %v7426_v1  ;;  %v7613_v52 = vpop.f32.mrf.mxu1  ;;  %v7381_v1 = vadd.f32 %v7380_v16, %v17563_v20  ;;  %v7652_v22 = vadd.f32 %v17604_v63, %v7632_v25 }
0x19f1   :  { %v7686_v46 = vmul.f32 0.1, %v7654_v8  ;;  %vm7670_vm9 = vcmp.gt.f32.partialorder %v7654_v8, 0.0  ;;  %v7651_v37 = vadd.f32 %v17604_v63, %v7631_v6  ;;  %v7703_v10 = vsel %vm7671_vm7, %v7655_v4, %v7687_v44 }
0x19f2   :  { %v7636_v11 = vadd.f32 %v7613_v52, %v7421_v55  ;;  %v7657_v32 = vadd.f32 %v17604_v63, %v7637_v43  ;;  %v7371_v16 = vadd.f32 %v17595_v49, %v17559_v31  ;;  %v7628_v18 = vadd.f32 %v7573_v17, %v7381_v1  ;;  %v19999_v1 = vld [vmem:[#allocation28_spill] sm:$0xff] }
0x19f3   :  { %v7650_v20 = vadd.f32 %v17604_v63, %v7630_v23  ;;  %v7684_v55 = vmul.f32 0.1, %v7652_v22  ;;  %v7702_v47 = vsel %vm7670_vm9, %v7654_v8, %v7686_v46  ;;  %v7719_v54 = vadd.f32 %v7703_v10, %v17390_v28  ;;  %v20000_v46 = vld [vmem:[#allocation27_spill] sm:$0xff] }
0x19f4   :  { %v7656_v9 = vadd.f32 %v17604_v63, %v7636_v11  ;;  %vm7673_vm2 = vcmp.gt.f32.partialorder %v7657_v32, 0.0  ;;  %v7689_v7 = vmul.f32 0.1, %v7657_v32  ;;  %vm7668_vm10 = vcmp.gt.f32.partialorder %v7652_v22, 0.0 }
0x19f5   :  { %v7683_v49 = vmul.f32 0.1, %v7651_v37  ;;  %v7701_v31 = vsel %vm7669_vm4, %v7653_v59, %v7685_v30  ;;  %v7361_v17 = vadd.f32 %v17583_v50, %v17555_v24  ;;  %vm7667_vm13 = vcmp.gt.f32.partialorder %v7651_v37, 0.0  ;;  %v20002_v30 = vld [vmem:[#allocation25_spill] sm:$0xff] }
0x19f6   :  { %v7688_v12 = vmul.f32 0.1, %v7656_v9  ;;  %vm7672_vm1 = vcmp.gt.f32.partialorder %v7656_v9, 0.0  ;;  %v7705_v26 = vsel %vm7673_vm2, %v7657_v32, %v7689_v7  ;;  %v7718_v2 = vadd.f32 %v7702_v47, %v17386_v53 }
0x19f7   :  { %v7721_v61 = vadd.f32 %v7705_v26, %v17395_v15  ;;  %v7366_v15 = vadd.f32 %v17573_v3, %v17553_v36  ;;  %v7626_v36 = vadd.f32 %v17599_v0, %v7371_v16  ;;  %v7648_v3 = vadd.f32 %v17604_v63, %v7628_v18  ;;  %v20003_v16 = vld [vmem:[#allocation23_spill] sm:$0xff] }
0x19f8   :  { %v7704_v35 = vsel %vm7672_vm1, %v7656_v9, %v7688_v12  ;;  %v7682_v28 = vmul.f32 0.1, %v7650_v20  ;;  %v7700_v45 = vsel %vm7668_vm10, %v7652_v22, %v7684_v55  ;;  %v7717_v48 = vadd.f32 %v7701_v31, %v17380_v41  ;;  %v19998_v9 = vld [vmem:[#allocation29_spill] sm:$0xff] }
0x19f9   :  { %v7720_v51 = vadd.f32 %v7704_v35, %v17398_v56  ;;  %14664 = vmatprep.subr.mxu0 %v7721_v61  ;;  %v7627_v56 = vadd.f32 %v17597_v62, %v7376_v19  ;;  %v7356_v62 = vadd.f32 %v17567_v5, %v17549_v60  ;;  %vm7666_vm12 = vcmp.gt.f32.partialorder %v7650_v20, 0.0  ;;  %v20001_v35 = vld [vmem:[#allocation26_spill] sm:$0xff]  ;;  %v20013_v31 = vld [vmem:[#allocation9_spill] sm:$0xff] }
0x19fa   :  { %14665 = vmatpush3.msra.mxu0 %v7721_v61  ;;  %v7625_v24 = vadd.f32 %v17585_v29, %v7366_v15  ;;  %v7699_v0 = vsel %vm7667_vm13, %v7651_v37, %v7683_v49  ;;  %v7351_v53 = vadd.f32 %v17569_v13, %v17551_v42  ;;  %vm7665_vm0 = vcmp.gt.f32.partialorder %v7649_v21, 0.0  ;;  %v20011_v49 = vld [vmem:[#allocation13_spill] sm:$0xff] }
0x19fb   :  { %14666 = vmatprep.subr.mxu0 %v7720_v51  ;;  %v7647_v50 = vadd.f32 %v17604_v63, %v7627_v56  ;;  %v7716_v4 = vadd.f32 %v7700_v45, %v17376_v34  ;;  %v7624_v60 = vadd.f32 %v17590_v57, %v7361_v17  ;;  %v7646_v41 = vadd.f32 %v17604_v63, %v7626_v36  ;;  %v19996_v57 = vld [vmem:[#allocation31_spill] sm:$0xff]  ;;  %v20015_v17 = vld [vmem:[#allocation14_spill] sm:$0xff]  ;;  %v20019_v36 = vld [vmem:[#allocation16_spill] sm:$0xff] }
0x19fc   :  { %14667 = vmatpush3.msra.mxu0 %v7720_v51  ;;  %v7680_v5 = vmul.f32 0.1, %v7648_v3  ;;  %v7698_v29 = vsel %vm7666_vm12, %v7650_v20, %v7682_v28  ;;  %v7715_v43 = vadd.f32 %v7699_v0, %v17366_v39  ;;  %vm7664_vm8 = vcmp.gt.f32.partialorder %v7648_v3, 0.0  ;;  %v19997_v39 = vld [vmem:[#allocation30_spill] sm:$0xff]  ;;  %v20004_v20 = vld [vmem:[#allocation24_spill] sm:$0xff]  ;;  %v20023_v28 = vld [vmem:[#allocation5_spill] sm:$0xff] }
0x19fd   :  { %14668 = vmatprep.subr.mxu0 %v7719_v54  ;;  %v7623_v52 = vadd.f32 %v17571_v38, %v7356_v62  ;;  %v7645_v11 = vadd.f32 %v17604_v63, %v7625_v24  ;;  %v7679_v42 = vmul.f32 0.1, %v7647_v50  ;;  %v7697_v13 = vsel %vm7665_vm0, %v7649_v21, %v7681_v40  ;;  %v20009_v21 = vld [vmem:[#allocation12_spill] sm:$0xff]  ;;  %v20024_v62 = vld [vmem:[#allocation18_spill] sm:$0xff] }
0x19fe   :  { %14669 = vmatpush3.msra.mxu0 %v7719_v54  ;;  %vm7663_vm14 = vcmp.gt.f32.partialorder %v7647_v50, 0.0  ;;  %v7714_v34 = vadd.f32 %v7698_v29, %v17363_v27  ;;  %v7622_v33 = vadd.f32 %v19996_v57, %v7351_v53  ;;  %v7644_v25 = vadd.f32 %v17604_v63, %v7624_v60  ;;  %v20028_v0 = vld [vmem:[#allocation20_spill] sm:$0xff]  ;;  %v20030_v53 = vld [vmem:[#allocation21_spill] sm:$0xff] }
0x19ff   :  { %14670 = vmatprep.subr.mxu0 %v7718_v2  ;;  %v7678_v8 = vmul.f32 0.1, %v7646_v41  ;;  %v7696_v32 = vsel %vm7664_vm8, %v7648_v3, %v7680_v5  ;;  %v7713_v19 = vadd.f32 %v7697_v13, %v19997_v39  ;;  %vm7662_vm11 = vcmp.gt.f32.partialorder %v7646_v41, 0.0  ;;  %v20021_v3 = vld [vmem:[#allocation17_spill] sm:$0xff] }
0x1a00   :  { %14671 = vmatpush3.msra.mxu0 %v7718_v2  ;;  %v7643_v38 = vadd.f32 %v17604_v63, %v7623_v52  ;;  %v7677_v58 = vmul.f32 0.1, %v7645_v11  ;;  %v7695_v6 = vsel %vm7663_vm14, %v7647_v50, %v7679_v42  ;;  %vm7661_vm6 = vcmp.gt.f32.partialorder %v7645_v11, 0.0  ;;  %v20017_v2 = vld [vmem:[#allocation15_spill] sm:$0xff] }
0x1a01   :  { %14672 = vmatprep.subr.mxu0 %v7717_v48  ;;  %v7712_v27 = vadd.f32 %v7696_v32, %v19998_v9  ;;  %v7642_v59 = vadd.f32 %v17604_v63, %v7622_v33  ;;  %v7676_v44 = vmul.f32 0.1, %v7644_v25  ;;  %v7694_v7 = vsel %vm7662_vm11, %v7646_v41, %v7678_v8  ;;  %v20032_v41 = vld [vmem:[#allocation6_spill] sm:$0xff] }
0x1a02   :  { %14673 = vmatpush3.msra.mxu0 %v7717_v48  ;;  %v7711_v12 = vadd.f32 %v7695_v6, %v19999_v1  ;;  %vm7660_vm2 = vcmp.gt.f32.partialorder %v7644_v25, 0.0  ;;  %v7675_v23 = vmul.f32 0.1, %v7643_v38  ;;  %v7693_v22 = vsel %vm7661_vm6, %v7645_v11, %v7677_v58  ;;  %v20026_v48 = vld [vmem:[#allocation19_spill] sm:$0xff] }
0x1a03   :  { %14674 = vmatprep.subr.mxu0 %v7716_v4  ;;  %vm7659_vm7 = vcmp.gt.f32.partialorder %v7643_v38, 0.0  ;;  %v7710_v26 = vadd.f32 %v7694_v7, %v20000_v46  ;;  %v7674_v14 = vmul.f32 0.1, %v7642_v59  ;;  %v7692_v61 = vsel %vm7660_vm2, %v7644_v25, %v7676_v44  ;;  %v8030_v46 = vld [vmem:[%s19688_s6 + $0x138] sm:$0xff] }
0x1a04   :  { %14675 = vmatpush3.msra.mxu0 %v7716_v4  ;;  %v7709_v63 = vadd.f32 %v7693_v22, %v20001_v35  ;;  %vm7658_vm1 = vcmp.gt.f32.partialorder %v7642_v59, 0.0  ;;  %v7691_v37 = vsel %vm7659_vm7, %v7643_v38, %v7675_v23  ;;  %v7708_v51 = vadd.f32 %v7692_v61, %v20002_v30  ;;  %v8028_v61 = vld [vmem:[%s19688_s6 + $0x128] sm:$0xff]  ;;  %v8027_v35 = vld [vmem:[%s19688_s6 + $0x120] sm:$0xff]  ;;  %v8037_v30 = vld [vmem:[%s19688_s6 + $0x170] sm:$0xff] }
0x1a05   :  { %14676 = vmatprep.subr.mxu0 %v7715_v43  ;;  %v7690_v10 = vsel %vm7658_vm1, %v7642_v59, %v7674_v14  ;;  %v7707_v18 = vadd.f32 %v7691_v37, %v20003_v16  ;;  %v20005_v47 = vmov 1.0   ;;  %vm20010_vm9 = vnez %v20009_v21  ;;  %v8029_v14 = vld [vmem:[%s19688_s6 + $0x130] sm:$0xff] }
0x1a06   :  { %14677 = vmatpush3.msra.mxu0 %v7715_v43  ;;  %v7706_v55 = vadd.f32 %v7690_v10, %v20004_v20  ;;  %vm20012_vm4 = vnez %v20011_v49  ;;  %vm20014_vm10 = vnez %v20013_v31  ;;  %vm20022_vm13 = vnez %v20021_v3  ;;  %v20033_v43 = vld [vmem:[#allocation22_spill] sm:$0xff] }
0x1a07   :  { %14678 = vmatprep.subr.mxu0 %v7714_v34  ;;  %v17690_v45 = vadd.s32 128, %v20023_v28  ;;  %vm20025_vm12 = vnez %v20024_v62  ;;  %vm20027_vm0 = vnez %v20026_v48  ;;  %v7723_v24 = vadd.s32 136, %v20023_v28  ;;  %v8036_v10 = vld [vmem:[%s19688_s6 + $0x168] sm:$0xff] }
0x1a08   :  { %14679 = vmatpush3.msra.mxu0 %v7714_v34  ;;  %v7724_v40 = vadd.s32 144, %v20023_v28  ;;  %vm20029_vm8 = vnez %v20028_v0  ;;  %vm20031_vm14 = vnez %v20030_v53  ;;  %v7725_v60 = vadd.s32 152, %v20023_v28 }
0x1a09   :  { %14680 = vmatprep.subr.mxu0 %v7713_v19  ;;  %v7738_v50 = vshra.s32 %v17690_v45, 1  ;;  %v7739_v4 = vshra.s32 %v7723_v24, 1  ;;  %v7726_v29 = vadd.s32 160, %v20023_v28  ;;  %vm20034_vm6 = vnez %v20033_v43 }
0x1a0a   :  { %14681 = vmatpush3.msra.mxu0 %v7713_v19  ;;  %v7740_v5 = vshra.s32 %v7724_v40, 1  ;;  %v7741_v52 = vshra.s32 %v7725_v60, 1  ;;  %v7727_v11 = vadd.s32 168, %v20023_v28  ;;  %v7728_v13 = vadd.s32 176, %v20023_v28 }
0x1a0b   :  { %14682 = vmatprep.subr.mxu0 %v7712_v27  ;;  %vm7754_vm11 = vcmp.eq.s32.totalorder %v7738_v50, %v20032_v41  ;;  %vm7755_vm2 = vcmp.eq.s32.totalorder %v7739_v4, %v20032_v41  ;;  %v7742_v42 = vshra.s32 %v7726_v29, 1  ;;  %v7729_v57 = vadd.s32 184, %v20023_v28 }
0x1a0c   :  { %14683 = vmatpush3.msra.mxu0 %v7712_v27  ;;  %vm7756_vm7 = vcmp.eq.s32.totalorder %v7740_v5, %v20032_v41  ;;  %vm7757_vm1 = vcmp.eq.s32.totalorder %v7741_v52, %v20032_v41  ;;  %v7743_v34 = vshra.s32 %v7727_v11, 1  ;;  %v7744_v33 = vshra.s32 %v7728_v13, 1 }
0x1a0d   :  { %14684 = vmatprep.subr.mxu0 %v7711_v12  ;;  %v7730_v25 = vadd.s32 192, %v20023_v28  ;;  %v7745_v8 = vshra.s32 %v7729_v57, 1  ;;  %v7731_v32 = vadd.s32 200, %v20023_v28  ;;  %v7732_v19 = vadd.s32 208, %v20023_v28 }
0x1a0e   :  { %14685 = vmatpush3.msra.mxu0 %v7711_v12  ;;  %v7733_v58 = vadd.s32 216, %v20023_v28  ;;  %v7734_v9 = vadd.s32 224, %v20023_v28  ;;  %v7735_v59 = vadd.s32 232, %v20023_v28  ;;  %v7736_v7 = vadd.s32 240, %v20023_v28 }
0x1a0f   :  { %14686 = vmatprep.subr.mxu0 %v7710_v26  ;;  %v7746_v39 = vshra.s32 %v7730_v25, 1  ;;  %v7747_v38 = vshra.s32 %v7731_v32, 1  ;;  %v7748_v6 = vshra.s32 %v7732_v19, 1  ;;  %v17746_v12 = vadd.s32 248, %v20023_v28 }
0x1a10   :  { %14687 = vmatpush3.msra.mxu0 %v7710_v26  ;;  %v7749_v27 = vshra.s32 %v7733_v58, 1  ;;  %v7750_v44 = vshra.s32 %v7734_v9, 1  ;;  %v7751_v1 = vshra.s32 %v7735_v59, 1  ;;  %v7752_v23 = vshra.s32 %v7736_v7, 1  ;;  %v8038_v26 = vld [vmem:[%s19688_s6 + $0x178] sm:$0xff] }
0x1a11   :  { %14688 = vmatprep.subr.mxu0 %v7709_v63  ;;  %v7753_v22 = vshra.s32 %v17746_v12, 1  ;;  %14856 = vmatprep.subr.mxu1 %v8038_v26  ;;  %v8040_v43 = vand.u32 127, %v20023_v28  ;;  %v20064_v57 = vmov 0 }
0x1a12   :  { %14689 = vmatpush3.msra.mxu0 %v7709_v63 }
0x1a13   :  { %14690 = vmatprep.subr.mxu0 %v7708_v51 }
0x1a14   :  { %14691 = vmatpush3.msra.mxu0 %v7708_v51 }
0x1a15   :  { %14692 = vmatprep.subr.mxu0 %v7707_v18 }
0x1a16   :  { %14693 = vmatpush3.msra.mxu0 %v7707_v18  ;;  %v8035_v18 = vld [vmem:[%s19688_s6 + $0x160] sm:$0xff] }
0x1a17   :  { %14694 = vmatprep.subr.mxu0 %v7706_v55 }
0x1a18   :  { %14695 = vmatpush3.msra.mxu0 %v7706_v55 }
0x1a19   :  { %14697 = vmatmul.mubr.msk.f32.vlgmr.msra.gmra.mxu0 %vm16843_vm15, %v20005_v47  ;;  %vm20016_vm15 = vnez %v20015_v17  ;;  %14800 = vmatprep.subr.mxu0 %v8030_v46 }
0x1a1a   :  { %14699 = vmatprep.mubr.msk.f32.mxu0 %vm16850_vm3, %v20005_v47  ;;  %vm20018_vm3 = vnez %v20017_v2  ;;  %14801 = vmatpush3.msra.mxu0 %v8030_v46 }
0x1a1b   :  { %14802 = vmatprep.subr.mxu0 %v8029_v14 }
0x1a1c   :  { %14803 = vmatpush3.msra.mxu0 %v8029_v14 }
0x1a1d   :  { %14700 = vmatmul.mubr.msk.f32.gmra.mxu0 %vm16863_vm5, %v20005_v47  ;;  %vm20020_vm5 = vnez %v20019_v36  ;;  %14804 = vmatprep.subr.mxu0 %v8028_v61 }
0x1a1e   :  { %14702 = vmatprep.mubr.msk.f32.mxu0 %vm20010_vm9, %v20005_v47  ;;  %vm7758_vm9 = vcmp.eq.s32.totalorder %v7742_v42, %v20032_v41  ;;  %14805 = vmatpush3.msra.mxu0 %v8028_v61 }
0x1a1f   :  { %14806 = vmatprep.subr.mxu0 %v8027_v35 }
0x1a20   :  { %14807 = vmatpush3.msra.mxu0 %v8027_v35 }
0x1a21   :  { %14703 = vmatmul.mubr.msk.f32.gmra.mxu0 %vm20012_vm4, %v20005_v47  ;;  %vm7759_vm4 = vcmp.eq.s32.totalorder %v7743_v34, %v20032_v41 }
0x1a22   :  { %14705 = vmatprep.mubr.msk.f32.mxu0 %vm20014_vm10, %v20005_v47  ;;  %vm7760_vm10 = vcmp.eq.s32.totalorder %v7744_v33, %v20032_v41 }
0x1a25   :  { %14706 = vmatmul.mubr.msk.f32.gmra.mxu0 %vm20016_vm15, %v20005_v47  ;;  %vm7761_vm15 = vcmp.eq.s32.totalorder %v7745_v8, %v20032_v41 }
0x1a26   :  { %14708 = vmatprep.mubr.msk.f32.mxu0 %vm20018_vm3, %v20005_v47  ;;  %vm7762_vm3 = vcmp.eq.s32.totalorder %v7746_v39, %v20032_v41 }
0x1a29   :  { %14709 = vmatmul.mubr.msk.f32.gmra.mxu0 %vm20020_vm5, %v20005_v47  ;;  %vm7763_vm5 = vcmp.eq.s32.totalorder %v7747_v38, %v20032_v41 }
0x1a2a   :  { %14711 = vmatprep.mubr.msk.f32.mxu0 %vm20022_vm13, %v20005_v47  ;;  %vm7764_vm13 = vcmp.eq.s32.totalorder %v7748_v6, %v20032_v41 }
0x1a2d   :  { %14712 = vmatmul.mubr.msk.f32.gmra.mxu0 %vm20025_vm12, %v20005_v47  ;;  %vm7765_vm12 = vcmp.eq.s32.totalorder %v7749_v27, %v20032_v41 }
0x1a2e   :  { %14714 = vmatprep.mubr.msk.f32.mxu0 %vm20027_vm0, %v20005_v47  ;;  %vm7766_vm0 = vcmp.eq.s32.totalorder %v7750_v44, %v20032_v41 }
0x1a31   :  { %14715 = vmatmul.mubr.msk.f32.gmra.mxu0 %vm20029_vm8, %v20005_v47  ;;  %vm7767_vm8 = vcmp.eq.s32.totalorder %v7751_v1, %v20032_v41 }
0x1a32   :  { %14717 = vmatprep.mubr.msk.f32.mxu0 %vm20031_vm14, %v20005_v47  ;;  %vm7768_vm14 = vcmp.eq.s32.totalorder %v7752_v23, %v20032_v41 }
0x1a35   :  { %14718 = vmatmul.mubr.msk.f32.gmra.mxu0 %vm20034_vm6, %v20005_v47  ;;  %vm20035_vm6 = vcmask 261120  }
0x1a36   :  { %14720 = vmatprep.mubr.msk.f32.mxu0 %vm7754_vm11, %v20005_v47  ;;  %vm7769_vm11 = vcmp.eq.s32.totalorder %v7753_v22, %v20032_v41 }
0x1a39   :  { %14721 = vmatmul.mubr.msk.f32.gmra.mxu0 %vm7755_vm2, %v20005_v47  ;;  %vm20036_vm2 = vmmov %vm20035_vm6 }
0x1a3a   :  { %14723 = vmatprep.mubr.msk.f32.mxu0 %vm7756_vm7, %v20005_v47  ;;  %vm20037_vm7 = vmmov %vm20036_vm2 }
0x1a3d   :  { %14724 = vmatmul.mubr.msk.f32.gmra.mxu0 %vm7757_vm1, %v20005_v47  ;;  %vm20038_vm1 = vmmov %vm20036_vm2 }
0x1a3e   :  { %14726 = vmatprep.mubr.msk.f32.mxu0 %vm7758_vm9, %v20005_v47  ;;  %vm20039_vm9 = vmmov %vm20038_vm1 }
0x1a41   :  { %14727 = vmatmul.mubr.msk.f32.gmra.mxu0 %vm7759_vm4, %v20005_v47  ;;  %vm20040_vm4 = vmmov %vm20038_vm1 }
0x1a42   :  { %14729 = vmatprep.mubr.msk.f32.mxu0 %vm7760_vm10, %v20005_v47  ;;  %vm20041_vm10 = vmmov %vm20038_vm1 }
0x1a45   :  { %14730 = vmatmul.mubr.msk.f32.gmra.mxu0 %vm7761_vm15, %v20005_v47  ;;  %vm20042_vm15 = vmmov %vm20038_vm1 }
0x1a46   :  { %14732 = vmatprep.mubr.msk.f32.mxu0 %vm7762_vm3, %v20005_v47  ;;  %vm20043_vm3 = vmmov %vm20038_vm1 }
0x1a49   :  { %14733 = vmatmul.mubr.msk.f32.gmra.mxu0 %vm7763_vm5, %v20005_v47  ;;  %vm20044_vm5 = vmmov %vm20038_vm1 }
0x1a4a   :  { %14735 = vmatprep.mubr.msk.f32.mxu0 %vm7764_vm13, %v20005_v47  ;;  %vm20045_vm13 = vmmov %vm20038_vm1 }
0x1a4d   :  { %14736 = vmatmul.mubr.msk.f32.gmra.mxu0 %vm7765_vm12, %v20005_v47  ;;  %vm20046_vm12 = vmmov %vm20038_vm1 }
0x1a4e   :  { %14738 = vmatprep.mubr.msk.f32.mxu0 %vm7766_vm0, %v20005_v47  ;;  %vm20047_vm0 = vmmov %vm20038_vm1 }
0x1a51   :  { %14739 = vmatmul.mubr.msk.f32.gmra.mxu0 %vm7767_vm8, %v20005_v47  ;;  %vm20048_vm8 = vmmov %vm20047_vm0 }
0x1a52   :  { %14741 = vmatprep.mubr.msk.f32.mxu0 %vm7768_vm14, %v20005_v47  ;;  %vm20049_vm14 = vmmov %vm20047_vm0 }
0x1a55   :  { %14742 = vmatmul.mubr.msk.f32.gmra.mxu0 %vm7769_vm11, %v20005_v47  ;;  %vm20050_vm11 = vmmov %vm20047_vm0 }
0x1ad9   :  { %v17773_v63 = vpop.f32.mrf.mxu0 }
0x1ada   :  { %v8345_v33 = vrot.slane %v17773_v63, 1  ;;  %v8185_v32 = vrot.slane %v17773_v63, 7 }
0x1adb   :  { %v17775_v37 = vpop.f32.mrf.mxu0 }
0x1adc   :  { %14752 = vmatprep.mubr.msk.f32.mxu1 %vm20035_vm6, %v17775_v37  ;;  %vm20051_vm6 = vmmov %vm20047_vm0  ;;  %v8344_v11 = vrot.slane %v17775_v37, 1  ;;  %v8184_v13 = vrot.slane %v17775_v37, 7  ;;  %v9635_v37 = vld [vmem:[%s19688_s6 + $0x1a0] sm:$0xff] }
0x1add   :  { %v17782_v51 = vpop.f32.mrf.mxu0  ;;  %14753 = vmatmul.mubr.msk.f32.vlgmr.msra.gmra.mxu1 %vm20036_vm2, %v17773_v63  ;;  %vm20052_vm2 = vmmov %vm20047_vm0 }
0x1ade   :  { %14857 = vmatpush3.msra.mxu1 %v8038_v26  ;;  %v8347_v9 = vrot.slane %v17782_v51, 1  ;;  %v8187_v44 = vrot.slane %v17782_v51, 7 }
0x1adf   :  { %v17789_v16 = vpop.f32.mrf.mxu0  ;;  %14858 = vmatprep.subr.mxu1 %v8037_v30 }
0x1ae0   :  { %14755 = vmatprep.mubr.msk.f32.mxu1 %vm20037_vm7, %v17789_v16  ;;  %14859 = vmatpush3.msra.mxu1 %v8037_v30  ;;  %vm20053_vm7 = vmmov %vm20047_vm0  ;;  %v8186_v25 = vrot.slane %v17789_v16, 7  ;;  %v8346_v39 = vrot.slane %v17789_v16, 1 }
0x1ae1   :  { %v17796_v20 = vpop.f32.mrf.mxu0  ;;  %14756 = vmatmul.mubr.msk.f32.gmra.mxu1 %vm20038_vm1, %v17782_v51  ;;  %14860 = vmatprep.subr.mxu1 %v8036_v10  ;;  %vm20054_vm1 = vmmov %vm20047_vm0 }
0x1ae2   :  { %14861 = vmatpush3.msra.mxu1 %v8036_v10  ;;  %v8349_v46 = vrot.slane %v17796_v20, 1  ;;  %v8189_v61 = vrot.slane %v17796_v20, 7 }
0x1ae3   :  { %v17800_v55 = vpop.f32.mrf.mxu0  ;;  %14862 = vmatprep.subr.mxu1 %v8035_v18 }
0x1ae4   :  { %14758 = vmatprep.mubr.msk.f32.mxu1 %vm20039_vm9, %v17800_v55  ;;  %14863 = vmatpush3.msra.mxu1 %v8035_v18  ;;  %vm20055_vm9 = vmmov %vm20047_vm0  ;;  %v8188_v27 = vrot.slane %v17800_v55, 7  ;;  %v8348_v1 = vrot.slane %v17800_v55, 1 }
0x1ae5   :  { %v17804_v47 = vpop.f32.mrf.mxu0  ;;  %14759 = vmatmul.mubr.msk.f32.gmra.mxu1 %vm20040_vm4, %v17796_v20  ;;  %vm20056_vm4 = vmmov %vm20047_vm0 }
0x1ae6   :  { %v8351_v10 = vrot.slane %v17804_v47, 1  ;;  %v8191_v20 = vrot.slane %v17804_v47, 7 }
0x1ae7   :  { %v17808_v15 = vpop.f32.mrf.mxu0 }
0x1ae8   :  { %14761 = vmatprep.mubr.msk.f32.mxu1 %vm20041_vm10, %v17808_v15  ;;  %vm20057_vm10 = vmmov %vm20047_vm0  ;;  %v8190_v26 = vrot.slane %v17808_v15, 7  ;;  %v8350_v35 = vrot.slane %v17808_v15, 1 }
0x1ae9   :  { %v17812_v54 = vpop.f32.mrf.mxu0  ;;  %14762 = vmatmul.mubr.msk.f32.gmra.mxu1 %vm20042_vm15, %v17804_v47  ;;  %vm20058_vm15 = vmmov %vm20047_vm0 }
0x1aeb   :  { %v17816_v56 = vpop.f32.mrf.mxu0 }
0x1aec   :  { %14764 = vmatprep.mubr.msk.f32.mxu1 %vm20043_vm3, %v17816_v56  ;;  %vm20059_vm3 = vmmov %vm20047_vm0  ;;  %v8192_v16 = vrot.slane %v17816_v56, 7  ;;  %v8352_v55 = vrot.slane %v17816_v56, 1 }
0x1aed   :  { %v17820_v21 = vpop.f32.mrf.mxu0  ;;  %14765 = vmatmul.mubr.msk.f32.gmra.mxu1 %vm20044_vm5, %v17812_v54  ;;  %vm20060_vm5 = vmmov %vm20047_vm0 }
0x1aef   :  { %v17824_v49 = vpop.f32.mrf.mxu0 }
0x1af0   :  { %14767 = vmatprep.mubr.msk.f32.mxu1 %vm20045_vm13, %v17824_v49  ;;  %vm20061_vm13 = vmmov %vm20047_vm0  ;;  %v8194_v47 = vrot.slane %v17824_v49, 7 }
0x1af1   :  { %v17828_v31 = vpop.f32.mrf.mxu0  ;;  %14768 = vmatmul.mubr.msk.f32.gmra.mxu1 %vm20046_vm12, %v17820_v21  ;;  %vm20062_vm12 = vmmov %vm20047_vm0 }
0x1af3   :  { %v17832_v17 = vpop.f32.mrf.mxu0 }
0x1af4   :  { %14770 = vmatprep.mubr.msk.f32.mxu1 %vm20047_vm0, %v17832_v17 }
0x1af5   :  { %v17836_v2 = vpop.f32.mrf.mxu0  ;;  %14771 = vmatmul.mubr.msk.f32.gmra.mxu1 %vm20048_vm8, %v17828_v31  ;;  %vm20063_vm8 = vmmov %vm20047_vm0 }
0x1af7   :  { %v17840_v36 = vpop.f32.mrf.mxu0 }
0x1af8   :  { %14773 = vmatprep.mubr.msk.f32.mxu1 %vm20049_vm14, %v17840_v36  ;;  %vm17908_vm14 = vcmp.ne.s32.totalorder %v8040_v43, 0 }
0x1af9   :  { %v17844_v3 = vpop.f32.mrf.mxu0  ;;  %14774 = vmatmul.mubr.msk.f32.gmra.mxu1 %vm20050_vm11, %v17836_v2  ;;  %v20065_v57 = vsel %vm17908_vm14, 4294967295, %v20064_v57  ;;  %vm20067_vm11 = vmmov %vm20047_vm0 }
0x1afa   :  { %20066 = vst [vmem:[#allocation31_spill] sm:$0xff] %v20065_v57 }
0x1afb   :  { %v17848_v62 = vpop.f32.mrf.mxu0 }
0x1afc   :  { %14776 = vmatprep.mubr.msk.f32.mxu1 %vm20051_vm6, %v17848_v62  ;;  %vm20068_vm6 = vcmp.lt.s32.totalorder %v20023_v28, 1 }
0x1afd   :  { %v17852_v48 = vpop.f32.mrf.mxu0  ;;  %14777 = vmatmul.mubr.msk.f32.gmra.mxu1 %vm20052_vm2, %v17844_v3  ;;  %vm20069_vm2 = vmmov %vm20047_vm0 }
0x1aff   :  { %v17856_v24 = vpop.f32.mrf.mxu0 }
0x1b00   :  { %14779 = vmatprep.mubr.msk.f32.mxu1 %vm20053_vm7, %v17856_v24  ;;  %vm20070_vm7 = vcmp.lt.s32.totalorder %v20023_v28, 7 }
0x1b01   :  { %v17860_v50 = vpop.f32.mrf.mxu0  ;;  %14780 = vmatmul.mubr.msk.f32.gmra.mxu1 %vm20054_vm1, %v17852_v48  ;;  %v8406_v58 = vsel %vm20070_vm7, %v8344_v11, %v8345_v33  ;;  %vm20071_vm1 = vmmov %vm20068_vm6 }
0x1b02   :  { %v8246_v6 = vsel %vm20071_vm1, %v8184_v13, %v8185_v32 }
0x1b03   :  { %v17864_v40 = vpop.f32.mrf.mxu0 }
0x1b04   :  { %14782 = vmatprep.mubr.msk.f32.mxu1 %vm20055_vm9, %v17864_v40  ;;  %vm20072_vm9 = vmmov %vm20047_vm0 }
0x1b05   :  { %v17868_v0 = vpop.f32.mrf.mxu0  ;;  %14783 = vmatmul.mubr.msk.f32.gmra.mxu1 %vm20056_vm4, %v17860_v50  ;;  %vm20073_vm4 = vmmov %vm20047_vm0 }
0x1b07   :  { %v17872_v53 = vpop.f32.mrf.mxu0 }
0x1b08   :  { %14785 = vmatprep.mubr.msk.f32.mxu1 %vm20057_vm10, %v17872_v53  ;;  %vm20074_vm10 = vmmov %vm20047_vm0 }
0x1b09   :  { %v17876_v4 = vpop.f32.mrf.mxu0  ;;  %14786 = vmatmul.mubr.msk.f32.gmra.mxu1 %vm20058_vm15, %v17868_v0  ;;  %vm20075_vm15 = vmmov %vm20071_vm1 }
0x1b0a   :  { %v8245_v59 = vsel %vm20075_vm15, %v8185_v32, %v8186_v25  ;;  %vm20089_vm15 = vmmov %vm20047_vm0  ;;  %v8354_v32 = vrot.slane %v17824_v49, 1  ;;  %v8355_v49 = vrot.slane %v17820_v21, 1 }
0x1b0b   :  { %v17880_v60 = vpop.f32.mrf.mxu0 }
0x1b0c   :  { %14788 = vmatprep.mubr.msk.f32.mxu1 %vm20059_vm3, %v17880_v60  ;;  %vm20076_vm3 = vmmov %vm20070_vm7 }
0x1b0d   :  { %v17884_v41 = vpop.f32.mrf.mxu0  ;;  %14789 = vmatmul.mubr.msk.f32.gmra.mxu1 %vm20060_vm5, %v17876_v4  ;;  %v8405_v7 = vsel %vm20076_vm3, %v8345_v33, %v8346_v39  ;;  %vm20077_vm5 = vmmov %vm20047_vm0  ;;  %v8353_v33 = vrot.slane %v17812_v54, 1 }
0x1b0e   :  { %vm20084_vm7 = vmmov %vm20076_vm3 }
0x1b0f   :  { %v17888_v5 = vpop.f32.mrf.mxu0  ;;  %v8403_v63 = vsel %vm20084_vm7, %v8347_v9, %v8348_v1 }
0x1b10   :  { %14791 = vmatprep.mubr.msk.f32.mxu1 %vm20061_vm13, %v17888_v5  ;;  %vm20078_vm13 = vmmov %vm20047_vm0 }
0x1b11   :  { %v17892_v29 = vpop.f32.mrf.mxu0  ;;  %14792 = vmatmul.mubr.msk.f32.gmra.mxu1 %vm20062_vm12, %v17884_v41  ;;  %vm20079_vm12 = vmmov %vm20076_vm3 }
0x1b12   :  { %v8404_v23 = vsel %vm20079_vm12, %v8346_v39, %v8347_v9  ;;  %vm20093_vm12 = vmmov %vm20047_vm0  ;;  %v8195_v9 = vrot.slane %v17820_v21, 7  ;;  %v8357_v21 = vrot.slane %v17828_v31, 1 }
0x1b13   :  { %v17897_v52 = vpop.f32.mrf.mxu0 }
0x1b14   :  { %14794 = vmatprep.mubr.msk.f32.mxu1 %vm20047_vm0, %v17897_v52 }
0x1b15   :  { %v17902_v42 = vpop.f32.mrf.mxu0  ;;  %14795 = vmatmul.mubr.msk.f32.gmra.mxu1 %vm20063_vm8, %v17892_v29  ;;  %vm20080_vm8 = vmmov %vm20071_vm1 }
0x1b16   :  { %v8215_v34 = vrot.slane %v17902_v42, 7  ;;  %v8244_v22 = vsel %vm20080_vm8, %v8186_v25, %v8187_v44  ;;  %v8193_v25 = vrot.slane %v17812_v54, 7 }
0x1b17   :  { %v17914_v8 = vpop.f32.mrf.mxu0 }
0x1b18   :  { %14797 = vmatprep.mubr.msk.f32.mxu1 %vm20067_vm11, %v17914_v8  ;;  %v8247_v19 = vsel %vm20068_vm6, %v8215_v34, %v8184_v13  ;;  %vm20081_vm11 = vmmov %vm20047_vm0 }
0x1b19   :  { %14798 = vmatmul.mubr.msk.f32.gmra.mxu1 %vm20069_vm2, %v17902_v42  ;;  %v8312_v38 = vsel %vm17908_vm14, %v8247_v19, 0.0  ;;  %vm20082_vm6 = vmmov %vm20071_vm1 }
0x1b1a   :  { %14808 = vmatprep.mubr.msk.f32.mxu0 %vm20072_vm9, %v8312_v38  ;;  %14864 = vmatprep.mubr.msk.f32.mxu1 %vm20073_vm4, %v8406_v58  ;;  %v8243_v14 = vsel %vm20082_vm6, %v8187_v44, %v8188_v27  ;;  %vm20083_vm2 = vmmov %vm20047_vm0  ;;  %v9638_v38 = vld [vmem:[%s19688_s6 + $0x1b8] sm:$0xff]  ;;  %v8196_v58 = vrot.slane %v17832_v17, 7 }
0x1b1b   :  { %14809 = vmatmul.mubr.msk.f32.vlgmr.msra.gmra.mxu0 %vm20074_vm10, %v8246_v6  ;;  %vm20085_vm1 = vmmov %vm20047_vm0  ;;  %14912 = vmatprep.subr.mxu0 %v9638_v38 }
0x1b1c   :  { %14811 = vmatprep.mubr.msk.f32.mxu0 %vm20077_vm5, %v8245_v59  ;;  %vm20086_vm9 = vmmov %vm20076_vm3  ;;  %14913 = vmatpush3.msra.mxu0 %v9638_v38  ;;  %v8203_v38 = vrot.slane %v17852_v48, 7 }
0x1b1d   :  { %14865 = vmatmul.mubr.msk.f32.vlgmr.msra.gmra.mxu1 %vm20078_vm13, %v8405_v7  ;;  %v8402_v30 = vsel %vm20086_vm9, %v8348_v1, %v8349_v46  ;;  %vm20087_vm4 = vmmov %vm20047_vm0 }
0x1b1e   :  { %14867 = vmatprep.mubr.msk.f32.mxu1 %vm20047_vm0, %v8404_v23  ;;  %vm20088_vm10 = vmmov %vm20082_vm6  ;;  %v8056_v23 = vand.u32 127, %v17690_v45 }
0x1b1f   :  { %14812 = vmatmul.mubr.msk.f32.gmra.mxu0 %vm20081_vm11, %v8244_v22  ;;  %v8242_v51 = vsel %vm20088_vm10, %v8188_v27, %v8189_v61  ;;  %vm20090_vm3 = vmmov %vm20082_vm6  ;;  %v8356_v27 = vrot.slane %v17832_v17, 1  ;;  %v8198_v17 = vrot.slane %v17840_v36, 7  ;;  %v8197_v22 = vrot.slane %v17828_v31, 7 }
0x1b20   :  { %14814 = vmatprep.mubr.msk.f32.mxu0 %vm20083_vm2, %v8243_v14  ;;  %v8241_v18 = vsel %vm20090_vm3, %v8189_v61, %v8190_v26  ;;  %vm20091_vm5 = vmmov %vm20047_vm0  ;;  %v8360_v61 = vrot.slane %v17848_v62, 1  ;;  %v8199_v31 = vrot.slane %v17836_v2, 7 }
0x1b21   :  { %14868 = vmatmul.mubr.msk.f32.gmra.mxu1 %vm20085_vm1, %v8403_v63  ;;  %vm20092_vm13 = vmmov %vm20084_vm7  ;;  %v20119_v63 = vld [vmem:[#allocation10_spill] sm:$0xff] }
0x1b22   :  { %14870 = vmatprep.mubr.msk.f32.mxu1 %vm20087_vm4, %v8402_v30  ;;  %v8401_v15 = vsel %vm20092_vm13, %v8349_v46, %v8350_v35  ;;  %vm20094_vm0 = vmmov %vm20084_vm7  ;;  %v8358_v46 = vrot.slane %v17840_v36, 1  ;;  %v8135_v45 = vand.u32 127, %v20119_v63  ;;  %v8359_v30 = vrot.slane %v17836_v2, 1 }
0x1b23   :  { %14815 = vmatmul.mubr.msk.f32.gmra.mxu0 %vm20089_vm15, %v8242_v51  ;;  %v8400_v43 = vsel %vm20094_vm0, %v8350_v35, %v8351_v10  ;;  %vm20095_vm8 = vmmov %vm20085_vm1 }
0x1b24   :  { %14817 = vmatprep.mubr.msk.f32.mxu0 %vm20091_vm5, %v8241_v18  ;;  %vm20096_vm11 = vmmov %vm20090_vm3  ;;  %v20132_v18 = vmov 0 }
0x1b25   :  { %14871 = vmatmul.mubr.msk.f32.gmra.mxu1 %vm20093_vm12, %v8401_v15  ;;  %v8240_v13 = vsel %vm20096_vm11, %v8190_v26, %v8191_v20  ;;  %vm20097_vm6 = vmmov %vm20085_vm1  ;;  %v8200_v26 = vrot.slane %v17848_v62, 7  ;;  %v8361_v15 = vrot.slane %v17844_v3, 1 }
0x1b26   :  { %14873 = vmatprep.mubr.msk.f32.mxu1 %vm20095_vm8, %v8400_v43  ;;  %vm20098_vm2 = vmmov %vm20090_vm3  ;;  %v8202_v43 = vrot.slane %v17856_v24, 7 }
0x1b27   :  { %14818 = vmatmul.mubr.msk.f32.gmra.mxu0 %vm20097_vm6, %v8240_v13  ;;  %v8239_v56 = vsel %vm20098_vm2, %v8191_v20, %v8192_v16  ;;  %vm20099_vm7 = vmmov %vm20085_vm1 }
0x1b28   :  { %14820 = vmatprep.mubr.msk.f32.mxu0 %vm20099_vm7, %v8239_v56  ;;  %vm20100_vm1 = vmmov %vm20094_vm0 }
0x1b29   :  { %v8399_v39 = vsel %vm20100_vm1, %v8351_v10, %v8352_v55  ;;  %vm20101_vm9 = vmmov %vm20087_vm4  ;;  %v20126_v10 = vmov 0 }
0x1b2a   :  { %14874 = vmatmul.mubr.msk.f32.gmra.mxu1 %vm20101_vm9, %v8399_v39  ;;  %vm20102_vm4 = vmmov %vm20094_vm0  ;;  %v8204_v39 = vrot.slane %v17864_v40, 7 }
0x1b2b   :  { %v8398_v19 = vsel %vm20102_vm4, %v8352_v55, %v8353_v33  ;;  %vm20103_vm10 = vmmov %vm20091_vm5 }
0x1b2c   :  { %14876 = vmatprep.mubr.msk.f32.mxu1 %vm20103_vm10, %v8398_v19  ;;  %vm20104_vm15 = vmmov %vm20098_vm2 }
0x1b2d   :  { %v8238_v54 = vsel %vm20104_vm15, %v8192_v16, %v8193_v25  ;;  %vm20105_vm3 = vmmov %vm20091_vm5 }
0x1b2e   :  { %14821 = vmatmul.mubr.msk.f32.gmra.mxu0 %vm20105_vm3, %v8238_v54  ;;  %vm20106_vm5 = vmmov %vm20098_vm2  ;;  %v8364_v54 = vrot.slane %v17864_v40, 1  ;;  %v8206_v40 = vrot.slane %v17872_v53, 7 }
0x1b2f   :  { %v8237_v6 = vsel %vm20106_vm5, %v8193_v25, %v8194_v47  ;;  %vm20107_vm13 = vmmov %vm20105_vm3 }
0x1b30   :  { %14823 = vmatprep.mubr.msk.f32.mxu0 %vm20107_vm13, %v8237_v6  ;;  %vm20108_vm12 = vmmov %vm20094_vm0 }
0x1b31   :  { %v8397_v59 = vsel %vm20108_vm12, %v8353_v33, %v8354_v32  ;;  %vm20109_vm0 = vmmov %vm20105_vm3  ;;  %v8201_v33 = vrot.slane %v17844_v3, 7 }
0x1b32   :  { %14877 = vmatmul.mubr.msk.f32.gmra.mxu1 %vm20109_vm0, %v8397_v59  ;;  %vm20110_vm8 = vmmov %vm20100_vm1  ;;  %v8366_v59 = vrot.slane %v17872_v53, 1 }
0x1b33   :  { %v8396_v44 = vsel %vm20110_vm8, %v8354_v32, %v8355_v49  ;;  %vm20111_vm11 = vmmov %vm20109_vm0  ;;  %v9637_v32 = vld [vmem:[%s19688_s6 + $0x1b0] sm:$0xff] }
0x1b34   :  { %14879 = vmatprep.mubr.msk.f32.mxu1 %vm20111_vm11, %v8396_v44  ;;  %vm20112_vm6 = vmmov %vm20098_vm2  ;;  %14914 = vmatprep.subr.mxu0 %v9637_v32 }
0x1b35   :  { %v8236_v7 = vsel %vm20112_vm6, %v8194_v47, %v8195_v9  ;;  %vm20113_vm2 = vmmov %vm20109_vm0  ;;  %v8362_v47 = vrot.slane %v17856_v24, 1  ;;  %v8363_v24 = vrot.slane %v17852_v48, 1  ;;  %14915 = vmatpush3.msra.mxu0 %v9637_v32  ;;  %v8365_v48 = vrot.slane %v17860_v50, 1 }
0x1b36   :  { %14824 = vmatmul.mubr.msk.f32.gmra.mxu0 %vm20113_vm2, %v8236_v7  ;;  %vm20114_vm7 = vmmov %vm20106_vm5 }
0x1b37   :  { %v8235_v1 = vsel %vm20114_vm7, %v8195_v9, %v8196_v58  ;;  %vm20115_vm1 = vmmov %vm20109_vm0  ;;  %vm18056_vm7 = vcmp.ne.s32.totalorder %v8135_v45, 0 }
0x1b38   :  { %14826 = vmatprep.mubr.msk.f32.mxu0 %vm20115_vm1, %v8235_v1  ;;  %vm20116_vm9 = vmmov %vm20102_vm4  ;;  %v20133_v18 = vsel %vm18056_vm7, 4294967295, %v20132_v18  ;;  %v8207_v1 = vrot.slane %v17868_v0, 7 }
0x1b39   :  { %v8395_v14 = vsel %vm20116_vm9, %v8355_v49, %v8356_v27  ;;  %vm20117_vm4 = vmmov %vm20109_vm0  ;;  %20134 = vst [vmem:[#allocation29_spill] sm:$0xff] %v20133_v18 }
0x1b3a   :  { %14880 = vmatmul.mubr.msk.f32.gmra.mxu1 %vm20117_vm4, %v8395_v14  ;;  %vm20118_vm10 = vmmov %vm20110_vm8  ;;  %v8369_v14 = vrot.slane %v17876_v4, 1 }
0x1b3b   :  { %v8394_v35 = vsel %vm20118_vm10, %v8356_v27, %v8357_v21  ;;  %vm20120_vm15 = vmmov %vm20109_vm0  ;;  %v8205_v27 = vrot.slane %v17860_v50, 7  ;;  %v8208_v50 = vrot.slane %v17880_v60, 7 }
0x1b3c   :  { %14882 = vmatprep.mubr.msk.f32.mxu1 %vm20120_vm15, %v8394_v35  ;;  %vm20121_vm3 = vmmov %vm20106_vm5  ;;  %v8370_v35 = vrot.slane %v17888_v5, 1 }
0x1b3d   :  { %v8234_v36 = vsel %vm20121_vm3, %v8196_v58, %v8197_v22  ;;  %vm20122_vm5 = vmmov %vm20109_vm0 }
0x1b3e   :  { %14827 = vmatmul.mubr.msk.f32.gmra.mxu0 %vm20122_vm5, %v8234_v36  ;;  %vm20123_vm13 = vmmov %vm20121_vm3  ;;  %v8212_v36 = vrot.slane %v17897_v52, 7 }
0x1b3f   :  { %v8233_v62 = vsel %vm20123_vm13, %v8197_v22, %v8198_v17  ;;  %vm20124_vm12 = vmmov %vm20109_vm0 }
0x1b40   :  { %14829 = vmatprep.mubr.msk.f32.mxu0 %vm20124_vm12, %v8233_v62  ;;  %vm20125_vm0 = vmmov %vm20110_vm8  ;;  %vm18047_vm8 = vcmp.ne.s32.totalorder %v8056_v23, 0  ;;  %v8368_v23 = vrot.slane %v17880_v60, 1  ;;  %v8211_v62 = vrot.slane %v17884_v41, 7 }
0x1b41   :  { %v8393_v51 = vsel %vm20125_vm0, %v8357_v21, %v8358_v46  ;;  %v20127_v10 = vsel %vm18047_vm8, 4294967295, %v20126_v10  ;;  %vm20129_vm11 = vmmov %vm20121_vm3 }
0x1b42   :  { %20128 = vst [vmem:[#allocation30_spill] sm:$0xff] %v20127_v10  ;;  %v8231_v16 = vsel %vm20129_vm11, %v8199_v31, %v8200_v26  ;;  %vm20130_vm6 = vmmov %vm20115_vm1 }
0x1b43   :  { %14883 = vmatmul.mubr.msk.f32.gmra.mxu1 %vm20130_vm6, %v8393_v51  ;;  %vm20131_vm2 = vmmov %vm20125_vm0  ;;  %v8328_v13 = vsel %vm18047_vm8, %v8231_v16, 0.0  ;;  %v8372_v51 = vrot.slane %v17897_v52, 1  ;;  %v8373_v52 = vrot.slane %v17892_v29, 1 }
0x1b44   :  { %v8392_v2 = vsel %vm20131_vm2, %v8358_v46, %v8359_v30  ;;  %vm20135_vm1 = vmmov %vm20125_vm0 }
0x1b45   :  { %v8391_v20 = vsel %vm20135_vm1, %v8359_v30, %v8360_v61  ;;  %vm20136_vm9 = vmmov %vm20117_vm4 }
0x1b46   :  { %14885 = vmatprep.mubr.msk.f32.mxu1 %vm20136_vm9, %v8392_v2  ;;  %vm20137_vm4 = vmmov %vm20121_vm3  ;;  %v8487_v56 = vsel %vm18056_vm7, %v8391_v20, 0.0  ;;  %v8119_v20 = vadd.s32 1, %v17746_v12 }
0x1b47   :  { %v8232_v55 = vsel %vm20137_vm4, %v8198_v17, %v8199_v31  ;;  %vm20138_vm10 = vmmov %vm20122_vm5  ;;  %v8367_v17 = vrot.slane %v17868_v0, 1  ;;  %v8210_v0 = vrot.slane %v17888_v5, 7  ;;  %v9636_v31 = vld [vmem:[%s19688_s6 + $0x1a8] sm:$0xff]  ;;  %v8371_v5 = vrot.slane %v17884_v41, 1 }
0x1b48   :  { %14830 = vmatmul.mubr.msk.f32.gmra.mxu0 %vm20138_vm10, %v8232_v55  ;;  %vm20139_vm15 = vmmov %vm20122_vm5  ;;  %14916 = vmatprep.subr.mxu0 %v9636_v31  ;;  %v8214_v55 = vrot.slane %v17914_v8, 7 }
0x1b49   :  { %14832 = vmatprep.mubr.msk.f32.mxu0 %vm20139_vm15, %v8328_v13  ;;  %vm20140_vm3 = vmmov %vm20122_vm5  ;;  %14917 = vmatpush3.msra.mxu0 %v9636_v31  ;;  %v8374_v13 = vrot.slane %v17914_v8, 1 }
0x1b4a   :  { %14886 = vmatmul.mubr.msk.f32.gmra.mxu1 %vm20140_vm3, %v8487_v56  ;;  %vm20141_vm5 = vmmov %vm20125_vm0  ;;  %v8151_v56 = vand.u32 127, %v8119_v20  ;;  %14918 = vmatprep.subr.mxu0 %v9635_v37  ;;  %v18287_v20 = vld [vmem:[%s19689_s7 + $0x13] ss:$0 sm:$0xff] }
0x1b4b   :  { %v8390_v25 = vsel %vm20141_vm5, %v8360_v61, %v8361_v15  ;;  %vm20142_vm13 = vmmov %vm20140_vm3  ;;  %v8209_v61 = vrot.slane %v17876_v4, 7  ;;  %14919 = vmatpush3.msra.mxu0 %v9635_v37 }
0x1b4c   :  { %14888 = vmatprep.mubr.msk.f32.mxu1 %vm20142_vm13, %v8390_v25  ;;  %vm20143_vm12 = vmmov %vm20137_vm4 }
0x1b4d   :  { %v8230_v3 = vsel %vm20143_vm12, %v8200_v26, %v8201_v33  ;;  %vm20144_vm0 = vmmov %vm20140_vm3 }
0x1b4e   :  { %14833 = vmatmul.mubr.msk.f32.gmra.mxu0 %vm20144_vm0, %v8230_v3  ;;  %vm20145_vm11 = vmmov %vm20137_vm4  ;;  %v20198_v3 = vmov 0 }
0x1b4f   :  { %v8229_v19 = vsel %vm20145_vm11, %v8201_v33, %v8202_v43  ;;  %vm20146_vm6 = vmmov %vm20144_vm0  ;;  %v8375_v33 = vrot.slane %v17902_v42, 1  ;;  %v18220_v42 = vld [vmem:[%s19688_s6 + $0x1d8] sm:$0xff] }
0x1b50   :  { %14835 = vmatprep.mubr.msk.f32.mxu0 %vm20146_vm6, %v8229_v19  ;;  %vm20147_vm2 = vmmov %vm20135_vm1  ;;  %15024 = vmatprep.subr.mxu0 %v18220_v42 }
0x1b51   :  { %v8389_v49 = vsel %vm20147_vm2, %v8361_v15, %v8362_v47  ;;  %vm20148_vm1 = vmmov %vm20144_vm0 }
0x1b52   :  { %14889 = vmatmul.mubr.msk.f32.gmra.mxu1 %vm20148_vm1, %v8389_v49  ;;  %vm20149_vm9 = vmmov %vm20147_vm2 }
0x1b53   :  { %v8388_v58 = vsel %vm20149_vm9, %v8362_v47, %v8363_v24  ;;  %vm20150_vm4 = vmmov %vm20144_vm0 }
0x1b54   :  { %14891 = vmatprep.mubr.msk.f32.mxu1 %vm20150_vm4, %v8388_v58  ;;  %vm20151_vm10 = vmmov %vm20145_vm11 }
0x1b55   :  { %v8228_v6 = vsel %vm20151_vm10, %v8202_v43, %v8203_v38  ;;  %vm20152_vm15 = vmmov %vm20144_vm0  ;;  %v8213_v43 = vrot.slane %v17892_v29, 7 }
0x1b56   :  { %14836 = vmatmul.mubr.msk.f32.gmra.mxu0 %vm20152_vm15, %v8228_v6  ;;  %vm20153_vm3 = vmmov %vm20151_vm10 }
0x1b57   :  { %v8227_v9 = vsel %vm20153_vm3, %v8203_v38, %v8204_v39  ;;  %vm20154_vm5 = vmmov %vm20144_vm0  ;;  %v9632_v38 = vld [vmem:[%s19688_s6 + $0x188] sm:$0xff] }
0x1b58   :  { %14838 = vmatprep.mubr.msk.f32.mxu0 %vm20154_vm5, %v8227_v9  ;;  %vm20155_vm13 = vmmov %vm20147_vm2 }
0x1b59   :  { %v8387_v44 = vsel %vm20155_vm13, %v8363_v24, %v8364_v54  ;;  %vm20156_vm12 = vmmov %vm20144_vm0 }
0x1b5a   :  { %14892 = vmatmul.mubr.msk.f32.gmra.mxu1 %vm20156_vm12, %v8387_v44  ;;  %vm20157_vm0 = vmmov %vm20147_vm2 }
0x1b5b   :  { %v8386_v7 = vsel %vm20157_vm0, %v8364_v54, %v8365_v48  ;;  %vm20158_vm11 = vmmov %vm20148_vm1  ;;  %v9631_v54 = vld [vmem:[%s19688_s6 + $0x180] sm:$0xff] }
0x1b5c   :  { %14894 = vmatprep.mubr.msk.f32.mxu1 %vm20158_vm11, %v8386_v7  ;;  %vm20159_vm6 = vmmov %vm20153_vm3 }
0x1b5d   :  { %v8226_v21 = vsel %vm20159_vm6, %v8204_v39, %v8205_v27  ;;  %vm20160_vm2 = vmmov %vm20148_vm1 }
0x1b5e   :  { %14839 = vmatmul.mubr.msk.f32.gmra.mxu0 %vm20160_vm2, %v8226_v21  ;;  %vm20161_vm1 = vmmov %vm20153_vm3 }
0x1b5f   :  { %v8225_v53 = vsel %vm20161_vm1, %v8205_v27, %v8206_v40  ;;  %vm20162_vm9 = vmmov %vm20160_vm2 }
0x1b60   :  { %14841 = vmatprep.mubr.msk.f32.mxu0 %vm20162_vm9, %v8225_v53  ;;  %vm20163_vm4 = vmmov %vm20157_vm0 }
0x1b61   :  { %v8385_v22 = vsel %vm20163_vm4, %v8365_v48, %v8366_v59  ;;  %vm20164_vm10 = vmmov %vm20160_vm2 }
0x1b62   :  { %14895 = vmatmul.mubr.msk.f32.gmra.mxu1 %vm20164_vm10, %v8385_v22  ;;  %vm20165_vm15 = vmmov %vm20157_vm0 }
0x1b63   :  { %v8384_v46 = vsel %vm20165_vm15, %v8366_v59, %v8367_v17  ;;  %vm20166_vm3 = vmmov %vm20160_vm2 }
0x1b64   :  { %14897 = vmatprep.mubr.msk.f32.mxu1 %vm20166_vm3, %v8384_v46  ;;  %vm20167_vm5 = vmmov %vm20161_vm1 }
0x1b65   :  { %v8224_v26 = vsel %vm20167_vm5, %v8206_v40, %v8207_v1  ;;  %vm20168_vm13 = vmmov %vm20160_vm2 }
0x1b66   :  { %14842 = vmatmul.mubr.msk.f32.gmra.mxu0 %vm20168_vm13, %v8224_v26  ;;  %vm20169_vm12 = vmmov %vm20161_vm1 }
0x1b67   :  { %v8223_v60 = vsel %vm20169_vm12, %v8207_v1, %v8208_v50  ;;  %vm20170_vm0 = vmmov %vm20160_vm2 }
0x1b68   :  { %14844 = vmatprep.mubr.msk.f32.mxu0 %vm20170_vm0, %v8223_v60  ;;  %vm20171_vm11 = vmmov %vm20163_vm4 }
0x1b69   :  { %v8383_v63 = vsel %vm20171_vm11, %v8367_v17, %v8368_v23  ;;  %vm20172_vm6 = vmmov %vm20170_vm0 }
0x1b6a   :  { %14898 = vmatmul.mubr.msk.f32.gmra.mxu1 %vm20172_vm6, %v8383_v63  ;;  %vm20173_vm2 = vmmov %vm20163_vm4 }
0x1b6b   :  { %v8382_v45 = vsel %vm20173_vm2, %v8368_v23, %v8369_v14  ;;  %vm20174_vm1 = vmmov %vm20170_vm0 }
0x1b6c   :  { %14900 = vmatprep.mubr.msk.f32.mxu1 %vm20174_vm1, %v8382_v45  ;;  %vm20175_vm9 = vmmov %vm20167_vm5 }
0x1b6d   :  { %v8222_v4 = vsel %vm20175_vm9, %v8208_v50, %v8209_v61  ;;  %vm20176_vm4 = vmmov %vm20170_vm0 }
0x1b6e   :  { %14845 = vmatmul.mubr.msk.f32.gmra.mxu0 %vm20176_vm4, %v8222_v4  ;;  %vm20177_vm10 = vmmov %vm20167_vm5 }
0x1b6f   :  { %v8221_v30 = vsel %vm20177_vm10, %v8209_v61, %v8210_v0  ;;  %vm20178_vm15 = vmmov %vm20170_vm0 }
0x1b70   :  { %14847 = vmatprep.mubr.msk.f32.mxu0 %vm20178_vm15, %v8221_v30  ;;  %vm20179_vm3 = vmmov %vm20173_vm2 }
0x1b71   :  { %v8381_v16 = vsel %vm20179_vm3, %v8369_v14, %v8370_v35  ;;  %vm20180_vm5 = vmmov %vm20170_vm0 }
0x1b72   :  { %14901 = vmatmul.mubr.msk.f32.gmra.mxu1 %vm20180_vm5, %v8381_v16  ;;  %vm20181_vm13 = vmmov %vm20173_vm2 }
0x1b73   :  { %v8380_v2 = vsel %vm20181_vm13, %v8370_v35, %v8371_v5  ;;  %vm20182_vm12 = vmmov %vm20170_vm0 }
0x1b74   :  { %14903 = vmatprep.mubr.msk.f32.mxu1 %vm20182_vm12, %v8380_v2  ;;  %vm20183_vm0 = vmmov %vm20175_vm9 }
0x1b75   :  { %v8220_v41 = vsel %vm20183_vm0, %v8210_v0, %v8211_v62  ;;  %vm20184_vm11 = vmmov %vm20174_vm1 }
0x1b76   :  { %14848 = vmatmul.mubr.msk.f32.gmra.mxu0 %vm20184_vm11, %v8220_v41  ;;  %vm20185_vm6 = vmmov %vm20183_vm0 }
0x1b77   :  { %v8219_v15 = vsel %vm20185_vm6, %v8211_v62, %v8212_v36  ;;  %vm20186_vm2 = vmmov %vm20174_vm1  ;;  %vm18194_vm6 = vcmp.ne.s32.totalorder %v8151_v56, 0 }
0x1b78   :  { %14850 = vmatprep.mubr.msk.f32.mxu0 %vm20186_vm2, %v8219_v15  ;;  %vm20187_vm1 = vmmov %vm20179_vm3  ;;  %v20199_v3 = vsel %vm18194_vm6, 4294967295, %v20198_v3 }
0x1b79   :  { %v8379_v12 = vsel %vm20187_vm1, %v8371_v5, %v8372_v51  ;;  %vm20188_vm9 = vmmov %vm20186_vm2  ;;  %20200 = vst [vmem:[#allocation28_spill] sm:$0xff] %v20199_v3 }
0x1b7a   :  { %14904 = vmatmul.mubr.msk.f32.gmra.mxu1 %vm20188_vm9, %v8379_v12  ;;  %vm20189_vm4 = vmmov %vm20187_vm1 }
0x1b7b   :  { %v8378_v47 = vsel %vm20189_vm4, %v8372_v51, %v8373_v52  ;;  %vm20190_vm10 = vmmov %vm20186_vm2 }
0x1b7c   :  { %14906 = vmatprep.mubr.msk.f32.mxu1 %vm20190_vm10, %v8378_v47  ;;  %vm20191_vm15 = vmmov %vm20183_vm0 }
0x1b7d   :  { %v8218_v29 = vsel %vm20191_vm15, %v8212_v36, %v8213_v43  ;;  %vm20192_vm3 = vmmov %vm20186_vm2 }
0x1b7e   :  { %14851 = vmatmul.mubr.msk.f32.gmra.mxu0 %vm20192_vm3, %v8218_v29  ;;  %vm20193_vm5 = vmmov %vm20183_vm0 }
0x1b7f   :  { %v8217_v8 = vsel %vm20193_vm5, %v8213_v43, %v8214_v55  ;;  %vm20194_vm13 = vmmov %vm20186_vm2 }
0x1b80   :  { %14853 = vmatprep.mubr.msk.f32.mxu0 %vm20194_vm13, %v8217_v8  ;;  %vm20195_vm12 = vmmov %vm20187_vm1 }
0x1b81   :  { %v8377_v25 = vsel %vm20195_vm12, %v8373_v52, %v8374_v13  ;;  %vm20196_vm0 = vmmov %vm20186_vm2 }
0x1b82   :  { %14907 = vmatmul.mubr.msk.f32.gmra.mxu1 %vm20196_vm0, %v8377_v25  ;;  %vm20197_vm11 = vmmov %vm20187_vm1 }
0x1b83   :  { %v8376_v32 = vsel %vm20197_vm11, %v8374_v13, %v8375_v33  ;;  %vm20201_vm2 = vmmov %vm20187_vm1 }
0x1b84   :  { %v8407_v24 = vsel %vm20201_vm2, %v8375_v33, %v8344_v11  ;;  %vm20202_vm1 = vmmov %vm20196_vm0  ;;  %v9634_v11 = vld [vmem:[%s19688_s6 + $0x198] sm:$0xff] }
0x1b85   :  { %14909 = vmatprep.mubr.msk.f32.mxu1 %vm20202_vm1, %v8376_v32  ;;  %vm20203_vm9 = vmmov %vm20193_vm5  ;;  %v8503_v19 = vsel %vm18194_vm6, %v8407_v24, 0.0  ;;  %14968 = vmatprep.subr.mxu1 %v9634_v11 }
0x1b86   :  { %v8216_v39 = vsel %vm20203_vm9, %v8214_v55, %v8215_v34  ;;  %vm20204_vm4 = vmmov %vm20196_vm0  ;;  %14969 = vmatpush3.msra.mxu1 %v9634_v11  ;;  %v9633_v34 = vld [vmem:[%s19688_s6 + $0x190] sm:$0xff] }
0x1b87   :  { %14854 = vmatmul.mubr.msk.f32.gmra.mxu0 %vm20204_vm4, %v8216_v39  ;;  %vm20205_vm10 = vmmov %vm20196_vm0  ;;  %14970 = vmatprep.subr.mxu1 %v9633_v34 }
0x1b88   :  { %14910 = vmatmul.mubr.msk.f32.gmra.mxu1 %vm20205_vm10, %v8503_v19  ;;  %vm20206_vm5 = vmmov %vm20196_vm0 }
0x1b89   :  { %14971 = vmatpush3.msra.mxu1 %v9633_v34  ;;  %vm20207_vm12 = vmmov %vm20196_vm0 }
0x1b8a   :  { %14972 = vmatprep.subr.mxu1 %v9632_v38  ;;  %vm20208_vm2 = vmmov %vm20202_vm1 }
0x1b8b   :  { %14973 = vmatpush3.msra.mxu1 %v9632_v38  ;;  %vm20209_vm4 = vmmov %vm20202_vm1 }
0x1b8c   :  { %14974 = vmatprep.subr.mxu1 %v9631_v54 }
0x1b8d   :  { %14975 = vmatpush3.msra.mxu1 %v9631_v54 }
0x1b9d   :  { %v14754_v49 = vpop.f32.mrf.mxu1 }
0x1b9f   :  { %v8666_v58 = vpop.f32.mrf.mxu1 }
0x1ba1   :  { %v14757_v6 = vpop.f32.mrf.mxu1 }
0x1ba3   :  { %v8676_v48 = vpop.f32.mrf.mxu1 }
0x1ba5   :  { %v14760_v40 = vpop.f32.mrf.mxu1 }
0x1ba7   :  { %v8686_v9 = vpop.f32.mrf.mxu1 }
0x1ba9   :  { %v18232_v27 = vpop.f32.mrf.mxu1 }
0x1bab   :  { %v18234_v59 = vpop.f32.mrf.mxu1 }
0x1bad   :  { %v18236_v44 = vpop.f32.mrf.mxu1 }
0x1baf   :  { %v18238_v7 = vpop.f32.mrf.mxu1 }
0x1bb1   :  { %v18240_v21 = vpop.f32.mrf.mxu1 }
0x1bb3   :  { %v18242_v17 = vpop.f32.mrf.mxu1 }
0x1bb5   :  { %v18244_v50 = vpop.f32.mrf.mxu1 }
0x1bb7   :  { %v18246_v53 = vpop.f32.mrf.mxu1 }
0x1bb9   :  { %v18248_v1 = vpop.f32.mrf.mxu1 }
0x1bbb   :  { %v18250_v23 = vpop.f32.mrf.mxu1 }
0x1bbd   :  { %v18252_v22 = vpop.f32.mrf.mxu1 }
0x1bbf   :  { %v18254_v46 = vpop.f32.mrf.mxu1 }
0x1bc1   :  { %v18256_v26 = vpop.f32.mrf.mxu1 }
0x1bc3   :  { %v18258_v14 = vpop.f32.mrf.mxu1 }
0x1bc5   :  { %v18260_v0 = vpop.f32.mrf.mxu1 }
0x1bc7   :  { %v18262_v60 = vpop.f32.mrf.mxu1 }
0x1bc9   :  { %v18264_v61 = vpop.f32.mrf.mxu1 }
0x1bcb   :  { %v18266_v35 = vpop.f32.mrf.mxu1 }
0x1bcd   :  { %v18268_v63 = vpop.f32.mrf.mxu1 }
0x1bcf   :  { %v18270_v45 = vpop.f32.mrf.mxu1 }
0x1bd1   :  { %v18272_v31 = vpop.f32.mrf.mxu1 }
0x1bd3   :  { %v18274_v4 = vpop.f32.mrf.mxu1 }
0x1bd5   :  { %v18276_v5 = vpop.f32.mrf.mxu1 }
0x1bd7   :  { %v18278_v36 = vpop.f32.mrf.mxu1 }
0x1bd9   :  { %v18280_v30 = vpop.f32.mrf.mxu1 }
0x1bdb   :  { %v18282_v62 = vpop.f32.mrf.mxu1  ;;  %v14810_v51 = vpop.f32.mrf.mxu0 }
0x1bdc   :  { %v8993_v16 = vadd.f32 %v14810_v51, %v14754_v49 }
0x1bdd   :  { %v8987_v2 = vpop.f32.mrf.mxu0  ;;  %v14866_v41 = vpop.f32.mrf.mxu1 }
0x1bde   :  { %v8988_v52 = vadd.f32 %v8987_v2, %v8666_v58  ;;  %v9468_v55 = vadd.f32 %v14866_v41, %v8993_v16 }
0x1bdf   :  { %v14813_v15 = vpop.f32.mrf.mxu0  ;;  %v9308_v43 = vpop.f32.mrf.mxu1 }
0x1be0   :  { %v9504_v13 = vadd.f32 %v18287_v20, %v9468_v55  ;;  %v9003_v12 = vadd.f32 %v14813_v15, %v14757_v6  ;;  %v9467_v33 = vadd.f32 %v9308_v43, %v8988_v52 }
0x1be1   :  { %v8997_v47 = vpop.f32.mrf.mxu0  ;;  %v14869_v56 = vpop.f32.mrf.mxu1 }
0x1be2   :  { %v9503_v29 = vadd.f32 %v18287_v20, %v9467_v33  ;;  %v8998_v8 = vadd.f32 %v8997_v47, %v8676_v48  ;;  %v9568_v25 = vmul.f32 0.1, %v9504_v13  ;;  %v9470_v32 = vadd.f32 %v14869_v56, %v9003_v12  ;;  %v9640_v33 = vld [vmem:[%s19688_s6 + $0x1c8] sm:$0xff] }
0x1be3   :  { %v14816_v24 = vpop.f32.mrf.mxu0  ;;  %v9318_v39 = vpop.f32.mrf.mxu1  ;;  %vm9536_vm15 = vcmp.gt.f32.partialorder %v9504_v13, 0.0 }
0x1be4   :  { %v9013_v19 = vadd.f32 %v14816_v24, %v14760_v40  ;;  %v9469_v37 = vadd.f32 %v9318_v39, %v8998_v8  ;;  %vm9535_vm3 = vcmp.gt.f32.partialorder %v9503_v29, 0.0  ;;  %v9506_v11 = vadd.f32 %v18287_v20, %v9470_v32 }
0x1be5   :  { %v9007_v34 = vpop.f32.mrf.mxu0  ;;  %v14872_v38 = vpop.f32.mrf.mxu1  ;;  %v9567_v54 = vmul.f32 0.1, %v9503_v29  ;;  %v18293_v51 = vsel %vm9536_vm15, %v9504_v13, %v9568_v25  ;;  %vm20210_vm15 = vmmov %vm20202_vm1 }
0x1be6   :  { %v9505_v49 = vadd.f32 %v18287_v20, %v9469_v37  ;;  %v9008_v58 = vadd.f32 %v9007_v34, %v8686_v9  ;;  %v9472_v6 = vadd.f32 %v14872_v38, %v9013_v19  ;;  %v9570_v41 = vmul.f32 0.1, %v9506_v11  ;;  %v9641_v9 = vld [vmem:[%s19688_s6 + $0x1d0] sm:$0xff] }
0x1be7   :  { %v14819_v48 = vpop.f32.mrf.mxu0  ;;  %v9328_v16 = vpop.f32.mrf.mxu1  ;;  %v18295_v2 = vsel %vm9535_vm3, %v9503_v29, %v9567_v54  ;;  %vm9538_vm13 = vcmp.gt.f32.partialorder %v9506_v11, 0.0 }
0x1be8   :  { %v9508_v40 = vadd.f32 %v18287_v20, %v9472_v6  ;;  %v9023_v52 = vadd.f32 %v14819_v48, %v18232_v27  ;;  %v9471_v55 = vadd.f32 %v9328_v16, %v9008_v58  ;;  %14920 = vmatprep.mubr.msk.f32.mxu0 %vm20206_vm5, %v18295_v2  ;;  %vm9537_vm0 = vcmp.gt.f32.partialorder %v9505_v49, 0.0 }
0x1be9   :  { %14921 = vmatmul.mubr.msk.f32.vlgmr.msra.gmra.mxu0 %vm20207_vm12, %v18293_v51  ;;  %v9017_v15 = vpop.f32.mrf.mxu0  ;;  %v9569_v13 = vmul.f32 0.1, %v9505_v49  ;;  %vm20212_vm12 = vmmov %vm20202_vm1 }
0x1bea   :  { %v14875_v43 = vpop.f32.mrf.mxu1  ;;  %v9507_v12 = vadd.f32 %v18287_v20, %v9471_v55  ;;  %v9018_v27 = vadd.f32 %v9017_v15, %v18234_v59  ;;  %15025 = vmatpush3.msra.mxu0 %v18220_v42  ;;  %v9572_v47 = vmul.f32 0.1, %v9508_v40  ;;  %vm9540_vm11 = vcmp.gt.f32.partialorder %v9508_v40, 0.0  ;;  %v9639_v59 = vld [vmem:[%s19688_s6 + $0x1c0] sm:$0xff] }
0x1beb   :  { %v9474_v56 = vadd.f32 %v14875_v43, %v9023_v52  ;;  %v18312_v25 = vsel %vm9537_vm0, %v9505_v49, %v9569_v13  ;;  %15026 = vmatprep.subr.mxu0 %v9641_v9  ;;  %v18318_v42 = vsel %vm9538_vm13, %v9506_v11, %v9570_v41  ;;  %vm20211_vm13 = vmmov %vm20202_vm1 }
0x1bec   :  { %v9338_v8 = vpop.f32.mrf.mxu1  ;;  %14923 = vmatprep.mubr.msk.f32.mxu0 %vm20208_vm2, %v18312_v25  ;;  %15027 = vmatpush3.msra.mxu0 %v9641_v9  ;;  %vm9539_vm9 = vcmp.gt.f32.partialorder %v9507_v12, 0.0  ;;  %v18331_v6 = vsel %vm9540_vm11, %v9508_v40, %v9572_v47  ;;  %vm20213_vm11 = vmmov %vm20202_vm1 }
0x1bed   :  { %v9473_v24 = vadd.f32 %v9338_v8, %v9018_v27  ;;  %v9510_v39 = vadd.f32 %v18287_v20, %v9474_v56  ;;  %14924 = vmatmul.mubr.msk.f32.gmra.mxu0 %vm20202_vm1, %v18318_v42  ;;  %15028 = vmatprep.subr.mxu0 %v9640_v33 }
0x1bee   :  { %v14822_v29 = vpop.f32.mrf.mxu0  ;;  %15029 = vmatpush3.msra.mxu0 %v9640_v33 }
0x1bef   :  { %v9033_v32 = vadd.f32 %v14822_v29, %v18236_v44  ;;  %v9571_v44 = vmul.f32 0.1, %v9507_v12  ;;  %v9509_v34 = vadd.f32 %v18287_v20, %v9473_v24  ;;  %15030 = vmatprep.subr.mxu0 %v9639_v59  ;;  %v9574_v48 = vmul.f32 0.1, %v9510_v39 }
0x1bf0   :  { %v9027_v19 = vpop.f32.mrf.mxu0  ;;  %15031 = vmatpush3.msra.mxu0 %v9639_v59  ;;  %vm9542_vm10 = vcmp.gt.f32.partialorder %v9510_v39, 0.0 }
0x1bf1   :  { %v9028_v11 = vadd.f32 %v9027_v19, %v18238_v7  ;;  %v18328_v58 = vsel %vm9539_vm9, %v9507_v12, %v9571_v44  ;;  %vm9541_vm3 = vcmp.gt.f32.partialorder %v9509_v34, 0.0  ;;  %v9573_v40 = vmul.f32 0.1, %v9509_v34 }
0x1bf2   :  { %v14878_v37 = vpop.f32.mrf.mxu1  ;;  %14926 = vmatprep.mubr.msk.f32.mxu0 %vm20209_vm4, %v18328_v58  ;;  %v18347_v56 = vsel %vm9542_vm10, %v9510_v39, %v9574_v48  ;;  %vm20214_vm10 = vmmov %vm20202_vm1 }
0x1bf3   :  { %v9476_v38 = vadd.f32 %v14878_v37, %v9033_v32  ;;  %14927 = vmatmul.mubr.msk.f32.gmra.mxu0 %vm20210_vm15, %v18331_v6  ;;  %v18341_v27 = vsel %vm9541_vm3, %v9509_v34, %v9573_v40  ;;  %vm20215_vm15 = vmmov %vm20202_vm1 }
0x1bf4   :  { %v9348_v49 = vpop.f32.mrf.mxu1  ;;  %14929 = vmatprep.mubr.msk.f32.mxu0 %vm20211_vm13, %v18341_v27  ;;  %vm20216_vm13 = vmmov %vm20202_vm1 }
0x1bf5   :  { %v9512_v16 = vadd.f32 %v18287_v20, %v9476_v38  ;;  %v9475_v52 = vadd.f32 %v9348_v49, %v9028_v11 }
0x1bf6   :  { %v14825_v54 = vpop.f32.mrf.mxu0 }
0x1bf7   :  { %v9043_v41 = vadd.f32 %v14825_v54, %v18240_v21  ;;  %v9511_v9 = vadd.f32 %v18287_v20, %v9475_v52  ;;  %v9576_v43 = vmul.f32 0.1, %v9512_v16  ;;  %vm9544_vm5 = vcmp.gt.f32.partialorder %v9512_v16, 0.0  ;;  %14930 = vmatmul.mubr.msk.f32.gmra.mxu0 %vm20212_vm12, %v18347_v56  ;;  %vm20217_vm12 = vmmov %vm20202_vm1 }
0x1bf8   :  { %v9037_v7 = vpop.f32.mrf.mxu0 }
0x1bf9   :  { %v9038_v15 = vadd.f32 %v9037_v7, %v18242_v17  ;;  %vm9543_vm0 = vcmp.gt.f32.partialorder %v9511_v9, 0.0  ;;  %v9575_v32 = vmul.f32 0.1, %v9511_v9  ;;  %v18357_v39 = vsel %vm9544_vm5, %v9512_v16, %v9576_v43 }
0x1bfa   :  { %v14881_v55 = vpop.f32.mrf.mxu1 }
0x1bfb   :  { %v9478_v13 = vadd.f32 %v14881_v55, %v9043_v41  ;;  %v18354_v44 = vsel %vm9543_vm0, %v9511_v9, %v9575_v32 }
0x1bfc   :  { %v9358_v12 = vpop.f32.mrf.mxu1  ;;  %14932 = vmatprep.mubr.msk.f32.mxu0 %vm20213_vm11, %v18354_v44 }
0x1bfd   :  { %v9477_v47 = vadd.f32 %v9358_v12, %v9038_v15  ;;  %v9514_v29 = vadd.f32 %v18287_v20, %v9478_v13  ;;  %14933 = vmatmul.mubr.msk.f32.gmra.mxu0 %vm20202_vm1, %v18357_v39 }
0x1bfe   :  { %v14828_v21 = vpop.f32.mrf.mxu0 }
0x1bff   :  { %v9053_v33 = vadd.f32 %v14828_v21, %v18244_v50  ;;  %v9513_v24 = vadd.f32 %v18287_v20, %v9477_v47  ;;  %v9578_v34 = vmul.f32 0.1, %v9514_v29  ;;  %vm9546_vm2 = vcmp.gt.f32.partialorder %v9514_v29, 0.0 }
0x1c00   :  { %v9047_v17 = vpop.f32.mrf.mxu0 }
0x1c01   :  { %v9048_v50 = vadd.f32 %v9047_v17, %v18246_v53  ;;  %vm9545_vm9 = vcmp.gt.f32.partialorder %v9513_v24, 0.0  ;;  %v9577_v48 = vmul.f32 0.1, %v9513_v24  ;;  %v18373_v43 = vsel %vm9546_vm2, %v9514_v29, %v9578_v34  ;;  %vm20218_vm2 = vmmov %vm20202_vm1 }
0x1c03   :  { %v14884_v8 = vpop.f32.mrf.mxu1  ;;  %v18367_v40 = vsel %vm9545_vm9, %v9513_v24, %v9577_v48 }
0x1c04   :  { %v9480_v59 = vadd.f32 %v14884_v8, %v9053_v33  ;;  %14935 = vmatprep.mubr.msk.f32.mxu0 %vm20214_vm10, %v18367_v40  ;;  %vm20219_vm10 = vmmov %vm20202_vm1 }
0x1c05   :  { %v9368_v37 = vpop.f32.mrf.mxu1  ;;  %14936 = vmatmul.mubr.msk.f32.gmra.mxu0 %vm20215_vm15, %v18373_v43  ;;  %vm20220_vm15 = vmmov %vm20202_vm1 }
0x1c06   :  { %v9516_v11 = vadd.f32 %v18287_v20, %v9480_v59  ;;  %v9479_v54 = vadd.f32 %v9368_v37, %v9048_v50 }
0x1c08   :  { %v14831_v19 = vpop.f32.mrf.mxu0  ;;  %v9515_v16 = vadd.f32 %v18287_v20, %v9479_v54  ;;  %v9580_v52 = vmul.f32 0.1, %v9516_v11  ;;  %vm9548_vm4 = vcmp.gt.f32.partialorder %v9516_v11, 0.0 }
0x1c09   :  { %v9063_v38 = vadd.f32 %v14831_v19, %v18248_v1 }
0x1c0a   :  { %v9057_v53 = vpop.f32.mrf.mxu0  ;;  %v14887_v49 = vpop.f32.mrf.mxu1  ;;  %vm9547_vm3 = vcmp.gt.f32.partialorder %v9515_v16, 0.0  ;;  %v9579_v12 = vmul.f32 0.1, %v9515_v16  ;;  %v18383_v29 = vsel %vm9548_vm4, %v9516_v11, %v9580_v52 }
0x1c0b   :  { %v9058_v41 = vadd.f32 %v9057_v53, %v18250_v23  ;;  %v9482_v7 = vadd.f32 %v14887_v49, %v9063_v38 }
0x1c0c   :  { %v9378_v1 = vpop.f32.mrf.mxu1  ;;  %v18380_v24 = vsel %vm9547_vm3, %v9515_v16, %v9579_v12 }
0x1c0d   :  { %v9481_v15 = vadd.f32 %v9378_v1, %v9058_v41  ;;  %v9518_v13 = vadd.f32 %v18287_v20, %v9482_v7  ;;  %14938 = vmatprep.mubr.msk.f32.mxu0 %vm20216_vm13, %v18380_v24  ;;  %vm20223_vm13 = vmmov %vm20202_vm1 }
0x1c0e   :  { %v14834_v55 = vpop.f32.mrf.mxu0  ;;  %14939 = vmatmul.mubr.msk.f32.gmra.mxu0 %vm20217_vm12, %v18383_v29  ;;  %vm20224_vm12 = vmmov %vm20202_vm1 }
0x1c0f   :  { %v9073_v9 = vadd.f32 %v14834_v55, %v18252_v22  ;;  %v9517_v33 = vadd.f32 %v18287_v20, %v9481_v15  ;;  %v9582_v17 = vmul.f32 0.1, %v9518_v13  ;;  %vm9550_vm5 = vcmp.gt.f32.partialorder %v9518_v13, 0.0 }
0x1c10   :  { %v9067_v23 = vpop.f32.mrf.mxu0 }
0x1c11   :  { %v9068_v22 = vadd.f32 %v9067_v23, %v18254_v46  ;;  %vm9549_vm0 = vcmp.gt.f32.partialorder %v9517_v33, 0.0  ;;  %v9581_v34 = vmul.f32 0.1, %v9517_v33  ;;  %v18396_v16 = vsel %vm9550_vm5, %v9518_v13, %v9582_v17 }
0x1c12   :  { %v14890_v21 = vpop.f32.mrf.mxu1 }
0x1c13   :  { %v9484_v47 = vadd.f32 %v14890_v21, %v9073_v9 }
0x1c14   :  { %v9388_v32 = vpop.f32.mrf.mxu1 }
0x1c15   :  { %v9520_v50 = vadd.f32 %v18287_v20, %v9484_v47  ;;  %v9483_v19 = vadd.f32 %v9388_v32, %v9068_v22 }
0x1c16   :  { %v14837_v8 = vpop.f32.mrf.mxu0 }
0x1c17   :  { %v9083_v59 = vadd.f32 %v14837_v8, %v18256_v26  ;;  %v9519_v38 = vadd.f32 %v18287_v20, %v9483_v19  ;;  %v9584_v54 = vmul.f32 0.1, %v9520_v50  ;;  %v18393_v26 = vsel %vm9549_vm0, %v9517_v33, %v9581_v34 }
0x1c18   :  { %v9077_v46 = vpop.f32.mrf.mxu0  ;;  %vm9552_vm11 = vcmp.gt.f32.partialorder %v9520_v50, 0.0  ;;  %14941 = vmatprep.mubr.msk.f32.mxu0 %vm20218_vm2, %v18393_v26  ;;  %vm20226_vm2 = vmmov %vm20202_vm1 }
0x1c19   :  { %v9078_v11 = vadd.f32 %v9077_v46, %v18258_v14  ;;  %v9583_v41 = vmul.f32 0.1, %v9519_v38  ;;  %14942 = vmatmul.mubr.msk.f32.gmra.mxu0 %vm20202_vm1, %v18396_v16  ;;  %vm9551_vm9 = vcmp.gt.f32.partialorder %v9519_v38, 0.0  ;;  %v18411_v33 = vsel %vm9552_vm11, %v9520_v50, %v9584_v54 }
0x1c1a   :  { %v14893_v37 = vpop.f32.mrf.mxu1 }
0x1c1b   :  { %v9486_v53 = vadd.f32 %v14893_v37, %v9083_v59  ;;  %v18406_v23 = vsel %vm9551_vm9, %v9519_v38, %v9583_v41 }
0x1c1c   :  { %v9398_v48 = vpop.f32.mrf.mxu1  ;;  %14944 = vmatprep.mubr.msk.f32.mxu0 %vm20219_vm10, %v18406_v23  ;;  %vm20230_vm10 = vmmov %vm20202_vm1 }
0x1c1d   :  { %v9485_v7 = vadd.f32 %v9398_v48, %v9078_v11  ;;  %v9522_v55 = vadd.f32 %v18287_v20, %v9486_v53  ;;  %14945 = vmatmul.mubr.msk.f32.gmra.mxu0 %vm20220_vm15, %v18411_v33  ;;  %vm20231_vm15 = vmmov %vm20202_vm1 }
0x1c1e   :  { %v14840_v49 = vpop.f32.mrf.mxu0 }
0x1c1f   :  { %v9093_v52 = vadd.f32 %v14840_v49, %v18260_v0  ;;  %v9521_v9 = vadd.f32 %v18287_v20, %v9485_v7  ;;  %vm9554_vm4 = vcmp.gt.f32.partialorder %v9522_v55, 0.0  ;;  %v9586_v0 = vmul.f32 0.1, %v9522_v55 }
0x1c20   :  { %v9087_v14 = vpop.f32.mrf.mxu0 }
0x1c21   :  { %v9088_v15 = vadd.f32 %v9087_v14, %v18262_v60  ;;  %v9585_v22 = vmul.f32 0.1, %v9521_v9  ;;  %vm9553_vm3 = vcmp.gt.f32.partialorder %v9521_v9, 0.0  ;;  %v18422_v11 = vsel %vm9554_vm4, %v9522_v55, %v9586_v0 }
0x1c22   :  { %v14896_v1 = vpop.f32.mrf.mxu1  ;;  %20222 = vst [vmem:[#allocation26_spill] sm:$0xff] %v18422_v11 }
0x1c23   :  { %v9488_v13 = vadd.f32 %v14896_v1, %v9093_v52  ;;  %v18419_v38 = vsel %vm9553_vm3, %v9521_v9, %v9585_v22 }
0x1c24   :  { %v9408_v12 = vpop.f32.mrf.mxu1  ;;  %20221 = vst [vmem:[#allocation27_spill] sm:$0xff] %v18419_v38  ;;  %14947 = vmatprep.mubr.msk.f32.mxu0 %vm20223_vm13, %v18419_v38 }
0x1c25   :  { %v9524_v47 = vadd.f32 %v18287_v20, %v9488_v13  ;;  %v9487_v8 = vadd.f32 %v9408_v12, %v9088_v15  ;;  %14948 = vmatmul.mubr.msk.f32.gmra.mxu0 %vm20224_vm12, %v18422_v11  ;;  %vm20235_vm12 = vmmov %vm20202_vm1 }
0x1c26   :  { %v14843_v21 = vpop.f32.mrf.mxu0 }
0x1c27   :  { %v9103_v17 = vadd.f32 %v14843_v21, %v18264_v61  ;;  %v9523_v59 = vadd.f32 %v18287_v20, %v9487_v8  ;;  %v9588_v46 = vmul.f32 0.1, %v9524_v47  ;;  %vm9556_vm5 = vcmp.gt.f32.partialorder %v9524_v47, 0.0 }
0x1c28   :  { %v9097_v60 = vpop.f32.mrf.mxu0 }
0x1c29   :  { %v9098_v19 = vadd.f32 %v9097_v60, %v18266_v35  ;;  %v9587_v61 = vmul.f32 0.1, %v9523_v59  ;;  %vm9555_vm0 = vcmp.gt.f32.partialorder %v9523_v59, 0.0  ;;  %v18437_v9 = vsel %vm9556_vm5, %v9524_v47, %v9588_v46  ;;  %vm20233_vm5 = vmmov %vm20202_vm1 }
0x1c2a   :  { %v14899_v32 = vpop.f32.mrf.mxu1  ;;  %20227 = vst [vmem:[#allocation23_spill] sm:$0xff] %v18437_v9 }
0x1c2b   :  { %v9490_v37 = vadd.f32 %v14899_v32, %v9103_v17  ;;  %v18432_v55 = vsel %vm9555_vm0, %v9523_v59, %v9587_v61 }
0x1c2c   :  { %v9418_v34 = vpop.f32.mrf.mxu1  ;;  %20225 = vst [vmem:[#allocation25_spill] sm:$0xff] %v18432_v55  ;;  %14950 = vmatprep.mubr.msk.f32.mxu0 %vm20226_vm2, %v18432_v55 }
0x1c2d   :  { %v9489_v53 = vadd.f32 %v9418_v34, %v9098_v19  ;;  %v9526_v49 = vadd.f32 %v18287_v20, %v9490_v37  ;;  %14951 = vmatmul.mubr.msk.f32.gmra.mxu0 %vm20202_vm1, %v18437_v9 }
0x1c2e   :  { %v14846_v50 = vpop.f32.mrf.mxu0 }
0x1c2f   :  { %v9113_v54 = vadd.f32 %v14846_v50, %v18268_v63  ;;  %v9525_v41 = vadd.f32 %v18287_v20, %v9489_v53  ;;  %vm9558_vm11 = vcmp.gt.f32.partialorder %v9526_v49, 0.0  ;;  %v9590_v63 = vmul.f32 0.1, %v9526_v49 }
0x1c30   :  { %v9107_v35 = vpop.f32.mrf.mxu0 }
0x1c31   :  { %v9108_v52 = vadd.f32 %v9107_v35, %v18270_v45  ;;  %v9589_v15 = vmul.f32 0.1, %v9525_v41  ;;  %vm9557_vm9 = vcmp.gt.f32.partialorder %v9525_v41, 0.0  ;;  %v18448_v19 = vsel %vm9558_vm11, %v9526_v49, %v9590_v63  ;;  %vm20237_vm11 = vmmov %vm20202_vm1 }
0x1c32   :  { %v14902_v48 = vpop.f32.mrf.mxu1  ;;  %20229 = vst [vmem:[#allocation11_spill] sm:$0xff] %v18448_v19 }
0x1c33   :  { %v9492_v7 = vadd.f32 %v14902_v48, %v9113_v54  ;;  %v18445_v59 = vsel %vm9557_vm9, %v9525_v41, %v9589_v15 }
0x1c34   :  { %v9428_v1 = vpop.f32.mrf.mxu1  ;;  %20228 = vst [vmem:[#allocation24_spill] sm:$0xff] %v18445_v59  ;;  %14953 = vmatprep.mubr.msk.f32.mxu0 %vm20230_vm10, %v18445_v59  ;;  %vm20240_vm10 = vmmov %vm20202_vm1 }
0x1c35   :  { %v9528_v13 = vadd.f32 %v18287_v20, %v9492_v7  ;;  %v9491_v21 = vadd.f32 %v9428_v1, %v9108_v52  ;;  %14954 = vmatmul.mubr.msk.f32.gmra.mxu0 %vm20231_vm15, %v18448_v19 }
0x1c36   :  { %v14849_v14 = vpop.f32.mrf.mxu0 }
0x1c37   :  { %v9123_v0 = vadd.f32 %v14849_v14, %v18272_v31  ;;  %v9527_v22 = vadd.f32 %v18287_v20, %v9491_v21  ;;  %v9592_v8 = vmul.f32 0.1, %v9528_v13  ;;  %vm9560_vm4 = vcmp.gt.f32.partialorder %v9528_v13, 0.0 }
0x1c38   :  { %v9117_v45 = vpop.f32.mrf.mxu0 }
0x1c39   :  { %v9118_v17 = vadd.f32 %v9117_v45, %v18274_v4  ;;  %v9591_v31 = vmul.f32 0.1, %v9527_v22  ;;  %vm9559_vm3 = vcmp.gt.f32.partialorder %v9527_v22, 0.0  ;;  %v18463_v41 = vsel %vm9560_vm4, %v9528_v13, %v9592_v8 }
0x1c3a   :  { %v14905_v12 = vpop.f32.mrf.mxu1  ;;  %20234 = vst [vmem:[#allocation8_spill] sm:$0xff] %v18463_v41 }
0x1c3b   :  { %v9494_v60 = vadd.f32 %v14905_v12, %v9123_v0  ;;  %v18458_v49 = vsel %vm9559_vm3, %v9527_v22, %v9591_v31  ;;  %vm20242_vm3 = vmmov %vm20202_vm1 }
0x1c3c   :  { %v9438_v32 = vpop.f32.mrf.mxu1  ;;  %20232 = vst [vmem:[#allocation7_spill] sm:$0xff] %v18458_v49  ;;  %14956 = vmatprep.mubr.msk.f32.mxu0 %vm20233_vm5, %v18458_v49  ;;  %vm20245_vm5 = vmmov %vm20202_vm1 }
0x1c3d   :  { %v9493_v37 = vadd.f32 %v9438_v32, %v9118_v17  ;;  %v9530_v50 = vadd.f32 %v18287_v20, %v9494_v60  ;;  %14957 = vmatmul.mubr.msk.f32.gmra.mxu0 %vm20235_vm12, %v18463_v41  ;;  %vm20247_vm12 = vmmov %vm20202_vm1 }
0x1c3e   :  { %v14852_v47 = vpop.f32.mrf.mxu0 }
0x1c3f   :  { %v9133_v46 = vadd.f32 %v14852_v47, %v18276_v5  ;;  %v9529_v61 = vadd.f32 %v18287_v20, %v9493_v37  ;;  %v9594_v5 = vmul.f32 0.1, %v9530_v50  ;;  %vm9562_vm13 = vcmp.gt.f32.partialorder %v9530_v50, 0.0 }
0x1c40   :  { %v9127_v4 = vpop.f32.mrf.mxu0 }
0x1c41   :  { %v9128_v54 = vadd.f32 %v9127_v4, %v18278_v36  ;;  %v9593_v52 = vmul.f32 0.1, %v9529_v61  ;;  %vm9561_vm0 = vcmp.gt.f32.partialorder %v9529_v61, 0.0 }
0x1c42   :  { %v14908_v34 = vpop.f32.mrf.mxu1 }
0x1c43   :  { %v9496_v53 = vadd.f32 %v14908_v34, %v9133_v46  ;;  %v18471_v45 = vsel %vm9561_vm0, %v9529_v61, %v9593_v52  ;;  %v9740_v46 = vrot.slane %v18295_v2, 1  ;;  %v9646_v34 = vrot.slane %v18312_v25, 7 }
0x1c44   :  { %v9448_v48 = vpop.f32.mrf.mxu1  ;;  %20236 = vst [vmem:[#allocation12_spill] sm:$0xff] %v18471_v45  ;;  %14959 = vmatprep.mubr.msk.f32.mxu0 %vm20237_vm11, %v18471_v45  ;;  %v9741_v61 = vrot.slane %v18293_v51, 1  ;;  %vm20248_vm0 = vcmp.lt.s32.totalorder %v20023_v28, 7  ;;  %vm20249_vm11 = vmmov %vm20202_vm1 }
0x1c45   :  { %v9532_v7 = vadd.f32 %v18287_v20, %v9496_v53  ;;  %v9495_v14 = vadd.f32 %v9448_v48, %v9128_v54  ;;  %v9645_v54 = vrot.slane %v18293_v51, 7  ;;  %v9742_v53 = vrot.slane %v18312_v25, 1 }
0x1c46   :  { %v9802_v48 = vsel %vm20248_vm0, %v9740_v46, %v9741_v61 }
0x1c47   :  { %v14855_v35 = vpop.f32.mrf.mxu0  ;;  %v9531_v15 = vadd.f32 %v18287_v20, %v9495_v14  ;;  %v9596_v12 = vmul.f32 0.1, %v9532_v7  ;;  %vm9564_vm2 = vcmp.gt.f32.partialorder %v9532_v7, 0.0  ;;  %v9743_v14 = vrot.slane %v18318_v42, 1 }
0x1c48   :  { %v9143_v63 = vadd.f32 %v14855_v35, %v18280_v30  ;;  %v14911_v1 = vpop.f32.mrf.mxu1  ;;  %v18475_v30 = vsel %vm9562_vm13, %v9530_v50, %v9594_v5  ;;  %vm20246_vm13 = vcmp.lt.s32.totalorder %v20023_v28, 1 }
0x1c49   :  { %v9137_v36 = vpop.f32.mrf.mxu0  ;;  %v9595_v22 = vmul.f32 0.1, %v9531_v15  ;;  %20238 = vst [vmem:[#allocation13_spill] sm:$0xff] %v18475_v30  ;;  %14960 = vmatmul.mubr.msk.f32.gmra.mxu0 %vm20202_vm1, %v18475_v30  ;;  %vm9563_vm9 = vcmp.gt.f32.partialorder %v9531_v15, 0.0  ;;  %v18485_v31 = vsel %vm9564_vm2, %v9532_v7, %v9596_v12  ;;  %vm20250_vm2 = vmmov %vm20202_vm1  ;;  %v9648_v7 = vrot.slane %v18328_v58, 7 }
0x1c4a   :  { %v9138_v0 = vadd.f32 %v9137_v36, %v18282_v62  ;;  %v9498_v21 = vadd.f32 %v14911_v1, %v9143_v63  ;;  %v9458_v13 = vpop.f32.mrf.mxu1  ;;  %20241 = vst [vmem:[#allocation14_spill] sm:$0xff] %v18485_v31  ;;  %vm20251_vm1 = vmmov %vm20246_vm13  ;;  %v9647_v36 = vrot.slane %v18318_v42, 7  ;;  %v9744_v1 = vrot.slane %v18328_v58, 1 }
0x1c4b   :  { %v18481_v60 = vsel %vm9563_vm9, %v9531_v15, %v9595_v22  ;;  %vm20252_vm9 = vmmov %vm20250_vm2  ;;  %v9745_v22 = vrot.slane %v18331_v6, 1 }
0x1c4c   :  { %v9497_v17 = vadd.f32 %v9458_v13, %v9138_v0  ;;  %v9534_v8 = vadd.f32 %v18287_v20, %v9498_v21  ;;  %20239 = vst [vmem:[#allocation9_spill] sm:$0xff] %v18481_v60  ;;  %14962 = vmatprep.mubr.msk.f32.mxu0 %vm20240_vm10, %v18481_v60  ;;  %vm20254_vm10 = vmmov %vm20250_vm2  ;;  %v9650_v13 = vrot.slane %v18341_v27, 7 }
0x1c4d   :  { %14963 = vmatmul.mubr.msk.f32.gmra.mxu0 %vm20242_vm3, %v18485_v31  ;;  %vm20256_vm3 = vmmov %vm20250_vm2 }
0x1c4e   :  { %v9533_v62 = vadd.f32 %v18287_v20, %v9497_v17  ;;  %vm9566_vm4 = vcmp.gt.f32.partialorder %v9534_v8, 0.0  ;;  %v9598_v47 = vmul.f32 0.1, %v9534_v8  ;;  %v9644_v20 = vrot.slane %v18295_v2, 7 }
0x1c4f   :  { %v9649_v17 = vrot.slane %v18331_v6, 7 }
0x1c50   :  { %v9597_v32 = vmul.f32 0.1, %v9533_v62  ;;  %vm9565_vm15 = vcmp.gt.f32.partialorder %v9533_v62, 0.0  ;;  %v18490_v37 = vsel %vm9566_vm4, %v9534_v8, %v9598_v47  ;;  %v9706_v52 = vsel %vm20251_vm1, %v9644_v20, %v9645_v54  ;;  %vm20253_vm4 = vmmov %vm20251_vm1 }
0x1c51   :  { %20243 = vst [vmem:[#allocation15_spill] sm:$0xff] %v18490_v37  ;;  %v9675_v4 = vrot.slane %v18490_v37, 7  ;;  %v9705_v63 = vsel %vm20253_vm4, %v9645_v54, %v9646_v34  ;;  %v9746_v8 = vrot.slane %v18341_v27, 1  ;;  %v9651_v54 = vrot.slane %v18347_v56, 7 }
0x1c52   :  { %v18493_v50 = vsel %vm9565_vm15, %v9533_v62, %v9597_v32  ;;  %vm20255_vm15 = vmmov %vm20248_vm0 }
0x1c53   :  { %20244 = vst [vmem:[#allocation16_spill] sm:$0xff] %v18493_v50  ;;  %14965 = vmatprep.mubr.msk.f32.mxu0 %vm20245_vm5, %v18493_v50  ;;  %v9707_v5 = vsel %vm20246_vm13, %v9675_v4, %v9644_v20  ;;  %v9801_v15 = vsel %vm20255_vm15, %v9741_v61, %v9742_v53  ;;  %vm20257_vm5 = vmmov %vm20248_vm0  ;;  %v9652_v20 = vrot.slane %v18354_v44, 7  ;;  %v9747_v61 = vrot.slane %v18347_v56, 1 }
0x1c54   :  { %14966 = vmatmul.mubr.msk.f32.gmra.mxu0 %vm20247_vm12, %v18490_v37  ;;  %v9708_v35 = vsel %vm17908_vm14, %v9707_v5, 0.0  ;;  %v9800_v0 = vsel %vm20257_vm5, %v9742_v53, %v9743_v14  ;;  %vm20258_vm13 = vmmov %vm20250_vm2  ;;  %v9748_v53 = vrot.slane %v18354_v44, 1 }
0x1c55   :  { %14976 = vmatprep.mubr.msk.f32.mxu1 %vm20249_vm11, %v9708_v35  ;;  %15032 = vmatprep.mubr.msk.f32.mxu0 %vm20250_vm2, %v9802_v48  ;;  %vm20259_vm12 = vmmov %vm20251_vm1 }
0x1c56   :  { %14977 = vmatmul.mubr.msk.f32.vlgmr.msra.gmra.mxu1 %vm20252_vm9, %v9706_v52  ;;  %v9704_v21 = vsel %vm20259_vm12, %v9646_v34, %v9647_v36  ;;  %vm20260_vm0 = vmmov %vm20250_vm2  ;;  %v9654_v52 = vrot.slane %v18367_v40, 7 }
0x1c57   :  { %14979 = vmatprep.mubr.msk.f32.mxu1 %vm20254_vm10, %v9705_v63  ;;  %vm20261_vm11 = vmmov %vm20251_vm1  ;;  %v9749_v63 = vrot.slane %v18357_v39, 1 }
0x1c58   :  { %15033 = vmatmul.mubr.msk.f32.vlgmr.msra.gmra.mxu0 %vm20256_vm3, %v9801_v15  ;;  %v9703_v12 = vsel %vm20261_vm11, %v9647_v36, %v9648_v7  ;;  %vm20262_vm2 = vmmov %vm20260_vm0  ;;  %v9750_v36 = vrot.slane %v18367_v40, 1 }
0x1c59   :  { %15035 = vmatprep.mubr.msk.f32.mxu0 %vm20258_vm13, %v9800_v0  ;;  %vm20263_vm1 = vmmov %vm20257_vm5 }
0x1c5a   :  { %14980 = vmatmul.mubr.msk.f32.gmra.mxu1 %vm20260_vm0, %v9704_v21  ;;  %v9799_v62 = vsel %vm20263_vm1, %v9743_v14, %v9744_v1  ;;  %vm20264_vm9 = vmmov %vm20260_vm0  ;;  %v9653_v14 = vrot.slane %v18357_v39, 7  ;;  %v9656_v21 = vrot.slane %v18380_v24, 7 }
0x1c5b   :  { %14982 = vmatprep.mubr.msk.f32.mxu1 %vm20262_vm2, %v9703_v12  ;;  %vm20265_vm4 = vmmov %vm20263_vm1  ;;  %v9751_v12 = vrot.slane %v18373_v43, 1 }
0x1c5c   :  { %15036 = vmatmul.mubr.msk.f32.gmra.mxu0 %vm20264_vm9, %v9799_v62  ;;  %v9798_v47 = vsel %vm20265_vm4, %v9744_v1, %v9745_v22  ;;  %vm20266_vm10 = vmmov %vm20260_vm0 }
0x1c5d   :  { %15038 = vmatprep.mubr.msk.f32.mxu0 %vm20266_vm10, %v9798_v47  ;;  %vm20267_vm15 = vmmov %vm20261_vm11 }
0x1c5e   :  { %v9702_v32 = vsel %vm20267_vm15, %v9648_v7, %v9649_v17  ;;  %vm20268_vm3 = vmmov %vm20260_vm0 }
0x1c5f   :  { %14983 = vmatmul.mubr.msk.f32.gmra.mxu1 %vm20268_vm3, %v9702_v32  ;;  %vm20269_vm5 = vmmov %vm20261_vm11 }
0x1c60   :  { %v9701_v34 = vsel %vm20269_vm5, %v9649_v17, %v9650_v13  ;;  %vm20270_vm13 = vmmov %vm20260_vm0  ;;  %v9655_v17 = vrot.slane %v18373_v43, 7 }
0x1c61   :  { %14985 = vmatprep.mubr.msk.f32.mxu1 %vm20270_vm13, %v9701_v34  ;;  %vm20271_vm12 = vmmov %vm20263_vm1 }
0x1c62   :  { %v9797_v5 = vsel %vm20271_vm12, %v9745_v22, %v9746_v8  ;;  %vm20272_vm11 = vmmov %vm20263_vm1  ;;  %v11002_v22 = vld [vmem:[%s19688_s6 + $0x218] sm:$0xff] }
0x1c63   :  { %15039 = vmatmul.mubr.msk.f32.gmra.mxu0 %vm20260_vm0, %v9797_v5  ;;  %v9796_v35 = vsel %vm20272_vm11, %v9746_v8, %v9747_v61  ;;  %vm20273_vm2 = vmmov %vm20260_vm0  ;;  %v9752_v8 = vrot.slane %v18380_v24, 1  ;;  %15080 = vmatprep.subr.mxu1 %v11002_v22  ;;  %v9660_v5 = vrot.slane %v18406_v23, 7 }
0x1c64   :  { %15041 = vmatprep.mubr.msk.f32.mxu0 %vm20273_vm2, %v9796_v35  ;;  %vm20274_vm1 = vmmov %vm20269_vm5  ;;  %15081 = vmatpush3.msra.mxu1 %v11002_v22 }
0x1c65   :  { %v9700_v48 = vsel %vm20274_vm1, %v9650_v13, %v9651_v54  ;;  %vm20275_vm9 = vmmov %vm20260_vm0 }
0x1c66   :  { %14986 = vmatmul.mubr.msk.f32.gmra.mxu1 %vm20275_vm9, %v9700_v48  ;;  %vm20276_vm4 = vmmov %vm20274_vm1  ;;  %v9756_v48 = vrot.slane %v18406_v23, 1 }
0x1c67   :  { %v9699_v7 = vsel %vm20276_vm4, %v9651_v54, %v9652_v20  ;;  %vm20277_vm10 = vmmov %vm20260_vm0  ;;  %v9657_v54 = vrot.slane %v18383_v29, 7 }
0x1c68   :  { %14988 = vmatprep.mubr.msk.f32.mxu1 %vm20277_vm10, %v9699_v7  ;;  %vm20278_vm15 = vmmov %vm20272_vm11  ;;  %v9659_v7 = vrot.slane %v18396_v16, 7 }
0x1c69   :  { %v9795_v1 = vsel %vm20278_vm15, %v9747_v61, %v9748_v53  ;;  %vm20279_vm3 = vmmov %vm20260_vm0  ;;  %v9753_v61 = vrot.slane %v18383_v29, 1 }
0x1c6a   :  { %15042 = vmatmul.mubr.msk.f32.gmra.mxu0 %vm20279_vm3, %v9795_v1  ;;  %vm20280_vm5 = vmmov %vm20272_vm11 }
0x1c6b   :  { %v9794_v15 = vsel %vm20280_vm5, %v9748_v53, %v9749_v63  ;;  %vm20281_vm13 = vmmov %vm20260_vm0  ;;  %v9754_v53 = vrot.slane %v18393_v26, 1 }
0x1c6c   :  { %15044 = vmatprep.mubr.msk.f32.mxu0 %vm20281_vm13, %v9794_v15  ;;  %vm20282_vm12 = vmmov %vm20274_vm1 }
0x1c6d   :  { %v9698_v0 = vsel %vm20282_vm12, %v9652_v20, %v9653_v14  ;;  %vm20283_vm11 = vmmov %vm20274_vm1  ;;  %v9658_v20 = vrot.slane %v18393_v26, 7 }
0x1c6e   :  { %14989 = vmatmul.mubr.msk.f32.gmra.mxu1 %vm20260_vm0, %v9698_v0  ;;  %v9697_v13 = vsel %vm20283_vm11, %v9653_v14, %v9654_v52  ;;  %vm20284_vm2 = vmmov %vm20260_vm0 }
0x1c6f   :  { %14991 = vmatprep.mubr.msk.f32.mxu1 %vm20284_vm2, %v9697_v13  ;;  %vm20285_vm1 = vmmov %vm20280_vm5 }
0x1c70   :  { %v9793_v62 = vsel %vm20285_vm1, %v9749_v63, %v9750_v36  ;;  %vm20286_vm9 = vmmov %vm20260_vm0 }
0x1c71   :  { %15045 = vmatmul.mubr.msk.f32.gmra.mxu0 %vm20286_vm9, %v9793_v62  ;;  %vm20287_vm4 = vmmov %vm20285_vm1  ;;  %v9758_v62 = vrot.slane %v18419_v38, 1 }
0x1c72   :  { %v9792_v47 = vsel %vm20287_vm4, %v9750_v36, %v9751_v12  ;;  %vm20288_vm10 = vmmov %vm20260_vm0  ;;  %v9755_v36 = vrot.slane %v18396_v16, 1 }
0x1c73   :  { %15047 = vmatprep.mubr.msk.f32.mxu0 %vm20288_vm10, %v9792_v47  ;;  %vm20289_vm15 = vmmov %vm20283_vm11 }
0x1c74   :  { %v9696_v32 = vsel %vm20289_vm15, %v9654_v52, %v9655_v17  ;;  %vm20290_vm3 = vmmov %vm20260_vm0 }
0x1c75   :  { %14992 = vmatmul.mubr.msk.f32.gmra.mxu1 %vm20290_vm3, %v9696_v32  ;;  %vm20291_vm5 = vmmov %vm20283_vm11 }
0x1c76   :  { %v9695_v34 = vsel %vm20291_vm5, %v9655_v17, %v9656_v21  ;;  %vm20292_vm13 = vmmov %vm20260_vm0  ;;  %v9757_v17 = vrot.slane %v18411_v33, 1 }
0x1c77   :  { %14994 = vmatprep.mubr.msk.f32.mxu1 %vm20292_vm13, %v9695_v34  ;;  %vm20293_vm12 = vmmov %vm20285_vm1  ;;  %v9664_v34 = vrot.slane %v18432_v55, 7 }
0x1c78   :  { %v9791_v35 = vsel %vm20293_vm12, %v9751_v12, %v9752_v8  ;;  %vm20294_vm11 = vmmov %vm20285_vm1  ;;  %v9662_v12 = vrot.slane %v18419_v38, 7 }
0x1c79   :  { %15048 = vmatmul.mubr.msk.f32.gmra.mxu0 %vm20260_vm0, %v9791_v35  ;;  %v9790_v52 = vsel %vm20294_vm11, %v9752_v8, %v9753_v61  ;;  %vm20295_vm2 = vmmov %vm20260_vm0  ;;  %v9661_v8 = vrot.slane %v18411_v33, 7  ;;  %v9663_v35 = vrot.slane %v18422_v11, 7 }
0x1c7a   :  { %15050 = vmatprep.mubr.msk.f32.mxu0 %vm20295_vm2, %v9790_v52  ;;  %vm20296_vm1 = vmmov %vm20291_vm5 }
0x1c7b   :  { %v9694_v63 = vsel %vm20296_vm1, %v9656_v21, %v9657_v54  ;;  %vm20297_vm9 = vmmov %vm20260_vm0 }
0x1c7c   :  { %14995 = vmatmul.mubr.msk.f32.gmra.mxu1 %vm20297_vm9, %v9694_v63  ;;  %vm20298_vm4 = vmmov %vm20296_vm1  ;;  %v9666_v63 = vrot.slane %v18445_v59, 7 }
0x1c7d   :  { %v9693_v14 = vsel %vm20298_vm4, %v9657_v54, %v9658_v20  ;;  %vm20299_vm10 = vmmov %vm20260_vm0  ;;  %v9759_v54 = vrot.slane %v18422_v11, 1 }
0x1c7e   :  { %14997 = vmatprep.mubr.msk.f32.mxu1 %vm20299_vm10, %v9693_v14  ;;  %vm20300_vm15 = vmmov %vm20294_vm11 }
0x1c7f   :  { %v9789_v1 = vsel %vm20300_vm15, %v9753_v61, %v9754_v53  ;;  %vm20301_vm3 = vmmov %vm20296_vm1 }
0x1c80   :  { %v9691_v15 = vsel %vm20301_vm3, %v9659_v7, %v9660_v5  ;;  %vm20302_vm5 = vmmov %vm20260_vm0 }
0x1c81   :  { %15051 = vmatmul.mubr.msk.f32.gmra.mxu0 %vm20302_vm5, %v9789_v1  ;;  %vm20303_vm13 = vmmov %vm20294_vm11  ;;  %v9724_v22 = vsel %vm18047_vm8, %v9691_v15, 0.0  ;;  %v9665_v1 = vrot.slane %v18437_v9, 7  ;;  %v9762_v15 = vrot.slane %v18445_v59, 1 }
0x1c82   :  { %v9788_v0 = vsel %vm20303_vm13, %v9754_v53, %v9755_v36  ;;  %vm20304_vm12 = vmmov %vm20294_vm11  ;;  %v11001_v53 = vld [vmem:[%s19688_s6 + $0x210] sm:$0xff] }
0x1c83   :  { %v9787_v21 = vsel %vm20304_vm12, %v9755_v36, %v9756_v48  ;;  %15053 = vmatprep.mubr.msk.f32.mxu0 %vm20260_vm0, %v9788_v0  ;;  %vm20305_vm11 = vmmov %vm20296_vm1  ;;  %15082 = vmatprep.subr.mxu1 %v11001_v53  ;;  %v9761_v36 = vrot.slane %v18437_v9, 1 }
0x1c84   :  { %v9692_v13 = vsel %vm20305_vm11, %v9658_v20, %v9659_v7  ;;  %vm20306_vm2 = vmmov %vm20260_vm0  ;;  %v9819_v47 = vsel %vm18056_vm7, %v9787_v21, 0.0  ;;  %15083 = vmatpush3.msra.mxu1 %v11001_v53  ;;  %v9669_v53 = vrot.slane %v18463_v41, 7 }
0x1c85   :  { %14998 = vmatmul.mubr.msk.f32.gmra.mxu1 %vm20306_vm2, %v9692_v13  ;;  %vm20307_vm1 = vmmov %vm20260_vm0 }
0x1c86   :  { %15000 = vmatprep.mubr.msk.f32.mxu1 %vm20307_vm1, %v9724_v22  ;;  %vm20308_vm9 = vmmov %vm20260_vm0 }
0x1c87   :  { %15054 = vmatmul.mubr.msk.f32.gmra.mxu0 %vm20308_vm9, %v9819_v47  ;;  %vm20309_vm4 = vmmov %vm20304_vm12 }
0x1c88   :  { %v9786_v32 = vsel %vm20309_vm4, %v9756_v48, %v9757_v17  ;;  %vm20310_vm10 = vmmov %vm20260_vm0  ;;  %v9760_v48 = vrot.slane %v18432_v55, 1 }
0x1c89   :  { %15056 = vmatprep.mubr.msk.f32.mxu0 %vm20310_vm10, %v9786_v32  ;;  %vm20311_vm15 = vmmov %vm20301_vm3 }
0x1c8a   :  { %v9690_v20 = vsel %vm20311_vm15, %v9660_v5, %v9661_v8  ;;  %vm20312_vm3 = vmmov %vm20260_vm0 }
0x1c8b   :  { %15001 = vmatmul.mubr.msk.f32.gmra.mxu1 %vm20312_vm3, %v9690_v20  ;;  %vm20313_vm5 = vmmov %vm20305_vm11 }
0x1c8c   :  { %v9689_v61 = vsel %vm20313_vm5, %v9661_v8, %v9662_v12  ;;  %vm20314_vm13 = vmmov %vm20260_vm0  ;;  %v9667_v8 = vrot.slane %v18448_v19, 7 }
0x1c8d   :  { %15003 = vmatprep.mubr.msk.f32.mxu1 %vm20314_vm13, %v9689_v61  ;;  %vm20315_vm12 = vmmov %vm20309_vm4 }
0x1c8e   :  { %v9785_v5 = vsel %vm20315_vm12, %v9757_v17, %v9758_v62  ;;  %vm20316_vm11 = vmmov %vm20309_vm4  ;;  %v9763_v17 = vrot.slane %v18448_v19, 1 }
0x1c8f   :  { %15057 = vmatmul.mubr.msk.f32.gmra.mxu0 %vm20260_vm0, %v9785_v5  ;;  %v9784_v52 = vsel %vm20316_vm11, %v9758_v62, %v9759_v54  ;;  %vm20317_vm2 = vmmov %vm20260_vm0  ;;  %v9764_v62 = vrot.slane %v18458_v49, 1 }
0x1c90   :  { %15059 = vmatprep.mubr.msk.f32.mxu0 %vm20317_vm2, %v9784_v52  ;;  %vm20318_vm1 = vmmov %vm20313_vm5 }
0x1c91   :  { %v9688_v7 = vsel %vm20318_vm1, %v9662_v12, %v9663_v35  ;;  %vm20319_vm9 = vmmov %vm20260_vm0  ;;  %v9668_v12 = vrot.slane %v18458_v49, 7 }
0x1c92   :  { %15004 = vmatmul.mubr.msk.f32.gmra.mxu1 %vm20319_vm9, %v9688_v7  ;;  %vm20320_vm4 = vmmov %vm20318_vm1  ;;  %v9672_v7 = vrot.slane %v18481_v60, 7 }
0x1c93   :  { %v9687_v14 = vsel %vm20320_vm4, %v9663_v35, %v9664_v34  ;;  %vm20321_vm10 = vmmov %vm20260_vm0  ;;  %v9766_v35 = vrot.slane %v18471_v45, 1 }
0x1c94   :  { %15006 = vmatprep.mubr.msk.f32.mxu1 %vm20321_vm10, %v9687_v14  ;;  %vm20322_vm15 = vmmov %vm20316_vm11  ;;  %v9767_v14 = vrot.slane %v18475_v30, 1 }
0x1c95   :  { %v9783_v0 = vsel %vm20322_vm15, %v9759_v54, %v9760_v48  ;;  %vm20323_vm3 = vmmov %vm20260_vm0  ;;  %v9765_v54 = vrot.slane %v18463_v41, 1 }
0x1c96   :  { %15060 = vmatmul.mubr.msk.f32.gmra.mxu0 %vm20323_vm3, %v9783_v0  ;;  %vm20324_vm5 = vmmov %vm20316_vm11 }
0x1c97   :  { %v9782_v21 = vsel %vm20324_vm5, %v9760_v48, %v9761_v36  ;;  %vm20325_vm13 = vmmov %vm20260_vm0 }
0x1c98   :  { %15062 = vmatprep.mubr.msk.f32.mxu0 %vm20325_vm13, %v9782_v21  ;;  %vm20326_vm12 = vmmov %vm20318_vm1 }
0x1c99   :  { %v9686_v13 = vsel %vm20326_vm12, %v9664_v34, %v9665_v1  ;;  %vm20327_vm11 = vmmov %vm20318_vm1  ;;  %v9670_v34 = vrot.slane %v18471_v45, 7  ;;  %v18854_v45 = vld [vmem:[%s19689_s7 + $0x14] ss:$0 sm:$0xff] }
0x1c9a   :  { %15007 = vmatmul.mubr.msk.f32.gmra.mxu1 %vm20260_vm0, %v9686_v13  ;;  %v9685_v22 = vsel %vm20327_vm11, %v9665_v1, %v9666_v63  ;;  %vm20328_vm2 = vmmov %vm20260_vm0  ;;  %v9671_v1 = vrot.slane %v18475_v30, 7 }
0x1c9b   :  { %15009 = vmatprep.mubr.msk.f32.mxu1 %vm20328_vm2, %v9685_v22  ;;  %vm20329_vm1 = vmmov %vm20324_vm5 }
0x1c9c   :  { %v9781_v47 = vsel %vm20329_vm1, %v9761_v36, %v9762_v15  ;;  %vm20330_vm9 = vmmov %vm20260_vm0  ;;  %v11000_v36 = vld [vmem:[%s19688_s6 + $0x208] sm:$0xff] }
0x1c9d   :  { %15063 = vmatmul.mubr.msk.f32.gmra.mxu0 %vm20330_vm9, %v9781_v47  ;;  %vm20331_vm4 = vmmov %vm20329_vm1  ;;  %15084 = vmatprep.subr.mxu1 %v11000_v36 }
0x1c9e   :  { %v9780_v32 = vsel %vm20331_vm4, %v9762_v15, %v9763_v17  ;;  %vm20332_vm10 = vmmov %vm20260_vm0  ;;  %v9768_v15 = vrot.slane %v18481_v60, 1  ;;  %15085 = vmatpush3.msra.mxu1 %v11000_v36 }
0x1c9f   :  { %15065 = vmatprep.mubr.msk.f32.mxu0 %vm20332_vm10, %v9780_v32  ;;  %vm20333_vm15 = vmmov %vm20327_vm11 }
0x1ca0   :  { %v9684_v20 = vsel %vm20333_vm15, %v9666_v63, %v9667_v8  ;;  %vm20334_vm3 = vmmov %vm20260_vm0 }
0x1ca1   :  { %15010 = vmatmul.mubr.msk.f32.gmra.mxu1 %vm20334_vm3, %v9684_v20  ;;  %vm20335_vm5 = vmmov %vm20327_vm11  ;;  %v9771_v20 = vrot.slane %v18490_v37, 1 }
0x1ca2   :  { %v9683_v61 = vsel %vm20335_vm5, %v9667_v8, %v9668_v12  ;;  %vm20336_vm13 = vmmov %vm20260_vm0  ;;  %v9673_v8 = vrot.slane %v18485_v31, 7 }
0x1ca3   :  { %15012 = vmatprep.mubr.msk.f32.mxu1 %vm20336_vm13, %v9683_v61  ;;  %vm20337_vm12 = vmmov %vm20329_vm1 }
0x1ca4   :  { %v9779_v48 = vsel %vm20337_vm12, %v9763_v17, %v9764_v62  ;;  %vm20338_vm11 = vmmov %vm20329_vm1  ;;  %v9769_v17 = vrot.slane %v18485_v31, 1 }
0x1ca5   :  { %15066 = vmatmul.mubr.msk.f32.gmra.mxu0 %vm20260_vm0, %v9779_v48  ;;  %v9778_v5 = vsel %vm20338_vm11, %v9764_v62, %v9765_v54  ;;  %vm20339_vm2 = vmmov %vm20260_vm0  ;;  %v9770_v62 = vrot.slane %v18493_v50, 1 }
0x1ca6   :  { %15068 = vmatprep.mubr.msk.f32.mxu0 %vm20339_vm2, %v9778_v5  ;;  %vm20340_vm1 = vmmov %vm20335_vm5 }
0x1ca7   :  { %v9682_v52 = vsel %vm20340_vm1, %v9668_v12, %v9669_v53  ;;  %vm20341_vm9 = vmmov %vm20260_vm0  ;;  %v9674_v12 = vrot.slane %v18493_v50, 7 }
0x1ca8   :  { %15013 = vmatmul.mubr.msk.f32.gmra.mxu1 %vm20341_vm9, %v9682_v52  ;;  %vm20342_vm4 = vmmov %vm20340_vm1  ;;  %v10999_v52 = vld [vmem:[%s19688_s6 + $0x200] sm:$0xff] }
0x1ca9   :  { %v9681_v63 = vsel %vm20342_vm4, %v9669_v53, %v9670_v34  ;;  %vm20343_vm10 = vmmov %vm20260_vm0  ;;  %15086 = vmatprep.subr.mxu1 %v10999_v52 }
0x1caa   :  { %15015 = vmatprep.mubr.msk.f32.mxu1 %vm20343_vm10, %v9681_v63  ;;  %vm20344_vm15 = vmmov %vm20338_vm11  ;;  %15087 = vmatpush3.msra.mxu1 %v10999_v52  ;;  %v10996_v63 = vld [vmem:[%s19688_s6 + $0x1e8] sm:$0xff] }
0x1cab   :  { %v9777_v0 = vsel %vm20344_vm15, %v9765_v54, %v9766_v35  ;;  %vm20345_vm3 = vmmov %vm20260_vm0 }
0x1cac   :  { %15069 = vmatmul.mubr.msk.f32.gmra.mxu0 %vm20345_vm3, %v9777_v0  ;;  %vm20346_vm5 = vmmov %vm20338_vm11 }
0x1cad   :  { %v9776_v21 = vsel %vm20346_vm5, %v9766_v35, %v9767_v14  ;;  %vm20347_vm13 = vmmov %vm20260_vm0 }
0x1cae   :  { %15071 = vmatprep.mubr.msk.f32.mxu0 %vm20347_vm13, %v9776_v21  ;;  %vm20348_vm12 = vmmov %vm20340_vm1 }
0x1caf   :  { %v9680_v13 = vsel %vm20348_vm12, %v9670_v34, %v9671_v1  ;;  %vm20349_vm11 = vmmov %vm20340_vm1 }
0x1cb0   :  { %15016 = vmatmul.mubr.msk.f32.gmra.mxu1 %vm20260_vm0, %v9680_v13  ;;  %v9679_v22 = vsel %vm20349_vm11, %v9671_v1, %v9672_v7  ;;  %vm20350_vm2 = vmmov %vm20260_vm0 }
0x1cb1   :  { %15018 = vmatprep.mubr.msk.f32.mxu1 %vm20350_vm2, %v9679_v22  ;;  %vm20351_vm1 = vmmov %vm20346_vm5 }
0x1cb2   :  { %v9775_v47 = vsel %vm20351_vm1, %v9767_v14, %v9768_v15  ;;  %vm20352_vm9 = vmmov %vm20260_vm0  ;;  %v14922_v14 = vpop.f32.mrf.mxu0 }
0x1cb3   :  { %15072 = vmatmul.mubr.msk.f32.gmra.mxu0 %vm20352_vm9, %v9775_v47  ;;  %vm20353_vm4 = vmmov %vm20351_vm1 }
0x1cb4   :  { %v9774_v32 = vsel %vm20353_vm4, %v9768_v15, %v9769_v17  ;;  %vm20354_vm10 = vmmov %vm20260_vm0  ;;  %v9998_v36 = vpop.f32.mrf.mxu0  ;;  %v10995_v15 = vld [vmem:[%s19688_s6 + $0x1e0] sm:$0xff] }
0x1cb5   :  { %15074 = vmatprep.mubr.msk.f32.mxu0 %vm20354_vm10, %v9774_v32  ;;  %vm20355_vm15 = vmmov %vm20349_vm11 }
0x1cb6   :  { %v9678_v34 = vsel %vm20355_vm15, %v9672_v7, %v9673_v8  ;;  %vm20356_vm3 = vmmov %vm20260_vm0  ;;  %v10997_v7 = vld [vmem:[%s19688_s6 + $0x1f0] sm:$0xff]  ;;  %v14925_v1 = vpop.f32.mrf.mxu0 }
0x1cb7   :  { %15019 = vmatmul.mubr.msk.f32.gmra.mxu1 %vm20356_vm3, %v9678_v34  ;;  %vm20357_vm5 = vmmov %vm20349_vm11 }
0x1cb8   :  { %v9677_v61 = vsel %vm20357_vm5, %v9673_v8, %v9674_v12  ;;  %vm20358_vm13 = vmmov %vm20260_vm0  ;;  %v10008_v0 = vpop.f32.mrf.mxu0 }
0x1cb9   :  { %15021 = vmatprep.mubr.msk.f32.mxu1 %vm20358_vm13, %v9677_v61  ;;  %vm20359_vm12 = vmmov %vm20351_vm1 }
0x1cba   :  { %v9773_v54 = vsel %vm20359_vm12, %v9769_v17, %v9770_v62  ;;  %vm20360_vm11 = vmmov %vm20351_vm1  ;;  %v14928_v21 = vpop.f32.mrf.mxu0 }
0x1cbb   :  { %15075 = vmatmul.mubr.msk.f32.gmra.mxu0 %vm20260_vm0, %v9773_v54  ;;  %v9772_v53 = vsel %vm20360_vm11, %v9770_v62, %v9771_v20  ;;  %vm20361_vm2 = vmmov %vm20351_vm1 }
0x1cbc   :  { %v9803_v35 = vsel %vm20361_vm2, %v9771_v20, %v9740_v46  ;;  %vm20362_vm1 = vmmov %vm20260_vm0  ;;  %v10998_v46 = vld [vmem:[%s19688_s6 + $0x1f8] sm:$0xff]  ;;  %v10018_v13 = vpop.f32.mrf.mxu0 }
0x1cbd   :  { %15077 = vmatprep.mubr.msk.f32.mxu0 %vm20362_vm1, %v9772_v53  ;;  %vm20363_vm9 = vmmov %vm20357_vm5  ;;  %v9835_v5 = vsel %vm18194_vm6, %v9803_v35, 0.0  ;;  %15136 = vmatprep.subr.mxu0 %v10998_v46 }
0x1cbe   :  { %v9676_v48 = vsel %vm20363_vm9, %v9674_v12, %v9675_v4  ;;  %vm20364_vm4 = vmmov %vm20260_vm0  ;;  %v18787_v4 = vld [vmem:[%s19688_s6 + $0x238] sm:$0xff]  ;;  %15137 = vmatpush3.msra.mxu0 %v10998_v46  ;;  %v18799_v12 = vpop.f32.mrf.mxu0 }
0x1cbf   :  { %15022 = vmatmul.mubr.msk.f32.gmra.mxu1 %vm20364_vm4, %v9676_v48  ;;  %vm20365_vm10 = vmmov %vm20260_vm0  ;;  %15192 = vmatprep.subr.mxu1 %v18787_v4 }
0x1cc0   :  { %15078 = vmatmul.mubr.msk.f32.gmra.mxu0 %vm20365_vm10, %v9835_v5  ;;  %15138 = vmatprep.subr.mxu0 %v10997_v7  ;;  %v18801_v22 = vpop.f32.mrf.mxu0  ;;  %vm20374_vm12 = vmmov %vm20260_vm0 }
0x1cc1   :  { %15139 = vmatpush3.msra.mxu0 %v10997_v7  ;;  %vm20375_vm9 = vmmov %vm20260_vm0 }
0x1cc2   :  { %15140 = vmatprep.subr.mxu0 %v10996_v63  ;;  %v18803_v17 = vpop.f32.mrf.mxu0  ;;  %vm20376_vm4 = vmmov %vm20260_vm0 }
0x1cc3   :  { %15141 = vmatpush3.msra.mxu0 %v10996_v63 }
0x1cc4   :  { %15142 = vmatprep.subr.mxu0 %v10995_v15  ;;  %v18805_v8 = vpop.f32.mrf.mxu0 }
0x1cc5   :  { %15143 = vmatpush3.msra.mxu0 %v10995_v15 }
0x1cc6   :  { %v18807_v62 = vpop.f32.mrf.mxu0 }
0x1cc8   :  { %v18809_v47 = vpop.f32.mrf.mxu0 }
0x1cce   :  { %v18811_v32 = vpop.f32.mrf.mxu0 }
0x1cd0   :  { %v18813_v20 = vpop.f32.mrf.mxu0 }
0x1cd9   :  { %v18815_v34 = vpop.f32.mrf.mxu0 }
0x1cdb   :  { %v18817_v61 = vpop.f32.mrf.mxu0 }
0x1cdd   :  { %v18819_v54 = vpop.f32.mrf.mxu0 }
0x1cdf   :  { %v18821_v53 = vpop.f32.mrf.mxu0 }
0x1ce5   :  { %v18823_v35 = vpop.f32.mrf.mxu0 }
0x1ce7   :  { %v18825_v48 = vpop.f32.mrf.mxu0 }
0x1ced   :  { %v18827_v5 = vpop.f32.mrf.mxu0 }
0x1cef   :  { %v18829_v52 = vpop.f32.mrf.mxu0 }
0x1cf5   :  { %v18831_v46 = vpop.f32.mrf.mxu0 }
0x1cf7   :  { %v18833_v7 = vpop.f32.mrf.mxu0 }
0x1cfd   :  { %v18835_v63 = vpop.f32.mrf.mxu0 }
0x1cfe   :  { %20366 = vst [vmem:[#allocation17_spill] sm:$0xff] %v18835_v63 }
0x1cff   :  { %v18837_v15 = vpop.f32.mrf.mxu0 }
0x1d00   :  { %20367 = vst [vmem:[#allocation5_spill] sm:$0xff] %v18837_v15 }
0x1d09   :  { %v18839_v3 = vpop.f32.mrf.mxu0 }
0x1d0a   :  { %20368 = vst [vmem:[#allocation18_spill] sm:$0xff] %v18839_v3 }
0x1d0b   :  { %v18841_v18 = vpop.f32.mrf.mxu0 }
0x1d0c   :  { %20369 = vst [vmem:[#allocation19_spill] sm:$0xff] %v18841_v18 }
0x1d0d   :  { %v18843_v10 = vpop.f32.mrf.mxu0 }
0x1d0e   :  { %20370 = vst [vmem:[#allocation20_spill] sm:$0xff] %v18843_v10 }
0x1d0f   :  { %v18845_v57 = vpop.f32.mrf.mxu0 }
0x1d10   :  { %20371 = vst [vmem:[#allocation21_spill] sm:$0xff] %v18845_v57 }
0x1d14   :  { %v18847_v50 = vpop.f32.mrf.mxu0 }
0x1d15   :  { %20372 = vst [vmem:[#allocation6_spill] sm:$0xff] %v18847_v50 }
0x1d16   :  { %v18849_v37 = vpop.f32.mrf.mxu0  ;;  %v14978_v31 = vpop.f32.mrf.mxu1 }
0x1d17   :  { %20373 = vst [vmem:[#allocation22_spill] sm:$0xff] %v18849_v37  ;;  %v10325_v60 = vadd.f32 %v14978_v31, %v14922_v14 }
0x1d18   :  { %v10319_v30 = vpop.f32.mrf.mxu1  ;;  %v15034_v41 = vpop.f32.mrf.mxu0 }
0x1d19   :  { %v10320_v49 = vadd.f32 %v10319_v30, %v9998_v36  ;;  %v10800_v59 = vadd.f32 %v15034_v41, %v10325_v60 }
0x1d1a   :  { %v14981_v19 = vpop.f32.mrf.mxu1  ;;  %v10640_v18 = vpop.f32.mrf.mxu0 }
0x1d1b   :  { %v10836_v10 = vadd.f32 %v18854_v45, %v10800_v59  ;;  %v10335_v57 = vadd.f32 %v14981_v19, %v14925_v1  ;;  %v10799_v9 = vadd.f32 %v10640_v18, %v10320_v49 }
0x1d1c   :  { %v10329_v50 = vpop.f32.mrf.mxu1  ;;  %v15037_v3 = vpop.f32.mrf.mxu0 }
0x1d1d   :  { %v10900_v37 = vmul.f32 0.1, %v10836_v10  ;;  %v10835_v31 = vadd.f32 %v18854_v45, %v10799_v9  ;;  %v10330_v14 = vadd.f32 %v10329_v50, %v10008_v0  ;;  %vm10868_vm15 = vcmp.gt.f32.partialorder %v10836_v10, 0.0 }
0x1d1e   :  { %v10802_v55 = vadd.f32 %v15037_v3, %v10335_v57  ;;  %v10650_v38 = vpop.f32.mrf.mxu0 }
0x1d1f   :  { %v14984_v15 = vpop.f32.mrf.mxu1  ;;  %vm10867_vm3 = vcmp.gt.f32.partialorder %v10835_v31, 0.0  ;;  %v10899_v11 = vmul.f32 0.1, %v10835_v31  ;;  %v10801_v60 = vadd.f32 %v10650_v38, %v10330_v14  ;;  %v10932_v19 = vsel %vm10868_vm15, %v10836_v10, %v10900_v37 }
0x1d20   :  { %v10345_v30 = vadd.f32 %v14984_v15, %v14928_v21  ;;  %v10838_v41 = vadd.f32 %v18854_v45, %v10802_v55  ;;  %v18866_v38 = vadd.f32 %v10932_v19, %v18293_v51 }
0x1d21   :  { %v10339_v36 = vpop.f32.mrf.mxu1  ;;  %v10931_v18 = vsel %vm10867_vm3, %v10835_v31, %v10899_v11  ;;  %v10837_v9 = vadd.f32 %v18854_v45, %v10801_v60  ;;  %vm20377_vm3 = vmmov %vm20260_vm0 }
0x1d22   :  { %v10340_v49 = vadd.f32 %v10339_v36, %v10018_v13  ;;  %vm10870_vm5 = vcmp.gt.f32.partialorder %v10838_v41, 0.0  ;;  %v10902_v63 = vmul.f32 0.1, %v10838_v41  ;;  %v18863_v55 = vadd.f32 %v10931_v18, %v18295_v2  ;;  %v11004_v36 = vld [vmem:[%s19688_s6 + $0x228] sm:$0xff] }
0x1d23   :  { %v15040_v59 = vpop.f32.mrf.mxu0  ;;  %vm10869_vm13 = vcmp.gt.f32.partialorder %v10837_v9, 0.0  ;;  %v10901_v10 = vmul.f32 0.1, %v10837_v9 }
0x1d24   :  { %v10804_v1 = vadd.f32 %v15040_v59, %v10345_v30  ;;  %v10934_v13 = vsel %vm10870_vm5, %v10838_v41, %v10902_v63  ;;  %15088 = vmatprep.mubr.msk.f32.mxu1 %vm20374_vm12, %v18863_v55  ;;  %v11009_v59 = vrot.slane %v18866_v38, 7 }
0x1d25   :  { %v10660_v57 = vpop.f32.mrf.mxu0  ;;  %v10933_v31 = vsel %vm10869_vm13, %v10837_v9, %v10901_v10  ;;  %15089 = vmatmul.mubr.msk.f32.vlgmr.msra.gmra.mxu1 %vm20260_vm0, %v18866_v38  ;;  %v18888_v9 = vadd.f32 %v10934_v13, %v18318_v42  ;;  %v11003_v42 = vld [vmem:[%s19688_s6 + $0x220] sm:$0xff]  ;;  %vm20378_vm13 = vmmov %vm20260_vm0 }
0x1d26   :  { %v14987_v50 = vpop.f32.mrf.mxu1  ;;  %v10840_v3 = vadd.f32 %v18854_v45, %v10804_v1  ;;  %v10803_v21 = vadd.f32 %v10660_v57, %v10340_v49  ;;  %15193 = vmatpush3.msra.mxu1 %v18787_v4  ;;  %v18885_v1 = vadd.f32 %v10933_v31, %v18312_v25 }
0x1d27   :  { %v10355_v0 = vadd.f32 %v14987_v50, %v18799_v12  ;;  %v11005_v12 = vld [vmem:[%s19688_s6 + $0x230] sm:$0xff] }
0x1d28   :  { %v10349_v11 = vpop.f32.mrf.mxu1  ;;  %v10839_v15 = vadd.f32 %v18854_v45, %v10803_v21  ;;  %v10904_v2 = vmul.f32 0.1, %v10840_v3  ;;  %vm10872_vm11 = vcmp.gt.f32.partialorder %v10840_v3, 0.0  ;;  %15194 = vmatprep.subr.mxu1 %v11005_v12  ;;  %15091 = vmatprep.mubr.msk.f32.mxu1 %vm20375_vm9, %v18885_v1  ;;  %vm20381_vm9 = vmmov %vm20260_vm0 }
0x1d29   :  { %v10350_v14 = vadd.f32 %v10349_v11, %v18801_v22  ;;  %15195 = vmatpush3.msra.mxu1 %v11005_v12 }
0x1d2a   :  { %v15043_v37 = vpop.f32.mrf.mxu0  ;;  %vm10871_vm2 = vcmp.gt.f32.partialorder %v10839_v15, 0.0  ;;  %v10903_v63 = vmul.f32 0.1, %v10839_v15  ;;  %v10936_v57 = vsel %vm10872_vm11, %v10840_v3, %v10904_v2  ;;  %15196 = vmatprep.subr.mxu1 %v11004_v36  ;;  %15092 = vmatmul.mubr.msk.f32.gmra.mxu1 %vm20376_vm4, %v18888_v9  ;;  %v11105_v2 = vrot.slane %v18866_v38, 1  ;;  %vm20379_vm11 = vmmov %vm20260_vm0 }
0x1d2b   :  { %v10806_v51 = vadd.f32 %v15043_v37, %v10355_v0  ;;  %15197 = vmatpush3.msra.mxu1 %v11004_v36  ;;  %vm20382_vm4 = vcmp.lt.s32.totalorder %v20023_v28, 7 }
0x1d2c   :  { %v10670_v60 = vpop.f32.mrf.mxu0  ;;  %15198 = vmatprep.subr.mxu1 %v11003_v42 }
0x1d2d   :  { %v10842_v22 = vadd.f32 %v18854_v45, %v10806_v51  ;;  %v10805_v19 = vadd.f32 %v10670_v60, %v10350_v14  ;;  %v18907_v14 = vadd.f32 %v10936_v57, %v18331_v6  ;;  %15199 = vmatpush3.msra.mxu1 %v11003_v42 }
0x1d2e   :  { %v14990_v30 = vpop.f32.mrf.mxu1 }
0x1d2f   :  { %v10365_v41 = vadd.f32 %v14990_v30, %v18803_v17  ;;  %v10935_v17 = vsel %vm10871_vm2, %v10839_v15, %v10903_v63  ;;  %vm10874_vm1 = vcmp.gt.f32.partialorder %v10842_v22, 0.0  ;;  %v10906_v0 = vmul.f32 0.1, %v10842_v22 }
0x1d30   :  { %v10359_v18 = vpop.f32.mrf.mxu1  ;;  %v10841_v21 = vadd.f32 %v18854_v45, %v10805_v19  ;;  %v18903_v37 = vadd.f32 %v10935_v17, %v18328_v58  ;;  %vm20380_vm2 = vcmp.lt.s32.totalorder %v20023_v28, 1 }
0x1d31   :  { %v15046_v49 = vpop.f32.mrf.mxu0  ;;  %v10360_v4 = vadd.f32 %v10359_v18, %v18805_v8  ;;  %v10938_v13 = vsel %vm10874_vm1, %v10842_v22, %v10906_v0 }
0x1d32   :  { %v10808_v50 = vadd.f32 %v15046_v49, %v10365_v41  ;;  %vm10873_vm10 = vcmp.gt.f32.partialorder %v10841_v21, 0.0  ;;  %v10905_v15 = vmul.f32 0.1, %v10841_v21  ;;  %15094 = vmatprep.mubr.msk.f32.mxu1 %vm20377_vm3, %v18903_v37  ;;  %v18915_v6 = vadd.f32 %v10938_v13, %v18347_v56  ;;  %vm20383_vm3 = vmmov %vm20260_vm0 }
0x1d33   :  { %v10680_v10 = vpop.f32.mrf.mxu0  ;;  %15095 = vmatmul.mubr.msk.f32.gmra.mxu1 %vm20378_vm13, %v18907_v14 }
0x1d34   :  { %v10844_v8 = vadd.f32 %v18854_v45, %v10808_v50  ;;  %v10807_v11 = vadd.f32 %v10680_v10, %v10360_v4  ;;  %v10937_v58 = vsel %vm10873_vm10, %v10841_v21, %v10905_v15  ;;  %v11010_v21 = vrot.slane %v18885_v1, 7 }
0x1d35   :  { %v14993_v25 = vpop.f32.mrf.mxu1  ;;  %v18923_v50 = vadd.f32 %v10937_v58, %v18341_v27 }
0x1d36   :  { %v10375_v3 = vadd.f32 %v14993_v25, %v18807_v62  ;;  %vm10876_vm15 = vcmp.gt.f32.partialorder %v10844_v8, 0.0  ;;  %v10908_v51 = vmul.f32 0.1, %v10844_v8  ;;  %v10843_v30 = vadd.f32 %v18854_v45, %v10807_v11 }
0x1d37   :  { %v10369_v12 = vpop.f32.mrf.mxu1  ;;  %v11106_v62 = vrot.slane %v18885_v1, 1  ;;  %15097 = vmatprep.mubr.msk.f32.mxu1 %vm20260_vm0, %v18923_v50  ;;  %v18943_v11 = vsel %vm20380_vm2, %v11009_v59, %v11010_v21  ;;  %vm20386_vm2 = vmmov %vm20260_vm0 }
0x1d38   :  { %v10370_v60 = vadd.f32 %v10369_v12, %v18809_v47  ;;  %vm10875_vm5 = vcmp.gt.f32.partialorder %v10843_v30, 0.0  ;;  %v10907_v22 = vmul.f32 0.1, %v10843_v30  ;;  %v10940_v18 = vsel %vm10876_vm15, %v10844_v8, %v10908_v51  ;;  %15098 = vmatmul.mubr.msk.f32.gmra.mxu1 %vm20379_vm11, %v18915_v6 }
0x1d39   :  { %v15049_v31 = vpop.f32.mrf.mxu0 }
0x1d3a   :  { %v10810_v63 = vadd.f32 %v15049_v31, %v10375_v3  ;;  %v10939_v57 = vsel %vm10875_vm5, %v10843_v30, %v10907_v22  ;;  %v18956_v31 = vadd.f32 %v10940_v18, %v18357_v39  ;;  %v11107_v18 = vrot.slane %v18888_v9, 1  ;;  %vm20384_vm5 = vmmov %vm20382_vm4 }
0x1d3b   :  { %v10690_v36 = vpop.f32.mrf.mxu0  ;;  %v18931_v8 = vadd.f32 %v10939_v57, %v18354_v44 }
0x1d3c   :  { %v14996_v41 = vpop.f32.mrf.mxu1  ;;  %v10846_v49 = vadd.f32 %v18854_v45, %v10810_v63  ;;  %v10809_v17 = vadd.f32 %v10690_v36, %v10370_v60 }
0x1d3d   :  { %v10385_v19 = vadd.f32 %v14996_v41, %v18811_v32  ;;  %15100 = vmatprep.mubr.msk.f32.mxu1 %vm20381_vm9, %v18931_v8  ;;  %vm20387_vm9 = vcmp.lt.s32.totalorder %v20023_v28, 1 }
0x1d3e   :  { %v10379_v47 = vpop.f32.mrf.mxu1  ;;  %vm10878_vm12 = vcmp.gt.f32.partialorder %v10846_v49, 0.0  ;;  %v10910_v25 = vmul.f32 0.1, %v10846_v49  ;;  %v10845_v32 = vadd.f32 %v18854_v45, %v10809_v17  ;;  %15101 = vmatmul.mubr.msk.f32.gmra.mxu1 %vm20383_vm3, %v18956_v31  ;;  %vm20389_vm3 = vmmov %vm20260_vm0 }
0x1d3f   :  { %v10380_v56 = vadd.f32 %v10379_v47, %v18813_v20 }
0x1d40   :  { %v10942_v13 = vsel %vm10878_vm12, %v10846_v49, %v10910_v25  ;;  %vm10877_vm1 = vcmp.gt.f32.partialorder %v10845_v32, 0.0  ;;  %v10909_v44 = vmul.f32 0.1, %v10845_v32  ;;  %vm20385_vm12 = vmmov %vm20260_vm0 }
0x1d41   :  { %v15052_v4 = vpop.f32.mrf.mxu0  ;;  %v18960_v58 = vadd.f32 %v10942_v13, %v18373_v43 }
0x1d42   :  { %v10812_v0 = vadd.f32 %v15052_v4, %v10385_v19  ;;  %v10941_v60 = vsel %vm10877_vm1, %v10845_v32, %v10909_v44 }
0x1d43   :  { %v10700_v42 = vpop.f32.mrf.mxu0 }
0x1d44   :  { %v10848_v27 = vadd.f32 %v18854_v45, %v10812_v0  ;;  %v10811_v3 = vadd.f32 %v10700_v42, %v10380_v56 }
0x1d45   :  { %v14999_v10 = vpop.f32.mrf.mxu1 }
0x1d46   :  { %v10395_v20 = vadd.f32 %v14999_v10, %v18815_v34  ;;  %v18953_v34 = vsel %vm20382_vm4, %v11105_v2, %v11106_v62  ;;  %vm10880_vm10 = vcmp.gt.f32.partialorder %v10848_v27, 0.0  ;;  %v10912_v51 = vmul.f32 0.1, %v10848_v27 }
0x1d47   :  { %v10389_v15 = vpop.f32.mrf.mxu1  ;;  %v15055_v12 = vpop.f32.mrf.mxu0  ;;  %v10847_v30 = vadd.f32 %v18854_v45, %v10811_v3 }
0x1d48   :  { %v10390_v63 = vadd.f32 %v10389_v15, %v18817_v61  ;;  %v10814_v41 = vadd.f32 %v15055_v12, %v10395_v20  ;;  %v10944_v49 = vsel %vm10880_vm10, %v10848_v27, %v10912_v51  ;;  %v18969_v61 = vadd.f32 %v10941_v60, %v18367_v40  ;;  %vm20388_vm10 = vmmov %vm20260_vm0 }
0x1d49   :  { %v10710_v22 = vpop.f32.mrf.mxu0  ;;  %vm10879_vm15 = vcmp.gt.f32.partialorder %v10847_v30, 0.0  ;;  %v10911_v19 = vmul.f32 0.1, %v10847_v30  ;;  %v18991_v20 = vadd.f32 %v10944_v49, %v18383_v29 }
0x1d4a   :  { %v10850_v17 = vadd.f32 %v18854_v45, %v10814_v41  ;;  %v10813_v43 = vadd.f32 %v10710_v22, %v10390_v63  ;;  %15103 = vmatprep.mubr.msk.f32.mxu1 %vm20385_vm12, %v18969_v61  ;;  %vm20391_vm12 = vmmov %vm20260_vm0 }
0x1d4b   :  { %v15002_v36 = vpop.f32.mrf.mxu1  ;;  %v10943_v57 = vsel %vm10879_vm15, %v10847_v30, %v10911_v19  ;;  %15104 = vmatmul.mubr.msk.f32.gmra.mxu1 %vm20260_vm0, %v18960_v58 }
0x1d4c   :  { %v10405_v39 = vadd.f32 %v15002_v36, %v18819_v54  ;;  %v18978_v54 = vsel %vm20384_vm5, %v11106_v62, %v11107_v18  ;;  %vm10882_vm13 = vcmp.gt.f32.partialorder %v10850_v17, 0.0  ;;  %v10914_v25 = vmul.f32 0.1, %v10850_v17  ;;  %vm20390_vm5 = vmmov %vm20260_vm0 }
0x1d4d   :  { %v10399_v47 = vpop.f32.mrf.mxu1  ;;  %v10849_v32 = vadd.f32 %v18854_v45, %v10813_v43 }
0x1d4e   :  { %v10400_v56 = vadd.f32 %v10399_v47, %v18821_v53  ;;  %v18984_v53 = vadd.f32 %v10943_v57, %v18380_v24  ;;  %v11011_v24 = vrot.slane %v18888_v9, 7  ;;  %v10946_v15 = vsel %vm10882_vm13, %v10850_v17, %v10914_v25 }
0x1d4f   :  { %v15058_v4 = vpop.f32.mrf.mxu0  ;;  %vm10881_vm11 = vcmp.gt.f32.partialorder %v10849_v32, 0.0  ;;  %v10913_v3 = vmul.f32 0.1, %v10849_v32 }
0x1d50   :  { %v10816_v0 = vadd.f32 %v15058_v4, %v10405_v39  ;;  %15106 = vmatprep.mubr.msk.f32.mxu1 %vm20386_vm2, %v18984_v53  ;;  %v19005_v41 = vsel %vm20387_vm9, %v11010_v21, %v11011_v24  ;;  %vm20396_vm9 = vmmov %vm20386_vm2 }
0x1d51   :  { %v10720_v10 = vpop.f32.mrf.mxu0  ;;  %15107 = vmatmul.mubr.msk.f32.gmra.mxu1 %vm20388_vm10, %v18991_v20 }
0x1d52   :  { %v15005_v40 = vpop.f32.mrf.mxu1  ;;  %v10852_v42 = vadd.f32 %v18854_v45, %v10816_v0  ;;  %v10815_v27 = vadd.f32 %v10720_v10, %v10400_v56 }
0x1d53   :  { %v10415_v62 = vadd.f32 %v15005_v40, %v18823_v35  ;;  %v10945_v35 = vsel %vm10881_vm11, %v10849_v32, %v10913_v3 }
0x1d54   :  { %v10409_v13 = vpop.f32.mrf.mxu1  ;;  %vm10884_vm1 = vcmp.gt.f32.partialorder %v10852_v42, 0.0  ;;  %v10916_v12 = vmul.f32 0.1, %v10852_v42  ;;  %v10851_v51 = vadd.f32 %v18854_v45, %v10815_v27  ;;  %v19015_v1 = vadd.f32 %v10945_v35, %v18393_v26  ;;  %v20393_v35 = vld [vmem:[#allocation26_spill] sm:$0xff] }
0x1d55   :  { %v10410_v30 = vadd.f32 %v10409_v13, %v18825_v48  ;;  %v19011_v48 = vadd.f32 %v10946_v15, %v18396_v16 }
0x1d56   :  { %v15061_v44 = vpop.f32.mrf.mxu0  ;;  %vm10883_vm4 = vcmp.gt.f32.partialorder %v10851_v51, 0.0  ;;  %v10915_v36 = vmul.f32 0.1, %v10851_v51  ;;  %v10948_v21 = vsel %vm10884_vm1, %v10852_v42, %v10916_v12  ;;  %15109 = vmatprep.mubr.msk.f32.mxu1 %vm20389_vm3, %v19015_v1 }
0x1d57   :  { %v10818_v29 = vadd.f32 %v15061_v44, %v10415_v62  ;;  %15110 = vmatmul.mubr.msk.f32.gmra.mxu1 %vm20390_vm5, %v19011_v48  ;;  %v19032_v42 = vadd.f32 %v10948_v21, %v18411_v33 }
0x1d58   :  { %v10730_v63 = vpop.f32.mrf.mxu0  ;;  %v10947_v43 = vsel %vm10883_vm4, %v10851_v51, %v10915_v36  ;;  %v20392_v51 = vld [vmem:[#allocation17_spill] sm:$0xff]  ;;  %vm20398_vm4 = vmmov %vm20386_vm2 }
0x1d59   :  { %v10854_v19 = vadd.f32 %v18854_v45, %v10818_v29  ;;  %v10817_v39 = vadd.f32 %v10730_v63, %v10410_v30  ;;  %v19023_v0 = vadd.f32 %v10947_v43, %v18406_v23 }
0x1d5a   :  { %v15008_v60 = vpop.f32.mrf.mxu1 }
0x1d5b   :  { %v10425_v22 = vadd.f32 %v15008_v60, %v18827_v5  ;;  %vm10886_vm15 = vcmp.gt.f32.partialorder %v10854_v19, 0.0  ;;  %v10918_v57 = vmul.f32 0.1, %v10854_v19  ;;  %v10853_v5 = vadd.f32 %v18854_v45, %v10817_v39  ;;  %15112 = vmatprep.mubr.msk.f32.mxu1 %vm20391_vm12, %v19023_v0 }
0x1d5c   :  { %v10419_v49 = vpop.f32.mrf.mxu1  ;;  %15113 = vmatmul.mubr.msk.f32.gmra.mxu1 %vm20386_vm2, %v19032_v42  ;;  %vm20408_vm12 = vcmp.lt.s32.totalorder %v20023_v28, 1 }
0x1d5d   :  { %v15064_v17 = vpop.f32.mrf.mxu0  ;;  %v10420_v47 = vadd.f32 %v10419_v49, %v18829_v52  ;;  %vm10885_vm13 = vcmp.gt.f32.partialorder %v10853_v5, 0.0  ;;  %v10917_v32 = vmul.f32 0.1, %v10853_v5  ;;  %v10950_v23 = vsel %vm10886_vm15, %v10854_v19, %v10918_v57  ;;  %v20395_v49 = vld [vmem:[#allocation5_spill] sm:$0xff]  ;;  %vm20401_vm15 = vmmov %vm20386_vm2 }
0x1d5e   :  { %v10820_v4 = vadd.f32 %v15064_v17, %v10425_v22  ;;  %v19041_v30 = vadd.f32 %v10950_v23, %v20393_v35  ;;  %v20394_v22 = vld [vmem:[#allocation27_spill] sm:$0xff] }
0x1d5f   :  { %v10740_v56 = vpop.f32.mrf.mxu0  ;;  %v10949_v3 = vsel %vm10885_vm13, %v10853_v5, %v10917_v32  ;;  %v20397_v5 = vld [vmem:[#allocation25_spill] sm:$0xff]  ;;  %v11109_v32 = vrot.slane %v18907_v14, 1  ;;  %vm20404_vm13 = vmmov %vm20386_vm2 }
0x1d60   :  { %v10856_v26 = vadd.f32 %v18854_v45, %v10820_v4  ;;  %v10819_v25 = vadd.f32 %v10740_v56, %v10420_v47 }
0x1d61   :  { %v15011_v16 = vpop.f32.mrf.mxu1 }
0x1d62   :  { %v10435_v52 = vadd.f32 %v15011_v16, %v18831_v46  ;;  %v10920_v62 = vmul.f32 0.1, %v10856_v26  ;;  %v10855_v27 = vadd.f32 %v18854_v45, %v10819_v25  ;;  %vm10888_vm0 = vcmp.gt.f32.partialorder %v10856_v26, 0.0 }
0x1d63   :  { %v10429_v40 = vpop.f32.mrf.mxu1 }
0x1d64   :  { %v10430_v46 = vadd.f32 %v10429_v40, %v18833_v7  ;;  %vm10887_vm11 = vcmp.gt.f32.partialorder %v10855_v27, 0.0  ;;  %v10919_v12 = vmul.f32 0.1, %v10855_v27  ;;  %v19045_v7 = vadd.f32 %v10949_v3, %v20394_v22  ;;  %v20400_v40 = vld [vmem:[#allocation23_spill] sm:$0xff] }
0x1d65   :  { %v15067_v10 = vpop.f32.mrf.mxu0  ;;  %v10952_v19 = vsel %vm10888_vm0, %v10856_v26, %v10920_v62  ;;  %v20399_v26 = vld [vmem:[#allocation18_spill] sm:$0xff] }
0x1d66   :  { %v10822_v13 = vadd.f32 %v15067_v10, %v10435_v52  ;;  %v10951_v39 = vsel %vm10887_vm11, %v10855_v27, %v10919_v12  ;;  %15115 = vmatprep.mubr.msk.f32.mxu1 %vm20396_vm9, %v19045_v7  ;;  %v19060_v10 = vadd.f32 %v10952_v19, %v20400_v40  ;;  %v20402_v12 = vld [vmem:[#allocation19_spill] sm:$0xff]  ;;  %v20405_v19 = vld [vmem:[#allocation20_spill] sm:$0xff]  ;;  %vm20409_vm11 = vmmov %vm20386_vm2 }
0x1d67   :  { %v10750_v15 = vpop.f32.mrf.mxu0  ;;  %v19052_v16 = vadd.f32 %v10951_v39, %v20397_v5  ;;  %15116 = vmatmul.mubr.msk.f32.gmra.mxu1 %vm20398_vm4, %v19041_v30  ;;  %vm20413_vm9 = vmmov %vm20386_vm2 }
0x1d68   :  { %v15014_v44 = vpop.f32.mrf.mxu1  ;;  %v10858_v29 = vadd.f32 %v18854_v45, %v10822_v13  ;;  %v10821_v60 = vadd.f32 %v10750_v15, %v10430_v46 }
0x1d69   :  { %v10445_v33 = vadd.f32 %v15014_v44, %v20392_v51  ;;  %15118 = vmatprep.mubr.msk.f32.mxu1 %vm20401_vm15, %v19052_v16  ;;  %v11014_v44 = vrot.slane %v18923_v50, 7 }
0x1d6a   :  { %v10439_v63 = vpop.f32.mrf.mxu1  ;;  %vm10890_vm1 = vcmp.gt.f32.partialorder %v10858_v29, 0.0  ;;  %v10922_v43 = vmul.f32 0.1, %v10858_v29  ;;  %v10857_v47 = vadd.f32 %v18854_v45, %v10821_v60 }
0x1d6b   :  { %v10440_v17 = vadd.f32 %v10439_v63, %v20395_v49  ;;  %v20403_v63 = vld [vmem:[#allocation11_spill] sm:$0xff]  ;;  %15119 = vmatmul.mubr.msk.f32.gmra.mxu1 %vm20404_vm13, %v19060_v10  ;;  %vm20420_vm13 = vmmov %vm20386_vm2 }
0x1d6c   :  { %v15070_v36 = vpop.f32.mrf.mxu0  ;;  %v10954_v23 = vsel %vm10890_vm1, %v10858_v29, %v10922_v43  ;;  %vm10889_vm10 = vcmp.gt.f32.partialorder %v10857_v47, 0.0  ;;  %v10921_v62 = vmul.f32 0.1, %v10857_v47  ;;  %v11013_v29 = vrot.slane %v18907_v14, 7 }
0x1d6d   :  { %v10824_v21 = vadd.f32 %v15070_v36, %v10445_v33  ;;  %v19069_v36 = vadd.f32 %v10954_v23, %v20403_v63 }
0x1d6e   :  { %v10760_v57 = vpop.f32.mrf.mxu0  ;;  %v10953_v15 = vsel %vm10889_vm10, %v10857_v47, %v10921_v62  ;;  %v19085_v40 = vsel %vm20408_vm12, %v11013_v29, %v11014_v44  ;;  %vm20415_vm10 = vcmp.lt.s32.totalorder %v20023_v28, 7 }
0x1d6f   :  { %v10860_v56 = vadd.f32 %v18854_v45, %v10824_v21  ;;  %v10823_v25 = vadd.f32 %v10760_v57, %v10440_v17 }
0x1d70   :  { %v15017_v4 = vpop.f32.mrf.mxu1 }
0x1d71   :  { %v10455_v52 = vadd.f32 %v15017_v4, %v20399_v26  ;;  %vm10892_vm3 = vcmp.gt.f32.partialorder %v10860_v56, 0.0  ;;  %v10924_v46 = vmul.f32 0.1, %v10860_v56  ;;  %v10859_v13 = vadd.f32 %v18854_v45, %v10823_v25  ;;  %v20406_v4 = vld [vmem:[#allocation24_spill] sm:$0xff]  ;;  %v20407_v26 = vld [vmem:[#allocation21_spill] sm:$0xff] }
0x1d72   :  { %v10449_v27 = vpop.f32.mrf.mxu1  ;;  %v19076_v57 = vadd.f32 %v10953_v15, %v20406_v4  ;;  %v20411_v15 = vld [vmem:[#allocation6_spill] sm:$0xff] }
0x1d73   :  { %v15073_v3 = vpop.f32.mrf.mxu0  ;;  %v10450_v51 = vadd.f32 %v10449_v27, %v20402_v12  ;;  %vm10891_vm5 = vcmp.gt.f32.partialorder %v10859_v13, 0.0  ;;  %v10923_v22 = vmul.f32 0.1, %v10859_v13  ;;  %v10956_v49 = vsel %vm10892_vm3, %v10860_v56, %v10924_v46  ;;  %vm20416_vm3 = vmmov %vm20386_vm2 }
0x1d74   :  { %v10826_v33 = vadd.f32 %v15073_v3, %v10455_v52  ;;  %15121 = vmatprep.mubr.msk.f32.mxu1 %vm20409_vm11, %v19076_v57  ;;  %v20410_v3 = vld [vmem:[#allocation7_spill] sm:$0xff]  ;;  %vm20424_vm11 = vcmp.lt.s32.totalorder %v20023_v28, 1  ;;  %v11030_v9 = vrot.slane %v19076_v57, 7 }
0x1d75   :  { %v10770_v60 = vpop.f32.mrf.mxu0  ;;  %v10955_v5 = vsel %vm10891_vm5, %v10859_v13, %v10923_v22  ;;  %15122 = vmatmul.mubr.msk.f32.gmra.mxu1 %vm20386_vm2, %v19069_v36  ;;  %vm20418_vm5 = vmmov %vm20415_vm10 }
0x1d76   :  { %v10862_v17 = vadd.f32 %v18854_v45, %v10826_v33  ;;  %v10825_v21 = vadd.f32 %v10770_v60, %v10450_v51  ;;  %v19091_v46 = vadd.f32 %v10955_v5, %v20410_v3  ;;  %v11110_v33 = vrot.slane %v18923_v50, 1  ;;  %v20414_v5 = vld [vmem:[#allocation22_spill] sm:$0xff] }
0x1d77   :  { %v15020_v35 = vpop.f32.mrf.mxu1  ;;  %v11114_v50 = vrot.slane %v18969_v61, 1 }
0x1d78   :  { %v10465_v39 = vadd.f32 %v15020_v35, %v20405_v19  ;;  %vm10894_vm0 = vcmp.gt.f32.partialorder %v10862_v17, 0.0  ;;  %v10926_v56 = vmul.f32 0.1, %v10862_v17  ;;  %v10861_v23 = vadd.f32 %v18854_v45, %v10825_v21  ;;  %v20412_v35 = vld [vmem:[#allocation8_spill] sm:$0xff]  ;;  %15124 = vmatprep.mubr.msk.f32.mxu1 %vm20413_vm9, %v19091_v46 }
0x1d79   :  { %v10459_v43 = vpop.f32.mrf.mxu1  ;;  %v19099_v60 = vadd.f32 %v10956_v49, %v20412_v35 }
0x1d7a   :  { %v10460_v52 = vadd.f32 %v10459_v43, %v20407_v26  ;;  %v10958_v63 = vsel %vm10894_vm0, %v10862_v17, %v10926_v56  ;;  %vm10893_vm1 = vcmp.gt.f32.partialorder %v10861_v23, 0.0  ;;  %v10925_v22 = vmul.f32 0.1, %v10861_v23  ;;  %v20417_v56 = vld [vmem:[#allocation12_spill] sm:$0xff]  ;;  %vm20423_vm0 = vmmov %vm20386_vm2 }
0x1d7b   :  { %v15076_v47 = vpop.f32.mrf.mxu0  ;;  %v19110_v17 = vsel %vm20415_vm10, %v11109_v32, %v11110_v33  ;;  %15125 = vmatmul.mubr.msk.f32.gmra.mxu1 %vm20416_vm3, %v19099_v60  ;;  %vm20427_vm9 = vmmov %vm20423_vm0 }
0x1d7c   :  { %v10828_v25 = vadd.f32 %v15076_v47, %v10465_v39  ;;  %v11111_v47 = vrot.slane %v18915_v6, 1  ;;  %v10957_v4 = vsel %vm10893_vm1, %v10861_v23, %v10925_v22  ;;  %v11015_v22 = vrot.slane %v18915_v6, 7  ;;  %vm20425_vm1 = vmmov %vm20423_vm0 }
0x1d7d   :  { %v10780_v27 = vpop.f32.mrf.mxu0  ;;  %vm20430_vm10 = vmmov %vm20418_vm5  ;;  %v11020_v6 = vrot.slane %v18984_v53, 7 }
0x1d7e   :  { %v10864_v13 = vadd.f32 %v18854_v45, %v10828_v25  ;;  %v10827_v51 = vadd.f32 %v10780_v27, %v10460_v52 }
0x1d7f   :  { %v15023_v62 = vpop.f32.mrf.mxu1 }
0x1d80   :  { %v10475_v12 = vadd.f32 %v15023_v62, %v20411_v15  ;;  %v15079_v39 = vpop.f32.mrf.mxu0  ;;  %vm10896_vm4 = vcmp.gt.f32.partialorder %v10864_v13, 0.0  ;;  %v10928_v21 = vmul.f32 0.1, %v10864_v13  ;;  %v10863_v43 = vadd.f32 %v18854_v45, %v10827_v51 }
0x1d81   :  { %v10469_v19 = vpop.f32.mrf.mxu1  ;;  %v19115_v62 = vadd.f32 %v10957_v4, %v20417_v56  ;;  %v19122_v15 = vsel %vm20418_vm5, %v11110_v33, %v11111_v47  ;;  %v20422_v4 = vld [vmem:[#allocation14_spill] sm:$0xff]  ;;  %v11008_v33 = vrot.slane %v18863_v55, 7  ;;  %v11018_v56 = vrot.slane %v18969_v61, 7 }
0x1d82   :  { %v10470_v26 = vadd.f32 %v10469_v19, %v20414_v5  ;;  %v10830_v52 = vadd.f32 %v15079_v39, %v10475_v12  ;;  %v10790_v49 = vpop.f32.mrf.mxu0  ;;  %vm10895_vm15 = vcmp.gt.f32.partialorder %v10863_v43, 0.0  ;;  %v10927_v25 = vmul.f32 0.1, %v10863_v43  ;;  %v20419_v12 = vld [vmem:[#allocation13_spill] sm:$0xff] }
0x1d83   :  { %v10960_v27 = vsel %vm10896_vm4, %v10864_v13, %v10928_v21  ;;  %v19125_v51 = vadd.f32 %v10958_v63, %v20419_v12  ;;  %15127 = vmatprep.mubr.msk.f32.mxu1 %vm20420_vm13, %v19115_v62  ;;  %v20421_v39 = vld [vmem:[#allocation9_spill] sm:$0xff]  ;;  %v19146_v63 = vsel %vm20424_vm11, %v11014_v44, %v11015_v22  ;;  %v19762_v44 = vrot.slane %v18863_v55, 1  ;;  %v20428_v12 = vld [vmem:[#allocation16_spill] sm:$0xff]  ;;  %vm20429_vm4 = vmmov %vm20424_vm11 }
0x1d84   :  { %v10866_v23 = vadd.f32 %v18854_v45, %v10830_v52  ;;  %v10829_v3 = vadd.f32 %v10790_v49, %v10470_v26  ;;  %v10959_v35 = vsel %vm10895_vm15, %v10863_v43, %v10927_v25  ;;  %v19135_v5 = vadd.f32 %v10960_v27, %v20422_v4  ;;  %v20426_v52 = vld [vmem:[#allocation15_spill] sm:$0xff]  ;;  %vm20431_vm15 = vmmov %vm20418_vm5 }
0x1d85   :  { %v19132_v21 = vadd.f32 %v10959_v35, %v20421_v39  ;;  %15128 = vmatmul.mubr.msk.f32.gmra.mxu1 %vm20423_vm0, %v19125_v51  ;;  %v11113_v26 = vrot.slane %v18956_v31, 1  ;;  %v11017_v25 = vrot.slane %v18956_v31, 7  ;;  %vm20432_vm3 = vmmov %vm20429_vm4 }
0x1d86   :  { %vm10898_vm12 = vcmp.gt.f32.partialorder %v10866_v23, 0.0  ;;  %v10930_v13 = vmul.f32 0.1, %v10866_v23  ;;  %v10865_v19 = vadd.f32 %v18854_v45, %v10829_v3  ;;  %v11019_v3 = vrot.slane %v18960_v58, 7  ;;  %vm20433_vm5 = vmmov %vm20423_vm0 }
0x1d87   :  { %15130 = vmatprep.mubr.msk.f32.mxu1 %vm20425_vm1, %v19132_v21  ;;  %v19170_v61 = vsel %vm20429_vm4, %v11017_v25, %v11018_v56  ;;  %vm20434_vm13 = vmmov %vm20432_vm3 }
0x1d88   :  { %v10962_v45 = vsel %vm10898_vm12, %v10866_v23, %v10930_v13  ;;  %vm10897_vm2 = vcmp.gt.f32.partialorder %v10865_v19, 0.0  ;;  %v10929_v43 = vmul.f32 0.1, %v10865_v19  ;;  %v19761_v23 = vrot.slane %v18960_v58, 1  ;;  %vm20436_vm12 = vmmov %vm20430_vm10 }
0x1d89   :  { %v19152_v49 = vadd.f32 %v10962_v45, %v20426_v52  ;;  %15131 = vmatmul.mubr.msk.f32.gmra.mxu1 %vm20427_vm9, %v19135_v5  ;;  %v19188_v4 = vsel %vm20432_vm3, %v11018_v56, %v11019_v3  ;;  %v11022_v52 = vrot.slane %v19015_v1, 7  ;;  %v11166_v56 = vsel %vm20436_vm12, %v19762_v44, %v11105_v2  ;;  %vm20437_vm11 = vmmov %vm20423_vm0 }
0x1d8a   :  { %v10961_v27 = vsel %vm10897_vm2, %v10865_v19, %v10929_v43  ;;  %v19176_v19 = vsel %vm20430_vm10, %v11113_v26, %v11114_v50  ;;  %v19182_v39 = vsel %vm20431_vm15, %v11114_v50, %v19761_v23  ;;  %v11021_v43 = vrot.slane %v18991_v20, 7  ;;  %vm20439_vm2 = vmmov %vm20432_vm3 }
0x1d8b   :  { %v19163_v35 = vadd.f32 %v10961_v27, %v20428_v12  ;;  %v19763_v13 = vrot.slane %v19152_v49, 7  ;;  %v11117_v12 = vrot.slane %v18991_v20, 1  ;;  %v11118_v23 = vrot.slane %v19015_v1, 1  ;;  %vm20440_vm1 = vmmov %vm20423_vm0 }
0x1d8c   :  { %v11012_v50 = vrot.slane %v18903_v37, 7  ;;  %v19220_v2 = vsel %vm20439_vm2, %v11021_v43, %v11022_v52  ;;  %v11119_v1 = vrot.slane %v19011_v48, 1  ;;  %vm20441_vm9 = vmmov %vm20423_vm0  ;;  %v19765_v44 = vrot.slane %v19032_v42, 1 }
0x1d8d   :  { %15133 = vmatprep.mubr.msk.f32.mxu1 %vm20433_vm5, %v19163_v35  ;;  %v11071_v45 = vsel %vm20434_vm13, %v19763_v13, %v11008_v33  ;;  %vm20442_vm4 = vmmov %vm20430_vm10  ;;  %v11029_v13 = vrot.slane %v19060_v10, 7 }
0x1d8e   :  { %v11072_v27 = vsel %vm17908_vm14, %v11071_v45, 0.0  ;;  %15134 = vmatmul.mubr.msk.f32.gmra.mxu1 %vm20423_vm0, %v19152_v49  ;;  %vm20438_vm14 = vmmov %vm20432_vm3  ;;  %v19229_v38 = vsel %vm20442_vm4, %v11117_v12, %v11118_v23 }
0x1d8f   :  { %15144 = vmatprep.mubr.msk.f32.mxu0 %vm20437_vm11, %v11072_v27  ;;  %v11070_v45 = vsel %vm20438_vm14, %v11008_v33, %v11009_v59  ;;  %15200 = vmatprep.mubr.msk.f32.mxu1 %vm20440_vm1, %v11166_v56  ;;  %v11023_v59 = vrot.slane %v19011_v48, 7  ;;  %vm20443_vm10 = vmmov %vm20423_vm0  ;;  %v11108_v33 = vrot.slane %v18903_v37, 1  ;;  %v11026_v56 = vrot.slane %v19045_v7, 7 }
0x1d90   :  { %15145 = vmatmul.mubr.msk.f32.vlgmr.msra.gmra.mxu0 %vm20441_vm9, %v11070_v45  ;;  %vm20444_vm15 = vmmov %vm20442_vm4  ;;  %v11122_v37 = vrot.slane %v19045_v7, 1  ;;  %v11027_v7 = vrot.slane %v19041_v30, 7  ;;  %v20497_v48 = vrot.slane %v19032_v42, 1 }
0x1d91   :  { %15147 = vmatprep.mubr.msk.f32.mxu0 %vm20443_vm10, %v18943_v11  ;;  %v19239_v27 = vsel %vm20444_vm15, %v11118_v23, %v11119_v1  ;;  %vm20445_vm3 = vmmov %vm20439_vm2  ;;  %v19764_v11 = vrot.slane %v19032_v42, 7 }
0x1d92   :  { %v19246_v45 = vsel %vm20445_vm3, %v11022_v52, %v11023_v59  ;;  %vm20446_vm5 = vmmov %vm20423_vm0 }
0x1d93   :  { %15201 = vmatmul.mubr.msk.f32.vlgmr.msra.gmra.mxu1 %vm20446_vm5, %v18953_v34  ;;  %vm20447_vm13 = vmmov %vm20439_vm2 }
0x1d94   :  { %v11067_v23 = vsel %vm20447_vm13, %v11011_v24, %v11012_v50  ;;  %vm20448_vm12 = vmmov %vm20423_vm0  ;;  %15148 = vmatmul.mubr.msk.f32.gmra.mxu0 %vm20423_vm0, %v19005_v41  ;;  %v19766_v24 = vrot.slane %v19041_v30, 1  ;;  %v11125_v41 = vrot.slane %v19060_v10, 1 }
0x1d95   :  { %15203 = vmatprep.mubr.msk.f32.mxu1 %vm20448_vm12, %v18978_v54  ;;  %vm20449_vm11 = vmmov %vm20439_vm2 }
0x1d96   :  { %v19265_v52 = vsel %vm20449_vm11, %v19764_v11, %v11026_v56  ;;  %vm20450_vm14 = vmmov %vm20442_vm4 }
0x1d97   :  { %v19271_v34 = vsel %vm20450_vm14, %v19765_v44, %v11122_v37  ;;  %vm20451_vm2 = vmmov %vm20423_vm0 }
0x1d98   :  { %15150 = vmatprep.mubr.msk.f32.mxu0 %vm20451_vm2, %v11067_v23  ;;  %vm20452_vm1 = vmmov %vm20442_vm4 }
0x1d99   :  { %v11163_v54 = vsel %vm20452_vm1, %v11107_v18, %v11108_v33  ;;  %vm20453_vm9 = vmmov %vm20452_vm1  ;;  %v11126_v18 = vrot.slane %v19076_v57, 1 }
0x1d9a   :  { %v19286_v11 = vsel %vm20453_vm9, %v11122_v37, %v19766_v24  ;;  %vm20454_vm4 = vmmov %vm20445_vm3  ;;  %v11066_v37 = vsel %vm20445_vm3, %v11012_v50, %v11013_v29  ;;  %v11016_v24 = vrot.slane %v18931_v8, 7  ;;  %v11031_v29 = vrot.slane %v19069_v36, 7 }
0x1d9b   :  { %v19292_v23 = vsel %vm20454_vm4, %v11026_v56, %v11027_v7  ;;  %vm20455_vm10 = vmmov %vm20423_vm0  ;;  %v11128_v56 = vrot.slane %v19091_v46, 1 }
0x1d9c   :  { %15204 = vmatmul.mubr.msk.f32.gmra.mxu1 %vm20455_vm10, %v11163_v54  ;;  %vm20456_vm15 = vmmov %vm20452_vm1 }
0x1d9d   :  { %v11162_v44 = vsel %vm20456_vm15, %v11108_v33, %v11109_v32  ;;  %vm20457_vm5 = vmmov %vm20423_vm0  ;;  %v11127_v32 = vrot.slane %v19069_v36, 1 }
0x1d9e   :  { %15206 = vmatprep.mubr.msk.f32.mxu1 %vm20457_vm5, %v11162_v44  ;;  %vm20458_vm13 = vmmov %vm20423_vm0  ;;  %v11112_v44 = vrot.slane %v18931_v8, 1 }
0x1d9f   :  { %15151 = vmatmul.mubr.msk.f32.gmra.mxu0 %vm20458_vm13, %v11066_v37  ;;  %vm20459_vm12 = vmmov %vm20445_vm3  ;;  %v11037_v37 = vrot.slane %v19135_v5, 7 }
0x1da0   :  { %v19312_v57 = vsel %vm20459_vm12, %v11029_v13, %v11030_v9  ;;  %vm20460_vm0 = vmmov %vm20452_vm1 }
0x1da1   :  { %v19318_v14 = vsel %vm20460_vm0, %v11125_v41, %v11126_v18  ;;  %vm20461_vm11 = vmmov %vm20451_vm2 }
0x1da2   :  { %15153 = vmatprep.mubr.msk.f32.mxu0 %vm20461_vm11, %v19085_v40  ;;  %vm20462_vm14 = vmmov %vm20460_vm0 }
0x1da3   :  { %v11144_v50 = vsel %vm20462_vm14, %v11126_v18, %v11127_v32  ;;  %vm20463_vm2 = vmmov %vm20445_vm3  ;;  %v11038_v18 = vrot.slane %v19163_v35, 7 }
0x1da4   :  { %v11048_v33 = vsel %vm20463_vm2, %v11030_v9, %v11031_v29  ;;  %vm20464_vm1 = vmmov %vm20457_vm5 }
0x1da5   :  { %15207 = vmatmul.mubr.msk.f32.gmra.mxu1 %vm20464_vm1, %v19110_v17  ;;  %vm20465_vm9 = vmmov %vm20464_vm1 }
0x1da6   :  { %15209 = vmatprep.mubr.msk.f32.mxu1 %vm20465_vm9, %v19122_v15  ;;  %vm20466_vm4 = vmmov %vm20464_vm1 }
0x1da7   :  { %15154 = vmatmul.mubr.msk.f32.gmra.mxu0 %vm20466_vm4, %v19146_v63  ;;  %vm20467_vm10 = vmmov %vm20463_vm2 }
0x1da8   :  { %v11063_v8 = vsel %vm20467_vm10, %v11015_v22, %v11016_v24  ;;  %vm20468_vm15 = vmmov %vm20464_vm1  ;;  %v11024_v22 = vrot.slane %v19023_v0, 7 }
0x1da9   :  { %15156 = vmatprep.mubr.msk.f32.mxu0 %vm20468_vm15, %v11063_v8  ;;  %vm20469_vm3 = vmmov %vm20460_vm0 }
0x1daa   :  { %v11159_v40 = vsel %vm20469_vm3, %v11111_v47, %v11112_v44  ;;  %vm20470_vm5 = vmmov %vm20464_vm1  ;;  %v11116_v47 = vrot.slane %v18984_v53, 1  ;;  %v20481_v53 = vrot.slane %v18960_v58, 1 }
0x1dab   :  { %15210 = vmatmul.mubr.msk.f32.gmra.mxu1 %vm20470_vm5, %v11159_v40  ;;  %vm20471_vm13 = vmmov %vm20460_vm0  ;;  %v20548_v40 = vrot.slane %v18863_v55, 1 }
0x1dac   :  { %v11158_v17 = vsel %vm20471_vm13, %v11112_v44, %v11113_v26  ;;  %vm20472_vm12 = vmmov %vm20463_vm2  ;;  %v11135_v44 = vrot.slane %v19152_v49, 1 }
0x1dad   :  { %v11062_v15 = vsel %vm20472_vm12, %v11016_v24, %v11017_v25  ;;  %vm20473_vm0 = vmmov %vm20464_vm1 }
0x1dae   :  { %15212 = vmatprep.mubr.msk.f32.mxu1 %vm20473_vm0, %v11158_v17  ;;  %vm20474_vm11 = vmmov %vm20473_vm0 }
0x1daf   :  { %15157 = vmatmul.mubr.msk.f32.gmra.mxu0 %vm20474_vm11, %v11062_v15  ;;  %vm20475_vm14 = vmmov %vm20473_vm0 }
0x1db0   :  { %15159 = vmatprep.mubr.msk.f32.mxu0 %vm20475_vm14, %v19170_v61  ;;  %vm20476_vm2 = vmmov %vm20473_vm0 }
0x1db1   :  { %15213 = vmatmul.mubr.msk.f32.gmra.mxu1 %vm20476_vm2, %v19176_v19  ;;  %vm20477_vm1 = vmmov %vm20473_vm0 }
0x1db2   :  { %15215 = vmatprep.mubr.msk.f32.mxu1 %vm20477_vm1, %v19182_v39  ;;  %vm20478_vm9 = vmmov %vm20473_vm0 }
0x1db3   :  { %15160 = vmatmul.mubr.msk.f32.gmra.mxu0 %vm20478_vm9, %v19188_v4  ;;  %vm20479_vm4 = vmmov %vm20467_vm10 }
0x1db4   :  { %v11059_v31 = vsel %vm20479_vm4, %v11019_v3, %v11020_v6  ;;  %vm20480_vm10 = vmmov %vm20473_vm0  ;;  %v11120_v3 = vrot.slane %v19023_v0, 1 }
0x1db5   :  { %15162 = vmatprep.mubr.msk.f32.mxu0 %vm20480_vm10, %v11059_v31  ;;  %vm20482_vm15 = vmmov %vm20469_vm3 }
0x1db6   :  { %v11155_v63 = vsel %vm20482_vm15, %v20481_v53, %v11116_v47  ;;  %vm20483_vm3 = vmmov %vm20473_vm0 }
0x1db7   :  { %15216 = vmatmul.mubr.msk.f32.gmra.mxu1 %vm20483_vm3, %v11155_v63  ;;  %vm20484_vm5 = vmmov %vm20471_vm13 }
0x1db8   :  { %v11154_v26 = vsel %vm20484_vm5, %v11116_v47, %v11117_v12  ;;  %vm20485_vm13 = vmmov %vm20479_vm4 }
0x1db9   :  { %v11058_v25 = vsel %vm20485_vm13, %v11020_v6, %v11021_v43  ;;  %vm20486_vm12 = vmmov %vm20473_vm0  ;;  %v20499_v43 = vrot.slane %v19032_v42, 7 }
0x1dba   :  { %15218 = vmatprep.mubr.msk.f32.mxu1 %vm20486_vm12, %v11154_v26  ;;  %15163 = vmatmul.mubr.msk.f32.gmra.mxu0 %vm20473_vm0, %v11058_v25  ;;  %vm20487_vm11 = vmmov %vm20473_vm0 }
0x1dbb   :  { %15165 = vmatprep.mubr.msk.f32.mxu0 %vm20487_vm11, %v19220_v2  ;;  %vm20488_vm14 = vmmov %vm20479_vm4  ;;  %v11028_v2 = vrot.slane %v19052_v16, 7 }
0x1dbc   :  { %v11055_v58 = vsel %vm20488_vm14, %v11023_v59, %v11024_v22  ;;  %vm20489_vm2 = vmmov %vm20473_vm0 }
0x1dbd   :  { %15219 = vmatmul.mubr.msk.f32.gmra.mxu1 %vm20489_vm2, %v19229_v38  ;;  %vm20490_vm1 = vmmov %vm20484_vm5  ;;  %v11088_v61 = vsel %vm18047_vm8, %v11055_v58, 0.0  ;;  %v20508_v38 = vrot.slane %v19041_v30, 1  ;;  %v11032_v30 = vrot.slane %v19091_v46, 7  ;;  %v11033_v46 = vrot.slane %v19099_v60, 7 }
0x1dbe   :  { %v11151_v20 = vsel %vm20490_vm1, %v11119_v1, %v11120_v3  ;;  %vm20491_vm9 = vmmov %vm20473_vm0  ;;  %v11124_v1 = vrot.slane %v19052_v16, 1 }
0x1dbf   :  { %15221 = vmatprep.mubr.msk.f32.mxu1 %vm20491_vm9, %v19239_v27  ;;  %vm20492_vm4 = vmmov %vm20473_vm0  ;;  %v11183_v39 = vsel %vm18056_vm7, %v11151_v20, 0.0 }
0x1dc0   :  { %15166 = vmatmul.mubr.msk.f32.gmra.mxu0 %vm20492_vm4, %v19246_v45  ;;  %vm20494_vm10 = vmmov %vm20473_vm0  ;;  %v11147_v16 = vsel %vm20490_vm1, %v20508_v38, %v11124_v1  ;;  %v11129_v45 = vrot.slane %v19099_v60, 1  ;;  %v11036_v60 = vrot.slane %v19132_v21, 7 }
0x1dc1   :  { %15168 = vmatprep.mubr.msk.f32.mxu0 %vm20494_vm10, %v11088_v61  ;;  %vm20496_vm15 = vmmov %vm20473_vm0 }
0x1dc2   :  { %15222 = vmatmul.mubr.msk.f32.gmra.mxu1 %vm20496_vm15, %v11183_v39  ;;  %vm20498_vm3 = vmmov %vm20490_vm1 }
0x1dc3   :  { %v11150_v4 = vsel %vm20498_vm3, %v11120_v3, %v20497_v48  ;;  %vm20500_vm5 = vmmov %vm20485_vm13 }
0x1dc4   :  { %v11054_v12 = vsel %vm20500_vm5, %v11024_v22, %v20499_v43  ;;  %vm20501_vm13 = vmmov %vm20473_vm0 }
0x1dc5   :  { %15224 = vmatprep.mubr.msk.f32.mxu1 %vm20501_vm13, %v11150_v4  ;;  %vm20502_vm8 = vmmov %vm20473_vm0 }
0x1dc6   :  { %15169 = vmatmul.mubr.msk.f32.gmra.mxu0 %vm20502_vm8, %v11054_v12  ;;  %vm20503_vm7 = vmmov %vm20473_vm0 }
0x1dc7   :  { %15171 = vmatprep.mubr.msk.f32.mxu0 %vm20503_vm7, %v19265_v52  ;;  %vm20504_vm12 = vmmov %vm20473_vm0  ;;  %v11130_v52 = vrot.slane %v19115_v62, 1 }
0x1dc8   :  { %15225 = vmatmul.mubr.msk.f32.gmra.mxu1 %vm20504_vm12, %v19271_v34  ;;  %vm20505_vm11 = vmmov %vm20473_vm0 }
0x1dc9   :  { %15227 = vmatprep.mubr.msk.f32.mxu1 %vm20473_vm0, %v19286_v11  ;;  %vm20506_vm14 = vmmov %vm20500_vm5 }
0x1dca   :  { %15172 = vmatmul.mubr.msk.f32.gmra.mxu0 %vm20505_vm11, %v19292_v23  ;;  %v11051_v42 = vsel %vm20506_vm14, %v11027_v7, %v11028_v2  ;;  %vm20507_vm2 = vmmov %vm20473_vm0  ;;  %v11035_v7 = vrot.slane %v19125_v51, 7 }
0x1dcb   :  { %15174 = vmatprep.mubr.msk.f32.mxu0 %vm20507_vm2, %v11051_v42  ;;  %vm20509_vm9 = vmmov %vm20473_vm0 }
0x1dcc   :  { %15228 = vmatmul.mubr.msk.f32.gmra.mxu1 %vm20509_vm9, %v11147_v16  ;;  %vm20510_vm4 = vmmov %vm20490_vm1 }
0x1dcd   :  { %v11146_v59 = vsel %vm20510_vm4, %v11124_v1, %v11125_v41  ;;  %vm20511_vm10 = vmmov %vm20500_vm5  ;;  %v11132_v41 = vrot.slane %v19132_v21, 1  ;;  %v11133_v21 = vrot.slane %v19135_v5, 1 }
0x1dce   :  { %v11050_v27 = vsel %vm20511_vm10, %v11028_v2, %v11029_v13  ;;  %vm20512_vm15 = vmmov %vm20473_vm0  ;;  %v11034_v13 = vrot.slane %v19115_v62, 7  ;;  %v11131_v62 = vrot.slane %v19125_v51, 1 }
0x1dcf   :  { %15230 = vmatprep.mubr.msk.f32.mxu1 %vm20512_vm15, %v11146_v59  ;;  %vm20513_vm3 = vmmov %vm20473_vm0 }
0x1dd0   :  { %15175 = vmatmul.mubr.msk.f32.gmra.mxu0 %vm20513_vm3, %v11050_v27  ;;  %vm20514_vm5 = vmmov %vm20473_vm0 }
0x1dd1   :  { %15177 = vmatprep.mubr.msk.f32.mxu0 %vm20514_vm5, %v19312_v57  ;;  %vm20515_vm13 = vmmov %vm20473_vm0 }
0x1dd2   :  { %15231 = vmatmul.mubr.msk.f32.gmra.mxu1 %vm20515_vm13, %v19318_v14  ;;  %vm20516_vm8 = vmmov %vm20473_vm0  ;;  %v11134_v14 = vrot.slane %v19163_v35, 1 }
0x1dd3   :  { %15233 = vmatprep.mubr.msk.f32.mxu1 %vm20516_vm8, %v11144_v50  ;;  %vm20517_vm7 = vmmov %vm20473_vm0 }
0x1dd4   :  { %15178 = vmatmul.mubr.msk.f32.gmra.mxu0 %vm20517_vm7, %v11048_v33  ;;  %vm20518_vm12 = vmmov %vm20511_vm10  ;;  %v20546_v33 = vrot.slane %v19152_v49, 7 }
0x1dd5   :  { %v11047_v10 = vsel %vm20518_vm12, %v11031_v29, %v11032_v30  ;;  %vm20519_vm11 = vmmov %vm20490_vm1 }
0x1dd6   :  { %15180 = vmatprep.mubr.msk.f32.mxu0 %vm20473_vm0, %v11047_v10  ;;  %v11143_v11 = vsel %vm20519_vm11, %v11127_v32, %v11128_v56  ;;  %vm20520_vm14 = vmmov %vm20473_vm0 }
0x1dd7   :  { %15234 = vmatmul.mubr.msk.f32.gmra.mxu1 %vm20520_vm14, %v11143_v11  ;;  %vm20521_vm2 = vmmov %vm20490_vm1 }
0x1dd8   :  { %v11142_v34 = vsel %vm20521_vm2, %v11128_v56, %v11129_v45  ;;  %vm20522_vm1 = vmmov %vm20511_vm10 }
0x1dd9   :  { %v11046_v24 = vsel %vm20522_vm1, %v11032_v30, %v11033_v46  ;;  %vm20523_vm9 = vmmov %vm20473_vm0 }
0x1dda   :  { %15236 = vmatprep.mubr.msk.f32.mxu1 %vm20523_vm9, %v11142_v34  ;;  %vm20524_vm4 = vmmov %vm20473_vm0 }
0x1ddb   :  { %15181 = vmatmul.mubr.msk.f32.gmra.mxu0 %vm20524_vm4, %v11046_v24  ;;  %vm20525_vm10 = vmmov %vm20522_vm1 }
0x1ddc   :  { %v11045_v36 = vsel %vm20525_vm10, %v11033_v46, %v11034_v13  ;;  %vm20526_vm15 = vmmov %vm20473_vm0 }
0x1ddd   :  { %15183 = vmatprep.mubr.msk.f32.mxu0 %vm20526_vm15, %v11045_v36  ;;  %vm20527_vm3 = vmmov %vm20521_vm2 }
0x1dde   :  { %v11141_v54 = vsel %vm20527_vm3, %v11129_v45, %v11130_v52  ;;  %vm20528_vm5 = vmmov %vm20473_vm0 }
0x1ddf   :  { %15237 = vmatmul.mubr.msk.f32.gmra.mxu1 %vm20528_vm5, %v11141_v54  ;;  %vm20529_vm13 = vmmov %vm20521_vm2  ;;  %v19590_v54 = vld [vmem:[%s19689_s7 + $0x15] ss:$0 sm:$0xff]  ;;  %s15422_s7 = smov [#allocation2]  }
0x1de0   :  { %v11140_v23 = vsel %vm20529_vm13, %v11130_v52, %v11131_v62  ;;  %vm20530_vm8 = vmmov %vm20522_vm1  ;;  %s12335_s29 = sshll.u32 %s15422_s7, 4  ;;  %s12336_s29 = int_to_ptr.vmem [resolvable:$true] %s12335_s29 }
0x1de1   :  { %v11044_v9 = vsel %vm20530_vm8, %v11034_v13, %v11035_v7  ;;  %vm20531_vm7 = vmmov %vm20473_vm0  ;;  %s15390_s30 = scalar_lea.vmem %s12336_s29, 32  ;;  %p15395_p1 = scmp.lt.s32.totalorder %s12336_s29, %s12336_s29 }
0x1de2   :  { %15239 = vmatprep.mubr.msk.f32.mxu1 %vm20531_vm7, %v11140_v23  ;;  %vm20532_vm12 = vmmov %vm20473_vm0  ;;  %p15391_p0 = scmp.ne.s32.totalorder %s12336_s29, %s15390_s30  ;;  %p15396_p2 = scmp.lt.s32.totalorder %s15390_s30, %s15390_s30 }
0x1de3   :  { %15184 = vmatmul.mubr.msk.f32.gmra.mxu0 %vm20532_vm12, %v11044_v9  ;;  %vm20533_vm0 = vmmov %vm20522_vm1 }
0x1de4   :  { %v11043_v51 = vsel %vm20533_vm0, %v11035_v7, %v11036_v60  ;;  %vm20534_vm11 = vmmov %vm20524_vm4  ;;  %p15397_p3 = por %p15396_p2, %p15395_p1 }
0x1de5   :  { %15186 = vmatprep.mubr.msk.f32.mxu0 %vm20534_vm11, %v11043_v51  ;;  %vm20535_vm14 = vmmov %vm20521_vm2  ;;  %v15090_v47 = vpop.f32.mrf.mxu1 }
0x1de6   :  { %v11139_v57 = vsel %vm20535_vm14, %v11131_v62, %v11132_v41  ;;  %vm20536_vm2 = vmmov %vm20524_vm4  ;;  %p15398_p4 = pnand %p15397_p3, %p15391_p0 }
0x1de7   :  { %15240 = vmatmul.mubr.msk.f32.gmra.mxu1 %vm20536_vm2, %v11139_v57  ;;  %vm20537_vm1 = vmmov %vm20527_vm3  ;;  %v11362_v31 = vpop.f32.mrf.mxu1 }
0x1de8   :  { %v11138_v32 = vsel %vm20537_vm1, %v11132_v41, %v11133_v21  ;;  %vm20538_vm9 = vmmov %vm20533_vm0 }
0x1de9   :  { %v11042_v29 = vsel %vm20538_vm9, %v11036_v60, %v11037_v37  ;;  %vm20539_vm4 = vmmov %vm20536_vm2 }
0x1dea   :  { %15242 = vmatprep.mubr.msk.f32.mxu1 %vm20539_vm4, %v11138_v32  ;;  %vm20540_vm10 = vmmov %vm20536_vm2  ;;  %v15093_v49 = vpop.f32.mrf.mxu1 }
0x1deb   :  { %15187 = vmatmul.mubr.msk.f32.gmra.mxu0 %vm20540_vm10, %v11042_v29  ;;  %vm20541_vm15 = vmmov %vm20533_vm0 }
0x1dec   :  { %v11041_v5 = vsel %vm20541_vm15, %v11037_v37, %v11038_v18  ;;  %vm20542_vm3 = vmmov %vm20536_vm2  ;;  %v11372_v22 = vpop.f32.mrf.mxu1 }
0x1ded   :  { %15189 = vmatprep.mubr.msk.f32.mxu0 %vm20542_vm3, %v11041_v5  ;;  %vm20543_vm5 = vmmov %vm20537_vm1 }
0x1dee   :  { %v11137_v35 = vsel %vm20543_vm5, %v11133_v21, %v11134_v14  ;;  %vm20544_vm13 = vmmov %vm20536_vm2 }
0x1def   :  { %15243 = vmatmul.mubr.msk.f32.gmra.mxu1 %vm20544_vm13, %v11137_v35  ;;  %vm20545_vm8 = vmmov %vm20537_vm1 }
0x1df0   :  { %v11136_v50 = vsel %vm20545_vm8, %v11134_v14, %v11135_v44  ;;  %vm20547_vm7 = vmmov %vm20533_vm0 }
0x1df1   :  { %v11040_v8 = vsel %vm20547_vm7, %v11038_v18, %v20546_v33  ;;  %vm20549_vm12 = vmmov %vm20537_vm1 }
0x1df2   :  { %v11167_v17 = vsel %vm20549_vm12, %v11135_v44, %v20548_v40  ;;  %vm20550_vm0 = vmmov %vm20536_vm2 }
0x1df3   :  { %15245 = vmatprep.mubr.msk.f32.mxu1 %vm20550_vm0, %v11136_v50  ;;  %vm20551_vm11 = vmmov %vm20550_vm0  ;;  %v11199_v6 = vsel %vm18194_vm6, %v11167_v17, 0.0  ;;  %v15096_v53 = vpop.f32.mrf.mxu1 }
0x1df4   :  { %15190 = vmatmul.mubr.msk.f32.gmra.mxu0 %vm20551_vm11, %v11040_v8  ;;  %vm20553_vm14 = vmmov %vm20550_vm0 }
0x1df5   :  { %15246 = vmatmul.mubr.msk.f32.gmra.mxu1 %vm20553_vm14, %v11199_v6  ;;  %v11382_v63 = vpop.f32.mrf.mxu1 }
0x1df8   :  { %v19535_v26 = vpop.f32.mrf.mxu1 }
0x1dfa   :  { %v19537_v55 = vpop.f32.mrf.mxu1 }
0x1dfe   :  { %v19539_v28 = vpop.f32.mrf.mxu1 }
0x1e00   :  { %v19541_v25 = vpop.f32.mrf.mxu1 }
0x1e0b   :  { %v19543_v3 = vpop.f32.mrf.mxu1 }
0x1e0d   :  { %v19545_v58 = vpop.f32.mrf.mxu1 }
0x1e11   :  { %v19547_v20 = vpop.f32.mrf.mxu1 }
0x1e13   :  { %v19549_v0 = vpop.f32.mrf.mxu1 }
0x1e17   :  { %v19551_v61 = vpop.f32.mrf.mxu1 }
0x1e19   :  { %v19553_v19 = vpop.f32.mrf.mxu1 }
0x1e1c   :  { %v19555_v39 = vpop.f32.mrf.mxu1 }
0x1e1e   :  { %v19557_v48 = vpop.f32.mrf.mxu1 }
0x1e27   :  { %v19559_v4 = vpop.f32.mrf.mxu1 }
0x1e29   :  { %v19561_v43 = vpop.f32.mrf.mxu1 }
0x1e2b   :  { %v19563_v12 = vpop.f32.mrf.mxu1 }
0x1e2d   :  { %v19565_v2 = vpop.f32.mrf.mxu1 }
0x1e35   :  { %v19567_v1 = vpop.f32.mrf.mxu1 }
0x1e37   :  { %v19569_v42 = vpop.f32.mrf.mxu1 }
0x1e3b   :  { %v19571_v38 = vpop.f32.mrf.mxu1 }
0x1e3d   :  { %v19573_v16 = vpop.f32.mrf.mxu1 }
0x1e45   :  { %v19575_v59 = vpop.f32.mrf.mxu1 }
0x1e47   :  { %v19577_v27 = vpop.f32.mrf.mxu1 }
0x1e49   :  { %v19579_v30 = vpop.f32.mrf.mxu1 }
0x1e4b   :  { %v19581_v56 = vpop.f32.mrf.mxu1 }
0x1e4e   :  { %v19583_v10 = vpop.f32.mrf.mxu1 }
0x1e50   :  { %v15146_v13 = vpop.f32.mrf.mxu0  ;;  %v19585_v45 = vpop.f32.mrf.mxu1 }
0x1e51   :  { %v11689_v46 = vadd.f32 %v15146_v13, %v15090_v47 }
0x1e52   :  { %v11683_v11 = vpop.f32.mrf.mxu0 }
0x1e53   :  { %v11684_v52 = vadd.f32 %v11683_v11, %v11362_v31  ;;  %v15202_v34 = vpop.f32.mrf.mxu1 }
0x1e54   :  { %v15149_v24 = vpop.f32.mrf.mxu0  ;;  %v12164_v60 = vadd.f32 %v15202_v34, %v11689_v46 }
0x1e55   :  { %v12004_v36 = vpop.f32.mrf.mxu1  ;;  %v11699_v37 = vadd.f32 %v15149_v24, %v15093_v49 }
0x1e56   :  { %v12163_v62 = vadd.f32 %v12004_v36, %v11684_v52  ;;  %v11693_v7 = vpop.f32.mrf.mxu0  ;;  %v12200_v21 = vadd.f32 %v19590_v54, %v12164_v60 }
0x1e57   :  { %v11694_v41 = vadd.f32 %v11693_v7, %v11372_v22 }
0x1e58   :  { %v12199_v9 = vadd.f32 %v19590_v54, %v12163_v62 }
0x1e5a   :  { %15326 = vtanh.f32 %v12199_v9 }
0x1e5b   :  { %15328 = vtanh.f32 %v12200_v21 }
0x1e5c   :  { %v15205_v23 = vpop.f32.mrf.mxu1 }
0x1e5d   :  { %v12166_v5 = vadd.f32 %v15205_v23, %v11699_v37 }
0x1e5e   :  { %v12014_v18 = vpop.f32.mrf.mxu1 }
0x1e5f   :  { %v15152_v51 = vpop.f32.mrf.mxu0  ;;  %v12165_v57 = vadd.f32 %v12014_v18, %v11694_v41  ;;  %v12202_v15 = vadd.f32 %v19590_v54, %v12166_v5 }
0x1e60   :  { %v11709_v6 = vadd.f32 %v15152_v51, %v15096_v53 }
0x1e61   :  { %v11703_v14 = vpop.f32.mrf.mxu0  ;;  %v12201_v35 = vadd.f32 %v19590_v54, %v12165_v57 }
0x1e62   :  { %v11704_v50 = vadd.f32 %v11703_v14, %v11382_v63 }
0x1e63   :  { %15330 = vtanh.f32 %v12201_v35 }
0x1e64   :  { %15332 = vtanh.f32 %v12202_v15 }
0x1e65   :  { %v15208_v32 = vpop.f32.mrf.mxu1 }
0x1e66   :  { %v12168_v46 = vadd.f32 %v15208_v32, %v11709_v6 }
0x1e67   :  { %v15155_v29 = vpop.f32.mrf.mxu0  ;;  %v12024_v44 = vpop.f32.mrf.mxu1 }
0x1e68   :  { %v12167_v47 = vadd.f32 %v12024_v44, %v11704_v50  ;;  %v15327_v34 = vpop.eup %15326  ;;  %v12204_v53 = vadd.f32 %v19590_v54, %v12168_v46  ;;  %v11719_v62 = vadd.f32 %v15155_v29, %v19535_v26 }
0x1e69   :  { %v11713_v33 = vpop.f32.mrf.mxu0  ;;  %12263 = vxpose.xlu0.b32.start [1/16] (narrow) %v15327_v34, 8  ;;  %v15329_v23 = vpop.eup %15328 }
0x1e6a   :  { %v12203_v11 = vadd.f32 %v19590_v54, %v12167_v47  ;;  %v11714_v52 = vadd.f32 %v11713_v33, %v19537_v55 }
0x1e6b   :  { %v15211_v8 = vpop.f32.mrf.mxu1 }
0x1e6c   :  { %15334 = vtanh.f32 %v12203_v11  ;;  %v12170_v21 = vadd.f32 %v15211_v8, %v11719_v62 }
0x1e6d   :  { %v12034_v17 = vpop.f32.mrf.mxu1  ;;  %12264 = vxpose.xlu0.b32.cont [2/16] (narrow) %v15329_v23, 8  ;;  %15336 = vtanh.f32 %v12204_v53 }
0x1e6e   :  { %v12169_v7 = vadd.f32 %v12034_v17, %v11714_v52 }
0x1e6f   :  { %v15158_v40 = vpop.f32.mrf.mxu0 }
0x1e70   :  { %v12205_v37 = vadd.f32 %v19590_v54, %v12169_v7  ;;  %v15331_v26 = vpop.eup %15330  ;;  %v11729_v29 = vadd.f32 %v15158_v40, %v19539_v28 }
0x1e71   :  { %v11723_v31 = vpop.f32.mrf.mxu0  ;;  %v15214_v49 = vpop.f32.mrf.mxu1  ;;  %12265 = vxpose.xlu0.b32.cont [3/16] (narrow) %v15331_v26, 8 }
0x1e72   :  { %v11724_v55 = vadd.f32 %v11723_v31, %v19541_v25  ;;  %v12206_v25 = vadd.f32 %v19590_v54, %v12170_v21  ;;  %15338 = vtanh.f32 %v12205_v37  ;;  %v15333_v33 = vpop.eup %15332  ;;  %v12172_v6 = vadd.f32 %v15214_v49, %v11729_v29 }
0x1e73   :  { %v15161_v22 = vpop.f32.mrf.mxu0  ;;  %v12044_v13 = vpop.f32.mrf.mxu1 }
0x1e74   :  { %v12171_v44 = vadd.f32 %v12044_v13, %v11724_v55  ;;  %15340 = vtanh.f32 %v12206_v25  ;;  %v11739_v34 = vadd.f32 %v15161_v22, %v19543_v3  ;;  %v12208_v49 = vadd.f32 %v19590_v54, %v12172_v6 }
0x1e75   :  { %v11733_v63 = vpop.f32.mrf.mxu0  ;;  %12266 = vxpose.xlu0.b32.cont [4/16] (narrow) %v15333_v33, 8 }
0x1e76   :  { %v12207_v47 = vadd.f32 %v19590_v54, %v12171_v44  ;;  %v11734_v28 = vadd.f32 %v11733_v63, %v19545_v58 }
0x1e77   :  { %v15217_v24 = vpop.f32.mrf.mxu1 }
0x1e78   :  { %15342 = vtanh.f32 %v12207_v47  ;;  %v12174_v37 = vadd.f32 %v15217_v24, %v11739_v34 }
0x1e79   :  { %v12054_v60 = vpop.f32.mrf.mxu1  ;;  %v15335_v11 = vpop.eup %15334 }
0x1e7a   :  { %v19598_v36 = vpop.f32.mrf.mxu0  ;;  %12267 = vxpose.xlu0.b32.cont [5/16] (narrow) %v15335_v11, 8  ;;  %v12173_v62 = vadd.f32 %v12054_v60, %v11734_v28  ;;  %v12210_v24 = vadd.f32 %v19590_v54, %v12174_v37 }
0x1e7c   :  { %v11743_v41 = vpop.f32.mrf.mxu0  ;;  %v12209_v26 = vadd.f32 %v19590_v54, %v12173_v62 }
0x1e7d   :  { %v19602_v9 = vpop.f32.mrf.mxu1  ;;  %v11744_v3 = vadd.f32 %v11743_v41, %v19549_v0  ;;  %v11749_v0 = vadd.f32 %v19598_v36, %v19547_v20 }
0x1e7f   :  { %v19607_v18 = vpop.f32.mrf.mxu1  ;;  %v12176_v20 = vadd.f32 %v19602_v9, %v11749_v0 }
0x1e80   :  { %v19604_v51 = vpop.f32.mrf.mxu0  ;;  %v12175_v41 = vadd.f32 %v19607_v18, %v11744_v3 }
0x1e82   :  { %v19610_v57 = vpop.f32.mrf.mxu0  ;;  %v19612_v14 = vpop.f32.mrf.mxu1  ;;  %v12211_v36 = vadd.f32 %v19590_v54, %v12175_v41 }
0x1e84   :  { %v19615_v5 = vpop.f32.mrf.mxu1 }
0x1e86   :  { %v15170_v32 = vpop.f32.mrf.mxu0 }
0x1e87   :  { %v11769_v35 = vadd.f32 %v15170_v32, %v19555_v39 }
0x1e88   :  { %v11763_v50 = vpop.f32.mrf.mxu0  ;;  %v15226_v17 = vpop.f32.mrf.mxu1 }
0x1e89   :  { %v11764_v8 = vadd.f32 %v11763_v50, %v19557_v48  ;;  %v12180_v31 = vadd.f32 %v15226_v17, %v11769_v35 }
0x1e8a   :  { %v15173_v15 = vpop.f32.mrf.mxu0  ;;  %v12084_v40 = vpop.f32.mrf.mxu1 }
0x1e8b   :  { %v12179_v13 = vadd.f32 %v12084_v40, %v11764_v8  ;;  %v11779_v58 = vadd.f32 %v15173_v15, %v19559_v4  ;;  %v12216_v7 = vadd.f32 %v19590_v54, %v12180_v31 }
0x1e8c   :  { %v11773_v46 = vpop.f32.mrf.mxu0  ;;  %v15229_v52 = vpop.f32.mrf.mxu1 }
0x1e8d   :  { %v11774_v39 = vadd.f32 %v11773_v46, %v19561_v43  ;;  %v12215_v48 = vadd.f32 %v19590_v54, %v12179_v13  ;;  %v15337_v43 = vpop.eup %15336  ;;  %v12182_v32 = vadd.f32 %v15229_v52, %v11779_v58 }
0x1e8e   :  { %v12094_v63 = vpop.f32.mrf.mxu1  ;;  %12268 = vxpose.xlu0.b32.cont [6/16] (narrow) %v15337_v43, 8  ;;  %v15339_v25 = vpop.eup %15338 }
0x1e8f   :  { %15344 = vtanh.f32 %v12215_v48  ;;  %v12181_v23 = vadd.f32 %v12094_v63, %v11774_v39  ;;  %v12218_v33 = vadd.f32 %v19590_v54, %v12182_v32  ;;  %v15341_v47 = vpop.eup %15340 }
0x1e90   :  { %v15176_v53 = vpop.f32.mrf.mxu0  ;;  %15346 = vtanh.f32 %v12208_v49  ;;  %v15343_v11 = vpop.eup %15342 }
0x1e91   :  { %15348 = vtanh.f32 %v12216_v7  ;;  %v12217_v4 = vadd.f32 %v19590_v54, %v12181_v23  ;;  %v11789_v8 = vadd.f32 %v15176_v53, %v19563_v12  ;;  %v11754_v12 = vadd.f32 %v19610_v57, %v19553_v19 }
0x1e92   :  { %v11783_v55 = vpop.f32.mrf.mxu0  ;;  %v15232_v21 = vpop.f32.mrf.mxu1  ;;  %12269 = vxpose.xlu0.b32.cont [7/16] (narrow) %v15339_v25, 8  ;;  %15350 = vtanh.f32 %v12209_v26  ;;  %v11759_v53 = vadd.f32 %v19604_v51, %v19551_v61 }
0x1e93   :  { %v11784_v29 = vadd.f32 %v11783_v55, %v19565_v2  ;;  %15352 = vtanh.f32 %v12217_v4  ;;  %v12177_v58 = vadd.f32 %v19615_v5, %v11754_v12 }
0x1e94   :  { %v15179_v22 = vpop.f32.mrf.mxu0  ;;  %v12104_v60 = vpop.f32.mrf.mxu1  ;;  %15354 = vtanh.f32 %v12210_v24 }
0x1e95   :  { %v12183_v15 = vadd.f32 %v12104_v60, %v11784_v29  ;;  %15356 = vtanh.f32 %v12218_v33  ;;  %v11799_v7 = vadd.f32 %v15179_v22, %v19567_v1  ;;  %v12213_v22 = vadd.f32 %v19590_v54, %v12177_v58 }
0x1e96   :  { %v11793_v44 = vpop.f32.mrf.mxu0  ;;  %12270 = vxpose.xlu0.b32.cont [8/16] (narrow) %v15341_v47, 8  ;;  %15358 = vtanh.f32 %v12211_v36 }
0x1e97   :  { %v19632_v35 = vpop.f32.mrf.mxu1  ;;  %v11794_v39 = vadd.f32 %v11793_v44, %v19569_v42 }
0x1e98   :  { %v12186_v44 = vadd.f32 %v19632_v35, %v11799_v7 }
0x1e99   :  { %v12114_v17 = vpop.f32.mrf.mxu1 }
0x1e9a   :  { %12271 = vxpose.xlu0.b32.cont [9/16] (narrow) %v15343_v11, 8  ;;  %v12185_v23 = vadd.f32 %v12114_v17, %v11794_v39 }
0x1e9b   :  { %v15182_v50 = vpop.f32.mrf.mxu0 }
0x1e9c   :  { %v11809_v2 = vadd.f32 %v15182_v50, %v19571_v38  ;;  %v12184_v38 = vadd.f32 %v15232_v21, %v11789_v8  ;;  %v15345_v48 = vpop.eup %15344 }
0x1e9d   :  { %v11803_v6 = vpop.f32.mrf.mxu0  ;;  %12295 = vxpose.xlu1.b32.start [1/16] (narrow) %v15345_v48, 8 }
0x1e9e   :  { %v11804_v28 = vadd.f32 %v11803_v6, %v19573_v16  ;;  %v12219_v16 = vadd.f32 %v19590_v54, %v12183_v15  ;;  %v12220_v63 = vadd.f32 %v19590_v54, %v12184_v38  ;;  %v12222_v15 = vadd.f32 %v19590_v54, %v12186_v44 }
0x1e9f   :  { %v15238_v40 = vpop.f32.mrf.mxu1 }
0x1ea0   :  { %v12188_v18 = vadd.f32 %v15238_v40, %v11809_v2  ;;  %15360 = vtanh.f32 %v12219_v16 }
0x1ea1   :  { %v12124_v46 = vpop.f32.mrf.mxu1 }
0x1ea2   :  { %v19650_v9 = vadd.f32 %v19590_v54, %v12188_v18  ;;  %v12187_v52 = vadd.f32 %v12124_v46, %v11804_v28 }
0x1ea3   :  { %v15185_v31 = vpop.f32.mrf.mxu0 }
0x1ea4   :  { %v11819_v13 = vadd.f32 %v15185_v31, %v19575_v59  ;;  %v12212_v59 = vadd.f32 %v19590_v54, %v12176_v20  ;;  %v12223_v49 = vadd.f32 %v19590_v54, %v12187_v52 }
0x1ea5   :  { %v11813_v34 = vpop.f32.mrf.mxu0 }
0x1ea6   :  { %v11814_v19 = vadd.f32 %v11813_v34, %v19577_v27  ;;  %v15347_v27 = vpop.eup %15346  ;;  %15362 = vtanh.f32 %v12212_v59 }
0x1ea7   :  { %v15241_v57 = vpop.f32.mrf.mxu1  ;;  %v15349_v37 = vpop.eup %15348  ;;  %12272 = vxpose.xlu0.b32.cont [10/16] (narrow) %v15347_v27, 8  ;;  %15364 = vtanh.f32 %v12220_v63 }
0x1ea8   :  { %v12190_v62 = vadd.f32 %v15241_v57, %v11819_v13  ;;  %12296 = vxpose.xlu1.b32.cont [2/16] (narrow) %v15349_v37, 8  ;;  %v15351_v29 = vpop.eup %15350  ;;  %15366 = vtanh.f32 %v12213_v22 }
0x1ea9   :  { %v12134_v51 = vpop.f32.mrf.mxu1  ;;  %v15353_v41 = vpop.eup %15352 }
0x1eaa   :  { %v12226_v55 = vadd.f32 %v19590_v54, %v12190_v62  ;;  %v12189_v43 = vadd.f32 %v12134_v51, %v11814_v19 }
0x1eab   :  { %v15188_v42 = vpop.f32.mrf.mxu0  ;;  %12273 = vxpose.xlu0.b32.cont [11/16] (narrow) %v15351_v29, 8 }
0x1eac   :  { %v11829_v61 = vadd.f32 %v15188_v42, %v19579_v30  ;;  %v12225_v5 = vadd.f32 %v19590_v54, %v12189_v43  ;;  %v12178_v30 = vadd.f32 %v19612_v14, %v11759_v53  ;;  %12297 = vxpose.xlu1.b32.cont [3/16] (narrow) %v15353_v41, 8 }
0x1ead   :  { %v11823_v21 = vpop.f32.mrf.mxu0 }
0x1eae   :  { %v11824_v3 = vadd.f32 %v11823_v21, %v19581_v56  ;;  %v12221_v56 = vadd.f32 %v19590_v54, %v12185_v23  ;;  %v12214_v2 = vadd.f32 %v19590_v54, %v12178_v30 }
0x1eaf   :  { %v15244_v26 = vpop.f32.mrf.mxu1 }
0x1eb0   :  { %v12192_v32 = vadd.f32 %v15244_v26, %v11829_v61  ;;  %15368 = vtanh.f32 %v12221_v56 }
0x1eb1   :  { %v12144_v4 = vpop.f32.mrf.mxu1  ;;  %15370 = vtanh.f32 %v12214_v2 }
0x1eb2   :  { %v12228_v25 = vadd.f32 %v19590_v54, %v12192_v32  ;;  %v12191_v24 = vadd.f32 %v12144_v4, %v11824_v3  ;;  %15372 = vtanh.f32 %v12222_v15 }
0x1eb3   :  { %15374 = vtanh.f32 %v12223_v49 }
0x1eb4   :  { %v15191_v1 = vpop.f32.mrf.mxu0  ;;  %v12227_v14 = vadd.f32 %v19590_v54, %v12191_v24  ;;  %15376 = vtanh.f32 %v19650_v9 }
0x1eb5   :  { %v11839_v60 = vadd.f32 %v15191_v1, %v19583_v10  ;;  %v15247_v33 = vpop.f32.mrf.mxu1  ;;  %v15355_v10 = vpop.eup %15354  ;;  %15378 = vtanh.f32 %v12225_v5 }
0x1eb6   :  { %v11833_v0 = vpop.f32.mrf.mxu0  ;;  %v15357_v17 = vpop.eup %15356  ;;  %12274 = vxpose.xlu0.b32.cont [12/16] (narrow) %v15355_v10, 8  ;;  %15380 = vtanh.f32 %v12226_v55 }
0x1eb7   :  { %v11834_v50 = vadd.f32 %v11833_v0, %v19585_v45  ;;  %v12194_v8 = vadd.f32 %v15247_v33, %v11839_v60  ;;  %v12154_v35 = vpop.f32.mrf.mxu1  ;;  %12298 = vxpose.xlu1.b32.cont [4/16] (narrow) %v15357_v17, 8  ;;  %v15359_v28 = vpop.eup %15358  ;;  %15382 = vtanh.f32 %v12227_v14 }
0x1eb8   :  { %v15361_v40 = vpop.eup %15360  ;;  %15384 = vtanh.f32 %v12228_v25 }
0x1eb9   :  { %v12230_v6 = vadd.f32 %v19590_v54, %v12194_v8  ;;  %v12193_v47 = vadd.f32 %v12154_v35, %v11834_v50  ;;  %v15363_v20 = vpop.eup %15362 }
0x1eba   :  { %12275 = vxpose.xlu0.b32.cont [13/16] (narrow) %v15359_v28, 8  ;;  %v15365_v36 = vpop.eup %15364 }
0x1ebb   :  { %v12229_v45 = vadd.f32 %v19590_v54, %v12193_v47  ;;  %12299 = vxpose.xlu1.b32.cont [5/16] (narrow) %v15361_v40, 8  ;;  %v15367_v18 = vpop.eup %15366 }
0x1ebd   :  { %v15369_v31 = vpop.eup %15368  ;;  %15386 = vtanh.f32 %v12229_v45 }
0x1ebe   :  { %12276 = vxpose.xlu0.b32.cont [14/16] (narrow) %v15363_v20, 8  ;;  %v15371_v54 = vpop.eup %15370  ;;  %15388 = vtanh.f32 %v12230_v6 }
0x1ebf   :  { %12300 = vxpose.xlu1.b32.cont [6/16] (narrow) %v15365_v36, 8  ;;  %v15373_v12 = vpop.eup %15372 }
0x1ec0   :  { %v15375_v38 = vpop.eup %15374 }
0x1ec1   :  { %v15377_v13 = vpop.eup %15376 }
0x1ec2   :  { %12277 = vxpose.xlu0.b32.cont [15/16] (narrow) %v15367_v18, 8  ;;  %v15379_v46 = vpop.eup %15378 }
0x1ec3   :  { %12301 = vxpose.xlu1.b32.cont [7/16] (narrow) %v15369_v31, 8  ;;  %v15381_v11 = vpop.eup %15380 }
0x1ec4   :  { %v15383_v16 = vpop.eup %15382 }
0x1ec5   :  { %v15385_v39 = vpop.eup %15384 }
0x1ec6   :  { %12278 = vxpose.xlu0.b32.end [16/16] (narrow) %v15371_v54, 8 }
0x1ec7   :  { %12302 = vxpose.xlu1.b32.cont [8/16] (narrow) %v15373_v12, 8 }
0x1eca   :  { %v15387_v9 = vpop.eup %15386 }
0x1ecb   :  { %12303 = vxpose.xlu1.b32.cont [9/16] (narrow) %v15375_v38, 8  ;;  %v15389_v52 = vpop.eup %15388 }
0x1ecf   :  { %12304 = vxpose.xlu1.b32.cont [10/16] (narrow) %v15377_v13, 8 }
0x1ed3   :  { %12305 = vxpose.xlu1.b32.cont [11/16] (narrow) %v15379_v46, 8 }
0x1ed7   :  { %12306 = vxpose.xlu1.b32.cont [12/16] (narrow) %v15381_v11, 8 }
0x1edb   :  { %12307 = vxpose.xlu1.b32.cont [13/16] (narrow) %v15383_v16, 8 }
0x1edf   :  { %12308 = vxpose.xlu1.b32.cont [14/16] (narrow) %v15385_v39, 8 }
0x1ee3   :  { %12309 = vxpose.xlu1.b32.cont [15/16] (narrow) %v15387_v9, 8 }
0x1ee7   :  { %12310 = vxpose.xlu1.b32.end [16/16] (narrow) %v15389_v52, 8 }
0x1f06   :  { %v12279_v34 = vpop.trf.xlu0 }
0x1f07   :  { %12327 = vst [vmem:[#allocation2] sm:$0x1] %v12279_v34 }
0x1f27   :  { %v12311_v48 = vpop.trf.xlu1 }
0x1f28   :  { %12329 = vst [vmem:[#allocation2 + $0x1] sm:$0x1] %v12311_v48 }
0x1f29   :  { %15401 = shalt.err (!%p15398_p4)
}
0x1f2a   :  { %s15423_s9 = smov 1  }
0x1f2b   :  { %12341 = dma.vmem_to_hbm [thread:$0]  %s12336_s29, 32, %s19690_s8, [#allocation3], %s15419_s12, %s15419_s12, %s15423_s9  }
0x1f2c   :  { %15410 = dma.done.wait [#allocation3], 32  }
0x1f2d   :  { %15411 = vsyncadd [#allocation3], 4294967264 }
0x1f2e   :  { %12345 = vsyncpa [#allocation3], 1 }

</bundles_post_ra>
